<compile_context>
chip_gen: v5e
topology: v5e:2x2
jax: 0.10.0
libtpu: 0.0.40
codegen_flags: <defaults>
</compile_context>

<pallas_src>
import functools

import jax
import jax.numpy as jnp
from jax.experimental import pallas as pl
from jax.experimental.pallas import tpu as pltpu


def vecint_kernel(field_ref, o_ref, *, H, W, int_steps, scale, nb):
    """Integrate `nb` batch elements' 2-D flow fields by scaling-and-squaring.

    field_ref: (nb, 2, H*W)  stationary velocity fields (channel 0 = H-dir,
                             channel 1 = W-dir), row-major flattened spatial.
    o_ref    : (nb, 2, H*W)  integrated displacement fields.
    """
    HW = H * W
    f32 = jnp.float32
    i32 = jnp.int32

    # ----- loop-invariant constants (built once per grid step) ---------------
    # Flat pixel index p (on lanes) and its (row, col) = (p // W, p % W),
    # computed with exact float arithmetic -> no HBM "grid" input needed.
    pf = jax.lax.broadcasted_iota(i32, (1, HW), 1).astype(f32)          # p
    p_row = jnp.floor((pf + 0.5) * (1.0 / W))                           # p // W
    p_col = pf - p_row * W                                              # p %  W
    # voxelmorph convention: channel 0 (width/x sample coordinate) is offset by
    # the *row* index h and scaled by (W-1)/(H-1); channel 1 (height/y) by the
    # *column* index w and (H-1)/(W-1).
    base = jnp.concatenate([p_row, p_col], axis=0)                      # (2, HW)

    ch = jax.lax.broadcasted_iota(i32, (2, 1), 0)
    sx = (W - 1.0) / (H - 1.0)
    sy = (H - 1.0) / (W - 1.0)
    scale_vec = jnp.where(ch == 0, sx, sy)                              # (2, 1)
    limit_vec = jnp.where(ch == 0, W - 1.0, H - 1.0)                    # (2, 1)
    limit_int = limit_vec.astype(i32)

    # iotas for the separable one-hot bilinear weight factors
    y_iota = jax.lax.broadcasted_iota(i32, (H, HW), 0)                  # (H, HW)
    x_iota = jax.lax.broadcasted_iota(i32, (W, HW), 0)                  # (W, HW)

    # Constant operands of the lane->sublane relayout (2, HW) -> (2H, W),
    # implemented as mask + matmul (no in-kernel lane-splitting reshape):
    #   rowmask2[c*H + y, p] = 1.0 iff p // W == y
    p_row_i = p_row.astype(i32)
    rowmask = jnp.where(y_iota == p_row_i, 1.0, 0.0)                    # (H, HW)
    rowmask2 = jnp.concatenate([rowmask, rowmask], axis=0)              # (2H, HW)
    #   colsel[q, x] = 1.0 iff q % W == x
    qf = jax.lax.broadcasted_iota(i32, (HW, W), 0).astype(f32)
    q_col = qf - jnp.floor((qf + 0.5) * (1.0 / W)) * W
    x_idx = jax.lax.broadcasted_iota(i32, (HW, W), 1)
    colsel = jnp.where(q_col.astype(i32) == x_idx, 1.0, 0.0)            # (HW, W)

    def integrate_one(b, carry):
        out = field_ref[b].astype(f32) * scale                          # (2, HW)

        # scaling and squaring: out <- out + grid_sample(out, out)
        for _ in range(int_steps):
            # --- sample coordinates, both channels at once (2, HW) -----------
            coords = jnp.clip((base + out) * scale_vec, 0.0, limit_vec)
            c0 = jnp.floor(coords)
            frac = coords - c0
            c0i = c0.astype(i32)
            c1i = jnp.minimum(c0i + 1, limit_int)     # clamped corner -> 0 weight
            x0i = c0i[0:1]; x1i = c1i[0:1]; fx = frac[0:1]   # column coordinate
            y0i = c0i[1:2]; y1i = c1i[1:2]; fy = frac[1:2]   # row coordinate

            # --- separable one-hot bilinear weights (additive handles clamps) -
            wx = (jnp.where(x_iota == x0i, 1.0 - fx, 0.0)
                  + jnp.where(x_iota == x1i, fx, 0.0))                  # (W, HW)
            wy = (jnp.where(y_iota == y0i, 1.0 - fy, 0.0)
                  + jnp.where(y_iota == y1i, fy, 0.0))                  # (H, HW)

            # --- relayout field (2, HW) -> src2d (2H, W) via mask + matmul ----
            out_rep = jnp.concatenate(
                [jnp.broadcast_to(out[0:1], (H, HW)),
                 jnp.broadcast_to(out[1:2], (H, HW))], axis=0)          # (2H, HW)
            src2d = jnp.dot(out_rep * rowmask2, colsel,
                            preferred_element_type=f32)                 # (2H, W)

            # --- gather: width contraction on MXU, height on VPU/XLU ----------
            t = jnp.dot(src2d, wx, preferred_element_type=f32)          # (2H, HW)
            s0 = jnp.sum(t[0:H] * wy, axis=0, keepdims=True)            # (1, HW)
            s1 = jnp.sum(t[H:2 * H] * wy, axis=0, keepdims=True)        # (1, HW)
            sampled = jnp.concatenate([s0, s1], axis=0)                 # (2, HW)

            out = out + sampled

        o_ref[b] = out.astype(o_ref.dtype)
        return carry

    jax.lax.fori_loop(0, nb, integrate_one, 0, unroll=True)


def vec_int(field_nchw, int_steps=7, batch_block=None):
    """VecInt.forward for a 2-D field of shape (N, 2, H, W)."""
    N, C, H, W = field_nchw.shape
    assert C == 2, "2-D VecInt expects a 2-channel flow field"
    assert H > 1 and W > 1, "degenerate spatial size (grid normalization /0)"
    HW = H * W
    scale = 1.0 / (2 ** int_steps)

    if batch_block is None:
        # Block several batch elements per grid step to amortize per-step
        # pipeline overhead, but keep >= 2 grid steps so both v7x cores work.
        batch_block = 1
        for cand in (4, 2):
            if N % cand == 0 and N // cand >= 2:
                batch_block = cand
                break
    assert N % batch_block == 0, "batch_block must divide the batch size"
    nb = batch_block

    # lane-dense layout: flatten spatial dims onto the 128-lane axis
    x = field_nchw.reshape(N, C, HW)

    kernel = functools.partial(vecint_kernel, H=H, W=W,
                               int_steps=int_steps, scale=scale, nb=nb)

    out = pl.pallas_call(
        kernel,
        out_shape=jax.ShapeDtypeStruct((N, C, HW), field_nchw.dtype),
        grid_spec=pltpu.PrefetchScalarGridSpec(
            num_scalar_prefetch=0,
            grid=(N // nb,),
            in_specs=[pl.BlockSpec((nb, C, HW), lambda n: (n, 0, 0))],
            out_specs=pl.BlockSpec((nb, C, HW), lambda n: (n, 0, 0)),
        ),
        compiler_params=pltpu.CompilerParams(
            dimension_semantics=("parallel",)),
    )(x)

    return out.reshape(N, C, H, W)


def vec_int_reference(field, int_steps=7):
    """Pure-JAX reference (same math as the PyTorch module), for validation."""
    N, C, H, W = field.shape
    scale = 1.0 / (2 ** int_steps)
    hh = jnp.arange(H, dtype=jnp.float32)[:, None]     # (H, 1)
    ww = jnp.arange(W, dtype=jnp.float32)[None, :]     # (1, W)
    sx = (W - 1.0) / (H - 1.0)
    sy = (H - 1.0) / (W - 1.0)

    out = field * scale
    for _ in range(int_steps):
        f0 = out[:, 0]                                  # (N, H, W)
        f1 = out[:, 1]
        ix = jnp.clip((hh + f0) * sx, 0.0, W - 1.0)
        iy = jnp.clip((ww + f1) * sy, 0.0, H - 1.0)
        x0 = jnp.floor(ix); y0 = jnp.floor(iy)
        fx = ix - x0;       fy = iy - y0
        x0i = x0.astype(jnp.int32); y0i = y0.astype(jnp.int32)
        x1i = jnp.minimum(x0i + 1, W - 1)
        y1i = jnp.minimum(y0i + 1, H - 1)

        flat = out.reshape(N, C, H * W)

        def gather(yi, xi):
            q = (yi * W + xi).reshape(N, 1, H * W)
            q = jnp.broadcast_to(q, (N, C, H * W))
            return jnp.take_along_axis(flat, q, axis=2).reshape(N, C, H, W)

        v00 = gather(y0i, x0i); v01 = gather(y0i, x1i)
        v10 = gather(y1i, x0i); v11 = gather(y1i, x1i)
        w00 = ((1.0 - fy) * (1.0 - fx))[:, None]
        w01 = ((1.0 - fy) * fx)[:, None]
        w10 = (fy * (1.0 - fx))[:, None]
        w11 = (fy * fx)[:, None]
        sampled = w00 * v00 + w01 * v01 + w10 * v10 + w11 * v11
        out = out + sampled
    return out


if __name__ == "__main__":
    N, H, W = 4, 16, 16
    int_steps = 7

    key = jax.random.PRNGKey(0)
    field = jax.random.normal(key, (N, 2, H, W), jnp.float32)  # NCHW like PyTorch

    out = vec_int(field, int_steps=int_steps)
    out = jax.block_until_ready(out)

    assert out.shape == (N, 2, H, W), out.shape
    assert bool(jnp.all(jnp.isfinite(out)))

    ref = vec_int_reference(field, int_steps=int_steps)
    err = float(jnp.max(jnp.abs(out - ref)))
    assert err < 1e-3, f"mismatch vs reference: {err}"

    print("KERNEL_OK")
</pallas_src>

<mosaic_0001>
module attributes {stable_mosaic.version = 11 : i64} {
  func.func @vecint_kernel(%arg0: i32, %arg1: memref<2x2x256xf32, #tpu.memory_space<vmem>>, %arg2: memref<2x2x256xf32, #tpu.memory_space<vmem>>) attributes {dimension_semantics = [#tpu.dimension_semantics<parallel>], iteration_bounds = array<i64: 2>, scalar_prefetch = 0 : i64, scratch_operands = 0 : i64, tpu.core_type = #tpu.core_type<tc>, window_params = [{transform_indices = @transform_0, window_bounds = array<i64: 2, 2, 256>}, {transform_indices = @transform_1, window_bounds = array<i64: 2, 2, 256>}]} {
    %0 = tpu.iota {dimensions = array<i32: 1>} : vector<1x256xi32>
    %1 = arith.sitofp %0 : vector<1x256xi32> to vector<1x256xf32>
    %cst = arith.constant 5.000000e-01 : f32
    %2 = vector.broadcast %cst : f32 to vector<1x256xf32>
    %3 = arith.addf %1, %2 : vector<1x256xf32>
    %cst_0 = arith.constant 6.250000e-02 : f32
    %4 = vector.broadcast %cst_0 : f32 to vector<1x256xf32>
    %5 = arith.mulf %3, %4 : vector<1x256xf32>
    %6 = math.floor %5 : vector<1x256xf32>
    %cst_1 = arith.constant 1.600000e+01 : f32
    %7 = vector.broadcast %cst_1 : f32 to vector<1x256xf32>
    %8 = arith.mulf %6, %7 : vector<1x256xf32>
    %9 = arith.subf %1, %8 : vector<1x256xf32>
    %10 = tpu.concatenate %6, %9 in 0 : vector<1x256xf32>, vector<1x256xf32> -> vector<2x256xf32>
    %11 = tpu.iota {dimensions = array<i32: 0>} : vector<2x1xi32>
    %c0_i32 = arith.constant 0 : i32
    %12 = vector.broadcast %c0_i32 : i32 to vector<2x1xi32>
    %13 = arith.cmpi eq, %11, %12 : vector<2x1xi32>
    %cst_2 = arith.constant 1.000000e+00 : f32
    %cst_3 = arith.constant 1.000000e+00 : f32
    %14 = vector.broadcast %cst_2 : f32 to vector<2x1xf32>
    %15 = vector.broadcast %cst_3 : f32 to vector<2x1xf32>
    %16 = arith.select %13, %14, %15 : vector<2x1xi1>, vector<2x1xf32>
    %c0_i32_4 = arith.constant 0 : i32
    %17 = vector.broadcast %c0_i32_4 : i32 to vector<2x1xi32>
    %18 = arith.cmpi eq, %11, %17 : vector<2x1xi32>
    %cst_5 = arith.constant 1.500000e+01 : f32
    %cst_6 = arith.constant 1.500000e+01 : f32
    %19 = vector.broadcast %cst_5 : f32 to vector<2x1xf32>
    %20 = vector.broadcast %cst_6 : f32 to vector<2x1xf32>
    %21 = arith.select %18, %19, %20 : vector<2x1xi1>, vector<2x1xf32>
    %22 = arith.fptosi %21 : vector<2x1xf32> to vector<2x1xi32>
    %23 = tpu.iota {dimensions = array<i32: 0>} : vector<16x256xi32>
    %24 = tpu.iota {dimensions = array<i32: 0>} : vector<16x256xi32>
    %25 = arith.fptosi %6 : vector<1x256xf32> to vector<1x256xi32>
    %26 = vector.broadcast %25 : vector<1x256xi32> to vector<16x256xi32>
    %27 = arith.cmpi eq, %23, %26 : vector<16x256xi32>
    %cst_7 = arith.constant 1.000000e+00 : f32
    %cst_8 = arith.constant 0.000000e+00 : f32
    %28 = vector.broadcast %cst_7 : f32 to vector<16x256xf32>
    %29 = vector.broadcast %cst_8 : f32 to vector<16x256xf32>
    %30 = arith.select %27, %28, %29 : vector<16x256xi1>, vector<16x256xf32>
    %31 = tpu.concatenate %30, %30 in 0 : vector<16x256xf32>, vector<16x256xf32> -> vector<32x256xf32>
    %32 = tpu.iota {dimensions = array<i32: 0>} : vector<256x16xi32>
    %33 = arith.sitofp %32 : vector<256x16xi32> to vector<256x16xf32>
    %cst_9 = arith.constant 5.000000e-01 : f32
    %34 = vector.broadcast %cst_9 : f32 to vector<256x16xf32>
    %35 = arith.addf %33, %34 : vector<256x16xf32>
    %cst_10 = arith.constant 6.250000e-02 : f32
    %36 = vector.broadcast %cst_10 : f32 to vector<256x16xf32>
    %37 = arith.mulf %35, %36 : vector<256x16xf32>
    %38 = math.floor %37 : vector<256x16xf32>
    %cst_11 = arith.constant 1.600000e+01 : f32
    %39 = vector.broadcast %cst_11 : f32 to vector<256x16xf32>
    %40 = arith.mulf %38, %39 : vector<256x16xf32>
    %41 = arith.subf %33, %40 : vector<256x16xf32>
    %42 = tpu.iota {dimensions = array<i32: 1>} : vector<256x16xi32>
    %43 = arith.fptosi %41 : vector<256x16xf32> to vector<256x16xi32>
    %44 = arith.cmpi eq, %43, %42 : vector<256x16xi32>
    %cst_12 = arith.constant 1.000000e+00 : f32
    %cst_13 = arith.constant 0.000000e+00 : f32
    %45 = vector.broadcast %cst_12 : f32 to vector<256x16xf32>
    %46 = vector.broadcast %cst_13 : f32 to vector<256x16xf32>
    %47 = arith.select %44, %45, %46 : vector<256x16xi1>, vector<256x16xf32>
    %c0_i32_14 = arith.constant 0 : i32
    %48 = arith.index_cast %c0_i32_14 : i32 to index
    %c0 = arith.constant 0 : index
    %c0_15 = arith.constant 0 : index
    %49 = vector.load %arg1[%48, %c0, %c0_15] : memref<2x2x256xf32, #tpu.memory_space<vmem>>, vector<1x2x256xf32>
    %50 = vector.shape_cast %49 : vector<1x2x256xf32> to vector<2x256xf32>
    %cst_16 = arith.constant 7.812500e-03 : f32
    %51 = vector.broadcast %cst_16 : f32 to vector<2x256xf32>
    %52 = arith.mulf %50, %51 : vector<2x256xf32>
    %53 = arith.addf %10, %52 : vector<2x256xf32>
    %54 = vector.broadcast %16 : vector<2x1xf32> to vector<2x256xf32>
    %55 = arith.mulf %53, %54 : vector<2x256xf32>
    %cst_17 = arith.constant 0.000000e+00 : f32
    %56 = vector.broadcast %cst_17 : f32 to vector<2x256xf32>
    %57 = arith.maximumf %56, %55 : vector<2x256xf32>
    %58 = vector.broadcast %21 : vector<2x1xf32> to vector<2x256xf32>
    %59 = arith.minimumf %58, %57 : vector<2x256xf32>
    %60 = math.floor %59 : vector<2x256xf32>
    %61 = arith.subf %59, %60 : vector<2x256xf32>
    %62 = arith.fptosi %60 : vector<2x256xf32> to vector<2x256xi32>
    %c1_i32 = arith.constant 1 : i32
    %63 = vector.broadcast %c1_i32 : i32 to vector<2x256xi32>
    %64 = arith.addi %62, %63 : vector<2x256xi32>
    %65 = vector.broadcast %22 : vector<2x1xi32> to vector<2x256xi32>
    %66 = arith.minsi %64, %65 : vector<2x256xi32>
    %67 = vector.extract_strided_slice %62 {offsets = [0, 0], sizes = [1, 256], strides = [1, 1]} : vector<2x256xi32> to vector<1x256xi32>
    %68 = vector.extract_strided_slice %66 {offsets = [0, 0], sizes = [1, 256], strides = [1, 1]} : vector<2x256xi32> to vector<1x256xi32>
    %69 = vector.extract_strided_slice %61 {offsets = [0, 0], sizes = [1, 256], strides = [1, 1]} : vector<2x256xf32> to vector<1x256xf32>
    %70 = vector.extract_strided_slice %62 {offsets = [1, 0], sizes = [1, 256], strides = [1, 1]} : vector<2x256xi32> to vector<1x256xi32>
    %71 = vector.extract_strided_slice %66 {offsets = [1, 0], sizes = [1, 256], strides = [1, 1]} : vector<2x256xi32> to vector<1x256xi32>
    %72 = vector.extract_strided_slice %61 {offsets = [1, 0], sizes = [1, 256], strides = [1, 1]} : vector<2x256xf32> to vector<1x256xf32>
    %73 = vector.broadcast %67 : vector<1x256xi32> to vector<16x256xi32>
    %74 = arith.cmpi eq, %24, %73 : vector<16x256xi32>
    %cst_18 = arith.constant 1.000000e+00 : f32
    %75 = vector.broadcast %cst_18 : f32 to vector<1x256xf32>
    %76 = arith.subf %75, %69 : vector<1x256xf32>
    %cst_19 = arith.constant 0.000000e+00 : f32
    %77 = vector.shape_cast %76 : vector<1x256xf32> to vector<1x256xf32>
    %78 = vector.broadcast %77 : vector<1x256xf32> to vector<16x256xf32>
    %79 = vector.broadcast %cst_19 : f32 to vector<16x256xf32>
    %80 = arith.select %74, %78, %79 : vector<16x256xi1>, vector<16x256xf32>
    %81 = vector.broadcast %68 : vector<1x256xi32> to vector<16x256xi32>
    %82 = arith.cmpi eq, %24, %81 : vector<16x256xi32>
    %cst_20 = arith.constant 0.000000e+00 : f32
    %83 = vector.shape_cast %69 : vector<1x256xf32> to vector<1x256xf32>
    %84 = vector.broadcast %83 : vector<1x256xf32> to vector<16x256xf32>
    %85 = vector.broadcast %cst_20 : f32 to vector<16x256xf32>
    %86 = arith.select %82, %84, %85 : vector<16x256xi1>, vector<16x256xf32>
    %87 = arith.addf %80, %86 : vector<16x256xf32>
    %88 = vector.broadcast %70 : vector<1x256xi32> to vector<16x256xi32>
    %89 = arith.cmpi eq, %23, %88 : vector<16x256xi32>
    %cst_21 = arith.constant 1.000000e+00 : f32
    %90 = vector.broadcast %cst_21 : f32 to vector<1x256xf32>
    %91 = arith.subf %90, %72 : vector<1x256xf32>
    %cst_22 = arith.constant 0.000000e+00 : f32
    %92 = vector.shape_cast %91 : vector<1x256xf32> to vector<1x256xf32>
    %93 = vector.broadcast %92 : vector<1x256xf32> to vector<16x256xf32>
    %94 = vector.broadcast %cst_22 : f32 to vector<16x256xf32>
    %95 = arith.select %89, %93, %94 : vector<16x256xi1>, vector<16x256xf32>
    %96 = vector.broadcast %71 : vector<1x256xi32> to vector<16x256xi32>
    %97 = arith.cmpi eq, %23, %96 : vector<16x256xi32>
    %cst_23 = arith.constant 0.000000e+00 : f32
    %98 = vector.shape_cast %72 : vector<1x256xf32> to vector<1x256xf32>
    %99 = vector.broadcast %98 : vector<1x256xf32> to vector<16x256xf32>
    %100 = vector.broadcast %cst_23 : f32 to vector<16x256xf32>
    %101 = arith.select %97, %99, %100 : vector<16x256xi1>, vector<16x256xf32>
    %102 = arith.addf %95, %101 : vector<16x256xf32>
    %103 = vector.extract_strided_slice %52 {offsets = [0, 0], sizes = [1, 256], strides = [1, 1]} : vector<2x256xf32> to vector<1x256xf32>
    %104 = vector.shape_cast %103 : vector<1x256xf32> to vector<1x256xf32>
    %105 = vector.broadcast %104 : vector<1x256xf32> to vector<16x256xf32>
    %106 = vector.extract_strided_slice %52 {offsets = [1, 0], sizes = [1, 256], strides = [1, 1]} : vector<2x256xf32> to vector<1x256xf32>
    %107 = vector.shape_cast %106 : vector<1x256xf32> to vector<1x256xf32>
    %108 = vector.broadcast %107 : vector<1x256xf32> to vector<16x256xf32>
    %109 = tpu.concatenate %105, %108 in 0 : vector<16x256xf32>, vector<16x256xf32> -> vector<32x256xf32>
    %110 = arith.mulf %109, %31 : vector<32x256xf32>
    %cst_24 = arith.constant dense<0.000000e+00> : vector<32x16xf32>
    %111 = tpu.matmul %110, %47, %cst_24 {dimension_numbers = #tpu.dot_dimension_numbers<[1], [0], [0], [1], [0, 0, 1, 1], [], []>} : vector<32x256xf32>, vector<256x16xf32>, vector<32x16xf32> -> vector<32x16xf32>
    %cst_25 = arith.constant dense<0.000000e+00> : vector<32x256xf32>
    %112 = tpu.matmul %111, %87, %cst_25 {dimension_numbers = #tpu.dot_dimension_numbers<[1], [0], [0], [1], [0, 0, 1, 1], [], []>} : vector<32x16xf32>, vector<16x256xf32>, vector<32x256xf32> -> vector<32x256xf32>
    %113 = vector.extract_strided_slice %112 {offsets = [0, 0], sizes = [16, 256], strides = [1, 1]} : vector<32x256xf32> to vector<16x256xf32>
    %114 = arith.mulf %113, %102 : vector<16x256xf32>
    %cst_26 = arith.constant dense<0.000000e+00> : vector<256xf32>
    %115 = vector.multi_reduction <add>, %114, %cst_26 [0] : vector<16x256xf32> to vector<256xf32>
    %116 = vector.shape_cast %115 : vector<256xf32> to vector<1x256xf32>
    %117 = vector.extract_strided_slice %112 {offsets = [16, 0], sizes = [16, 256], strides = [1, 1]} : vector<32x256xf32> to vector<16x256xf32>
    %118 = arith.mulf %117, %102 : vector<16x256xf32>
    %cst_27 = arith.constant dense<0.000000e+00> : vector<256xf32>
    %119 = vector.multi_reduction <add>, %118, %cst_27 [0] : vector<16x256xf32> to vector<256xf32>
    %120 = vector.shape_cast %119 : vector<256xf32> to vector<1x256xf32>
    %121 = tpu.concatenate %116, %120 in 0 : vector<1x256xf32>, vector<1x256xf32> -> vector<2x256xf32>
    %122 = arith.addf %52, %121 : vector<2x256xf32>
    %123 = arith.addf %10, %122 : vector<2x256xf32>
    %124 = vector.broadcast %16 : vector<2x1xf32> to vector<2x256xf32>
    %125 = arith.mulf %123, %124 : vector<2x256xf32>
    %cst_28 = arith.constant 0.000000e+00 : f32
    %126 = vector.broadcast %cst_28 : f32 to vector<2x256xf32>
    %127 = arith.maximumf %126, %125 : vector<2x256xf32>
    %128 = vector.broadcast %21 : vector<2x1xf32> to vector<2x256xf32>
    %129 = arith.minimumf %128, %127 : vector<2x256xf32>
    %130 = math.floor %129 : vector<2x256xf32>
    %131 = arith.subf %129, %130 : vector<2x256xf32>
    %132 = arith.fptosi %130 : vector<2x256xf32> to vector<2x256xi32>
    %c1_i32_29 = arith.constant 1 : i32
    %133 = vector.broadcast %c1_i32_29 : i32 to vector<2x256xi32>
    %134 = arith.addi %132, %133 : vector<2x256xi32>
    %135 = vector.broadcast %22 : vector<2x1xi32> to vector<2x256xi32>
    %136 = arith.minsi %134, %135 : vector<2x256xi32>
    %137 = vector.extract_strided_slice %132 {offsets = [0, 0], sizes = [1, 256], strides = [1, 1]} : vector<2x256xi32> to vector<1x256xi32>
    %138 = vector.extract_strided_slice %136 {offsets = [0, 0], sizes = [1, 256], strides = [1, 1]} : vector<2x256xi32> to vector<1x256xi32>
    %139 = vector.extract_strided_slice %131 {offsets = [0, 0], sizes = [1, 256], strides = [1, 1]} : vector<2x256xf32> to vector<1x256xf32>
    %140 = vector.extract_strided_slice %132 {offsets = [1, 0], sizes = [1, 256], strides = [1, 1]} : vector<2x256xi32> to vector<1x256xi32>
    %141 = vector.extract_strided_slice %136 {offsets = [1, 0], sizes = [1, 256], strides = [1, 1]} : vector<2x256xi32> to vector<1x256xi32>
    %142 = vector.extract_strided_slice %131 {offsets = [1, 0], sizes = [1, 256], strides = [1, 1]} : vector<2x256xf32> to vector<1x256xf32>
    %143 = vector.broadcast %137 : vector<1x256xi32> to vector<16x256xi32>
    %144 = arith.cmpi eq, %24, %143 : vector<16x256xi32>
    %cst_30 = arith.constant 1.000000e+00 : f32
    %145 = vector.broadcast %cst_30 : f32 to vector<1x256xf32>
    %146 = arith.subf %145, %139 : vector<1x256xf32>
    %cst_31 = arith.constant 0.000000e+00 : f32
    %147 = vector.shape_cast %146 : vector<1x256xf32> to vector<1x256xf32>
    %148 = vector.broadcast %147 : vector<1x256xf32> to vector<16x256xf32>
    %149 = vector.broadcast %cst_31 : f32 to vector<16x256xf32>
    %150 = arith.select %144, %148, %149 : vector<16x256xi1>, vector<16x256xf32>
    %151 = vector.broadcast %138 : vector<1x256xi32> to vector<16x256xi32>
    %152 = arith.cmpi eq, %24, %151 : vector<16x256xi32>
    %cst_32 = arith.constant 0.000000e+00 : f32
    %153 = vector.shape_cast %139 : vector<1x256xf32> to vector<1x256xf32>
    %154 = vector.broadcast %153 : vector<1x256xf32> to vector<16x256xf32>
    %155 = vector.broadcast %cst_32 : f32 to vector<16x256xf32>
    %156 = arith.select %152, %154, %155 : vector<16x256xi1>, vector<16x256xf32>
    %157 = arith.addf %150, %156 : vector<16x256xf32>
    %158 = vector.broadcast %140 : vector<1x256xi32> to vector<16x256xi32>
    %159 = arith.cmpi eq, %23, %158 : vector<16x256xi32>
    %cst_33 = arith.constant 1.000000e+00 : f32
    %160 = vector.broadcast %cst_33 : f32 to vector<1x256xf32>
    %161 = arith.subf %160, %142 : vector<1x256xf32>
    %cst_34 = arith.constant 0.000000e+00 : f32
    %162 = vector.shape_cast %161 : vector<1x256xf32> to vector<1x256xf32>
    %163 = vector.broadcast %162 : vector<1x256xf32> to vector<16x256xf32>
    %164 = vector.broadcast %cst_34 : f32 to vector<16x256xf32>
    %165 = arith.select %159, %163, %164 : vector<16x256xi1>, vector<16x256xf32>
    %166 = vector.broadcast %141 : vector<1x256xi32> to vector<16x256xi32>
    %167 = arith.cmpi eq, %23, %166 : vector<16x256xi32>
    %cst_35 = arith.constant 0.000000e+00 : f32
    %168 = vector.shape_cast %142 : vector<1x256xf32> to vector<1x256xf32>
    %169 = vector.broadcast %168 : vector<1x256xf32> to vector<16x256xf32>
    %170 = vector.broadcast %cst_35 : f32 to vector<16x256xf32>
    %171 = arith.select %167, %169, %170 : vector<16x256xi1>, vector<16x256xf32>
    %172 = arith.addf %165, %171 : vector<16x256xf32>
    %173 = vector.extract_strided_slice %122 {offsets = [0, 0], sizes = [1, 256], strides = [1, 1]} : vector<2x256xf32> to vector<1x256xf32>
    %174 = vector.shape_cast %173 : vector<1x256xf32> to vector<1x256xf32>
    %175 = vector.broadcast %174 : vector<1x256xf32> to vector<16x256xf32>
    %176 = vector.extract_strided_slice %122 {offsets = [1, 0], sizes = [1, 256], strides = [1, 1]} : vector<2x256xf32> to vector<1x256xf32>
    %177 = vector.shape_cast %176 : vector<1x256xf32> to vector<1x256xf32>
    %178 = vector.broadcast %177 : vector<1x256xf32> to vector<16x256xf32>
    %179 = tpu.concatenate %175, %178 in 0 : vector<16x256xf32>, vector<16x256xf32> -> vector<32x256xf32>
    %180 = arith.mulf %179, %31 : vector<32x256xf32>
    %cst_36 = arith.constant dense<0.000000e+00> : vector<32x16xf32>
    %181 = tpu.matmul %180, %47, %cst_36 {dimension_numbers = #tpu.dot_dimension_numbers<[1], [0], [0], [1], [0, 0, 1, 1], [], []>} : vector<32x256xf32>, vector<256x16xf32>, vector<32x16xf32> -> vector<32x16xf32>
    %cst_37 = arith.constant dense<0.000000e+00> : vector<32x256xf32>
    %182 = tpu.matmul %181, %157, %cst_37 {dimension_numbers = #tpu.dot_dimension_numbers<[1], [0], [0], [1], [0, 0, 1, 1], [], []>} : vector<32x16xf32>, vector<16x256xf32>, vector<32x256xf32> -> vector<32x256xf32>
    %183 = vector.extract_strided_slice %182 {offsets = [0, 0], sizes = [16, 256], strides = [1, 1]} : vector<32x256xf32> to vector<16x256xf32>
    %184 = arith.mulf %183, %172 : vector<16x256xf32>
    %cst_38 = arith.constant dense<0.000000e+00> : vector<256xf32>
    %185 = vector.multi_reduction <add>, %184, %cst_38 [0] : vector<16x256xf32> to vector<256xf32>
    %186 = vector.shape_cast %185 : vector<256xf32> to vector<1x256xf32>
    %187 = vector.extract_strided_slice %182 {offsets = [16, 0], sizes = [16, 256], strides = [1, 1]} : vector<32x256xf32> to vector<16x256xf32>
    %188 = arith.mulf %187, %172 : vector<16x256xf32>
    %cst_39 = arith.constant dense<0.000000e+00> : vector<256xf32>
    %189 = vector.multi_reduction <add>, %188, %cst_39 [0] : vector<16x256xf32> to vector<256xf32>
    %190 = vector.shape_cast %189 : vector<256xf32> to vector<1x256xf32>
    %191 = tpu.concatenate %186, %190 in 0 : vector<1x256xf32>, vector<1x256xf32> -> vector<2x256xf32>
    %192 = arith.addf %122, %191 : vector<2x256xf32>
    %193 = arith.addf %10, %192 : vector<2x256xf32>
    %194 = vector.broadcast %16 : vector<2x1xf32> to vector<2x256xf32>
    %195 = arith.mulf %193, %194 : vector<2x256xf32>
    %cst_40 = arith.constant 0.000000e+00 : f32
    %196 = vector.broadcast %cst_40 : f32 to vector<2x256xf32>
    %197 = arith.maximumf %196, %195 : vector<2x256xf32>
    %198 = vector.broadcast %21 : vector<2x1xf32> to vector<2x256xf32>
    %199 = arith.minimumf %198, %197 : vector<2x256xf32>
    %200 = math.floor %199 : vector<2x256xf32>
    %201 = arith.subf %199, %200 : vector<2x256xf32>
    %202 = arith.fptosi %200 : vector<2x256xf32> to vector<2x256xi32>
    %c1_i32_41 = arith.constant 1 : i32
    %203 = vector.broadcast %c1_i32_41 : i32 to vector<2x256xi32>
    %204 = arith.addi %202, %203 : vector<2x256xi32>
    %205 = vector.broadcast %22 : vector<2x1xi32> to vector<2x256xi32>
    %206 = arith.minsi %204, %205 : vector<2x256xi32>
    %207 = vector.extract_strided_slice %202 {offsets = [0, 0], sizes = [1, 256], strides = [1, 1]} : vector<2x256xi32> to vector<1x256xi32>
    %208 = vector.extract_strided_slice %206 {offsets = [0, 0], sizes = [1, 256], strides = [1, 1]} : vector<2x256xi32> to vector<1x256xi32>
    %209 = vector.extract_strided_slice %201 {offsets = [0, 0], sizes = [1, 256], strides = [1, 1]} : vector<2x256xf32> to vector<1x256xf32>
    %210 = vector.extract_strided_slice %202 {offsets = [1, 0], sizes = [1, 256], strides = [1, 1]} : vector<2x256xi32> to vector<1x256xi32>
    %211 = vector.extract_strided_slice %206 {offsets = [1, 0], sizes = [1, 256], strides = [1, 1]} : vector<2x256xi32> to vector<1x256xi32>
    %212 = vector.extract_strided_slice %201 {offsets = [1, 0], sizes = [1, 256], strides = [1, 1]} : vector<2x256xf32> to vector<1x256xf32>
    %213 = vector.broadcast %207 : vector<1x256xi32> to vector<16x256xi32>
    %214 = arith.cmpi eq, %24, %213 : vector<16x256xi32>
    %cst_42 = arith.constant 1.000000e+00 : f32
    %215 = vector.broadcast %cst_42 : f32 to vector<1x256xf32>
    %216 = arith.subf %215, %209 : vector<1x256xf32>
    %cst_43 = arith.constant 0.000000e+00 : f32
    %217 = vector.shape_cast %216 : vector<1x256xf32> to vector<1x256xf32>
    %218 = vector.broadcast %217 : vector<1x256xf32> to vector<16x256xf32>
    %219 = vector.broadcast %cst_43 : f32 to vector<16x256xf32>
    %220 = arith.select %214, %218, %219 : vector<16x256xi1>, vector<16x256xf32>
    %221 = vector.broadcast %208 : vector<1x256xi32> to vector<16x256xi32>
    %222 = arith.cmpi eq, %24, %221 : vector<16x256xi32>
    %cst_44 = arith.constant 0.000000e+00 : f32
    %223 = vector.shape_cast %209 : vector<1x256xf32> to vector<1x256xf32>
    %224 = vector.broadcast %223 : vector<1x256xf32> to vector<16x256xf32>
    %225 = vector.broadcast %cst_44 : f32 to vector<16x256xf32>
    %226 = arith.select %222, %224, %225 : vector<16x256xi1>, vector<16x256xf32>
    %227 = arith.addf %220, %226 : vector<16x256xf32>
    %228 = vector.broadcast %210 : vector<1x256xi32> to vector<16x256xi32>
    %229 = arith.cmpi eq, %23, %228 : vector<16x256xi32>
    %cst_45 = arith.constant 1.000000e+00 : f32
    %230 = vector.broadcast %cst_45 : f32 to vector<1x256xf32>
    %231 = arith.subf %230, %212 : vector<1x256xf32>
    %cst_46 = arith.constant 0.000000e+00 : f32
    %232 = vector.shape_cast %231 : vector<1x256xf32> to vector<1x256xf32>
    %233 = vector.broadcast %232 : vector<1x256xf32> to vector<16x256xf32>
    %234 = vector.broadcast %cst_46 : f32 to vector<16x256xf32>
    %235 = arith.select %229, %233, %234 : vector<16x256xi1>, vector<16x256xf32>
    %236 = vector.broadcast %211 : vector<1x256xi32> to vector<16x256xi32>
    %237 = arith.cmpi eq, %23, %236 : vector<16x256xi32>
    %cst_47 = arith.constant 0.000000e+00 : f32
    %238 = vector.shape_cast %212 : vector<1x256xf32> to vector<1x256xf32>
    %239 = vector.broadcast %238 : vector<1x256xf32> to vector<16x256xf32>
    %240 = vector.broadcast %cst_47 : f32 to vector<16x256xf32>
    %241 = arith.select %237, %239, %240 : vector<16x256xi1>, vector<16x256xf32>
    %242 = arith.addf %235, %241 : vector<16x256xf32>
    %243 = vector.extract_strided_slice %192 {offsets = [0, 0], sizes = [1, 256], strides = [1, 1]} : vector<2x256xf32> to vector<1x256xf32>
    %244 = vector.shape_cast %243 : vector<1x256xf32> to vector<1x256xf32>
    %245 = vector.broadcast %244 : vector<1x256xf32> to vector<16x256xf32>
    %246 = vector.extract_strided_slice %192 {offsets = [1, 0], sizes = [1, 256], strides = [1, 1]} : vector<2x256xf32> to vector<1x256xf32>
    %247 = vector.shape_cast %246 : vector<1x256xf32> to vector<1x256xf32>
    %248 = vector.broadcast %247 : vector<1x256xf32> to vector<16x256xf32>
    %249 = tpu.concatenate %245, %248 in 0 : vector<16x256xf32>, vector<16x256xf32> -> vector<32x256xf32>
    %250 = arith.mulf %249, %31 : vector<32x256xf32>
    %cst_48 = arith.constant dense<0.000000e+00> : vector<32x16xf32>
    %251 = tpu.matmul %250, %47, %cst_48 {dimension_numbers = #tpu.dot_dimension_numbers<[1], [0], [0], [1], [0, 0, 1, 1], [], []>} : vector<32x256xf32>, vector<256x16xf32>, vector<32x16xf32> -> vector<32x16xf32>
    %cst_49 = arith.constant dense<0.000000e+00> : vector<32x256xf32>
    %252 = tpu.matmul %251, %227, %cst_49 {dimension_numbers = #tpu.dot_dimension_numbers<[1], [0], [0], [1], [0, 0, 1, 1], [], []>} : vector<32x16xf32>, vector<16x256xf32>, vector<32x256xf32> -> vector<32x256xf32>
    %253 = vector.extract_strided_slice %252 {offsets = [0, 0], sizes = [16, 256], strides = [1, 1]} : vector<32x256xf32> to vector<16x256xf32>
    %254 = arith.mulf %253, %242 : vector<16x256xf32>
    %cst_50 = arith.constant dense<0.000000e+00> : vector<256xf32>
    %255 = vector.multi_reduction <add>, %254, %cst_50 [0] : vector<16x256xf32> to vector<256xf32>
    %256 = vector.shape_cast %255 : vector<256xf32> to vector<1x256xf32>
    %257 = vector.extract_strided_slice %252 {offsets = [16, 0], sizes = [16, 256], strides = [1, 1]} : vector<32x256xf32> to vector<16x256xf32>
    %258 = arith.mulf %257, %242 : vector<16x256xf32>
    %cst_51 = arith.constant dense<0.000000e+00> : vector<256xf32>
    %259 = vector.multi_reduction <add>, %258, %cst_51 [0] : vector<16x256xf32> to vector<256xf32>
    %260 = vector.shape_cast %259 : vector<256xf32> to vector<1x256xf32>
    %261 = tpu.concatenate %256, %260 in 0 : vector<1x256xf32>, vector<1x256xf32> -> vector<2x256xf32>
    %262 = arith.addf %192, %261 : vector<2x256xf32>
    %263 = arith.addf %10, %262 : vector<2x256xf32>
    %264 = vector.broadcast %16 : vector<2x1xf32> to vector<2x256xf32>
    %265 = arith.mulf %263, %264 : vector<2x256xf32>
    %cst_52 = arith.constant 0.000000e+00 : f32
    %266 = vector.broadcast %cst_52 : f32 to vector<2x256xf32>
    %267 = arith.maximumf %266, %265 : vector<2x256xf32>
    %268 = vector.broadcast %21 : vector<2x1xf32> to vector<2x256xf32>
    %269 = arith.minimumf %268, %267 : vector<2x256xf32>
    %270 = math.floor %269 : vector<2x256xf32>
    %271 = arith.subf %269, %270 : vector<2x256xf32>
    %272 = arith.fptosi %270 : vector<2x256xf32> to vector<2x256xi32>
    %c1_i32_53 = arith.constant 1 : i32
    %273 = vector.broadcast %c1_i32_53 : i32 to vector<2x256xi32>
    %274 = arith.addi %272, %273 : vector<2x256xi32>
    %275 = vector.broadcast %22 : vector<2x1xi32> to vector<2x256xi32>
    %276 = arith.minsi %274, %275 : vector<2x256xi32>
    %277 = vector.extract_strided_slice %272 {offsets = [0, 0], sizes = [1, 256], strides = [1, 1]} : vector<2x256xi32> to vector<1x256xi32>
    %278 = vector.extract_strided_slice %276 {offsets = [0, 0], sizes = [1, 256], strides = [1, 1]} : vector<2x256xi32> to vector<1x256xi32>
    %279 = vector.extract_strided_slice %271 {offsets = [0, 0], sizes = [1, 256], strides = [1, 1]} : vector<2x256xf32> to vector<1x256xf32>
    %280 = vector.extract_strided_slice %272 {offsets = [1, 0], sizes = [1, 256], strides = [1, 1]} : vector<2x256xi32> to vector<1x256xi32>
    %281 = vector.extract_strided_slice %276 {offsets = [1, 0], sizes = [1, 256], strides = [1, 1]} : vector<2x256xi32> to vector<1x256xi32>
    %282 = vector.extract_strided_slice %271 {offsets = [1, 0], sizes = [1, 256], strides = [1, 1]} : vector<2x256xf32> to vector<1x256xf32>
    %283 = vector.broadcast %277 : vector<1x256xi32> to vector<16x256xi32>
    %284 = arith.cmpi eq, %24, %283 : vector<16x256xi32>
    %cst_54 = arith.constant 1.000000e+00 : f32
    %285 = vector.broadcast %cst_54 : f32 to vector<1x256xf32>
    %286 = arith.subf %285, %279 : vector<1x256xf32>
    %cst_55 = arith.constant 0.000000e+00 : f32
    %287 = vector.shape_cast %286 : vector<1x256xf32> to vector<1x256xf32>
    %288 = vector.broadcast %287 : vector<1x256xf32> to vector<16x256xf32>
    %289 = vector.broadcast %cst_55 : f32 to vector<16x256xf32>
    %290 = arith.select %284, %288, %289 : vector<16x256xi1>, vector<16x256xf32>
    %291 = vector.broadcast %278 : vector<1x256xi32> to vector<16x256xi32>
    %292 = arith.cmpi eq, %24, %291 : vector<16x256xi32>
    %cst_56 = arith.constant 0.000000e+00 : f32
    %293 = vector.shape_cast %279 : vector<1x256xf32> to vector<1x256xf32>
    %294 = vector.broadcast %293 : vector<1x256xf32> to vector<16x256xf32>
    %295 = vector.broadcast %cst_56 : f32 to vector<16x256xf32>
    %296 = arith.select %292, %294, %295 : vector<16x256xi1>, vector<16x256xf32>
    %297 = arith.addf %290, %296 : vector<16x256xf32>
    %298 = vector.broadcast %280 : vector<1x256xi32> to vector<16x256xi32>
    %299 = arith.cmpi eq, %23, %298 : vector<16x256xi32>
    %cst_57 = arith.constant 1.000000e+00 : f32
    %300 = vector.broadcast %cst_57 : f32 to vector<1x256xf32>
    %301 = arith.subf %300, %282 : vector<1x256xf32>
    %cst_58 = arith.constant 0.000000e+00 : f32
    %302 = vector.shape_cast %301 : vector<1x256xf32> to vector<1x256xf32>
    %303 = vector.broadcast %302 : vector<1x256xf32> to vector<16x256xf32>
    %304 = vector.broadcast %cst_58 : f32 to vector<16x256xf32>
    %305 = arith.select %299, %303, %304 : vector<16x256xi1>, vector<16x256xf32>
    %306 = vector.broadcast %281 : vector<1x256xi32> to vector<16x256xi32>
    %307 = arith.cmpi eq, %23, %306 : vector<16x256xi32>
    %cst_59 = arith.constant 0.000000e+00 : f32
    %308 = vector.shape_cast %282 : vector<1x256xf32> to vector<1x256xf32>
    %309 = vector.broadcast %308 : vector<1x256xf32> to vector<16x256xf32>
    %310 = vector.broadcast %cst_59 : f32 to vector<16x256xf32>
    %311 = arith.select %307, %309, %310 : vector<16x256xi1>, vector<16x256xf32>
    %312 = arith.addf %305, %311 : vector<16x256xf32>
    %313 = vector.extract_strided_slice %262 {offsets = [0, 0], sizes = [1, 256], strides = [1, 1]} : vector<2x256xf32> to vector<1x256xf32>
    %314 = vector.shape_cast %313 : vector<1x256xf32> to vector<1x256xf32>
    %315 = vector.broadcast %314 : vector<1x256xf32> to vector<16x256xf32>
    %316 = vector.extract_strided_slice %262 {offsets = [1, 0], sizes = [1, 256], strides = [1, 1]} : vector<2x256xf32> to vector<1x256xf32>
    %317 = vector.shape_cast %316 : vector<1x256xf32> to vector<1x256xf32>
    %318 = vector.broadcast %317 : vector<1x256xf32> to vector<16x256xf32>
    %319 = tpu.concatenate %315, %318 in 0 : vector<16x256xf32>, vector<16x256xf32> -> vector<32x256xf32>
    %320 = arith.mulf %319, %31 : vector<32x256xf32>
    %cst_60 = arith.constant dense<0.000000e+00> : vector<32x16xf32>
    %321 = tpu.matmul %320, %47, %cst_60 {dimension_numbers = #tpu.dot_dimension_numbers<[1], [0], [0], [1], [0, 0, 1, 1], [], []>} : vector<32x256xf32>, vector<256x16xf32>, vector<32x16xf32> -> vector<32x16xf32>
    %cst_61 = arith.constant dense<0.000000e+00> : vector<32x256xf32>
    %322 = tpu.matmul %321, %297, %cst_61 {dimension_numbers = #tpu.dot_dimension_numbers<[1], [0], [0], [1], [0, 0, 1, 1], [], []>} : vector<32x16xf32>, vector<16x256xf32>, vector<32x256xf32> -> vector<32x256xf32>
    %323 = vector.extract_strided_slice %322 {offsets = [0, 0], sizes = [16, 256], strides = [1, 1]} : vector<32x256xf32> to vector<16x256xf32>
    %324 = arith.mulf %323, %312 : vector<16x256xf32>
    %cst_62 = arith.constant dense<0.000000e+00> : vector<256xf32>
    %325 = vector.multi_reduction <add>, %324, %cst_62 [0] : vector<16x256xf32> to vector<256xf32>
    %326 = vector.shape_cast %325 : vector<256xf32> to vector<1x256xf32>
    %327 = vector.extract_strided_slice %322 {offsets = [16, 0], sizes = [16, 256], strides = [1, 1]} : vector<32x256xf32> to vector<16x256xf32>
    %328 = arith.mulf %327, %312 : vector<16x256xf32>
    %cst_63 = arith.constant dense<0.000000e+00> : vector<256xf32>
    %329 = vector.multi_reduction <add>, %328, %cst_63 [0] : vector<16x256xf32> to vector<256xf32>
    %330 = vector.shape_cast %329 : vector<256xf32> to vector<1x256xf32>
    %331 = tpu.concatenate %326, %330 in 0 : vector<1x256xf32>, vector<1x256xf32> -> vector<2x256xf32>
    %332 = arith.addf %262, %331 : vector<2x256xf32>
    %333 = arith.addf %10, %332 : vector<2x256xf32>
    %334 = vector.broadcast %16 : vector<2x1xf32> to vector<2x256xf32>
    %335 = arith.mulf %333, %334 : vector<2x256xf32>
    %cst_64 = arith.constant 0.000000e+00 : f32
    %336 = vector.broadcast %cst_64 : f32 to vector<2x256xf32>
    %337 = arith.maximumf %336, %335 : vector<2x256xf32>
    %338 = vector.broadcast %21 : vector<2x1xf32> to vector<2x256xf32>
    %339 = arith.minimumf %338, %337 : vector<2x256xf32>
    %340 = math.floor %339 : vector<2x256xf32>
    %341 = arith.subf %339, %340 : vector<2x256xf32>
    %342 = arith.fptosi %340 : vector<2x256xf32> to vector<2x256xi32>
    %c1_i32_65 = arith.constant 1 : i32
    %343 = vector.broadcast %c1_i32_65 : i32 to vector<2x256xi32>
    %344 = arith.addi %342, %343 : vector<2x256xi32>
    %345 = vector.broadcast %22 : vector<2x1xi32> to vector<2x256xi32>
    %346 = arith.minsi %344, %345 : vector<2x256xi32>
    %347 = vector.extract_strided_slice %342 {offsets = [0, 0], sizes = [1, 256], strides = [1, 1]} : vector<2x256xi32> to vector<1x256xi32>
    %348 = vector.extract_strided_slice %346 {offsets = [0, 0], sizes = [1, 256], strides = [1, 1]} : vector<2x256xi32> to vector<1x256xi32>
    %349 = vector.extract_strided_slice %341 {offsets = [0, 0], sizes = [1, 256], strides = [1, 1]} : vector<2x256xf32> to vector<1x256xf32>
    %350 = vector.extract_strided_slice %342 {offsets = [1, 0], sizes = [1, 256], strides = [1, 1]} : vector<2x256xi32> to vector<1x256xi32>
    %351 = vector.extract_strided_slice %346 {offsets = [1, 0], sizes = [1, 256], strides = [1, 1]} : vector<2x256xi32> to vector<1x256xi32>
    %352 = vector.extract_strided_slice %341 {offsets = [1, 0], sizes = [1, 256], strides = [1, 1]} : vector<2x256xf32> to vector<1x256xf32>
    %353 = vector.broadcast %347 : vector<1x256xi32> to vector<16x256xi32>
    %354 = arith.cmpi eq, %24, %353 : vector<16x256xi32>
    %cst_66 = arith.constant 1.000000e+00 : f32
    %355 = vector.broadcast %cst_66 : f32 to vector<1x256xf32>
    %356 = arith.subf %355, %349 : vector<1x256xf32>
    %cst_67 = arith.constant 0.000000e+00 : f32
    %357 = vector.shape_cast %356 : vector<1x256xf32> to vector<1x256xf32>
    %358 = vector.broadcast %357 : vector<1x256xf32> to vector<16x256xf32>
    %359 = vector.broadcast %cst_67 : f32 to vector<16x256xf32>
    %360 = arith.select %354, %358, %359 : vector<16x256xi1>, vector<16x256xf32>
    %361 = vector.broadcast %348 : vector<1x256xi32> to vector<16x256xi32>
    %362 = arith.cmpi eq, %24, %361 : vector<16x256xi32>
    %cst_68 = arith.constant 0.000000e+00 : f32
    %363 = vector.shape_cast %349 : vector<1x256xf32> to vector<1x256xf32>
    %364 = vector.broadcast %363 : vector<1x256xf32> to vector<16x256xf32>
    %365 = vector.broadcast %cst_68 : f32 to vector<16x256xf32>
    %366 = arith.select %362, %364, %365 : vector<16x256xi1>, vector<16x256xf32>
    %367 = arith.addf %360, %366 : vector<16x256xf32>
    %368 = vector.broadcast %350 : vector<1x256xi32> to vector<16x256xi32>
    %369 = arith.cmpi eq, %23, %368 : vector<16x256xi32>
    %cst_69 = arith.constant 1.000000e+00 : f32
    %370 = vector.broadcast %cst_69 : f32 to vector<1x256xf32>
    %371 = arith.subf %370, %352 : vector<1x256xf32>
    %cst_70 = arith.constant 0.000000e+00 : f32
    %372 = vector.shape_cast %371 : vector<1x256xf32> to vector<1x256xf32>
    %373 = vector.broadcast %372 : vector<1x256xf32> to vector<16x256xf32>
    %374 = vector.broadcast %cst_70 : f32 to vector<16x256xf32>
    %375 = arith.select %369, %373, %374 : vector<16x256xi1>, vector<16x256xf32>
    %376 = vector.broadcast %351 : vector<1x256xi32> to vector<16x256xi32>
    %377 = arith.cmpi eq, %23, %376 : vector<16x256xi32>
    %cst_71 = arith.constant 0.000000e+00 : f32
    %378 = vector.shape_cast %352 : vector<1x256xf32> to vector<1x256xf32>
    %379 = vector.broadcast %378 : vector<1x256xf32> to vector<16x256xf32>
    %380 = vector.broadcast %cst_71 : f32 to vector<16x256xf32>
    %381 = arith.select %377, %379, %380 : vector<16x256xi1>, vector<16x256xf32>
    %382 = arith.addf %375, %381 : vector<16x256xf32>
    %383 = vector.extract_strided_slice %332 {offsets = [0, 0], sizes = [1, 256], strides = [1, 1]} : vector<2x256xf32> to vector<1x256xf32>
    %384 = vector.shape_cast %383 : vector<1x256xf32> to vector<1x256xf32>
    %385 = vector.broadcast %384 : vector<1x256xf32> to vector<16x256xf32>
    %386 = vector.extract_strided_slice %332 {offsets = [1, 0], sizes = [1, 256], strides = [1, 1]} : vector<2x256xf32> to vector<1x256xf32>
    %387 = vector.shape_cast %386 : vector<1x256xf32> to vector<1x256xf32>
    %388 = vector.broadcast %387 : vector<1x256xf32> to vector<16x256xf32>
    %389 = tpu.concatenate %385, %388 in 0 : vector<16x256xf32>, vector<16x256xf32> -> vector<32x256xf32>
    %390 = arith.mulf %389, %31 : vector<32x256xf32>
    %cst_72 = arith.constant dense<0.000000e+00> : vector<32x16xf32>
    %391 = tpu.matmul %390, %47, %cst_72 {dimension_numbers = #tpu.dot_dimension_numbers<[1], [0], [0], [1], [0, 0, 1, 1], [], []>} : vector<32x256xf32>, vector<256x16xf32>, vector<32x16xf32> -> vector<32x16xf32>
    %cst_73 = arith.constant dense<0.000000e+00> : vector<32x256xf32>
    %392 = tpu.matmul %391, %367, %cst_73 {dimension_numbers = #tpu.dot_dimension_numbers<[1], [0], [0], [1], [0, 0, 1, 1], [], []>} : vector<32x16xf32>, vector<16x256xf32>, vector<32x256xf32> -> vector<32x256xf32>
    %393 = vector.extract_strided_slice %392 {offsets = [0, 0], sizes = [16, 256], strides = [1, 1]} : vector<32x256xf32> to vector<16x256xf32>
    %394 = arith.mulf %393, %382 : vector<16x256xf32>
    %cst_74 = arith.constant dense<0.000000e+00> : vector<256xf32>
    %395 = vector.multi_reduction <add>, %394, %cst_74 [0] : vector<16x256xf32> to vector<256xf32>
    %396 = vector.shape_cast %395 : vector<256xf32> to vector<1x256xf32>
    %397 = vector.extract_strided_slice %392 {offsets = [16, 0], sizes = [16, 256], strides = [1, 1]} : vector<32x256xf32> to vector<16x256xf32>
    %398 = arith.mulf %397, %382 : vector<16x256xf32>
    %cst_75 = arith.constant dense<0.000000e+00> : vector<256xf32>
    %399 = vector.multi_reduction <add>, %398, %cst_75 [0] : vector<16x256xf32> to vector<256xf32>
    %400 = vector.shape_cast %399 : vector<256xf32> to vector<1x256xf32>
    %401 = tpu.concatenate %396, %400 in 0 : vector<1x256xf32>, vector<1x256xf32> -> vector<2x256xf32>
    %402 = arith.addf %332, %401 : vector<2x256xf32>
    %403 = arith.addf %10, %402 : vector<2x256xf32>
    %404 = vector.broadcast %16 : vector<2x1xf32> to vector<2x256xf32>
    %405 = arith.mulf %403, %404 : vector<2x256xf32>
    %cst_76 = arith.constant 0.000000e+00 : f32
    %406 = vector.broadcast %cst_76 : f32 to vector<2x256xf32>
    %407 = arith.maximumf %406, %405 : vector<2x256xf32>
    %408 = vector.broadcast %21 : vector<2x1xf32> to vector<2x256xf32>
    %409 = arith.minimumf %408, %407 : vector<2x256xf32>
    %410 = math.floor %409 : vector<2x256xf32>
    %411 = arith.subf %409, %410 : vector<2x256xf32>
    %412 = arith.fptosi %410 : vector<2x256xf32> to vector<2x256xi32>
    %c1_i32_77 = arith.constant 1 : i32
    %413 = vector.broadcast %c1_i32_77 : i32 to vector<2x256xi32>
    %414 = arith.addi %412, %413 : vector<2x256xi32>
    %415 = vector.broadcast %22 : vector<2x1xi32> to vector<2x256xi32>
    %416 = arith.minsi %414, %415 : vector<2x256xi32>
    %417 = vector.extract_strided_slice %412 {offsets = [0, 0], sizes = [1, 256], strides = [1, 1]} : vector<2x256xi32> to vector<1x256xi32>
    %418 = vector.extract_strided_slice %416 {offsets = [0, 0], sizes = [1, 256], strides = [1, 1]} : vector<2x256xi32> to vector<1x256xi32>
    %419 = vector.extract_strided_slice %411 {offsets = [0, 0], sizes = [1, 256], strides = [1, 1]} : vector<2x256xf32> to vector<1x256xf32>
    %420 = vector.extract_strided_slice %412 {offsets = [1, 0], sizes = [1, 256], strides = [1, 1]} : vector<2x256xi32> to vector<1x256xi32>
    %421 = vector.extract_strided_slice %416 {offsets = [1, 0], sizes = [1, 256], strides = [1, 1]} : vector<2x256xi32> to vector<1x256xi32>
    %422 = vector.extract_strided_slice %411 {offsets = [1, 0], sizes = [1, 256], strides = [1, 1]} : vector<2x256xf32> to vector<1x256xf32>
    %423 = vector.broadcast %417 : vector<1x256xi32> to vector<16x256xi32>
    %424 = arith.cmpi eq, %24, %423 : vector<16x256xi32>
    %cst_78 = arith.constant 1.000000e+00 : f32
    %425 = vector.broadcast %cst_78 : f32 to vector<1x256xf32>
    %426 = arith.subf %425, %419 : vector<1x256xf32>
    %cst_79 = arith.constant 0.000000e+00 : f32
    %427 = vector.shape_cast %426 : vector<1x256xf32> to vector<1x256xf32>
    %428 = vector.broadcast %427 : vector<1x256xf32> to vector<16x256xf32>
    %429 = vector.broadcast %cst_79 : f32 to vector<16x256xf32>
    %430 = arith.select %424, %428, %429 : vector<16x256xi1>, vector<16x256xf32>
    %431 = vector.broadcast %418 : vector<1x256xi32> to vector<16x256xi32>
    %432 = arith.cmpi eq, %24, %431 : vector<16x256xi32>
    %cst_80 = arith.constant 0.000000e+00 : f32
    %433 = vector.shape_cast %419 : vector<1x256xf32> to vector<1x256xf32>
    %434 = vector.broadcast %433 : vector<1x256xf32> to vector<16x256xf32>
    %435 = vector.broadcast %cst_80 : f32 to vector<16x256xf32>
    %436 = arith.select %432, %434, %435 : vector<16x256xi1>, vector<16x256xf32>
    %437 = arith.addf %430, %436 : vector<16x256xf32>
    %438 = vector.broadcast %420 : vector<1x256xi32> to vector<16x256xi32>
    %439 = arith.cmpi eq, %23, %438 : vector<16x256xi32>
    %cst_81 = arith.constant 1.000000e+00 : f32
    %440 = vector.broadcast %cst_81 : f32 to vector<1x256xf32>
    %441 = arith.subf %440, %422 : vector<1x256xf32>
    %cst_82 = arith.constant 0.000000e+00 : f32
    %442 = vector.shape_cast %441 : vector<1x256xf32> to vector<1x256xf32>
    %443 = vector.broadcast %442 : vector<1x256xf32> to vector<16x256xf32>
    %444 = vector.broadcast %cst_82 : f32 to vector<16x256xf32>
    %445 = arith.select %439, %443, %444 : vector<16x256xi1>, vector<16x256xf32>
    %446 = vector.broadcast %421 : vector<1x256xi32> to vector<16x256xi32>
    %447 = arith.cmpi eq, %23, %446 : vector<16x256xi32>
    %cst_83 = arith.constant 0.000000e+00 : f32
    %448 = vector.shape_cast %422 : vector<1x256xf32> to vector<1x256xf32>
    %449 = vector.broadcast %448 : vector<1x256xf32> to vector<16x256xf32>
    %450 = vector.broadcast %cst_83 : f32 to vector<16x256xf32>
    %451 = arith.select %447, %449, %450 : vector<16x256xi1>, vector<16x256xf32>
    %452 = arith.addf %445, %451 : vector<16x256xf32>
    %453 = vector.extract_strided_slice %402 {offsets = [0, 0], sizes = [1, 256], strides = [1, 1]} : vector<2x256xf32> to vector<1x256xf32>
    %454 = vector.shape_cast %453 : vector<1x256xf32> to vector<1x256xf32>
    %455 = vector.broadcast %454 : vector<1x256xf32> to vector<16x256xf32>
    %456 = vector.extract_strided_slice %402 {offsets = [1, 0], sizes = [1, 256], strides = [1, 1]} : vector<2x256xf32> to vector<1x256xf32>
    %457 = vector.shape_cast %456 : vector<1x256xf32> to vector<1x256xf32>
    %458 = vector.broadcast %457 : vector<1x256xf32> to vector<16x256xf32>
    %459 = tpu.concatenate %455, %458 in 0 : vector<16x256xf32>, vector<16x256xf32> -> vector<32x256xf32>
    %460 = arith.mulf %459, %31 : vector<32x256xf32>
    %cst_84 = arith.constant dense<0.000000e+00> : vector<32x16xf32>
    %461 = tpu.matmul %460, %47, %cst_84 {dimension_numbers = #tpu.dot_dimension_numbers<[1], [0], [0], [1], [0, 0, 1, 1], [], []>} : vector<32x256xf32>, vector<256x16xf32>, vector<32x16xf32> -> vector<32x16xf32>
    %cst_85 = arith.constant dense<0.000000e+00> : vector<32x256xf32>
    %462 = tpu.matmul %461, %437, %cst_85 {dimension_numbers = #tpu.dot_dimension_numbers<[1], [0], [0], [1], [0, 0, 1, 1], [], []>} : vector<32x16xf32>, vector<16x256xf32>, vector<32x256xf32> -> vector<32x256xf32>
    %463 = vector.extract_strided_slice %462 {offsets = [0, 0], sizes = [16, 256], strides = [1, 1]} : vector<32x256xf32> to vector<16x256xf32>
    %464 = arith.mulf %463, %452 : vector<16x256xf32>
    %cst_86 = arith.constant dense<0.000000e+00> : vector<256xf32>
    %465 = vector.multi_reduction <add>, %464, %cst_86 [0] : vector<16x256xf32> to vector<256xf32>
    %466 = vector.shape_cast %465 : vector<256xf32> to vector<1x256xf32>
    %467 = vector.extract_strided_slice %462 {offsets = [16, 0], sizes = [16, 256], strides = [1, 1]} : vector<32x256xf32> to vector<16x256xf32>
    %468 = arith.mulf %467, %452 : vector<16x256xf32>
    %cst_87 = arith.constant dense<0.000000e+00> : vector<256xf32>
    %469 = vector.multi_reduction <add>, %468, %cst_87 [0] : vector<16x256xf32> to vector<256xf32>
    %470 = vector.shape_cast %469 : vector<256xf32> to vector<1x256xf32>
    %471 = tpu.concatenate %466, %470 in 0 : vector<1x256xf32>, vector<1x256xf32> -> vector<2x256xf32>
    %472 = arith.addf %402, %471 : vector<2x256xf32>
    %473 = arith.addf %10, %472 : vector<2x256xf32>
    %474 = vector.broadcast %16 : vector<2x1xf32> to vector<2x256xf32>
    %475 = arith.mulf %473, %474 : vector<2x256xf32>
    %cst_88 = arith.constant 0.000000e+00 : f32
    %476 = vector.broadcast %cst_88 : f32 to vector<2x256xf32>
    %477 = arith.maximumf %476, %475 : vector<2x256xf32>
    %478 = vector.broadcast %21 : vector<2x1xf32> to vector<2x256xf32>
    %479 = arith.minimumf %478, %477 : vector<2x256xf32>
    %480 = math.floor %479 : vector<2x256xf32>
    %481 = arith.subf %479, %480 : vector<2x256xf32>
    %482 = arith.fptosi %480 : vector<2x256xf32> to vector<2x256xi32>
    %c1_i32_89 = arith.constant 1 : i32
    %483 = vector.broadcast %c1_i32_89 : i32 to vector<2x256xi32>
    %484 = arith.addi %482, %483 : vector<2x256xi32>
    %485 = vector.broadcast %22 : vector<2x1xi32> to vector<2x256xi32>
    %486 = arith.minsi %484, %485 : vector<2x256xi32>
    %487 = vector.extract_strided_slice %482 {offsets = [0, 0], sizes = [1, 256], strides = [1, 1]} : vector<2x256xi32> to vector<1x256xi32>
    %488 = vector.extract_strided_slice %486 {offsets = [0, 0], sizes = [1, 256], strides = [1, 1]} : vector<2x256xi32> to vector<1x256xi32>
    %489 = vector.extract_strided_slice %481 {offsets = [0, 0], sizes = [1, 256], strides = [1, 1]} : vector<2x256xf32> to vector<1x256xf32>
    %490 = vector.extract_strided_slice %482 {offsets = [1, 0], sizes = [1, 256], strides = [1, 1]} : vector<2x256xi32> to vector<1x256xi32>
    %491 = vector.extract_strided_slice %486 {offsets = [1, 0], sizes = [1, 256], strides = [1, 1]} : vector<2x256xi32> to vector<1x256xi32>
    %492 = vector.extract_strided_slice %481 {offsets = [1, 0], sizes = [1, 256], strides = [1, 1]} : vector<2x256xf32> to vector<1x256xf32>
    %493 = vector.broadcast %487 : vector<1x256xi32> to vector<16x256xi32>
    %494 = arith.cmpi eq, %24, %493 : vector<16x256xi32>
    %cst_90 = arith.constant 1.000000e+00 : f32
    %495 = vector.broadcast %cst_90 : f32 to vector<1x256xf32>
    %496 = arith.subf %495, %489 : vector<1x256xf32>
    %cst_91 = arith.constant 0.000000e+00 : f32
    %497 = vector.shape_cast %496 : vector<1x256xf32> to vector<1x256xf32>
    %498 = vector.broadcast %497 : vector<1x256xf32> to vector<16x256xf32>
    %499 = vector.broadcast %cst_91 : f32 to vector<16x256xf32>
    %500 = arith.select %494, %498, %499 : vector<16x256xi1>, vector<16x256xf32>
    %501 = vector.broadcast %488 : vector<1x256xi32> to vector<16x256xi32>
    %502 = arith.cmpi eq, %24, %501 : vector<16x256xi32>
    %cst_92 = arith.constant 0.000000e+00 : f32
    %503 = vector.shape_cast %489 : vector<1x256xf32> to vector<1x256xf32>
    %504 = vector.broadcast %503 : vector<1x256xf32> to vector<16x256xf32>
    %505 = vector.broadcast %cst_92 : f32 to vector<16x256xf32>
    %506 = arith.select %502, %504, %505 : vector<16x256xi1>, vector<16x256xf32>
    %507 = arith.addf %500, %506 : vector<16x256xf32>
    %508 = vector.broadcast %490 : vector<1x256xi32> to vector<16x256xi32>
    %509 = arith.cmpi eq, %23, %508 : vector<16x256xi32>
    %cst_93 = arith.constant 1.000000e+00 : f32
    %510 = vector.broadcast %cst_93 : f32 to vector<1x256xf32>
    %511 = arith.subf %510, %492 : vector<1x256xf32>
    %cst_94 = arith.constant 0.000000e+00 : f32
    %512 = vector.shape_cast %511 : vector<1x256xf32> to vector<1x256xf32>
    %513 = vector.broadcast %512 : vector<1x256xf32> to vector<16x256xf32>
    %514 = vector.broadcast %cst_94 : f32 to vector<16x256xf32>
    %515 = arith.select %509, %513, %514 : vector<16x256xi1>, vector<16x256xf32>
    %516 = vector.broadcast %491 : vector<1x256xi32> to vector<16x256xi32>
    %517 = arith.cmpi eq, %23, %516 : vector<16x256xi32>
    %cst_95 = arith.constant 0.000000e+00 : f32
    %518 = vector.shape_cast %492 : vector<1x256xf32> to vector<1x256xf32>
    %519 = vector.broadcast %518 : vector<1x256xf32> to vector<16x256xf32>
    %520 = vector.broadcast %cst_95 : f32 to vector<16x256xf32>
    %521 = arith.select %517, %519, %520 : vector<16x256xi1>, vector<16x256xf32>
    %522 = arith.addf %515, %521 : vector<16x256xf32>
    %523 = vector.extract_strided_slice %472 {offsets = [0, 0], sizes = [1, 256], strides = [1, 1]} : vector<2x256xf32> to vector<1x256xf32>
    %524 = vector.shape_cast %523 : vector<1x256xf32> to vector<1x256xf32>
    %525 = vector.broadcast %524 : vector<1x256xf32> to vector<16x256xf32>
    %526 = vector.extract_strided_slice %472 {offsets = [1, 0], sizes = [1, 256], strides = [1, 1]} : vector<2x256xf32> to vector<1x256xf32>
    %527 = vector.shape_cast %526 : vector<1x256xf32> to vector<1x256xf32>
    %528 = vector.broadcast %527 : vector<1x256xf32> to vector<16x256xf32>
    %529 = tpu.concatenate %525, %528 in 0 : vector<16x256xf32>, vector<16x256xf32> -> vector<32x256xf32>
    %530 = arith.mulf %529, %31 : vector<32x256xf32>
    %cst_96 = arith.constant dense<0.000000e+00> : vector<32x16xf32>
    %531 = tpu.matmul %530, %47, %cst_96 {dimension_numbers = #tpu.dot_dimension_numbers<[1], [0], [0], [1], [0, 0, 1, 1], [], []>} : vector<32x256xf32>, vector<256x16xf32>, vector<32x16xf32> -> vector<32x16xf32>
    %cst_97 = arith.constant dense<0.000000e+00> : vector<32x256xf32>
    %532 = tpu.matmul %531, %507, %cst_97 {dimension_numbers = #tpu.dot_dimension_numbers<[1], [0], [0], [1], [0, 0, 1, 1], [], []>} : vector<32x16xf32>, vector<16x256xf32>, vector<32x256xf32> -> vector<32x256xf32>
    %533 = vector.extract_strided_slice %532 {offsets = [0, 0], sizes = [16, 256], strides = [1, 1]} : vector<32x256xf32> to vector<16x256xf32>
    %534 = arith.mulf %533, %522 : vector<16x256xf32>
    %cst_98 = arith.constant dense<0.000000e+00> : vector<256xf32>
    %535 = vector.multi_reduction <add>, %534, %cst_98 [0] : vector<16x256xf32> to vector<256xf32>
    %536 = vector.shape_cast %535 : vector<256xf32> to vector<1x256xf32>
    %537 = vector.extract_strided_slice %532 {offsets = [16, 0], sizes = [16, 256], strides = [1, 1]} : vector<32x256xf32> to vector<16x256xf32>
    %538 = arith.mulf %537, %522 : vector<16x256xf32>
    %cst_99 = arith.constant dense<0.000000e+00> : vector<256xf32>
    %539 = vector.multi_reduction <add>, %538, %cst_99 [0] : vector<16x256xf32> to vector<256xf32>
    %540 = vector.shape_cast %539 : vector<256xf32> to vector<1x256xf32>
    %541 = tpu.concatenate %536, %540 in 0 : vector<1x256xf32>, vector<1x256xf32> -> vector<2x256xf32>
    %542 = arith.addf %472, %541 : vector<2x256xf32>
    %543 = arith.index_cast %c0_i32_14 : i32 to index
    %c0_100 = arith.constant 0 : index
    %c0_101 = arith.constant 0 : index
    %544 = vector.load %arg2[%543, %c0_100, %c0_101] : memref<2x2x256xf32, #tpu.memory_space<vmem>>, vector<1x2x256xf32>
    %545 = vector.shape_cast %544 : vector<1x2x256xf32> to vector<2x256xf32>
    %546 = vector.shape_cast %542 : vector<2x256xf32> to vector<1x2x256xf32>
    tpu.vector_store %arg2[%543, %c0_100, %c0_101], %546 {strides = array<i32>} : memref<2x2x256xf32, #tpu.memory_space<vmem>>, vector<1x2x256xf32>,
    %c1_i32_102 = arith.constant 1 : i32
    %547 = arith.index_cast %c1_i32_102 : i32 to index
    %c0_103 = arith.constant 0 : index
    %c0_104 = arith.constant 0 : index
    %548 = vector.load %arg1[%547, %c0_103, %c0_104] : memref<2x2x256xf32, #tpu.memory_space<vmem>>, vector<1x2x256xf32>
    %549 = vector.shape_cast %548 : vector<1x2x256xf32> to vector<2x256xf32>
    %cst_105 = arith.constant 7.812500e-03 : f32
    %550 = vector.broadcast %cst_105 : f32 to vector<2x256xf32>
    %551 = arith.mulf %549, %550 : vector<2x256xf32>
    %552 = arith.addf %10, %551 : vector<2x256xf32>
    %553 = vector.broadcast %16 : vector<2x1xf32> to vector<2x256xf32>
    %554 = arith.mulf %552, %553 : vector<2x256xf32>
    %cst_106 = arith.constant 0.000000e+00 : f32
    %555 = vector.broadcast %cst_106 : f32 to vector<2x256xf32>
    %556 = arith.maximumf %555, %554 : vector<2x256xf32>
    %557 = vector.broadcast %21 : vector<2x1xf32> to vector<2x256xf32>
    %558 = arith.minimumf %557, %556 : vector<2x256xf32>
    %559 = math.floor %558 : vector<2x256xf32>
    %560 = arith.subf %558, %559 : vector<2x256xf32>
    %561 = arith.fptosi %559 : vector<2x256xf32> to vector<2x256xi32>
    %c1_i32_107 = arith.constant 1 : i32
    %562 = vector.broadcast %c1_i32_107 : i32 to vector<2x256xi32>
    %563 = arith.addi %561, %562 : vector<2x256xi32>
    %564 = vector.broadcast %22 : vector<2x1xi32> to vector<2x256xi32>
    %565 = arith.minsi %563, %564 : vector<2x256xi32>
    %566 = vector.extract_strided_slice %561 {offsets = [0, 0], sizes = [1, 256], strides = [1, 1]} : vector<2x256xi32> to vector<1x256xi32>
    %567 = vector.extract_strided_slice %565 {offsets = [0, 0], sizes = [1, 256], strides = [1, 1]} : vector<2x256xi32> to vector<1x256xi32>
    %568 = vector.extract_strided_slice %560 {offsets = [0, 0], sizes = [1, 256], strides = [1, 1]} : vector<2x256xf32> to vector<1x256xf32>
    %569 = vector.extract_strided_slice %561 {offsets = [1, 0], sizes = [1, 256], strides = [1, 1]} : vector<2x256xi32> to vector<1x256xi32>
    %570 = vector.extract_strided_slice %565 {offsets = [1, 0], sizes = [1, 256], strides = [1, 1]} : vector<2x256xi32> to vector<1x256xi32>
    %571 = vector.extract_strided_slice %560 {offsets = [1, 0], sizes = [1, 256], strides = [1, 1]} : vector<2x256xf32> to vector<1x256xf32>
    %572 = vector.broadcast %566 : vector<1x256xi32> to vector<16x256xi32>
    %573 = arith.cmpi eq, %24, %572 : vector<16x256xi32>
    %cst_108 = arith.constant 1.000000e+00 : f32
    %574 = vector.broadcast %cst_108 : f32 to vector<1x256xf32>
    %575 = arith.subf %574, %568 : vector<1x256xf32>
    %cst_109 = arith.constant 0.000000e+00 : f32
    %576 = vector.shape_cast %575 : vector<1x256xf32> to vector<1x256xf32>
    %577 = vector.broadcast %576 : vector<1x256xf32> to vector<16x256xf32>
    %578 = vector.broadcast %cst_109 : f32 to vector<16x256xf32>
    %579 = arith.select %573, %577, %578 : vector<16x256xi1>, vector<16x256xf32>
    %580 = vector.broadcast %567 : vector<1x256xi32> to vector<16x256xi32>
    %581 = arith.cmpi eq, %24, %580 : vector<16x256xi32>
    %cst_110 = arith.constant 0.000000e+00 : f32
    %582 = vector.shape_cast %568 : vector<1x256xf32> to vector<1x256xf32>
    %583 = vector.broadcast %582 : vector<1x256xf32> to vector<16x256xf32>
    %584 = vector.broadcast %cst_110 : f32 to vector<16x256xf32>
    %585 = arith.select %581, %583, %584 : vector<16x256xi1>, vector<16x256xf32>
    %586 = arith.addf %579, %585 : vector<16x256xf32>
    %587 = vector.broadcast %569 : vector<1x256xi32> to vector<16x256xi32>
    %588 = arith.cmpi eq, %23, %587 : vector<16x256xi32>
    %cst_111 = arith.constant 1.000000e+00 : f32
    %589 = vector.broadcast %cst_111 : f32 to vector<1x256xf32>
    %590 = arith.subf %589, %571 : vector<1x256xf32>
    %cst_112 = arith.constant 0.000000e+00 : f32
    %591 = vector.shape_cast %590 : vector<1x256xf32> to vector<1x256xf32>
    %592 = vector.broadcast %591 : vector<1x256xf32> to vector<16x256xf32>
    %593 = vector.broadcast %cst_112 : f32 to vector<16x256xf32>
    %594 = arith.select %588, %592, %593 : vector<16x256xi1>, vector<16x256xf32>
    %595 = vector.broadcast %570 : vector<1x256xi32> to vector<16x256xi32>
    %596 = arith.cmpi eq, %23, %595 : vector<16x256xi32>
    %cst_113 = arith.constant 0.000000e+00 : f32
    %597 = vector.shape_cast %571 : vector<1x256xf32> to vector<1x256xf32>
    %598 = vector.broadcast %597 : vector<1x256xf32> to vector<16x256xf32>
    %599 = vector.broadcast %cst_113 : f32 to vector<16x256xf32>
    %600 = arith.select %596, %598, %599 : vector<16x256xi1>, vector<16x256xf32>
    %601 = arith.addf %594, %600 : vector<16x256xf32>
    %602 = vector.extract_strided_slice %551 {offsets = [0, 0], sizes = [1, 256], strides = [1, 1]} : vector<2x256xf32> to vector<1x256xf32>
    %603 = vector.shape_cast %602 : vector<1x256xf32> to vector<1x256xf32>
    %604 = vector.broadcast %603 : vector<1x256xf32> to vector<16x256xf32>
    %605 = vector.extract_strided_slice %551 {offsets = [1, 0], sizes = [1, 256], strides = [1, 1]} : vector<2x256xf32> to vector<1x256xf32>
    %606 = vector.shape_cast %605 : vector<1x256xf32> to vector<1x256xf32>
    %607 = vector.broadcast %606 : vector<1x256xf32> to vector<16x256xf32>
    %608 = tpu.concatenate %604, %607 in 0 : vector<16x256xf32>, vector<16x256xf32> -> vector<32x256xf32>
    %609 = arith.mulf %608, %31 : vector<32x256xf32>
    %cst_114 = arith.constant dense<0.000000e+00> : vector<32x16xf32>
    %610 = tpu.matmul %609, %47, %cst_114 {dimension_numbers = #tpu.dot_dimension_numbers<[1], [0], [0], [1], [0, 0, 1, 1], [], []>} : vector<32x256xf32>, vector<256x16xf32>, vector<32x16xf32> -> vector<32x16xf32>
    %cst_115 = arith.constant dense<0.000000e+00> : vector<32x256xf32>
    %611 = tpu.matmul %610, %586, %cst_115 {dimension_numbers = #tpu.dot_dimension_numbers<[1], [0], [0], [1], [0, 0, 1, 1], [], []>} : vector<32x16xf32>, vector<16x256xf32>, vector<32x256xf32> -> vector<32x256xf32>
    %612 = vector.extract_strided_slice %611 {offsets = [0, 0], sizes = [16, 256], strides = [1, 1]} : vector<32x256xf32> to vector<16x256xf32>
    %613 = arith.mulf %612, %601 : vector<16x256xf32>
    %cst_116 = arith.constant dense<0.000000e+00> : vector<256xf32>
    %614 = vector.multi_reduction <add>, %613, %cst_116 [0] : vector<16x256xf32> to vector<256xf32>
    %615 = vector.shape_cast %614 : vector<256xf32> to vector<1x256xf32>
    %616 = vector.extract_strided_slice %611 {offsets = [16, 0], sizes = [16, 256], strides = [1, 1]} : vector<32x256xf32> to vector<16x256xf32>
    %617 = arith.mulf %616, %601 : vector<16x256xf32>
    %cst_117 = arith.constant dense<0.000000e+00> : vector<256xf32>
    %618 = vector.multi_reduction <add>, %617, %cst_117 [0] : vector<16x256xf32> to vector<256xf32>
    %619 = vector.shape_cast %618 : vector<256xf32> to vector<1x256xf32>
    %620 = tpu.concatenate %615, %619 in 0 : vector<1x256xf32>, vector<1x256xf32> -> vector<2x256xf32>
    %621 = arith.addf %551, %620 : vector<2x256xf32>
    %622 = arith.addf %10, %621 : vector<2x256xf32>
    %623 = vector.broadcast %16 : vector<2x1xf32> to vector<2x256xf32>
    %624 = arith.mulf %622, %623 : vector<2x256xf32>
    %cst_118 = arith.constant 0.000000e+00 : f32
    %625 = vector.broadcast %cst_118 : f32 to vector<2x256xf32>
    %626 = arith.maximumf %625, %624 : vector<2x256xf32>
    %627 = vector.broadcast %21 : vector<2x1xf32> to vector<2x256xf32>
    %628 = arith.minimumf %627, %626 : vector<2x256xf32>
    %629 = math.floor %628 : vector<2x256xf32>
    %630 = arith.subf %628, %629 : vector<2x256xf32>
    %631 = arith.fptosi %629 : vector<2x256xf32> to vector<2x256xi32>
    %c1_i32_119 = arith.constant 1 : i32
    %632 = vector.broadcast %c1_i32_119 : i32 to vector<2x256xi32>
    %633 = arith.addi %631, %632 : vector<2x256xi32>
    %634 = vector.broadcast %22 : vector<2x1xi32> to vector<2x256xi32>
    %635 = arith.minsi %633, %634 : vector<2x256xi32>
    %636 = vector.extract_strided_slice %631 {offsets = [0, 0], sizes = [1, 256], strides = [1, 1]} : vector<2x256xi32> to vector<1x256xi32>
    %637 = vector.extract_strided_slice %635 {offsets = [0, 0], sizes = [1, 256], strides = [1, 1]} : vector<2x256xi32> to vector<1x256xi32>
    %638 = vector.extract_strided_slice %630 {offsets = [0, 0], sizes = [1, 256], strides = [1, 1]} : vector<2x256xf32> to vector<1x256xf32>
    %639 = vector.extract_strided_slice %631 {offsets = [1, 0], sizes = [1, 256], strides = [1, 1]} : vector<2x256xi32> to vector<1x256xi32>
    %640 = vector.extract_strided_slice %635 {offsets = [1, 0], sizes = [1, 256], strides = [1, 1]} : vector<2x256xi32> to vector<1x256xi32>
    %641 = vector.extract_strided_slice %630 {offsets = [1, 0], sizes = [1, 256], strides = [1, 1]} : vector<2x256xf32> to vector<1x256xf32>
    %642 = vector.broadcast %636 : vector<1x256xi32> to vector<16x256xi32>
    %643 = arith.cmpi eq, %24, %642 : vector<16x256xi32>
    %cst_120 = arith.constant 1.000000e+00 : f32
    %644 = vector.broadcast %cst_120 : f32 to vector<1x256xf32>
    %645 = arith.subf %644, %638 : vector<1x256xf32>
    %cst_121 = arith.constant 0.000000e+00 : f32
    %646 = vector.shape_cast %645 : vector<1x256xf32> to vector<1x256xf32>
    %647 = vector.broadcast %646 : vector<1x256xf32> to vector<16x256xf32>
    %648 = vector.broadcast %cst_121 : f32 to vector<16x256xf32>
    %649 = arith.select %643, %647, %648 : vector<16x256xi1>, vector<16x256xf32>
    %650 = vector.broadcast %637 : vector<1x256xi32> to vector<16x256xi32>
    %651 = arith.cmpi eq, %24, %650 : vector<16x256xi32>
    %cst_122 = arith.constant 0.000000e+00 : f32
    %652 = vector.shape_cast %638 : vector<1x256xf32> to vector<1x256xf32>
    %653 = vector.broadcast %652 : vector<1x256xf32> to vector<16x256xf32>
    %654 = vector.broadcast %cst_122 : f32 to vector<16x256xf32>
    %655 = arith.select %651, %653, %654 : vector<16x256xi1>, vector<16x256xf32>
    %656 = arith.addf %649, %655 : vector<16x256xf32>
    %657 = vector.broadcast %639 : vector<1x256xi32> to vector<16x256xi32>
    %658 = arith.cmpi eq, %23, %657 : vector<16x256xi32>
    %cst_123 = arith.constant 1.000000e+00 : f32
    %659 = vector.broadcast %cst_123 : f32 to vector<1x256xf32>
    %660 = arith.subf %659, %641 : vector<1x256xf32>
    %cst_124 = arith.constant 0.000000e+00 : f32
    %661 = vector.shape_cast %660 : vector<1x256xf32> to vector<1x256xf32>
    %662 = vector.broadcast %661 : vector<1x256xf32> to vector<16x256xf32>
    %663 = vector.broadcast %cst_124 : f32 to vector<16x256xf32>
    %664 = arith.select %658, %662, %663 : vector<16x256xi1>, vector<16x256xf32>
    %665 = vector.broadcast %640 : vector<1x256xi32> to vector<16x256xi32>
    %666 = arith.cmpi eq, %23, %665 : vector<16x256xi32>
    %cst_125 = arith.constant 0.000000e+00 : f32
    %667 = vector.shape_cast %641 : vector<1x256xf32> to vector<1x256xf32>
    %668 = vector.broadcast %667 : vector<1x256xf32> to vector<16x256xf32>
    %669 = vector.broadcast %cst_125 : f32 to vector<16x256xf32>
    %670 = arith.select %666, %668, %669 : vector<16x256xi1>, vector<16x256xf32>
    %671 = arith.addf %664, %670 : vector<16x256xf32>
    %672 = vector.extract_strided_slice %621 {offsets = [0, 0], sizes = [1, 256], strides = [1, 1]} : vector<2x256xf32> to vector<1x256xf32>
    %673 = vector.shape_cast %672 : vector<1x256xf32> to vector<1x256xf32>
    %674 = vector.broadcast %673 : vector<1x256xf32> to vector<16x256xf32>
    %675 = vector.extract_strided_slice %621 {offsets = [1, 0], sizes = [1, 256], strides = [1, 1]} : vector<2x256xf32> to vector<1x256xf32>
    %676 = vector.shape_cast %675 : vector<1x256xf32> to vector<1x256xf32>
    %677 = vector.broadcast %676 : vector<1x256xf32> to vector<16x256xf32>
    %678 = tpu.concatenate %674, %677 in 0 : vector<16x256xf32>, vector<16x256xf32> -> vector<32x256xf32>
    %679 = arith.mulf %678, %31 : vector<32x256xf32>
    %cst_126 = arith.constant dense<0.000000e+00> : vector<32x16xf32>
    %680 = tpu.matmul %679, %47, %cst_126 {dimension_numbers = #tpu.dot_dimension_numbers<[1], [0], [0], [1], [0, 0, 1, 1], [], []>} : vector<32x256xf32>, vector<256x16xf32>, vector<32x16xf32> -> vector<32x16xf32>
    %cst_127 = arith.constant dense<0.000000e+00> : vector<32x256xf32>
    %681 = tpu.matmul %680, %656, %cst_127 {dimension_numbers = #tpu.dot_dimension_numbers<[1], [0], [0], [1], [0, 0, 1, 1], [], []>} : vector<32x16xf32>, vector<16x256xf32>, vector<32x256xf32> -> vector<32x256xf32>
    %682 = vector.extract_strided_slice %681 {offsets = [0, 0], sizes = [16, 256], strides = [1, 1]} : vector<32x256xf32> to vector<16x256xf32>
    %683 = arith.mulf %682, %671 : vector<16x256xf32>
    %cst_128 = arith.constant dense<0.000000e+00> : vector<256xf32>
    %684 = vector.multi_reduction <add>, %683, %cst_128 [0] : vector<16x256xf32> to vector<256xf32>
    %685 = vector.shape_cast %684 : vector<256xf32> to vector<1x256xf32>
    %686 = vector.extract_strided_slice %681 {offsets = [16, 0], sizes = [16, 256], strides = [1, 1]} : vector<32x256xf32> to vector<16x256xf32>
    %687 = arith.mulf %686, %671 : vector<16x256xf32>
    %cst_129 = arith.constant dense<0.000000e+00> : vector<256xf32>
    %688 = vector.multi_reduction <add>, %687, %cst_129 [0] : vector<16x256xf32> to vector<256xf32>
    %689 = vector.shape_cast %688 : vector<256xf32> to vector<1x256xf32>
    %690 = tpu.concatenate %685, %689 in 0 : vector<1x256xf32>, vector<1x256xf32> -> vector<2x256xf32>
    %691 = arith.addf %621, %690 : vector<2x256xf32>
    %692 = arith.addf %10, %691 : vector<2x256xf32>
    %693 = vector.broadcast %16 : vector<2x1xf32> to vector<2x256xf32>
    %694 = arith.mulf %692, %693 : vector<2x256xf32>
    %cst_130 = arith.constant 0.000000e+00 : f32
    %695 = vector.broadcast %cst_130 : f32 to vector<2x256xf32>
    %696 = arith.maximumf %695, %694 : vector<2x256xf32>
    %697 = vector.broadcast %21 : vector<2x1xf32> to vector<2x256xf32>
    %698 = arith.minimumf %697, %696 : vector<2x256xf32>
    %699 = math.floor %698 : vector<2x256xf32>
    %700 = arith.subf %698, %699 : vector<2x256xf32>
    %701 = arith.fptosi %699 : vector<2x256xf32> to vector<2x256xi32>
    %c1_i32_131 = arith.constant 1 : i32
    %702 = vector.broadcast %c1_i32_131 : i32 to vector<2x256xi32>
    %703 = arith.addi %701, %702 : vector<2x256xi32>
    %704 = vector.broadcast %22 : vector<2x1xi32> to vector<2x256xi32>
    %705 = arith.minsi %703, %704 : vector<2x256xi32>
    %706 = vector.extract_strided_slice %701 {offsets = [0, 0], sizes = [1, 256], strides = [1, 1]} : vector<2x256xi32> to vector<1x256xi32>
    %707 = vector.extract_strided_slice %705 {offsets = [0, 0], sizes = [1, 256], strides = [1, 1]} : vector<2x256xi32> to vector<1x256xi32>
    %708 = vector.extract_strided_slice %700 {offsets = [0, 0], sizes = [1, 256], strides = [1, 1]} : vector<2x256xf32> to vector<1x256xf32>
    %709 = vector.extract_strided_slice %701 {offsets = [1, 0], sizes = [1, 256], strides = [1, 1]} : vector<2x256xi32> to vector<1x256xi32>
    %710 = vector.extract_strided_slice %705 {offsets = [1, 0], sizes = [1, 256], strides = [1, 1]} : vector<2x256xi32> to vector<1x256xi32>
    %711 = vector.extract_strided_slice %700 {offsets = [1, 0], sizes = [1, 256], strides = [1, 1]} : vector<2x256xf32> to vector<1x256xf32>
    %712 = vector.broadcast %706 : vector<1x256xi32> to vector<16x256xi32>
    %713 = arith.cmpi eq, %24, %712 : vector<16x256xi32>
    %cst_132 = arith.constant 1.000000e+00 : f32
    %714 = vector.broadcast %cst_132 : f32 to vector<1x256xf32>
    %715 = arith.subf %714, %708 : vector<1x256xf32>
    %cst_133 = arith.constant 0.000000e+00 : f32
    %716 = vector.shape_cast %715 : vector<1x256xf32> to vector<1x256xf32>
    %717 = vector.broadcast %716 : vector<1x256xf32> to vector<16x256xf32>
    %718 = vector.broadcast %cst_133 : f32 to vector<16x256xf32>
    %719 = arith.select %713, %717, %718 : vector<16x256xi1>, vector<16x256xf32>
    %720 = vector.broadcast %707 : vector<1x256xi32> to vector<16x256xi32>
    %721 = arith.cmpi eq, %24, %720 : vector<16x256xi32>
    %cst_134 = arith.constant 0.000000e+00 : f32
    %722 = vector.shape_cast %708 : vector<1x256xf32> to vector<1x256xf32>
    %723 = vector.broadcast %722 : vector<1x256xf32> to vector<16x256xf32>
    %724 = vector.broadcast %cst_134 : f32 to vector<16x256xf32>
    %725 = arith.select %721, %723, %724 : vector<16x256xi1>, vector<16x256xf32>
    %726 = arith.addf %719, %725 : vector<16x256xf32>
    %727 = vector.broadcast %709 : vector<1x256xi32> to vector<16x256xi32>
    %728 = arith.cmpi eq, %23, %727 : vector<16x256xi32>
    %cst_135 = arith.constant 1.000000e+00 : f32
    %729 = vector.broadcast %cst_135 : f32 to vector<1x256xf32>
    %730 = arith.subf %729, %711 : vector<1x256xf32>
    %cst_136 = arith.constant 0.000000e+00 : f32
    %731 = vector.shape_cast %730 : vector<1x256xf32> to vector<1x256xf32>
    %732 = vector.broadcast %731 : vector<1x256xf32> to vector<16x256xf32>
    %733 = vector.broadcast %cst_136 : f32 to vector<16x256xf32>
    %734 = arith.select %728, %732, %733 : vector<16x256xi1>, vector<16x256xf32>
    %735 = vector.broadcast %710 : vector<1x256xi32> to vector<16x256xi32>
    %736 = arith.cmpi eq, %23, %735 : vector<16x256xi32>
    %cst_137 = arith.constant 0.000000e+00 : f32
    %737 = vector.shape_cast %711 : vector<1x256xf32> to vector<1x256xf32>
    %738 = vector.broadcast %737 : vector<1x256xf32> to vector<16x256xf32>
    %739 = vector.broadcast %cst_137 : f32 to vector<16x256xf32>
    %740 = arith.select %736, %738, %739 : vector<16x256xi1>, vector<16x256xf32>
    %741 = arith.addf %734, %740 : vector<16x256xf32>
    %742 = vector.extract_strided_slice %691 {offsets = [0, 0], sizes = [1, 256], strides = [1, 1]} : vector<2x256xf32> to vector<1x256xf32>
    %743 = vector.shape_cast %742 : vector<1x256xf32> to vector<1x256xf32>
    %744 = vector.broadcast %743 : vector<1x256xf32> to vector<16x256xf32>
    %745 = vector.extract_strided_slice %691 {offsets = [1, 0], sizes = [1, 256], strides = [1, 1]} : vector<2x256xf32> to vector<1x256xf32>
    %746 = vector.shape_cast %745 : vector<1x256xf32> to vector<1x256xf32>
    %747 = vector.broadcast %746 : vector<1x256xf32> to vector<16x256xf32>
    %748 = tpu.concatenate %744, %747 in 0 : vector<16x256xf32>, vector<16x256xf32> -> vector<32x256xf32>
    %749 = arith.mulf %748, %31 : vector<32x256xf32>
    %cst_138 = arith.constant dense<0.000000e+00> : vector<32x16xf32>
    %750 = tpu.matmul %749, %47, %cst_138 {dimension_numbers = #tpu.dot_dimension_numbers<[1], [0], [0], [1], [0, 0, 1, 1], [], []>} : vector<32x256xf32>, vector<256x16xf32>, vector<32x16xf32> -> vector<32x16xf32>
    %cst_139 = arith.constant dense<0.000000e+00> : vector<32x256xf32>
    %751 = tpu.matmul %750, %726, %cst_139 {dimension_numbers = #tpu.dot_dimension_numbers<[1], [0], [0], [1], [0, 0, 1, 1], [], []>} : vector<32x16xf32>, vector<16x256xf32>, vector<32x256xf32> -> vector<32x256xf32>
    %752 = vector.extract_strided_slice %751 {offsets = [0, 0], sizes = [16, 256], strides = [1, 1]} : vector<32x256xf32> to vector<16x256xf32>
    %753 = arith.mulf %752, %741 : vector<16x256xf32>
    %cst_140 = arith.constant dense<0.000000e+00> : vector<256xf32>
    %754 = vector.multi_reduction <add>, %753, %cst_140 [0] : vector<16x256xf32> to vector<256xf32>
    %755 = vector.shape_cast %754 : vector<256xf32> to vector<1x256xf32>
    %756 = vector.extract_strided_slice %751 {offsets = [16, 0], sizes = [16, 256], strides = [1, 1]} : vector<32x256xf32> to vector<16x256xf32>
    %757 = arith.mulf %756, %741 : vector<16x256xf32>
    %cst_141 = arith.constant dense<0.000000e+00> : vector<256xf32>
    %758 = vector.multi_reduction <add>, %757, %cst_141 [0] : vector<16x256xf32> to vector<256xf32>
    %759 = vector.shape_cast %758 : vector<256xf32> to vector<1x256xf32>
    %760 = tpu.concatenate %755, %759 in 0 : vector<1x256xf32>, vector<1x256xf32> -> vector<2x256xf32>
    %761 = arith.addf %691, %760 : vector<2x256xf32>
    %762 = arith.addf %10, %761 : vector<2x256xf32>
    %763 = vector.broadcast %16 : vector<2x1xf32> to vector<2x256xf32>
    %764 = arith.mulf %762, %763 : vector<2x256xf32>
    %cst_142 = arith.constant 0.000000e+00 : f32
    %765 = vector.broadcast %cst_142 : f32 to vector<2x256xf32>
    %766 = arith.maximumf %765, %764 : vector<2x256xf32>
    %767 = vector.broadcast %21 : vector<2x1xf32> to vector<2x256xf32>
    %768 = arith.minimumf %767, %766 : vector<2x256xf32>
    %769 = math.floor %768 : vector<2x256xf32>
    %770 = arith.subf %768, %769 : vector<2x256xf32>
    %771 = arith.fptosi %769 : vector<2x256xf32> to vector<2x256xi32>
    %c1_i32_143 = arith.constant 1 : i32
    %772 = vector.broadcast %c1_i32_143 : i32 to vector<2x256xi32>
    %773 = arith.addi %771, %772 : vector<2x256xi32>
    %774 = vector.broadcast %22 : vector<2x1xi32> to vector<2x256xi32>
    %775 = arith.minsi %773, %774 : vector<2x256xi32>
    %776 = vector.extract_strided_slice %771 {offsets = [0, 0], sizes = [1, 256], strides = [1, 1]} : vector<2x256xi32> to vector<1x256xi32>
    %777 = vector.extract_strided_slice %775 {offsets = [0, 0], sizes = [1, 256], strides = [1, 1]} : vector<2x256xi32> to vector<1x256xi32>
    %778 = vector.extract_strided_slice %770 {offsets = [0, 0], sizes = [1, 256], strides = [1, 1]} : vector<2x256xf32> to vector<1x256xf32>
    %779 = vector.extract_strided_slice %771 {offsets = [1, 0], sizes = [1, 256], strides = [1, 1]} : vector<2x256xi32> to vector<1x256xi32>
    %780 = vector.extract_strided_slice %775 {offsets = [1, 0], sizes = [1, 256], strides = [1, 1]} : vector<2x256xi32> to vector<1x256xi32>
    %781 = vector.extract_strided_slice %770 {offsets = [1, 0], sizes = [1, 256], strides = [1, 1]} : vector<2x256xf32> to vector<1x256xf32>
    %782 = vector.broadcast %776 : vector<1x256xi32> to vector<16x256xi32>
    %783 = arith.cmpi eq, %24, %782 : vector<16x256xi32>
    %cst_144 = arith.constant 1.000000e+00 : f32
    %784 = vector.broadcast %cst_144 : f32 to vector<1x256xf32>
    %785 = arith.subf %784, %778 : vector<1x256xf32>
    %cst_145 = arith.constant 0.000000e+00 : f32
    %786 = vector.shape_cast %785 : vector<1x256xf32> to vector<1x256xf32>
    %787 = vector.broadcast %786 : vector<1x256xf32> to vector<16x256xf32>
    %788 = vector.broadcast %cst_145 : f32 to vector<16x256xf32>
    %789 = arith.select %783, %787, %788 : vector<16x256xi1>, vector<16x256xf32>
    %790 = vector.broadcast %777 : vector<1x256xi32> to vector<16x256xi32>
    %791 = arith.cmpi eq, %24, %790 : vector<16x256xi32>
    %cst_146 = arith.constant 0.000000e+00 : f32
    %792 = vector.shape_cast %778 : vector<1x256xf32> to vector<1x256xf32>
    %793 = vector.broadcast %792 : vector<1x256xf32> to vector<16x256xf32>
    %794 = vector.broadcast %cst_146 : f32 to vector<16x256xf32>
    %795 = arith.select %791, %793, %794 : vector<16x256xi1>, vector<16x256xf32>
    %796 = arith.addf %789, %795 : vector<16x256xf32>
    %797 = vector.broadcast %779 : vector<1x256xi32> to vector<16x256xi32>
    %798 = arith.cmpi eq, %23, %797 : vector<16x256xi32>
    %cst_147 = arith.constant 1.000000e+00 : f32
    %799 = vector.broadcast %cst_147 : f32 to vector<1x256xf32>
    %800 = arith.subf %799, %781 : vector<1x256xf32>
    %cst_148 = arith.constant 0.000000e+00 : f32
    %801 = vector.shape_cast %800 : vector<1x256xf32> to vector<1x256xf32>
    %802 = vector.broadcast %801 : vector<1x256xf32> to vector<16x256xf32>
    %803 = vector.broadcast %cst_148 : f32 to vector<16x256xf32>
    %804 = arith.select %798, %802, %803 : vector<16x256xi1>, vector<16x256xf32>
    %805 = vector.broadcast %780 : vector<1x256xi32> to vector<16x256xi32>
    %806 = arith.cmpi eq, %23, %805 : vector<16x256xi32>
    %cst_149 = arith.constant 0.000000e+00 : f32
    %807 = vector.shape_cast %781 : vector<1x256xf32> to vector<1x256xf32>
    %808 = vector.broadcast %807 : vector<1x256xf32> to vector<16x256xf32>
    %809 = vector.broadcast %cst_149 : f32 to vector<16x256xf32>
    %810 = arith.select %806, %808, %809 : vector<16x256xi1>, vector<16x256xf32>
    %811 = arith.addf %804, %810 : vector<16x256xf32>
    %812 = vector.extract_strided_slice %761 {offsets = [0, 0], sizes = [1, 256], strides = [1, 1]} : vector<2x256xf32> to vector<1x256xf32>
    %813 = vector.shape_cast %812 : vector<1x256xf32> to vector<1x256xf32>
    %814 = vector.broadcast %813 : vector<1x256xf32> to vector<16x256xf32>
    %815 = vector.extract_strided_slice %761 {offsets = [1, 0], sizes = [1, 256], strides = [1, 1]} : vector<2x256xf32> to vector<1x256xf32>
    %816 = vector.shape_cast %815 : vector<1x256xf32> to vector<1x256xf32>
    %817 = vector.broadcast %816 : vector<1x256xf32> to vector<16x256xf32>
    %818 = tpu.concatenate %814, %817 in 0 : vector<16x256xf32>, vector<16x256xf32> -> vector<32x256xf32>
    %819 = arith.mulf %818, %31 : vector<32x256xf32>
    %cst_150 = arith.constant dense<0.000000e+00> : vector<32x16xf32>
    %820 = tpu.matmul %819, %47, %cst_150 {dimension_numbers = #tpu.dot_dimension_numbers<[1], [0], [0], [1], [0, 0, 1, 1], [], []>} : vector<32x256xf32>, vector<256x16xf32>, vector<32x16xf32> -> vector<32x16xf32>
    %cst_151 = arith.constant dense<0.000000e+00> : vector<32x256xf32>
    %821 = tpu.matmul %820, %796, %cst_151 {dimension_numbers = #tpu.dot_dimension_numbers<[1], [0], [0], [1], [0, 0, 1, 1], [], []>} : vector<32x16xf32>, vector<16x256xf32>, vector<32x256xf32> -> vector<32x256xf32>
    %822 = vector.extract_strided_slice %821 {offsets = [0, 0], sizes = [16, 256], strides = [1, 1]} : vector<32x256xf32> to vector<16x256xf32>
    %823 = arith.mulf %822, %811 : vector<16x256xf32>
    %cst_152 = arith.constant dense<0.000000e+00> : vector<256xf32>
    %824 = vector.multi_reduction <add>, %823, %cst_152 [0] : vector<16x256xf32> to vector<256xf32>
    %825 = vector.shape_cast %824 : vector<256xf32> to vector<1x256xf32>
    %826 = vector.extract_strided_slice %821 {offsets = [16, 0], sizes = [16, 256], strides = [1, 1]} : vector<32x256xf32> to vector<16x256xf32>
    %827 = arith.mulf %826, %811 : vector<16x256xf32>
    %cst_153 = arith.constant dense<0.000000e+00> : vector<256xf32>
    %828 = vector.multi_reduction <add>, %827, %cst_153 [0] : vector<16x256xf32> to vector<256xf32>
    %829 = vector.shape_cast %828 : vector<256xf32> to vector<1x256xf32>
    %830 = tpu.concatenate %825, %829 in 0 : vector<1x256xf32>, vector<1x256xf32> -> vector<2x256xf32>
    %831 = arith.addf %761, %830 : vector<2x256xf32>
    %832 = arith.addf %10, %831 : vector<2x256xf32>
    %833 = vector.broadcast %16 : vector<2x1xf32> to vector<2x256xf32>
    %834 = arith.mulf %832, %833 : vector<2x256xf32>
    %cst_154 = arith.constant 0.000000e+00 : f32
    %835 = vector.broadcast %cst_154 : f32 to vector<2x256xf32>
    %836 = arith.maximumf %835, %834 : vector<2x256xf32>
    %837 = vector.broadcast %21 : vector<2x1xf32> to vector<2x256xf32>
    %838 = arith.minimumf %837, %836 : vector<2x256xf32>
    %839 = math.floor %838 : vector<2x256xf32>
    %840 = arith.subf %838, %839 : vector<2x256xf32>
    %841 = arith.fptosi %839 : vector<2x256xf32> to vector<2x256xi32>
    %c1_i32_155 = arith.constant 1 : i32
    %842 = vector.broadcast %c1_i32_155 : i32 to vector<2x256xi32>
    %843 = arith.addi %841, %842 : vector<2x256xi32>
    %844 = vector.broadcast %22 : vector<2x1xi32> to vector<2x256xi32>
    %845 = arith.minsi %843, %844 : vector<2x256xi32>
    %846 = vector.extract_strided_slice %841 {offsets = [0, 0], sizes = [1, 256], strides = [1, 1]} : vector<2x256xi32> to vector<1x256xi32>
    %847 = vector.extract_strided_slice %845 {offsets = [0, 0], sizes = [1, 256], strides = [1, 1]} : vector<2x256xi32> to vector<1x256xi32>
    %848 = vector.extract_strided_slice %840 {offsets = [0, 0], sizes = [1, 256], strides = [1, 1]} : vector<2x256xf32> to vector<1x256xf32>
    %849 = vector.extract_strided_slice %841 {offsets = [1, 0], sizes = [1, 256], strides = [1, 1]} : vector<2x256xi32> to vector<1x256xi32>
    %850 = vector.extract_strided_slice %845 {offsets = [1, 0], sizes = [1, 256], strides = [1, 1]} : vector<2x256xi32> to vector<1x256xi32>
    %851 = vector.extract_strided_slice %840 {offsets = [1, 0], sizes = [1, 256], strides = [1, 1]} : vector<2x256xf32> to vector<1x256xf32>
    %852 = vector.broadcast %846 : vector<1x256xi32> to vector<16x256xi32>
    %853 = arith.cmpi eq, %24, %852 : vector<16x256xi32>
    %cst_156 = arith.constant 1.000000e+00 : f32
    %854 = vector.broadcast %cst_156 : f32 to vector<1x256xf32>
    %855 = arith.subf %854, %848 : vector<1x256xf32>
    %cst_157 = arith.constant 0.000000e+00 : f32
    %856 = vector.shape_cast %855 : vector<1x256xf32> to vector<1x256xf32>
    %857 = vector.broadcast %856 : vector<1x256xf32> to vector<16x256xf32>
    %858 = vector.broadcast %cst_157 : f32 to vector<16x256xf32>
    %859 = arith.select %853, %857, %858 : vector<16x256xi1>, vector<16x256xf32>
    %860 = vector.broadcast %847 : vector<1x256xi32> to vector<16x256xi32>
    %861 = arith.cmpi eq, %24, %860 : vector<16x256xi32>
    %cst_158 = arith.constant 0.000000e+00 : f32
    %862 = vector.shape_cast %848 : vector<1x256xf32> to vector<1x256xf32>
    %863 = vector.broadcast %862 : vector<1x256xf32> to vector<16x256xf32>
    %864 = vector.broadcast %cst_158 : f32 to vector<16x256xf32>
    %865 = arith.select %861, %863, %864 : vector<16x256xi1>, vector<16x256xf32>
    %866 = arith.addf %859, %865 : vector<16x256xf32>
    %867 = vector.broadcast %849 : vector<1x256xi32> to vector<16x256xi32>
    %868 = arith.cmpi eq, %23, %867 : vector<16x256xi32>
    %cst_159 = arith.constant 1.000000e+00 : f32
    %869 = vector.broadcast %cst_159 : f32 to vector<1x256xf32>
    %870 = arith.subf %869, %851 : vector<1x256xf32>
    %cst_160 = arith.constant 0.000000e+00 : f32
    %871 = vector.shape_cast %870 : vector<1x256xf32> to vector<1x256xf32>
    %872 = vector.broadcast %871 : vector<1x256xf32> to vector<16x256xf32>
    %873 = vector.broadcast %cst_160 : f32 to vector<16x256xf32>
    %874 = arith.select %868, %872, %873 : vector<16x256xi1>, vector<16x256xf32>
    %875 = vector.broadcast %850 : vector<1x256xi32> to vector<16x256xi32>
    %876 = arith.cmpi eq, %23, %875 : vector<16x256xi32>
    %cst_161 = arith.constant 0.000000e+00 : f32
    %877 = vector.shape_cast %851 : vector<1x256xf32> to vector<1x256xf32>
    %878 = vector.broadcast %877 : vector<1x256xf32> to vector<16x256xf32>
    %879 = vector.broadcast %cst_161 : f32 to vector<16x256xf32>
    %880 = arith.select %876, %878, %879 : vector<16x256xi1>, vector<16x256xf32>
    %881 = arith.addf %874, %880 : vector<16x256xf32>
    %882 = vector.extract_strided_slice %831 {offsets = [0, 0], sizes = [1, 256], strides = [1, 1]} : vector<2x256xf32> to vector<1x256xf32>
    %883 = vector.shape_cast %882 : vector<1x256xf32> to vector<1x256xf32>
    %884 = vector.broadcast %883 : vector<1x256xf32> to vector<16x256xf32>
    %885 = vector.extract_strided_slice %831 {offsets = [1, 0], sizes = [1, 256], strides = [1, 1]} : vector<2x256xf32> to vector<1x256xf32>
    %886 = vector.shape_cast %885 : vector<1x256xf32> to vector<1x256xf32>
    %887 = vector.broadcast %886 : vector<1x256xf32> to vector<16x256xf32>
    %888 = tpu.concatenate %884, %887 in 0 : vector<16x256xf32>, vector<16x256xf32> -> vector<32x256xf32>
    %889 = arith.mulf %888, %31 : vector<32x256xf32>
    %cst_162 = arith.constant dense<0.000000e+00> : vector<32x16xf32>
    %890 = tpu.matmul %889, %47, %cst_162 {dimension_numbers = #tpu.dot_dimension_numbers<[1], [0], [0], [1], [0, 0, 1, 1], [], []>} : vector<32x256xf32>, vector<256x16xf32>, vector<32x16xf32> -> vector<32x16xf32>
    %cst_163 = arith.constant dense<0.000000e+00> : vector<32x256xf32>
    %891 = tpu.matmul %890, %866, %cst_163 {dimension_numbers = #tpu.dot_dimension_numbers<[1], [0], [0], [1], [0, 0, 1, 1], [], []>} : vector<32x16xf32>, vector<16x256xf32>, vector<32x256xf32> -> vector<32x256xf32>
    %892 = vector.extract_strided_slice %891 {offsets = [0, 0], sizes = [16, 256], strides = [1, 1]} : vector<32x256xf32> to vector<16x256xf32>
    %893 = arith.mulf %892, %881 : vector<16x256xf32>
    %cst_164 = arith.constant dense<0.000000e+00> : vector<256xf32>
    %894 = vector.multi_reduction <add>, %893, %cst_164 [0] : vector<16x256xf32> to vector<256xf32>
    %895 = vector.shape_cast %894 : vector<256xf32> to vector<1x256xf32>
    %896 = vector.extract_strided_slice %891 {offsets = [16, 0], sizes = [16, 256], strides = [1, 1]} : vector<32x256xf32> to vector<16x256xf32>
    %897 = arith.mulf %896, %881 : vector<16x256xf32>
    %cst_165 = arith.constant dense<0.000000e+00> : vector<256xf32>
    %898 = vector.multi_reduction <add>, %897, %cst_165 [0] : vector<16x256xf32> to vector<256xf32>
    %899 = vector.shape_cast %898 : vector<256xf32> to vector<1x256xf32>
    %900 = tpu.concatenate %895, %899 in 0 : vector<1x256xf32>, vector<1x256xf32> -> vector<2x256xf32>
    %901 = arith.addf %831, %900 : vector<2x256xf32>
    %902 = arith.addf %10, %901 : vector<2x256xf32>
    %903 = vector.broadcast %16 : vector<2x1xf32> to vector<2x256xf32>
    %904 = arith.mulf %902, %903 : vector<2x256xf32>
    %cst_166 = arith.constant 0.000000e+00 : f32
    %905 = vector.broadcast %cst_166 : f32 to vector<2x256xf32>
    %906 = arith.maximumf %905, %904 : vector<2x256xf32>
    %907 = vector.broadcast %21 : vector<2x1xf32> to vector<2x256xf32>
    %908 = arith.minimumf %907, %906 : vector<2x256xf32>
    %909 = math.floor %908 : vector<2x256xf32>
    %910 = arith.subf %908, %909 : vector<2x256xf32>
    %911 = arith.fptosi %909 : vector<2x256xf32> to vector<2x256xi32>
    %c1_i32_167 = arith.constant 1 : i32
    %912 = vector.broadcast %c1_i32_167 : i32 to vector<2x256xi32>
    %913 = arith.addi %911, %912 : vector<2x256xi32>
    %914 = vector.broadcast %22 : vector<2x1xi32> to vector<2x256xi32>
    %915 = arith.minsi %913, %914 : vector<2x256xi32>
    %916 = vector.extract_strided_slice %911 {offsets = [0, 0], sizes = [1, 256], strides = [1, 1]} : vector<2x256xi32> to vector<1x256xi32>
    %917 = vector.extract_strided_slice %915 {offsets = [0, 0], sizes = [1, 256], strides = [1, 1]} : vector<2x256xi32> to vector<1x256xi32>
    %918 = vector.extract_strided_slice %910 {offsets = [0, 0], sizes = [1, 256], strides = [1, 1]} : vector<2x256xf32> to vector<1x256xf32>
    %919 = vector.extract_strided_slice %911 {offsets = [1, 0], sizes = [1, 256], strides = [1, 1]} : vector<2x256xi32> to vector<1x256xi32>
    %920 = vector.extract_strided_slice %915 {offsets = [1, 0], sizes = [1, 256], strides = [1, 1]} : vector<2x256xi32> to vector<1x256xi32>
    %921 = vector.extract_strided_slice %910 {offsets = [1, 0], sizes = [1, 256], strides = [1, 1]} : vector<2x256xf32> to vector<1x256xf32>
    %922 = vector.broadcast %916 : vector<1x256xi32> to vector<16x256xi32>
    %923 = arith.cmpi eq, %24, %922 : vector<16x256xi32>
    %cst_168 = arith.constant 1.000000e+00 : f32
    %924 = vector.broadcast %cst_168 : f32 to vector<1x256xf32>
    %925 = arith.subf %924, %918 : vector<1x256xf32>
    %cst_169 = arith.constant 0.000000e+00 : f32
    %926 = vector.shape_cast %925 : vector<1x256xf32> to vector<1x256xf32>
    %927 = vector.broadcast %926 : vector<1x256xf32> to vector<16x256xf32>
    %928 = vector.broadcast %cst_169 : f32 to vector<16x256xf32>
    %929 = arith.select %923, %927, %928 : vector<16x256xi1>, vector<16x256xf32>
    %930 = vector.broadcast %917 : vector<1x256xi32> to vector<16x256xi32>
    %931 = arith.cmpi eq, %24, %930 : vector<16x256xi32>
    %cst_170 = arith.constant 0.000000e+00 : f32
    %932 = vector.shape_cast %918 : vector<1x256xf32> to vector<1x256xf32>
    %933 = vector.broadcast %932 : vector<1x256xf32> to vector<16x256xf32>
    %934 = vector.broadcast %cst_170 : f32 to vector<16x256xf32>
    %935 = arith.select %931, %933, %934 : vector<16x256xi1>, vector<16x256xf32>
    %936 = arith.addf %929, %935 : vector<16x256xf32>
    %937 = vector.broadcast %919 : vector<1x256xi32> to vector<16x256xi32>
    %938 = arith.cmpi eq, %23, %937 : vector<16x256xi32>
    %cst_171 = arith.constant 1.000000e+00 : f32
    %939 = vector.broadcast %cst_171 : f32 to vector<1x256xf32>
    %940 = arith.subf %939, %921 : vector<1x256xf32>
    %cst_172 = arith.constant 0.000000e+00 : f32
    %941 = vector.shape_cast %940 : vector<1x256xf32> to vector<1x256xf32>
    %942 = vector.broadcast %941 : vector<1x256xf32> to vector<16x256xf32>
    %943 = vector.broadcast %cst_172 : f32 to vector<16x256xf32>
    %944 = arith.select %938, %942, %943 : vector<16x256xi1>, vector<16x256xf32>
    %945 = vector.broadcast %920 : vector<1x256xi32> to vector<16x256xi32>
    %946 = arith.cmpi eq, %23, %945 : vector<16x256xi32>
    %cst_173 = arith.constant 0.000000e+00 : f32
    %947 = vector.shape_cast %921 : vector<1x256xf32> to vector<1x256xf32>
    %948 = vector.broadcast %947 : vector<1x256xf32> to vector<16x256xf32>
    %949 = vector.broadcast %cst_173 : f32 to vector<16x256xf32>
    %950 = arith.select %946, %948, %949 : vector<16x256xi1>, vector<16x256xf32>
    %951 = arith.addf %944, %950 : vector<16x256xf32>
    %952 = vector.extract_strided_slice %901 {offsets = [0, 0], sizes = [1, 256], strides = [1, 1]} : vector<2x256xf32> to vector<1x256xf32>
    %953 = vector.shape_cast %952 : vector<1x256xf32> to vector<1x256xf32>
    %954 = vector.broadcast %953 : vector<1x256xf32> to vector<16x256xf32>
    %955 = vector.extract_strided_slice %901 {offsets = [1, 0], sizes = [1, 256], strides = [1, 1]} : vector<2x256xf32> to vector<1x256xf32>
    %956 = vector.shape_cast %955 : vector<1x256xf32> to vector<1x256xf32>
    %957 = vector.broadcast %956 : vector<1x256xf32> to vector<16x256xf32>
    %958 = tpu.concatenate %954, %957 in 0 : vector<16x256xf32>, vector<16x256xf32> -> vector<32x256xf32>
    %959 = arith.mulf %958, %31 : vector<32x256xf32>
    %cst_174 = arith.constant dense<0.000000e+00> : vector<32x16xf32>
    %960 = tpu.matmul %959, %47, %cst_174 {dimension_numbers = #tpu.dot_dimension_numbers<[1], [0], [0], [1], [0, 0, 1, 1], [], []>} : vector<32x256xf32>, vector<256x16xf32>, vector<32x16xf32> -> vector<32x16xf32>
    %cst_175 = arith.constant dense<0.000000e+00> : vector<32x256xf32>
    %961 = tpu.matmul %960, %936, %cst_175 {dimension_numbers = #tpu.dot_dimension_numbers<[1], [0], [0], [1], [0, 0, 1, 1], [], []>} : vector<32x16xf32>, vector<16x256xf32>, vector<32x256xf32> -> vector<32x256xf32>
    %962 = vector.extract_strided_slice %961 {offsets = [0, 0], sizes = [16, 256], strides = [1, 1]} : vector<32x256xf32> to vector<16x256xf32>
    %963 = arith.mulf %962, %951 : vector<16x256xf32>
    %cst_176 = arith.constant dense<0.000000e+00> : vector<256xf32>
    %964 = vector.multi_reduction <add>, %963, %cst_176 [0] : vector<16x256xf32> to vector<256xf32>
    %965 = vector.shape_cast %964 : vector<256xf32> to vector<1x256xf32>
    %966 = vector.extract_strided_slice %961 {offsets = [16, 0], sizes = [16, 256], strides = [1, 1]} : vector<32x256xf32> to vector<16x256xf32>
    %967 = arith.mulf %966, %951 : vector<16x256xf32>
    %cst_177 = arith.constant dense<0.000000e+00> : vector<256xf32>
    %968 = vector.multi_reduction <add>, %967, %cst_177 [0] : vector<16x256xf32> to vector<256xf32>
    %969 = vector.shape_cast %968 : vector<256xf32> to vector<1x256xf32>
    %970 = tpu.concatenate %965, %969 in 0 : vector<1x256xf32>, vector<1x256xf32> -> vector<2x256xf32>
    %971 = arith.addf %901, %970 : vector<2x256xf32>
    %972 = arith.addf %10, %971 : vector<2x256xf32>
    %973 = vector.broadcast %16 : vector<2x1xf32> to vector<2x256xf32>
    %974 = arith.mulf %972, %973 : vector<2x256xf32>
    %cst_178 = arith.constant 0.000000e+00 : f32
    %975 = vector.broadcast %cst_178 : f32 to vector<2x256xf32>
    %976 = arith.maximumf %975, %974 : vector<2x256xf32>
    %977 = vector.broadcast %21 : vector<2x1xf32> to vector<2x256xf32>
    %978 = arith.minimumf %977, %976 : vector<2x256xf32>
    %979 = math.floor %978 : vector<2x256xf32>
    %980 = arith.subf %978, %979 : vector<2x256xf32>
    %981 = arith.fptosi %979 : vector<2x256xf32> to vector<2x256xi32>
    %c1_i32_179 = arith.constant 1 : i32
    %982 = vector.broadcast %c1_i32_179 : i32 to vector<2x256xi32>
    %983 = arith.addi %981, %982 : vector<2x256xi32>
    %984 = vector.broadcast %22 : vector<2x1xi32> to vector<2x256xi32>
    %985 = arith.minsi %983, %984 : vector<2x256xi32>
    %986 = vector.extract_strided_slice %981 {offsets = [0, 0], sizes = [1, 256], strides = [1, 1]} : vector<2x256xi32> to vector<1x256xi32>
    %987 = vector.extract_strided_slice %985 {offsets = [0, 0], sizes = [1, 256], strides = [1, 1]} : vector<2x256xi32> to vector<1x256xi32>
    %988 = vector.extract_strided_slice %980 {offsets = [0, 0], sizes = [1, 256], strides = [1, 1]} : vector<2x256xf32> to vector<1x256xf32>
    %989 = vector.extract_strided_slice %981 {offsets = [1, 0], sizes = [1, 256], strides = [1, 1]} : vector<2x256xi32> to vector<1x256xi32>
    %990 = vector.extract_strided_slice %985 {offsets = [1, 0], sizes = [1, 256], strides = [1, 1]} : vector<2x256xi32> to vector<1x256xi32>
    %991 = vector.extract_strided_slice %980 {offsets = [1, 0], sizes = [1, 256], strides = [1, 1]} : vector<2x256xf32> to vector<1x256xf32>
    %992 = vector.broadcast %986 : vector<1x256xi32> to vector<16x256xi32>
    %993 = arith.cmpi eq, %24, %992 : vector<16x256xi32>
    %cst_180 = arith.constant 1.000000e+00 : f32
    %994 = vector.broadcast %cst_180 : f32 to vector<1x256xf32>
    %995 = arith.subf %994, %988 : vector<1x256xf32>
    %cst_181 = arith.constant 0.000000e+00 : f32
    %996 = vector.shape_cast %995 : vector<1x256xf32> to vector<1x256xf32>
    %997 = vector.broadcast %996 : vector<1x256xf32> to vector<16x256xf32>
    %998 = vector.broadcast %cst_181 : f32 to vector<16x256xf32>
    %999 = arith.select %993, %997, %998 : vector<16x256xi1>, vector<16x256xf32>
    %1000 = vector.broadcast %987 : vector<1x256xi32> to vector<16x256xi32>
    %1001 = arith.cmpi eq, %24, %1000 : vector<16x256xi32>
    %cst_182 = arith.constant 0.000000e+00 : f32
    %1002 = vector.shape_cast %988 : vector<1x256xf32> to vector<1x256xf32>
    %1003 = vector.broadcast %1002 : vector<1x256xf32> to vector<16x256xf32>
    %1004 = vector.broadcast %cst_182 : f32 to vector<16x256xf32>
    %1005 = arith.select %1001, %1003, %1004 : vector<16x256xi1>, vector<16x256xf32>
    %1006 = arith.addf %999, %1005 : vector<16x256xf32>
    %1007 = vector.broadcast %989 : vector<1x256xi32> to vector<16x256xi32>
    %1008 = arith.cmpi eq, %23, %1007 : vector<16x256xi32>
    %cst_183 = arith.constant 1.000000e+00 : f32
    %1009 = vector.broadcast %cst_183 : f32 to vector<1x256xf32>
    %1010 = arith.subf %1009, %991 : vector<1x256xf32>
    %cst_184 = arith.constant 0.000000e+00 : f32
    %1011 = vector.shape_cast %1010 : vector<1x256xf32> to vector<1x256xf32>
    %1012 = vector.broadcast %1011 : vector<1x256xf32> to vector<16x256xf32>
    %1013 = vector.broadcast %cst_184 : f32 to vector<16x256xf32>
    %1014 = arith.select %1008, %1012, %1013 : vector<16x256xi1>, vector<16x256xf32>
    %1015 = vector.broadcast %990 : vector<1x256xi32> to vector<16x256xi32>
    %1016 = arith.cmpi eq, %23, %1015 : vector<16x256xi32>
    %cst_185 = arith.constant 0.000000e+00 : f32
    %1017 = vector.shape_cast %991 : vector<1x256xf32> to vector<1x256xf32>
    %1018 = vector.broadcast %1017 : vector<1x256xf32> to vector<16x256xf32>
    %1019 = vector.broadcast %cst_185 : f32 to vector<16x256xf32>
    %1020 = arith.select %1016, %1018, %1019 : vector<16x256xi1>, vector<16x256xf32>
    %1021 = arith.addf %1014, %1020 : vector<16x256xf32>
    %1022 = vector.extract_strided_slice %971 {offsets = [0, 0], sizes = [1, 256], strides = [1, 1]} : vector<2x256xf32> to vector<1x256xf32>
    %1023 = vector.shape_cast %1022 : vector<1x256xf32> to vector<1x256xf32>
    %1024 = vector.broadcast %1023 : vector<1x256xf32> to vector<16x256xf32>
    %1025 = vector.extract_strided_slice %971 {offsets = [1, 0], sizes = [1, 256], strides = [1, 1]} : vector<2x256xf32> to vector<1x256xf32>
    %1026 = vector.shape_cast %1025 : vector<1x256xf32> to vector<1x256xf32>
    %1027 = vector.broadcast %1026 : vector<1x256xf32> to vector<16x256xf32>
    %1028 = tpu.concatenate %1024, %1027 in 0 : vector<16x256xf32>, vector<16x256xf32> -> vector<32x256xf32>
    %1029 = arith.mulf %1028, %31 : vector<32x256xf32>
    %cst_186 = arith.constant dense<0.000000e+00> : vector<32x16xf32>
    %1030 = tpu.matmul %1029, %47, %cst_186 {dimension_numbers = #tpu.dot_dimension_numbers<[1], [0], [0], [1], [0, 0, 1, 1], [], []>} : vector<32x256xf32>, vector<256x16xf32>, vector<32x16xf32> -> vector<32x16xf32>
    %cst_187 = arith.constant dense<0.000000e+00> : vector<32x256xf32>
    %1031 = tpu.matmul %1030, %1006, %cst_187 {dimension_numbers = #tpu.dot_dimension_numbers<[1], [0], [0], [1], [0, 0, 1, 1], [], []>} : vector<32x16xf32>, vector<16x256xf32>, vector<32x256xf32> -> vector<32x256xf32>
    %1032 = vector.extract_strided_slice %1031 {offsets = [0, 0], sizes = [16, 256], strides = [1, 1]} : vector<32x256xf32> to vector<16x256xf32>
    %1033 = arith.mulf %1032, %1021 : vector<16x256xf32>
    %cst_188 = arith.constant dense<0.000000e+00> : vector<256xf32>
    %1034 = vector.multi_reduction <add>, %1033, %cst_188 [0] : vector<16x256xf32> to vector<256xf32>
    %1035 = vector.shape_cast %1034 : vector<256xf32> to vector<1x256xf32>
    %1036 = vector.extract_strided_slice %1031 {offsets = [16, 0], sizes = [16, 256], strides = [1, 1]} : vector<32x256xf32> to vector<16x256xf32>
    %1037 = arith.mulf %1036, %1021 : vector<16x256xf32>
    %cst_189 = arith.constant dense<0.000000e+00> : vector<256xf32>
    %1038 = vector.multi_reduction <add>, %1037, %cst_189 [0] : vector<16x256xf32> to vector<256xf32>
    %1039 = vector.shape_cast %1038 : vector<256xf32> to vector<1x256xf32>
    %1040 = tpu.concatenate %1035, %1039 in 0 : vector<1x256xf32>, vector<1x256xf32> -> vector<2x256xf32>
    %1041 = arith.addf %971, %1040 : vector<2x256xf32>
    %1042 = arith.index_cast %c1_i32_102 : i32 to index
    %c0_190 = arith.constant 0 : index
    %c0_191 = arith.constant 0 : index
    %1043 = vector.load %arg2[%1042, %c0_190, %c0_191] : memref<2x2x256xf32, #tpu.memory_space<vmem>>, vector<1x2x256xf32>
    %1044 = vector.shape_cast %1043 : vector<1x2x256xf32> to vector<2x256xf32>
    %1045 = vector.shape_cast %1041 : vector<2x256xf32> to vector<1x2x256xf32>
    tpu.vector_store %arg2[%1042, %c0_190, %c0_191], %1045 {strides = array<i32>} : memref<2x2x256xf32, #tpu.memory_space<vmem>>, vector<1x2x256xf32>,
    %c2_i32 = arith.constant 2 : i32
    return
  }
  func.func @transform_0(%arg0: i32) -> (i32, i32, i32) {
    %c0_i32 = arith.constant 0 : i32
    %c0_i32_0 = arith.constant 0 : i32
    %c0_i32_1 = arith.constant 0 : i32
    return %arg0, %c0_i32, %c0_i32_0 : i32, i32, i32
  }
  func.func @transform_1(%arg0: i32) -> (i32, i32, i32) {
    %c0_i32 = arith.constant 0 : i32
    %c0_i32_0 = arith.constant 0 : i32
    %c0_i32_1 = arith.constant 0 : i32
    return %arg0, %c0_i32, %c0_i32_0 : i32, i32, i32
  }
}

</mosaic_0001>

<bundles_post_ra>
// kernel: tpu_custom_call.1
= control target key start
LH: loop header
LB: loop body
LE: loop exit
PB: predicated region body
PF: predicated region fallthrough
CT: control target
= control target key end

     0   :  { %6 = vsyncpa [#allocation3], 0  ;;  %s8573_s0 = inlined_call_operand.hbm [shape: f32[4,2,256], index: 0, kind: input, shape index: {}]   ;;  %s8574_s1 = inlined_call_operand.hbm [shape: f32[4,2,256], index: 1, kind: output, shape index: {}]  }
   0x1   :  { %8 = vsyncpa [#allocation3 + $0x1], 0 }
   0x2   :  { %9 = vsyncpa [#allocation4], 0 }
   0x3   :  { %11 = vsyncpa [#allocation4 + $0x1], 0  ;;  %s5397_s6 = smov 0   ;;  %s5399_s7 = smov 0  }
   0x4   :  { %s5401_s8 = smov 0   ;;  %s5403_s9 = smov 0  }
   0x5 LB: > { %s5418_s10 = sadd.s32 4294967295, %s5379_s9   ;;  %s4425_s11 = sadd.s32 4294967294, %s5379_s9   ;;  %s5379_s9 = sphi %s5403_s9, %s9462_s9   ;;  %s5375_s8 = sphi %s5401_s8, %s9461_s8   ;;  %s5371_s7 = sphi %s5399_s7, %s9460_s7   ;;  %s5367_s6 = sphi %s5397_s6, %s9459_s6  }
   0x6   : > { %s5422_s12 = sadd.s32 1, %s5379_s9   ;;  %s24_s13 = sadd.s32 1, %s5375_s8 }
   0x7   : > { %s21_s14 = ssub.s32 %s5379_s9, %s5422_s12  ;;  %p31_p0 = scmp.ne.s32.totalorder %s5375_s8, %s5371_s7 }
   0x8   : > { %p22_p1 = scmp.eq.s32.totalorder %s21_s14, 0  ;;  %p32_p2 = scmp.eq.s32.totalorder %s5379_s9, 0 }
   0x9   : > { %p37_p3 = scmp.ne.s32.totalorder %s5371_s7, %s5367_s6  ;;  %p38_p4 = scmp.eq.s32.totalorder %s5418_s10, 0 }
   0xa   : > { %s5434_s15 = scalar_select %p22_p1, %s5375_s8, %s24_s13  }
   0xb   : > { %p5436_p5 = por %p32_p2, %p31_p0  ;;  %p5440_p6 = por %p38_p4, %p37_p3 }
   0xc   : > { %p61_p7 = scmp.eq.s32.totalorder %s5418_s10, 1  ;;  %p67_p8 = scmp.eq.s32.totalorder %s4425_s11, 1 }
   0xd   : > { %p5243_p10 = scmp.lt.s32.totalorder %s5379_s9, 2  ;;  %s87_s20 = sand.u32 1, %s5375_s8  }
   0xe   : > { %p5447_p11 = por %p61_p7, %p31_p0  ;;  %p5451_p12 = por %p67_p8, %p37_p3 }
   0xf   : > { %s5004_s21 = sshll.u32 %s5379_s9, 3  ;;  %s4428_s22 = sshll.u32 %s87_s20, 3 }
  0x10   : > { %s97_s25 = scalar_lea.hbm %s8573_s0, %s5004_s21  ;;  %s91_s27 = scalar_lea.vmem [#allocation2], %s4428_s22 }
  0x11   : > { %s98_s26 = sshll.u32 %s97_s25, 4  ;;  %s100_s28 = sshll.u32 %s91_s27, 4  ;;  %s99_s26 = int_to_ptr.hbm [resolvable:$true] %s98_s26  ;;  %s101_s28 = int_to_ptr.vmem [resolvable:$true] %s100_s28 }
  0x12   : > { %p5462_p13 = pnand %p5243_p10, %p5436_p5  ;;  %p4432_p0 = scmp.ge.s32.totalorder %s5379_s9, 1 }
  0x13   : > { %p108_p1 = scmp.lt.s32.totalorder %s5379_s9, 3  ;;  %s88_s30 = scalar_lea.sflag [#allocation3], %s87_s20 }
  0x14   : > { %s5283_s2 = sshra.s32 %s99_s26, 4  ;;  %p5287_p3 = pneg %p5462_p13  ;;  %s5284_s2 = int_to_ptr.hbm [resolvable:$true] %s5283_s2 }
  0x15   : > { %s5285_s3 = scalar_lea.hbm %s5284_s2, 8  ;;  %s5290_s11 = scalar_lea.hbm %s8573_s0, 16 }
  0x16   : > { %p5286_p2 = scmp.ne.s32.totalorder %s5284_s2, %s5285_s3  ;;  %p5291_p5 = scmp.lt.s32.totalorder %s5284_s2, %s8573_s0 }
  0x17   : > { %p5292_p8 = scmp.lt.s32.totalorder %s5290_s11, %s5285_s3 }
  0x18   : > { %p5288_p4 = pnand %p5287_p3, %p5286_p2 }
  0x19   : > { %p5293_p10 = por %p5292_p8, %p5291_p5 }
  0x1a   : > { %p5289_p7 = pneg %p5288_p4 }
  0x1c   : > { %p5294_p9 = pnand %p5293_p10, %p5289_p7 }
  0x1e   : > { %5297 = shalt.err (!%p5294_p9)
}
  0x1f   : > { %s5381_s16 = smov 64   ;;  %s5382_s20 = smov 4  }
  0x20   : > { %5238 = dma.hbm_to_vmem [thread:$0]  (!%p5462_p13), %s99_s26, 128, %s101_s28, %s88_s30, %s5381_s16, %s5381_s16, %s5382_s20  }
  0x21   : > { %p109_p2 = pnand %p4432_p0, %p108_p1 }
  0x23   : > { %112 = sbr.rel (%p109_p2) target bundleno = 4284 (0x10bc), region = 24 }
  0x28   : > { %s5483_s21 = sand.u32 1, %s5371_s7   ;;  %v140_v0 = vlaneseq }
  0x29   : > { %s4433_s22 = sshll.u32 %s5483_s21, 3  ;;  %s115_s23 = scalar_lea.sflag [#allocation3], %s5483_s21 }
  0x2a   : > { %s5489_s24 = scalar_lea.vmem [#allocation2], %s4433_s22 }
  0x2b   : > { %5358 = dma.done.wait (%p5440_p6), %s115_s23, 128  }
  0x2c   : > { %5360 = vsyncadd (%p5440_p6), %s115_s23, 4294967168  ;;  %v5495_v1 = vshrl.u32 %v140_v0, 7  ;;  %v5497_v2 = vand.u32 127, %v140_v0  ;;  %s7569_s17 = scalar_lea.vmem [#allocation5], %s4433_s22  ;;  %s5006_s25 = sshll.u32 %s5418_s10, 3 }
  0x2d   : > { %s4348_s28 = scalar_lea.hbm %s8574_s1, %s5006_s25  ;;  %s4349_s29 = sshll.u32 %s7569_s17, 4  ;;  %s4350_s29 = int_to_ptr.vmem [resolvable:$true] %s4349_s29 }
  0x2e   : > { %v184_v3 = vadd.s32 120, %v5495_v1  ;;  %v200_v4 = vadd.s32 248, %v5495_v1  ;;  %v183_v5 = vadd.s32 112, %v5495_v1  ;;  %v199_v6 = vadd.s32 240, %v5495_v1  ;;  %s4351_s30 = sshll.u32 %s4348_s28, 4  ;;  %s4336_s10 = scalar_lea.sflag [#allocation4], %s5483_s21  ;;  %s4352_s30 = int_to_ptr.hbm [resolvable:$true] %s4351_s30 }
  0x2f   : > { %v182_v7 = vadd.s32 104, %v5495_v1  ;;  %v198_v8 = vadd.s32 232, %v5495_v1  ;;  %v181_v9 = vadd.s32 96, %v5495_v1  ;;  %v197_v10 = vadd.s32 224, %v5495_v1  ;;  %s5327_s2 = sshra.s32 %s4352_s30, 4  ;;  %s5333_s11 = scalar_lea.hbm %s8574_s1, 16  ;;  %s5328_s2 = int_to_ptr.hbm [resolvable:$true] %s5327_s2 }
  0x30   : > { %v216_v11 = vcvt.s32.f32 %v184_v3  ;;  %v232_v12 = vcvt.s32.f32 %v200_v4  ;;  %v215_v13 = vcvt.s32.f32 %v183_v5  ;;  %v231_v14 = vcvt.s32.f32 %v199_v6  ;;  %s5329_s3 = scalar_lea.hbm %s5328_s2, 8  ;;  %p5334_p0 = scmp.lt.s32.totalorder %s5328_s2, %s8574_s1 }
  0x31   : > { %v214_v15 = vcvt.s32.f32 %v182_v7  ;;  %v230_v16 = vcvt.s32.f32 %v198_v8  ;;  %v213_v17 = vcvt.s32.f32 %v181_v9  ;;  %v229_v18 = vcvt.s32.f32 %v197_v10  ;;  %p5330_p6 = scmp.ne.s32.totalorder %s5328_s2, %s5329_s3  ;;  %p5335_p1 = scmp.lt.s32.totalorder %s5333_s11, %s5329_s3 }
  0x32   : > { %v248_v19 = vadd.f32 0.5, %v216_v11  ;;  %v264_v20 = vadd.f32 0.5, %v232_v12  ;;  %v247_v21 = vadd.f32 0.5, %v215_v13  ;;  %v263_v22 = vadd.f32 0.5, %v231_v14 }
  0x33   : > { %v246_v23 = vadd.f32 0.5, %v214_v15  ;;  %v262_v24 = vadd.f32 0.5, %v230_v16  ;;  %v245_v25 = vadd.f32 0.5, %v213_v17  ;;  %v261_v26 = vadd.f32 0.5, %v229_v18  ;;  %p5331_p9 = pnand %p5330_p6, %p5447_p11  ;;  %p5336_p3 = por %p5335_p1, %p5334_p0 }
  0x34   : > { %v280_v27 = vmul.f32 0.0625, %v248_v19  ;;  %v296_v28 = vmul.f32 0.0625, %v264_v20  ;;  %v279_v29 = vmul.f32 0.0625, %v247_v21  ;;  %v295_v30 = vmul.f32 0.0625, %v263_v22 }
  0x35   : > { %v278_v31 = vmul.f32 0.0625, %v246_v23  ;;  %v294_v32 = vmul.f32 0.0625, %v262_v24  ;;  %v277_v33 = vmul.f32 0.0625, %v245_v25  ;;  %v293_v34 = vmul.f32 0.0625, %v261_v26  ;;  %p5332_p13 = pneg %p5331_p9 }
  0x36   : > { %v312_v35 = vfloor.f32 %v280_v27  ;;  %v328_v36 = vfloor.f32 %v296_v28  ;;  %v311_v37 = vfloor.f32 %v279_v29  ;;  %v327_v38 = vfloor.f32 %v295_v30 }
  0x37   : > { %v310_v39 = vfloor.f32 %v278_v31  ;;  %v326_v40 = vfloor.f32 %v294_v32  ;;  %v309_v41 = vfloor.f32 %v277_v33  ;;  %v325_v42 = vfloor.f32 %v293_v34  ;;  %p5337_p4 = pnand %p5336_p3, %p5332_p13 }
  0x38   : > { %v344_v43 = vmul.f32 16.0, %v312_v35  ;;  %v360_v44 = vmul.f32 16.0, %v328_v36  ;;  %v343_v45 = vmul.f32 16.0, %v311_v37  ;;  %v359_v46 = vmul.f32 16.0, %v327_v38 }
  0x39   : > { %v342_v47 = vmul.f32 16.0, %v310_v39  ;;  %v358_v48 = vmul.f32 16.0, %v326_v40  ;;  %v341_v49 = vmul.f32 16.0, %v309_v41  ;;  %v357_v50 = vmul.f32 16.0, %v325_v42 }
  0x3a   : > { %v376_v51 = vsub.f32 %v216_v11, %v344_v43  ;;  %v392_v52 = vsub.f32 %v232_v12, %v360_v44  ;;  %v375_v53 = vsub.f32 %v215_v13, %v343_v45  ;;  %v391_v54 = vsub.f32 %v231_v14, %v359_v46 }
  0x3b   : > { %v374_v55 = vsub.f32 %v214_v15, %v342_v47  ;;  %v390_v56 = vsub.f32 %v230_v16, %v358_v48  ;;  %v373_v57 = vsub.f32 %v213_v17, %v341_v49  ;;  %v389_v58 = vsub.f32 %v229_v18, %v357_v50 }
  0x3c   : > { %vm5090_vm0 = vcmp.lt.s32.totalorder %v376_v51, 0  ;;  %v5091_v59 = vceil.f32 %v376_v51  ;;  %v5092_v60 = vfloor.f32 %v376_v51  ;;  %vm5170_vm1 = vcmp.lt.s32.totalorder %v392_v52, 0 }
  0x3d   : > { %v5171_v61 = vceil.f32 %v392_v52  ;;  %v5172_v62 = vfloor.f32 %v392_v52  ;;  %vm5085_vm2 = vcmp.lt.s32.totalorder %v375_v53, 0  ;;  %v5086_v63 = vceil.f32 %v375_v53 }
  0x3e   : > { %v5093_v0 = vsel %vm5090_vm0, %v5091_v59, %v5092_v60  ;;  %v5087_v3 = vfloor.f32 %v375_v53  ;;  %vm5165_vm3 = vcmp.lt.s32.totalorder %v391_v54, 0  ;;  %v5166_v4 = vceil.f32 %v391_v54 }
  0x3f   : > { %v5094_v5 = vcvt.f32.s32 %v5093_v0  ;;  %v5173_v6 = vsel %vm5170_vm1, %v5171_v61, %v5172_v62  ;;  %v5167_v7 = vfloor.f32 %v391_v54  ;;  %vm5080_vm4 = vcmp.lt.s32.totalorder %v374_v55, 0 }
  0x40   : > { %v5174_v8 = vcvt.f32.s32 %v5173_v6  ;;  %v5088_v9 = vsel %vm5085_vm2, %v5086_v63, %v5087_v3  ;;  %v5081_v10 = vceil.f32 %v374_v55  ;;  %v5082_v11 = vfloor.f32 %v374_v55 }
  0x41   : > { %vm5508_vm5 = vcmp.eq.s32.totalorder %v5094_v5, %v5497_v2  ;;  %v8720_v12 = vmov 0  ;;  %v5089_v13 = vcvt.f32.s32 %v5088_v9  ;;  %v5168_v14 = vsel %vm5165_vm3, %v5166_v4, %v5167_v7 }
  0x42   : > { %v8721_v12 = vsel %vm5508_vm5, 4294967295, %v8720_v12  ;;  %vm5160_vm6 = vcmp.lt.s32.totalorder %v390_v56, 0  ;;  %v8621_v15 = vmov 1.0   ;;  %vm5516_vm7 = vcmp.eq.s32.totalorder %v5174_v8, %v5497_v2 }
  0x43   : > { %4435 = vmatpush.msk.msra.mxu0 %vm5508_vm5, %v8621_v15  ;;  %v8722_v16 = vmov 0  ;;  %v5169_v17 = vcvt.f32.s32 %v5168_v14  ;;  %v5083_v18 = vsel %vm5080_vm4, %v5081_v10, %v5082_v11  ;;  %v5161_v19 = vceil.f32 %v390_v56  ;;  %4451 = vmatpush.msk.msra.mxu1 %vm5516_vm7, %v8621_v15 }
  0x44   : > { %v8723_v16 = vsel %vm5516_vm7, 4294967295, %v8722_v16  ;;  %vm5524_vm8 = vcmp.eq.s32.totalorder %v5089_v13, %v5497_v2  ;;  %v8724_v20 = vmov 0  ;;  %v5084_v21 = vcvt.f32.s32 %v5083_v18 }
  0x45   : > { %v8725_v20 = vsel %vm5524_vm8, 4294967295, %v8724_v20  ;;  %v5162_v22 = vfloor.f32 %v390_v56  ;;  %vm5075_vm9 = vcmp.lt.s32.totalorder %v373_v57, 0  ;;  %4436 = vmatpush.msk.msra.mxu0 %vm5524_vm8, %v8621_v15  ;;  %vm5532_vm10 = vcmp.eq.s32.totalorder %v5169_v17, %v5497_v2 }
  0x46   : > { %v8726_v23 = vmov 0  ;;  %v5076_v24 = vceil.f32 %v373_v57  ;;  %v5077_v25 = vfloor.f32 %v373_v57  ;;  %vm5155_vm11 = vcmp.lt.s32.totalorder %v389_v58, 0  ;;  %4452 = vmatpush.msk.msra.mxu1 %vm5532_vm10, %v8621_v15 }
  0x47   : > { %v8727_v23 = vsel %vm5532_vm10, 4294967295, %v8726_v23  ;;  %vm5540_vm12 = vcmp.eq.s32.totalorder %v5084_v21, %v5497_v2  ;;  %v8728_v26 = vmov 0  ;;  %v5163_v27 = vsel %vm5160_vm6, %v5161_v19, %v5162_v22 }
  0x48   : > { %v8729_v26 = vsel %vm5540_vm12, 4294967295, %v8728_v26  ;;  %v5156_v28 = vceil.f32 %v389_v58  ;;  %v5157_v29 = vfloor.f32 %v389_v58  ;;  %4437 = vmatpush.msk.msra.mxu0 %vm5540_vm12, %v8621_v15  ;;  %v5164_v30 = vcvt.f32.s32 %v5163_v27 }
  0x49   : > { %v5078_v31 = vsel %vm5075_vm9, %v5076_v24, %v5077_v25  ;;  %v180_v32 = vadd.s32 88, %v5495_v1  ;;  %v196_v33 = vadd.s32 216, %v5495_v1  ;;  %v179_v36 = vadd.s32 80, %v5495_v1 }
  0x4a   : > { %v5079_v34 = vcvt.f32.s32 %v5078_v31  ;;  %v5158_v35 = vsel %vm5155_vm11, %v5156_v28, %v5157_v29  ;;  %v195_v37 = vadd.s32 208, %v5495_v1  ;;  %vm5553_vm13 = vcmp.eq.s32.totalorder %v5164_v30, %v5497_v2 }
  0x4b   : > { %v8730_v38 = vmov 0  ;;  %v5159_v39 = vcvt.f32.s32 %v5158_v35  ;;  %v212_v40 = vcvt.s32.f32 %v180_v32  ;;  %v228_v41 = vcvt.s32.f32 %v196_v33  ;;  %4453 = vmatpush.msk.msra.mxu1 %vm5553_vm13, %v8621_v15 }
  0x4c   : > { %v8731_v38 = vsel %vm5553_vm13, 4294967295, %v8730_v38  ;;  %vm5561_vm14 = vcmp.eq.s32.totalorder %v5079_v34, %v5497_v2  ;;  %v8732_v42 = vmov 0  ;;  %v211_v43 = vcvt.s32.f32 %v179_v36 }
  0x4d   : > { %v8733_v42 = vsel %vm5561_vm14, 4294967295, %v8732_v42  ;;  %v227_v44 = vcvt.s32.f32 %v195_v37  ;;  %v178_v45 = vadd.s32 72, %v5495_v1  ;;  %4438 = vmatpush.msk.msra.mxu0 %vm5561_vm14, %v8621_v15  ;;  %vm5570_vm15 = vcmp.eq.s32.totalorder %v5159_v39, %v5497_v2 }
  0x4e   : > { %v8734_v46 = vmov 0  ;;  %v244_v47 = vadd.f32 0.5, %v212_v40  ;;  %v260_v48 = vadd.f32 0.5, %v228_v41  ;;  %v5575_v49 = vadd.s32 200, %v5495_v1  ;;  %4454 = vmatpush.msk.msra.mxu1 %vm5570_vm15, %v8621_v15 }
  0x4f   : > { %v8735_v46 = vsel %vm5570_vm15, 4294967295, %v8734_v46  ;;  %v243_v50 = vadd.f32 0.5, %v211_v43  ;;  %v259_v51 = vadd.f32 0.5, %v227_v44  ;;  %v210_v52 = vcvt.s32.f32 %v178_v45 }
  0x50   : > { %v5581_v53 = vadd.s32 64, %v5495_v1  ;;  %v276_v54 = vmul.f32 0.0625, %v244_v47  ;;  %v292_v55 = vmul.f32 0.0625, %v260_v48  ;;  %v226_v56 = vcvt.s32.f32 %v5575_v49 }
  0x51   : > { %v5585_v57 = vadd.s32 192, %v5495_v1  ;;  %v275_v58 = vmul.f32 0.0625, %v243_v50  ;;  %v291_v59 = vmul.f32 0.0625, %v259_v51  ;;  %v242_v60 = vadd.f32 0.5, %v210_v52 }
  0x52   : > { %v209_v61 = vcvt.s32.f32 %v5581_v53  ;;  %v308_v62 = vfloor.f32 %v276_v54  ;;  %v324_v63 = vfloor.f32 %v292_v55  ;;  %v258_v0 = vadd.f32 0.5, %v226_v56 }
  0x53   : > { %v225_v3 = vcvt.s32.f32 %v5585_v57  ;;  %v307_v4 = vfloor.f32 %v275_v58  ;;  %v323_v5 = vfloor.f32 %v291_v59  ;;  %v274_v6 = vmul.f32 0.0625, %v242_v60 }
  0x54   : > { %v241_v7 = vadd.f32 0.5, %v209_v61  ;;  %v340_v8 = vmul.f32 16.0, %v308_v62  ;;  %v356_v9 = vmul.f32 16.0, %v324_v63  ;;  %v290_v10 = vmul.f32 0.0625, %v258_v0 }
  0x55   : > { %v257_v11 = vadd.f32 0.5, %v225_v3  ;;  %v339_v13 = vmul.f32 16.0, %v307_v4  ;;  %v355_v14 = vmul.f32 16.0, %v323_v5  ;;  %v306_v17 = vfloor.f32 %v274_v6 }
  0x56   : > { %v273_v18 = vmul.f32 0.0625, %v241_v7  ;;  %v372_v19 = vsub.f32 %v212_v40, %v340_v8  ;;  %v388_v21 = vsub.f32 %v228_v41, %v356_v9  ;;  %v322_v22 = vfloor.f32 %v290_v10 }
  0x57   : > { %v289_v24 = vmul.f32 0.0625, %v257_v11  ;;  %v371_v25 = vsub.f32 %v211_v43, %v339_v13  ;;  %v387_v27 = vsub.f32 %v227_v44, %v355_v14  ;;  %v338_v28 = vmul.f32 16.0, %v306_v17 }
  0x58   : > { %v305_v29 = vfloor.f32 %v273_v18  ;;  %vm5070_vm0 = vcmp.lt.s32.totalorder %v372_v19, 0  ;;  %v5071_v30 = vceil.f32 %v372_v19  ;;  %v5072_v31 = vfloor.f32 %v372_v19 }
  0x59   : > { %vm5150_vm1 = vcmp.lt.s32.totalorder %v388_v21, 0  ;;  %v5151_v32 = vceil.f32 %v388_v21  ;;  %v5152_v33 = vfloor.f32 %v388_v21  ;;  %vm5065_vm2 = vcmp.lt.s32.totalorder %v371_v25, 0 }
  0x5a   : > { %v5066_v34 = vceil.f32 %v371_v25  ;;  %v5073_v35 = vsel %vm5070_vm0, %v5071_v30, %v5072_v31  ;;  %v5067_v36 = vfloor.f32 %v371_v25  ;;  %vm5145_vm3 = vcmp.lt.s32.totalorder %v387_v27, 0 }
  0x5b   : > { %v5146_v37 = vceil.f32 %v387_v27  ;;  %v5074_v39 = vcvt.f32.s32 %v5073_v35  ;;  %v5153_v40 = vsel %vm5150_vm1, %v5151_v32, %v5152_v33  ;;  %v5147_v41 = vfloor.f32 %v387_v27 }
  0x5c   : > { %v370_v45 = vsub.f32 %v210_v52, %v338_v28  ;;  %v5154_v43 = vcvt.f32.s32 %v5153_v40  ;;  %v5068_v44 = vsel %vm5065_vm2, %v5066_v34, %v5067_v36  ;;  %v354_v47 = vmul.f32 16.0, %v322_v22 }
  0x5d   : > { %v337_v48 = vmul.f32 16.0, %v305_v29  ;;  %vm5592_vm4 = vcmp.eq.s32.totalorder %v5074_v39, %v5497_v2  ;;  %v8736_v49 = vmov 0  ;;  %v5069_v50 = vcvt.f32.s32 %v5068_v44 }
  0x5e   : > { %v8737_v49 = vsel %vm5592_vm4, 4294967295, %v8736_v49  ;;  %v5148_v51 = vsel %vm5145_vm3, %v5146_v37, %v5147_v41  ;;  %vm5060_vm6 = vcmp.lt.s32.totalorder %v370_v45, 0  ;;  %4439 = vmatpush.msk.msra.mxu0 %vm5592_vm4, %v8621_v15  ;;  %vm5600_vm9 = vcmp.eq.s32.totalorder %v5154_v43, %v5497_v2 }
  0x5f   : > { %v8738_v53 = vmov 0  ;;  %v5149_v52 = vcvt.f32.s32 %v5148_v51  ;;  %v5061_v54 = vceil.f32 %v370_v45  ;;  %v5062_v55 = vfloor.f32 %v370_v45  ;;  %4455 = vmatpush.msk.msra.mxu1 %vm5600_vm9, %v8621_v15 }
  0x60   : > { %v8739_v53 = vsel %vm5600_vm9, 4294967295, %v8738_v53  ;;  %vm5608_vm11 = vcmp.eq.s32.totalorder %v5069_v50, %v5497_v2  ;;  %v8740_v58 = vmov 0  ;;  %v386_v59 = vsub.f32 %v226_v56, %v354_v47 }
  0x61   : > { %v8741_v58 = vsel %vm5608_vm11, 4294967295, %v8740_v58  ;;  %v369_v60 = vsub.f32 %v209_v61, %v337_v48  ;;  %v321_v62 = vfloor.f32 %v289_v24  ;;  %4440 = vmatpush.msk.msra.mxu0 %vm5608_vm11, %v8621_v15  ;;  %vm5616_vm0 = vcmp.eq.s32.totalorder %v5149_v52, %v5497_v2 }
  0x62   : > { %v8742_v63 = vmov 0  ;;  %v5063_v0 = vsel %vm5060_vm6, %v5061_v54, %v5062_v55  ;;  %v176_v4 = vadd.s32 56, %v5495_v1  ;;  %v192_v5 = vadd.s32 184, %v5495_v1  ;;  %4456 = vmatpush.msk.msra.mxu1 %vm5616_vm0, %v8621_v15 }
  0x63   : > { %v8743_v63 = vsel %vm5616_vm0, 4294967295, %v8742_v63  ;;  %v5064_v56 = vcvt.f32.s32 %v5063_v0  ;;  %vm5140_vm1 = vcmp.lt.s32.totalorder %v386_v59, 0  ;;  %v5141_v61 = vceil.f32 %v386_v59 }
  0x64   : > { %v5142_v6 = vfloor.f32 %v386_v59  ;;  %vm5055_vm2 = vcmp.lt.s32.totalorder %v369_v60, 0  ;;  %v5056_v7 = vceil.f32 %v369_v60  ;;  %v5057_v8 = vfloor.f32 %v369_v60 }
  0x65   : > { %v353_v9 = vmul.f32 16.0, %v321_v62  ;;  %vm5626_vm3 = vcmp.eq.s32.totalorder %v5064_v56, %v5497_v2  ;;  %v8744_v10 = vmov 0  ;;  %v208_v13 = vcvt.s32.f32 %v176_v4 }
  0x66   : > { %v8745_v10 = vsel %vm5626_vm3, 4294967295, %v8744_v10  ;;  %v5143_v11 = vsel %vm5140_vm1, %v5141_v61, %v5142_v6  ;;  %v224_v14 = vcvt.s32.f32 %v192_v5  ;;  %4441 = vmatpush.msk.msra.mxu0 %vm5626_vm3, %v8621_v15  ;;  %v5058_v18 = vsel %vm5055_vm2, %v5056_v7, %v5057_v8 }
  0x67   : > { %v5144_v17 = vcvt.f32.s32 %v5143_v11  ;;  %v385_v19 = vsub.f32 %v225_v3, %v353_v9  ;;  %v175_v21 = vadd.s32 48, %v5495_v1  ;;  %v5059_v22 = vcvt.f32.s32 %v5058_v18 }
  0x68   : > { %v240_v24 = vadd.f32 0.5, %v208_v13  ;;  %v256_v25 = vadd.f32 0.5, %v224_v14  ;;  %v191_v27 = vadd.s32 176, %v5495_v1  ;;  %v8746_v28 = vmov 0 }
  0x69   : > { %vm5638_vm6 = vcmp.eq.s32.totalorder %v5144_v17, %v5497_v2  ;;  %vm5135_vm1 = vcmp.lt.s32.totalorder %v385_v19, 0  ;;  %v5136_v29 = vceil.f32 %v385_v19  ;;  %v5137_v30 = vfloor.f32 %v385_v19 }
  0x6a   : > { %v8747_v28 = vsel %vm5638_vm6, 4294967295, %v8746_v28  ;;  %4457 = vmatpush.msk.msra.mxu1 %vm5638_vm6, %v8621_v15  ;;  %vm5646_vm2 = vcmp.eq.s32.totalorder %v5059_v22, %v5497_v2  ;;  %v8749_v57 = vmov 0  ;;  %v272_v3 = vmul.f32 0.0625, %v240_v24 }
  0x6b   : > { %8748 = vst [vmem:[#allocation8_spill] sm:$0xff] %v8747_v28  ;;  %v8750_v57 = vsel %vm5646_vm2, 4294967295, %v8749_v57  ;;  %v288_v31 = vmul.f32 0.0625, %v256_v25  ;;  %v207_v32 = vcvt.s32.f32 %v175_v21  ;;  %4442 = vmatpush.msk.msra.mxu0 %vm5646_vm2, %v8621_v15  ;;  %v5138_v33 = vsel %vm5135_vm1, %v5136_v29, %v5137_v30 }
  0x6c   : > { %8751 = vst [vmem:[#allocation9_spill] sm:$0xff] %v8750_v57  ;;  %v223_v34 = vcvt.s32.f32 %v191_v27  ;;  %v174_v35 = vadd.s32 40, %v5495_v1  ;;  %v190_v36 = vadd.s32 168, %v5495_v1  ;;  %v5139_v37 = vcvt.f32.s32 %v5138_v33 }
  0x6d   : > { %v304_v39 = vfloor.f32 %v272_v3  ;;  %v320_v40 = vfloor.f32 %v288_v31  ;;  %v239_v41 = vadd.f32 0.5, %v207_v32  ;;  %v5656_v47 = vadd.s32 32, %v5495_v1 }
  0x6e   : > { %v255_v45 = vadd.f32 0.5, %v223_v34  ;;  %v206_v43 = vcvt.s32.f32 %v174_v35  ;;  %v222_v44 = vcvt.s32.f32 %v190_v36  ;;  %vm5659_vm6 = vcmp.eq.s32.totalorder %v5139_v37, %v5497_v2 }
  0x6f   : > { %v8752_v48 = vmov 0  ;;  %v336_v50 = vmul.f32 16.0, %v304_v39  ;;  %v352_v51 = vmul.f32 16.0, %v320_v40  ;;  %v271_v52 = vmul.f32 0.0625, %v239_v41  ;;  %4458 = vmatpush.msk.msra.mxu1 %vm5659_vm6, %v8621_v15 }
  0x70   : > { %v8753_v48 = vsel %vm5659_vm6, 4294967295, %v8752_v48  ;;  %v287_v54 = vmul.f32 0.0625, %v255_v45  ;;  %v238_v55 = vadd.f32 0.5, %v206_v43  ;;  %v254_v59 = vadd.f32 0.5, %v222_v44 }
  0x71   : > { %v205_v60 = vcvt.s32.f32 %v5656_v47  ;;  %v368_v62 = vsub.f32 %v208_v13, %v336_v50  ;;  %v384_v0 = vsub.f32 %v224_v14, %v352_v51  ;;  %v303_v4 = vfloor.f32 %v271_v52 }
  0x72   : > { %v5668_v5 = vadd.s32 160, %v5495_v1  ;;  %v319_v56 = vfloor.f32 %v287_v54  ;;  %v270_v61 = vmul.f32 0.0625, %v238_v55  ;;  %v286_v6 = vmul.f32 0.0625, %v254_v59 }
  0x73   : > { %v237_v7 = vadd.f32 0.5, %v205_v60  ;;  %vm5050_vm1 = vcmp.lt.s32.totalorder %v368_v62, 0  ;;  %v5051_v8 = vceil.f32 %v368_v62  ;;  %v5052_v9 = vfloor.f32 %v368_v62 }
  0x74   : > { %vm5130_vm2 = vcmp.lt.s32.totalorder %v384_v0, 0  ;;  %v5131_v11 = vceil.f32 %v384_v0  ;;  %v5132_v17 = vfloor.f32 %v384_v0  ;;  %v335_v18 = vmul.f32 16.0, %v303_v4 }
  0x75   : > { %v351_v19 = vmul.f32 16.0, %v319_v56  ;;  %v5053_v21 = vsel %vm5050_vm1, %v5051_v8, %v5052_v9  ;;  %v302_v22 = vfloor.f32 %v270_v61  ;;  %v318_v13 = vfloor.f32 %v286_v6 }
  0x76   : > { %v269_v14 = vmul.f32 0.0625, %v237_v7  ;;  %v5054_v24 = vcvt.f32.s32 %v5053_v21  ;;  %v5133_v25 = vsel %vm5130_vm2, %v5131_v11, %v5132_v17  ;;  %v367_v27 = vsub.f32 %v207_v32, %v335_v18 }
  0x77   : > { %v383_v29 = vsub.f32 %v223_v34, %v351_v19  ;;  %v5134_v30 = vcvt.f32.s32 %v5133_v25  ;;  %v334_v3 = vmul.f32 16.0, %v302_v22  ;;  %v350_v31 = vmul.f32 16.0, %v318_v13 }
  0x78   : > { %v301_v33 = vfloor.f32 %v269_v14  ;;  %vm5671_vm6 = vcmp.eq.s32.totalorder %v5054_v24, %v5497_v2  ;;  %v8754_v35 = vmov 0  ;;  %vm5045_vm3 = vcmp.lt.s32.totalorder %v367_v27, 0 }
  0x79   : > { %v8755_v35 = vsel %vm5671_vm6, 4294967295, %v8754_v35  ;;  %v5046_v36 = vceil.f32 %v367_v27  ;;  %v5047_v37 = vfloor.f32 %v367_v27  ;;  %4443 = vmatpush.msk.msra.mxu0 %vm5671_vm6, %v8621_v15  ;;  %vm5679_vm2 = vcmp.eq.s32.totalorder %v5134_v30, %v5497_v2 }
  0x7a   : > { %v8756_v32 = vmov 0  ;;  %vm5125_vm1 = vcmp.lt.s32.totalorder %v383_v29, 0  ;;  %v5126_v34 = vceil.f32 %v383_v29  ;;  %v5127_v39 = vfloor.f32 %v383_v29  ;;  %4459 = vmatpush.msk.msra.mxu1 %vm5679_vm2, %v8621_v15 }
  0x7b   : > { %v8757_v32 = vsel %vm5679_vm2, 4294967295, %v8756_v32  ;;  %v5048_v40 = vsel %vm5045_vm3, %v5046_v36, %v5047_v37  ;;  %v366_v41 = vsub.f32 %v206_v43, %v334_v3  ;;  %v382_v45 = vsub.f32 %v222_v44, %v350_v31 }
  0x7c   : > { %v333_v47 = vmul.f32 16.0, %v301_v33  ;;  %v5049_v50 = vcvt.f32.s32 %v5048_v40  ;;  %v5128_v51 = vsel %vm5125_vm1, %v5126_v34, %v5127_v39  ;;  %v221_v52 = vcvt.s32.f32 %v5668_v5 }
  0x7d   : > { %v172_v54 = vadd.s32 24, %v5495_v1  ;;  %v5129_v55 = vcvt.f32.s32 %v5128_v51  ;;  %vm5040_vm6 = vcmp.lt.s32.totalorder %v366_v41, 0  ;;  %v5041_v59 = vceil.f32 %v366_v41 }
  0x7e   : > { %v5042_v62 = vfloor.f32 %v366_v41  ;;  %vm5689_vm0 = vcmp.eq.s32.totalorder %v5049_v50, %v5497_v2  ;;  %v8758_v0 = vmov 0  ;;  %vm5120_vm2 = vcmp.lt.s32.totalorder %v382_v45, 0 }
  0x7f   : > { %v8759_v0 = vsel %vm5689_vm0, 4294967295, %v8758_v0  ;;  %v5121_v4 = vceil.f32 %v382_v45  ;;  %v5122_v43 = vfloor.f32 %v382_v45  ;;  %4444 = vmatpush.msk.msra.mxu0 %vm5689_vm0, %v8621_v15  ;;  %vm5697_vm3 = vcmp.eq.s32.totalorder %v5129_v55, %v5497_v2 }
  0x80   : > { %v8760_v44 = vmov 0  ;;  %v5043_v5 = vsel %vm5040_vm6, %v5041_v59, %v5042_v62  ;;  %v365_v56 = vsub.f32 %v205_v60, %v333_v47  ;;  %v253_v61 = vadd.f32 0.5, %v221_v52  ;;  %4460 = vmatpush.msk.msra.mxu1 %vm5697_vm3, %v8621_v15 }
  0x81   : > { %v8761_v44 = vsel %vm5697_vm3, 4294967295, %v8760_v44  ;;  %v5044_v6 = vcvt.f32.s32 %v5043_v5  ;;  %v5123_v7 = vsel %vm5120_vm2, %v5121_v4, %v5122_v43  ;;  %v204_v8 = vcvt.s32.f32 %v172_v54 }
  0x82   : > { %8762 = vst [vmem:[#allocation10_spill] sm:$0xff] %v8761_v44  ;;  %v188_v9 = vadd.s32 152, %v5495_v1  ;;  %v5124_v11 = vcvt.f32.s32 %v5123_v7  ;;  %vm5035_vm1 = vcmp.lt.s32.totalorder %v365_v56, 0  ;;  %v5036_v17 = vceil.f32 %v365_v56 }
  0x83   : > { %v5037_v18 = vfloor.f32 %v365_v56  ;;  %vm5706_vm0 = vcmp.eq.s32.totalorder %v5044_v6, %v5497_v2  ;;  %v8763_v19 = vmov 0  ;;  %v285_v60 = vmul.f32 0.0625, %v253_v61 }
  0x84   : > { %v8764_v19 = vsel %vm5706_vm0, 4294967295, %v8763_v19  ;;  %v236_v21 = vadd.f32 0.5, %v204_v8  ;;  %v220_v22 = vcvt.s32.f32 %v188_v9  ;;  %4445 = vmatpush.msk.msra.mxu0 %vm5706_vm0, %v8621_v15  ;;  %vm5714_vm6 = vcmp.eq.s32.totalorder %v5124_v11, %v5497_v2 }
  0x85   : > { %8765 = vst [vmem:[#allocation11_spill] sm:$0xff] %v8764_v19  ;;  %v8766_v13 = vmov 0  ;;  %v5038_v14 = vsel %vm5035_vm1, %v5036_v17, %v5037_v18  ;;  %v171_v24 = vadd.s32 16, %v5495_v1  ;;  %v187_v25 = vadd.s32 144, %v5495_v1  ;;  %4461 = vmatpush.msk.msra.mxu1 %vm5714_vm6, %v8621_v15 }
  0x86   : > { %v8767_v13 = vsel %vm5714_vm6, 4294967295, %v8766_v13  ;;  %v5039_v27 = vcvt.f32.s32 %v5038_v14  ;;  %v317_v29 = vfloor.f32 %v285_v60  ;;  %v268_v30 = vmul.f32 0.0625, %v236_v21 }
  0x87   : > { %8768 = vst [vmem:[#allocation12_spill] sm:$0xff] %v8767_v13  ;;  %v252_v3 = vadd.f32 0.5, %v220_v22  ;;  %v203_v31 = vcvt.s32.f32 %v171_v24  ;;  %v219_v33 = vcvt.s32.f32 %v187_v25  ;;  %v5724_v36 = vadd.s32 8, %v5495_v1 }
  0x88   : > { %v5727_v37 = vadd.s32 136, %v5495_v1  ;;  %vm5730_vm2 = vcmp.eq.s32.totalorder %v5039_v27, %v5497_v2  ;;  %v8769_v34 = vmov 0  ;;  %v349_v39 = vmul.f32 16.0, %v317_v29 }
  0x89   : > { %v8770_v34 = vsel %vm5730_vm2, 4294967295, %v8769_v34  ;;  %v300_v40 = vfloor.f32 %v268_v30  ;;  %v284_v41 = vmul.f32 0.0625, %v252_v3  ;;  %4446 = vmatpush.msk.msra.mxu0 %vm5730_vm2, %v8621_v15  ;;  %v235_v45 = vadd.f32 0.5, %v203_v31 }
  0x8a   : > { %8771 = vst [vmem:[#allocation13_spill] sm:$0xff] %v8770_v34  ;;  %v251_v47 = vadd.f32 0.5, %v219_v33  ;;  %v202_v50 = vcvt.s32.f32 %v5724_v36  ;;  %v218_v51 = vcvt.s32.f32 %v5727_v37  ;;  %v381_v54 = vsub.f32 %v221_v52, %v349_v39 }
  0x8b   : > { %v332_v55 = vmul.f32 16.0, %v300_v40  ;;  %v316_v59 = vfloor.f32 %v284_v41  ;;  %v201_v62 = vcvt.s32.f32 %v5495_v1  ;;  %v267_v4 = vmul.f32 0.0625, %v235_v45 }
  0x8c   : > { %v283_v43 = vmul.f32 0.0625, %v251_v47  ;;  %v234_v5 = vadd.f32 0.5, %v202_v50  ;;  %v250_v56 = vadd.f32 0.5, %v218_v51  ;;  %vm5115_vm1 = vcmp.lt.s32.totalorder %v381_v54, 0 }
  0x8d   : > { %v5116_v61 = vceil.f32 %v381_v54  ;;  %v5117_v6 = vfloor.f32 %v381_v54  ;;  %v364_v7 = vsub.f32 %v204_v8, %v332_v55  ;;  %v348_v9 = vmul.f32 16.0, %v316_v59 }
  0x8e   : > { %v299_v11 = vfloor.f32 %v267_v4  ;;  %v315_v17 = vfloor.f32 %v283_v43  ;;  %v266_v18 = vmul.f32 0.0625, %v234_v5  ;;  %v282_v3 = vmul.f32 0.0625, %v250_v56 }
  0x8f   : > { %v5118_v60 = vsel %vm5115_vm1, %v5116_v61, %v5117_v6  ;;  %vm5030_vm2 = vcmp.lt.s32.totalorder %v364_v7, 0  ;;  %v5031_v52 = vceil.f32 %v364_v7  ;;  %v5032_v21 = vfloor.f32 %v364_v7 }
  0x90   : > { %v5119_v14 = vcvt.f32.s32 %v5118_v60  ;;  %v380_v24 = vsub.f32 %v220_v22, %v348_v9  ;;  %v331_v25 = vmul.f32 16.0, %v299_v11  ;;  %v347_v27 = vmul.f32 16.0, %v315_v17 }
  0x91   : > { %v5033_v29 = vsel %vm5030_vm2, %v5031_v52, %v5032_v21  ;;  %v298_v30 = vfloor.f32 %v266_v18  ;;  %v233_v39 = vadd.f32 0.5, %v201_v62  ;;  %v8772_v8 = vmov 0 }
  0x92   : > { %vm5745_vm6 = vcmp.eq.s32.totalorder %v5119_v14, %v5497_v2  ;;  %v5034_v40 = vcvt.f32.s32 %v5033_v29  ;;  %vm5110_vm1 = vcmp.lt.s32.totalorder %v380_v24, 0  ;;  %v5111_v41 = vceil.f32 %v380_v24 }
  0x93   : > { %v8773_v8 = vsel %vm5745_vm6, 4294967295, %v8772_v8  ;;  %4462 = vmatpush.msk.msra.mxu1 %vm5745_vm6, %v8621_v15  ;;  %v5112_v22 = vfloor.f32 %v380_v24  ;;  %v363_v45 = vsub.f32 %v203_v31, %v331_v25  ;;  %v379_v47 = vsub.f32 %v219_v33, %v347_v27 }
  0x94   : > { %8774 = vst [vmem:[#allocation14_spill] sm:$0xff] %v8773_v8  ;;  %v330_v54 = vmul.f32 16.0, %v298_v30  ;;  %vm5753_vm2 = vcmp.eq.s32.totalorder %v5034_v40, %v5497_v2  ;;  %v8775_v55 = vmov 0  ;;  %v314_v59 = vfloor.f32 %v282_v3  ;;  %v489_v3 = vld [vmem:[%s5489_s24] sm:$0xf] }
  0x95   : > { %v8776_v55 = vsel %vm5753_vm2, 4294967295, %v8775_v55  ;;  %v265_v4 = vmul.f32 0.0625, %v233_v39  ;;  %v5758_v43 = vadd.s32 128, %v5495_v1  ;;  %4447 = vmatpush.msk.msra.mxu0 %vm5753_vm2, %v8621_v15  ;;  %v5113_v5 = vsel %vm5110_vm1, %v5111_v41, %v5112_v22 }
  0x96   : > { %8777 = vst [vmem:[#allocation15_spill] sm:$0xff] %v8776_v55  ;;  %vm5025_vm6 = vcmp.lt.s32.totalorder %v363_v45, 0  ;;  %v5026_v56 = vceil.f32 %v363_v45  ;;  %v5027_v31 = vfloor.f32 %v363_v45  ;;  %v5114_v33 = vcvt.f32.s32 %v5113_v5 }
  0x97   : > { %vm5105_vm0 = vcmp.lt.s32.totalorder %v379_v47, 0  ;;  %v5106_v61 = vceil.f32 %v379_v47  ;;  %v5107_v6 = vfloor.f32 %v379_v47  ;;  %v362_v9 = vsub.f32 %v202_v50, %v330_v54 }
  0x98   : > { %v5028_v7 = vsel %vm5025_vm6, %v5026_v56, %v5027_v31  ;;  %v346_v11 = vmul.f32 16.0, %v314_v59  ;;  %v297_v17 = vfloor.f32 %v265_v4  ;;  %vm5764_vm3 = vcmp.eq.s32.totalorder %v5114_v33, %v5497_v2 }
  0x99   : > { %v8778_v18 = vmov 0  ;;  %v5029_v60 = vcvt.f32.s32 %v5028_v7  ;;  %v5108_v52 = vsel %vm5105_vm0, %v5106_v61, %v5107_v6  ;;  %v217_v21 = vcvt.s32.f32 %v5758_v43  ;;  %4463 = vmatpush.msk.msra.mxu1 %vm5764_vm3, %v8621_v15 }
  0x9a   : > { %v8779_v18 = vsel %vm5764_vm3, 4294967295, %v8778_v18  ;;  %v5109_v14 = vcvt.f32.s32 %v5108_v52  ;;  %vm5020_vm1 = vcmp.lt.s32.totalorder %v362_v9, 0  ;;  %v5021_v24 = vceil.f32 %v362_v9 }
  0x9b   : > { %8780 = vst [vmem:[#allocation16_spill] sm:$0xff] %v8779_v18  ;;  %v5022_v50 = vfloor.f32 %v362_v9  ;;  %vm5773_vm6 = vcmp.eq.s32.totalorder %v5029_v60, %v5497_v2  ;;  %v8781_v25 = vmov 0  ;;  %v378_v27 = vsub.f32 %v218_v51, %v346_v11 }
  0x9c   : > { %v8782_v25 = vsel %vm5773_vm6, 4294967295, %v8781_v25  ;;  %v329_v29 = vmul.f32 16.0, %v297_v17  ;;  %v249_v30 = vadd.f32 0.5, %v217_v21  ;;  %4448 = vmatpush.msk.msra.mxu0 %vm5773_vm6, %v8621_v15  ;;  %vm5784_vm0 = vcmp.eq.s32.totalorder %v5109_v14, %v5497_v2 }
  0x9d   : > { %8783 = vst [vmem:[#allocation17_spill] sm:$0xff] %v8782_v25  ;;  %v8784_v39 = vmov 0  ;;  %v5023_v40 = vsel %vm5020_vm1, %v5021_v24, %v5022_v50  ;;  %v143_v41 = vcvt.s32.f32 %v5497_v2  ;;  %4464 = vmatpush.msk.msra.mxu1 %vm5784_vm0, %v8621_v15  ;;  %vm5100_vm3 = vcmp.lt.s32.totalorder %v378_v27, 0 }
  0x9e   : > { %v8785_v39 = vsel %vm5784_vm0, 4294967295, %v8784_v39  ;;  %v5024_v37 = vcvt.f32.s32 %v5023_v40  ;;  %v5101_v51 = vceil.f32 %v378_v27  ;;  %v5102_v22 = vfloor.f32 %v378_v27 }
  0x9f   : > { %8786 = vst [vmem:[#allocation18_spill] sm:$0xff] %v8785_v39  ;;  %v361_v45 = vsub.f32 %v201_v62, %v329_v29  ;;  %v281_v47 = vmul.f32 0.0625, %v249_v30  ;;  %v145_v54 = vadd.f32 0.5, %v143_v41  ;;  %v5796_v59 = vmul.f32 0.0078125, %v489_v3 }
  0xa0   : > { %vm5799_vm1 = vcmp.eq.s32.totalorder %v5024_v37, %v5497_v2  ;;  %v8787_v4 = vmov 0  ;;  %v5103_v43 = vsel %vm5100_vm3, %v5101_v51, %v5102_v22  ;;  %v5804_v5 = vadd.s32 128, %v5497_v2 }
  0xa1   : > { %v8788_v4 = vsel %vm5799_vm1, 4294967295, %v8787_v4  ;;  %4449 = vmatpush.msk.msra.mxu0 %vm5799_vm1, %v8621_v15  ;;  %v5104_v62 = vcvt.f32.s32 %v5103_v43  ;;  %vm5015_vm0 = vcmp.lt.s32.totalorder %v361_v45, 0  ;;  %v5016_v56 = vceil.f32 %v361_v45  ;;  %492 = vst [vmem:[#allocation1] ss:$4 sm:$0xff] %v5796_v59 }
  0xa2   : > { %8789 = vst [vmem:[#allocation19_spill] sm:$0xff] %v8788_v4  ;;  %v5017_v31 = vfloor.f32 %v361_v45  ;;  %v313_v33 = vfloor.f32 %v281_v47  ;;  %v147_v61 = vmul.f32 0.0625, %v145_v54  ;;  %v573_v6 = vperm.slane %v5796_v59, 0 }
  0xa3   : > { %v144_v7 = vcvt.s32.f32 %v5804_v5  ;;  %vm5813_vm3 = vcmp.eq.s32.totalorder %v5104_v62, %v5497_v2  ;;  %v8790_v9 = vmov 0  ;;  %v8793_v24 = vmov 0 }
  0xa4   : > { %v8791_v9 = vsel %vm5813_vm3, 4294967295, %v8790_v9  ;;  %v5018_v11 = vsel %vm5015_vm0, %v5016_v56, %v5017_v31  ;;  %4465 = vmatpush.msk.msra.mxu1 %vm5813_vm3, %v8621_v15  ;;  %v345_v60 = vmul.f32 16.0, %v313_v33  ;;  %v149_v52 = vfloor.f32 %v147_v61 }
  0xa5   : > { %8792 = vst [vmem:[#allocation20_spill] sm:$0xff] %v8791_v9  ;;  %v5019_v17 = vcvt.f32.s32 %v5018_v11  ;;  %v146_v14 = vadd.f32 0.5, %v144_v7  ;;  %v577_v29 = vperm.slane %v573_v6, 0  ;;  %v574_v3 = vperm.slane %v5796_v59, 2 }
  0xa6   : > { %v377_v50 = vsub.f32 %v217_v21, %v345_v60  ;;  %v5012_v27 = vcvt.f32.s32 %v149_v52  ;;  %v5384_v51 = vmov 0.0   ;;  %v8796_v62 = vmov 0 }
  0xa7   : > { %vm5821_vm1 = vcmp.eq.s32.totalorder %v5019_v17, %v5497_v2  ;;  %v148_v30 = vmul.f32 0.0625, %v146_v14  ;;  %v578_v5 = vperm.slane %v574_v3, 0  ;;  %v579_v6 = vperm.slane %v5796_v59, 1 }
  0xa8   : > { %v8794_v24 = vsel %vm5821_vm1, 4294967295, %v8793_v24  ;;  %4450 = vmatpush.msk.msra.mxu0 %vm5821_vm1, %v8621_v15  ;;  %vm5095_vm0 = vcmp.lt.s32.totalorder %v377_v50, 0  ;;  %v5096_v40 = vceil.f32 %v377_v50  ;;  %v5097_v37 = vfloor.f32 %v377_v50 }
  0xa9   : > { %8795 = vst [vmem:[#allocation21_spill] sm:$0xff] %v8794_v24  ;;  %vm163_vm3 = vcmp.eq.s32.totalorder %v5495_v1, %v5012_v27  ;;  %v150_v45 = vfloor.f32 %v148_v30  ;;  %vm165_vm6 = vcmp.eq.s32.totalorder %v5724_v36, %v5012_v27  ;;  %v583_v17 = vperm.slane %v579_v6, 1 }
  0xaa   : > { %v5830_v22 = vsel %vm163_vm3, 1.0, %v5384_v51  ;;  %v5098_v47 = vsel %vm5095_vm0, %v5096_v40, %v5097_v37  ;;  %v5840_v56 = vsel %vm165_vm6, 1.0, %v5384_v51  ;;  %v580_v14 = vperm.slane %v5796_v59, 3 }
  0xab   : > { %v585_v21 = vmul.f32 %v577_v29, %v5830_v22  ;;  %v5099_v54 = vcvt.f32.s32 %v5098_v47  ;;  %v5014_v43 = vcvt.f32.s32 %v150_v45  ;;  %8799 = vst [vmem:[#allocation23_spill] sm:$0xff] %v5840_v56  ;;  %v587_v61 = vmul.f32 %v577_v29, %v5840_v56 }
  0xac   : > { %v589_v50 = vmul.f32 %v583_v17, %v5830_v22  ;;  %v584_v27 = vperm.slane %v580_v14, 1  ;;  %v591_v29 = vmul.f32 %v583_v17, %v5840_v56  ;;  %v151_v40 = vmul.f32 16.0, %v149_v52 }
  0xad   : > { %609 = vmatmul.f32.vlgmr.msra.gmra.mxu0 %v585_v21  ;;  %vm5835_vm1 = vcmp.eq.s32.totalorder %v5099_v54, %v5497_v2  ;;  %vm164_vm2 = vcmp.eq.s32.totalorder %v5495_v1, %v5014_v43  ;;  %vm166_vm3 = vcmp.eq.s32.totalorder %v5724_v36, %v5014_v43  ;;  %v152_v37 = vmul.f32 16.0, %v150_v45  ;;  %v493_v54 = vld.sshfl [vmem:[#allocation1] sm:$0xff pattern:$0x73625140] }
  0xae   : > { %v8797_v62 = vsel %vm5835_vm1, 4294967295, %v8796_v62  ;;  %4466 = vmatpush.msk.msra.mxu1 %vm5835_vm1, %v8621_v15  ;;  %v5845_v31 = vsel %vm164_vm2, 1.0, %v5384_v51  ;;  %v5851_v11 = vsel %vm166_vm3, 1.0, %v5384_v51  ;;  %v153_v51 = vsub.f32 %v143_v41, %v151_v40 }
  0xaf   : > { %8798 = vst [vmem:[#allocation22_spill] sm:$0xff] %v8797_v62  ;;  %v586_v33 = vmul.f32 %v578_v5, %v5845_v31  ;;  %v588_v60 = vmul.f32 %v578_v5, %v5851_v11  ;;  %v590_v30 = vmul.f32 %v584_v27, %v5845_v31  ;;  %v592_v3 = vmul.f32 %v584_v27, %v5851_v11  ;;  %v494_v5 = vld.sshfl [vmem:[#allocation1 + $0x8] sm:$0xff pattern:$0x73625140] }
  0xb0   : > { %8800 = vst [vmem:[#allocation24_spill] sm:$0xff] %v5851_v11  ;;  %v154_v47 = vsub.f32 %v144_v7, %v152_v37  ;;  %vm8615_vm2 = vcmask 1040384  }
  0xb1   : > { %638 = vmatmul.f32.vlgmr.msra.gmra.mxu1 %v586_v33  ;;  %v5862_v21 = vsel %vm8615_vm2, %v149_v52, %v153_v51 }
  0xb2   : > { %8801 = vst [vmem:[#allocation25_spill] sm:$0xff] %v5862_v21  ;;  %v5865_v43 = vsel %vm8615_vm2, %v150_v45, %v154_v47  ;;  %v497_v33 = vadd.f32 %v493_v54, %v5862_v21 }
  0xb3   : > { %8802 = vst [vmem:[#allocation26_spill] sm:$0xff] %v5865_v43 }
  0xb4   : > { %v499_v6 = vmax.f32 %v497_v33, 0.0 }
  0xb5   : > { %612 = vmatmul.f32.gmra.mxu0 %v587_v61  ;;  %v498_v61 = vadd.f32 %v494_v5, %v5865_v43 }
  0xb7   : > { %v500_v17 = vmax.f32 %v498_v61, 0.0 }
  0xb9   : > { %641 = vmatmul.f32.gmra.mxu1 %v588_v60  ;;  %v501_v60 = vmin.f32 %v499_v6, 15.0  ;;  %v502_v14 = vmin.f32 %v500_v17, 15.0 }
  0xbb   : > { %v503_v2 = vfloor.f32 %v501_v60  ;;  %v504_v41 = vfloor.f32 %v502_v14 }
  0xbd   : > { %615 = vmatmul.f32.gmra.mxu0 %v589_v50  ;;  %v5869_v7 = vcvt.f32.s32 %v503_v2  ;;  %v5871_v50 = vcvt.f32.s32 %v504_v41  ;;  %v5875_v27 = vsub.f32 %v501_v60, %v503_v2 }
  0xbf   : > { %v509_v52 = vadd.s32 1, %v5869_v7  ;;  %v510_v45 = vadd.s32 1, %v5871_v50  ;;  %v515_v51 = vperm.slane %v5869_v7, 0  ;;  %v516_v54 = vperm.slane %v5871_v50, 0 }
  0xc0   : > { %v535_v61 = vperm.slane %v5875_v27, 0 }
  0xc1   : > { %644 = vmatmul.f32.gmra.mxu1 %v590_v30  ;;  %v5877_v30 = vsub.f32 %v502_v14, %v504_v41  ;;  %vm511_vm6 = vcmp.lt.s32.totalorder %v509_v52, 15  ;;  %vm513_vm0 = vcmp.lt.s32.totalorder %v510_v45, 15  ;;  %vm519_vm3 = vcmp.eq.s32.totalorder %v5724_v36, %v515_v51 }
  0xc2   : > { %v5882_v40 = vsel %vm513_vm0, %v510_v45, 15  ;;  %vm520_vm0 = vcmp.eq.s32.totalorder %v5724_v36, %v516_v54  ;;  %vm517_vm1 = vcmp.eq.s32.totalorder %v5495_v1, %v515_v51  ;;  %vm518_vm9 = vcmp.eq.s32.totalorder %v5495_v1, %v516_v54 }
  0xc3   : > { %v8620_v37 = vsub.f32 1.0, %v5877_v30  ;;  %v530_v5 = vperm.slane %v5882_v40, 0  ;;  %v536_v17 = vperm.slane %v5877_v30, 0 }
  0xc5   : > { %618 = vmatmul.f32.gmra.mxu0 %v591_v29  ;;  %v5879_v29 = vsel %vm511_vm6, %v509_v52, 15  ;;  %v524_v6 = vperm.slane %v8620_v37, 0  ;;  %vm534_vm2 = vcmp.eq.s32.totalorder %v5724_v36, %v530_v5  ;;  %vm532_vm4 = vcmp.eq.s32.totalorder %v5495_v1, %v530_v5 }
  0xc6   : > { %v529_v47 = vperm.slane %v5879_v29, 0  ;;  %v540_v41 = vsel %vm534_vm2, %v536_v17, 0.0  ;;  %v538_v43 = vsel %vm532_vm4, %v536_v17, 0.0  ;;  %vm8804_vm4 = vnez %v8737_v49 }
  0xc7   : > { %v528_v2 = vsel %vm520_vm0, %v524_v6, 0.0  ;;  %v526_v56 = vsel %vm518_vm9, %v524_v6, 0.0  ;;  %vm8805_vm9 = vnez %v8739_v53  ;;  %vm8808_vm2 = vnez %v8745_v10 }
  0xc8   : > { %vm533_vm6 = vcmp.eq.s32.totalorder %v5724_v36, %v529_v47  ;;  %v544_v45 = vadd.f32 %v540_v41, %v528_v2  ;;  %vm531_vm11 = vcmp.eq.s32.totalorder %v5495_v1, %v529_v47  ;;  %v542_v21 = vadd.f32 %v538_v43, %v526_v56 }
  0xc9   : > { %647 = vmatmul.f32.gmra.mxu1 %v592_v3  ;;  %v521_v3 = vsub.f32 1.0, %v5875_v27  ;;  %v539_v14 = vsel %vm533_vm6, %v535_v61, 0.0  ;;  %v537_v15 = vsel %vm531_vm11, %v535_v61, 0.0  ;;  %vm8806_vm11 = vnez %v8741_v58 }
  0xca   : > { %707 = vmatpush.msra.mxu3 %v544_v45  ;;  %vm8810_vm6 = vnez %v8750_v57  ;;  %vm8811_vm0 = vnez %v8753_v48  ;;  %v563_v43 = vperm.slane %v5875_v27, 1 }
  0xcb   : > { %v523_v33 = vperm.slane %v521_v3, 0 }
  0xcc   : > { %708 = vmatpush.msra.mxu3 %v542_v21  ;;  %v5975_v21 = vperm.slane %v521_v3, 1 }
  0xcd   : > { %v527_v60 = vsel %vm519_vm3, %v523_v33, 0.0  ;;  %v525_v37 = vsel %vm517_vm1, %v523_v33, 0.0  ;;  %vm8807_vm1 = vnez %v8743_v63  ;;  %vm8809_vm3 = vnez %v8747_v28 }
  0xce   : > { %v543_v52 = vadd.f32 %v539_v14, %v527_v60  ;;  %v541_v11 = vadd.f32 %v537_v15, %v525_v37  ;;  %v8803_v60 = vmov 1.0   ;;  %v557_v15 = vperm.slane %v5879_v29, 1 }
  0xcf   : > { %4491 = vmatpush.msk.msrb.mxu3 %vm5516_vm7, %v8803_v60 }
  0xd0   : > { %678 = vmatpush.msra.mxu2 %v543_v52 }
  0xd1   : > { %4492 = vmatpush.msk.msrb.mxu3 %vm5532_vm10, %v8803_v60 }
  0xd2   : > { %679 = vmatpush.msra.mxu2 %v541_v11  ;;  %v545_v11 = vperm.slane %v5869_v7, 1  ;;  %v8849_v7 = vsub.f32 1.0, %v5877_v30 }
  0xd3   : > { %4493 = vmatpush.msk.msrb.mxu3 %vm5553_vm13, %v8803_v60 }
  0xd4   : > { %4475 = vmatpush.msk.msrb.mxu2 %vm5508_vm5, %v8803_v60  ;;  %v552_v29 = vperm.slane %v8849_v7, 1 }
  0xd5   : > { %4494 = vmatpush.msk.msrb.mxu3 %vm5570_vm15, %v8803_v60 }
  0xd6   : > { %4476 = vmatpush.msk.msrb.mxu2 %vm5524_vm8, %v8803_v60 }
  0xd7   : > { %4495 = vmatpush.msk.msrb.mxu3 %vm8805_vm9, %v8803_v60 }
  0xd8   : > { %4477 = vmatpush.msk.msrb.mxu2 %vm5540_vm12, %v8803_v60 }
  0xd9   : > { %4496 = vmatpush.msk.msrb.mxu3 %vm8807_vm1, %v8803_v60  ;;  %vm8813_vm1 = vnez %v8757_v32 }
  0xda   : > { %4478 = vmatpush.msk.msrb.mxu2 %vm5561_vm14, %v8803_v60 }
  0xdb   : > { %4497 = vmatpush.msk.msrb.mxu3 %vm8809_vm3, %v8803_v60  ;;  %vm8815_vm3 = vnez %v8761_v44 }
  0xdc   : > { %4479 = vmatpush.msk.msrb.mxu2 %vm8804_vm4, %v8803_v60 }
  0xdd   : > { %4498 = vmatpush.msk.msrb.mxu3 %vm8811_vm0, %v8803_v60  ;;  %vm8816_vm0 = vnez %v8764_v19 }
  0xde   : > { %4480 = vmatpush.msk.msrb.mxu2 %vm8806_vm11, %v8803_v60  ;;  %vm8812_vm11 = vnez %v8755_v35 }
  0xdf   : > { %4499 = vmatpush.msk.msrb.mxu3 %vm8813_vm1, %v8803_v60  ;;  %vm8818_vm1 = vnez %v8770_v34 }
  0xe0   : > { %4481 = vmatpush.msk.msrb.mxu2 %vm8808_vm2, %v8803_v60  ;;  %vm8814_vm2 = vnez %v8759_v0 }
  0xe1   : > { %4500 = vmatpush.msk.msrb.mxu3 %vm8815_vm3, %v8803_v60  ;;  %vm8822_vm3 = vnez %v8782_v25 }
  0xe2   : > { %4482 = vmatpush.msk.msrb.mxu2 %vm8810_vm6, %v8803_v60  ;;  %vm8639_vm6 = vcmask 130048  }
  0xe4   : > { %4483 = vmatpush.msk.msrb.mxu2 %vm8812_vm11, %v8803_v60  ;;  %vm8817_vm11 = vnez %v8767_v13 }
  0xe5   : > { %4501 = vmatpush.msk.msrb.mxu3 %vm8817_vm11, %v8803_v60  ;;  %vm8820_vm11 = vnez %v8776_v55 }
  0xe6   : > { %4484 = vmatpush.msk.msrb.mxu2 %vm8814_vm2, %v8803_v60  ;;  %vm8819_vm2 = vnez %v8773_v8 }
  0xe7   : > { %4502 = vmatpush.msk.msrb.mxu3 %vm8819_vm2, %v8803_v60  ;;  %vm547_vm2 = vcmp.eq.s32.totalorder %v5495_v1, %v545_v11 }
  0xe8   : > { %4485 = vmatpush.msk.msrb.mxu2 %vm8816_vm0, %v8803_v60  ;;  %vm559_vm0 = vcmp.eq.s32.totalorder %v5495_v1, %v557_v15  ;;  %v553_v37 = vsel %vm547_vm2, %v5975_v21, 0.0  ;;  %vm8826_vm2 = vnez %v8794_v24 }
  0xe9   : > { %v565_v3 = vsel %vm559_vm0, %v563_v43, 0.0  ;;  %vm8825_vm0 = vnez %v8791_v9 }
  0xea   : > { %4486 = vmatpush.msk.msrb.mxu2 %vm8818_vm1, %v8803_v60  ;;  %vm8821_vm1 = vnez %v8779_v18  ;;  %v5999_v51 = vadd.f32 %v565_v3, %v553_v37  ;;  %v558_v37 = vperm.slane %v5882_v40, 1 }
  0xeb   : > { %4503 = vmatpush.msk.msrb.mxu3 %vm8821_vm1, %v8803_v60  ;;  %vm8824_vm1 = vnez %v8788_v4 }
  0xec   : > { %4487 = vmatpush.msk.msrb.mxu2 %vm8820_vm11, %v8803_v60  ;;  %vm8823_vm11 = vnez %v8785_v39 }
  0xed   : > { %4504 = vmatpush.msk.msrb.mxu3 %vm8823_vm11, %v8803_v60  ;;  %vm8827_vm11 = vnez %v8797_v62 }
  0xee   : > { %4488 = vmatpush.msk.msrb.mxu2 %vm8822_vm3, %v8803_v60 }
  0xef   : > { %4505 = vmatpush.msk.msrb.mxu3 %vm8825_vm0, %v8803_v60 }
  0xf0   : > { %4489 = vmatpush.msk.msrb.mxu2 %vm8824_vm1, %v8803_v60 }
  0xf1   : > { %4506 = vmatpush.msk.msrb.mxu3 %vm8827_vm11, %v8803_v60 }
  0xf2   : > { %4490 = vmatpush.msk.msrb.mxu2 %vm8826_vm2, %v8803_v60 }
 0x12a   : > { %v610_v56 = vpop.f32.mrf.mxu0 }
 0x12e   : > { %v639_v47 = vpop.f32.mrf.mxu1 }
 0x12f   : > { %v640_v54 = vadd.f32 %v639_v47, %v610_v56  ;;  %v546_v47 = vperm.slane %v5871_v50, 1 }
 0x131   : > { %4467 = vmatmul.msk.f32.vlgmr.msra.gmra.mxu2 %vm8639_vm6, %v640_v54  ;;  %4471 = vmatmul.msk.f32.vlgmr.msra.gmra.mxu3 %vm8639_vm6, %v640_v54 }
 0x132   : > { %v613_v5 = vpop.f32.mrf.mxu0  ;;  %4515 = vmatpush.msk.msra.mxu2 %vm5508_vm5, %v8803_v60  ;;  %4531 = vmatpush.msk.msra.mxu3 %vm5516_vm7, %v8803_v60 }
 0x134   : > { %4516 = vmatpush.msk.msra.mxu2 %vm5524_vm8, %v8803_v60  ;;  %4532 = vmatpush.msk.msra.mxu3 %vm5532_vm10, %v8803_v60 }
 0x136   : > { %v642_v33 = vpop.f32.mrf.mxu1  ;;  %4517 = vmatpush.msk.msra.mxu2 %vm5540_vm12, %v8803_v60  ;;  %4533 = vmatpush.msk.msra.mxu3 %vm5553_vm13, %v8803_v60  ;;  %vm8834_vm13 = vcmask 130048  }
 0x137   : > { %v643_v61 = vadd.f32 %v642_v33, %v613_v5 }
 0x138   : > { %4518 = vmatpush.msk.msra.mxu2 %vm5561_vm14, %v8803_v60  ;;  %4534 = vmatpush.msk.msra.mxu3 %vm5570_vm15, %v8803_v60  ;;  %vm8828_vm14 = vnez %v8741_v58  ;;  %vm8829_vm15 = vnez %v8743_v63 }
 0x139   : > { %4468 = vmatmul.msk.f32.gmra.mxu2 %vm8639_vm6, %v643_v61  ;;  %4472 = vmatmul.msk.f32.gmra.mxu3 %vm8639_vm6, %v643_v61  ;;  %vm8830_vm6 = vnez %v8745_v10 }
 0x13a   : > { %v616_v6 = vpop.f32.mrf.mxu0  ;;  %4519 = vmatpush.msk.msra.mxu2 %vm8804_vm4, %v8803_v60  ;;  %4535 = vmatpush.msk.msra.mxu3 %vm8805_vm9, %v8803_v60  ;;  %vm8831_vm4 = vnez %v8747_v28  ;;  %vm8832_vm9 = vnez %v8750_v57 }
 0x13c   : > { %4520 = vmatpush.msk.msra.mxu2 %vm8828_vm14, %v8803_v60  ;;  %4536 = vmatpush.msk.msra.mxu3 %vm8829_vm15, %v8803_v60  ;;  %vm8833_vm14 = vnez %v8753_v48  ;;  %vm8835_vm15 = vmmov %vm8834_vm13 }
 0x13e   : > { %v645_v17 = vpop.f32.mrf.mxu1  ;;  %4521 = vmatpush.msk.msra.mxu2 %vm8830_vm6, %v8803_v60  ;;  %4537 = vmatpush.msk.msra.mxu3 %vm8831_vm4, %v8803_v60  ;;  %vm8836_vm6 = vnez %v8755_v35  ;;  %vm8837_vm4 = vnez %v8757_v32 }
 0x13f   : > { %v646_v14 = vadd.f32 %v645_v17, %v616_v6 }
 0x140   : > { %4522 = vmatpush.msk.msra.mxu2 %vm8832_vm9, %v8803_v60  ;;  %4538 = vmatpush.msk.msra.mxu3 %vm8833_vm14, %v8803_v60  ;;  %vm8838_vm9 = vnez %v8759_v0  ;;  %vm8839_vm14 = vnez %v8761_v44 }
 0x141   : > { %4469 = vmatmul.msk.f32.gmra.mxu2 %vm8834_vm13, %v646_v14  ;;  %4473 = vmatmul.msk.f32.gmra.mxu3 %vm8835_vm15, %v646_v14  ;;  %vm8840_vm13 = vnez %v8764_v19  ;;  %vm8841_vm15 = vnez %v8767_v13 }
 0x142   : > { %4523 = vmatpush.msk.msra.mxu2 %vm8836_vm6, %v8803_v60  ;;  %4539 = vmatpush.msk.msra.mxu3 %vm8837_vm4, %v8803_v60  ;;  %v619_v2 = vpop.f32.mrf.mxu0  ;;  %vm8842_vm4 = vnez %v8770_v34  ;;  %vm8844_vm6 = vcmask 130048  }
 0x144   : > { %4524 = vmatpush.msk.msra.mxu2 %vm8838_vm9, %v8803_v60  ;;  %4540 = vmatpush.msk.msra.mxu3 %vm8839_vm14, %v8803_v60  ;;  %vm8843_vm9 = vnez %v8773_v8  ;;  %vm8845_vm14 = vmmov %vm8844_vm6 }
 0x146   : > { %v648_v41 = vpop.f32.mrf.mxu1  ;;  %4525 = vmatpush.msk.msra.mxu2 %vm8840_vm13, %v8803_v60  ;;  %4541 = vmatpush.msk.msra.mxu3 %vm8841_vm15, %v8803_v60  ;;  %vm8846_vm13 = vnez %v8776_v55  ;;  %vm8847_vm15 = vnez %v8779_v18 }
 0x147   : > { %v649_v52 = vadd.f32 %v648_v41, %v619_v2 }
 0x148   : > { %4526 = vmatpush.msk.msra.mxu2 %vm8842_vm4, %v8803_v60  ;;  %4542 = vmatpush.msk.msra.mxu3 %vm8843_vm9, %v8803_v60  ;;  %vm8848_vm4 = vnez %v8785_v39 }
 0x149   : > { %4470 = vmatmul.msk.f32.gmra.mxu2 %vm8844_vm6, %v649_v52  ;;  %4474 = vmatmul.msk.f32.gmra.mxu3 %vm8845_vm14, %v649_v52  ;;  %vm549_vm14 = vcmp.eq.s32.totalorder %v5724_v36, %v545_v11  ;;  %vm561_vm6 = vcmp.eq.s32.totalorder %v5724_v36, %v557_v15  ;;  %v564_v15 = vperm.slane %v5877_v30, 1 }
 0x14a   : > { %4527 = vmatpush.msk.msra.mxu2 %vm8846_vm13, %v8803_v60  ;;  %4543 = vmatpush.msk.msra.mxu3 %vm8847_vm15, %v8803_v60  ;;  %v555_v45 = vsel %vm549_vm14, %v5975_v21, 0.0  ;;  %v567_v56 = vsel %vm561_vm6, %v563_v43, 0.0  ;;  %vm548_vm14 = vcmp.eq.s32.totalorder %v5495_v1, %v546_v47  ;;  %vm560_vm6 = vcmp.eq.s32.totalorder %v5495_v1, %v558_v37 }
 0x14b   : > { %v571_v3 = vadd.f32 %v567_v56, %v555_v45  ;;  %v554_v40 = vsel %vm548_vm14, %v552_v29, 0.0  ;;  %v566_v21 = vsel %vm560_vm6, %v564_v15, 0.0  ;;  %vm8654_vm14 = vcmask 1041408  }
 0x14c   : > { %4528 = vmatpush.msk.msra.mxu2 %vm8822_vm3, %v8803_v60  ;;  %4544 = vmatpush.msk.msra.mxu3 %vm8848_vm4, %v8803_v60  ;;  %v570_v6 = vadd.f32 %v566_v21, %v554_v40  ;;  %vm8854_vm6 = vnez %v8731_v38 }
 0x14e   : > { %4529 = vmatpush.msk.msra.mxu2 %vm8824_vm1, %v8803_v60  ;;  %4545 = vmatpush.msk.msra.mxu3 %vm8825_vm0, %v8803_v60 }
 0x150   : > { %4530 = vmatpush.msk.msra.mxu2 %vm8826_vm2, %v8803_v60  ;;  %4546 = vmatpush.msk.msra.mxu3 %vm8827_vm11, %v8803_v60  ;;  %vm550_vm11 = vcmp.eq.s32.totalorder %v5724_v36, %v546_v47  ;;  %vm562_vm2 = vcmp.eq.s32.totalorder %v5724_v36, %v558_v37 }
 0x151   : > { %v556_v27 = vsel %vm550_vm11, %v552_v29, 0.0  ;;  %v568_v11 = vsel %vm562_vm2, %v564_v15, 0.0  ;;  %vm8850_vm11 = vcmask 1040384  }
 0x152   : > { %v572_v50 = vadd.f32 %v568_v11, %v556_v27  ;;  %vm8851_vm2 = vmmov %vm8850_vm11 }
 0x1b4   : > { %v681_v54 = vpop.f32.mrf.mxu2  ;;  %v710_v5 = vpop.f32.mrf.mxu3 }
 0x1b5   : > { %v722_v61 = vmul.f32 %v681_v54, %v5999_v51  ;;  %v723_v41 = vmul.f32 %v710_v5, %v570_v6 }
 0x1bc   : > { %v684_v43 = vpop.f32.mrf.mxu2  ;;  %v713_v33 = vpop.f32.mrf.mxu3 }
 0x1bd   : > { %v724_v17 = vmul.f32 %v684_v43, %v571_v3  ;;  %v725_v2 = vmul.f32 %v713_v33, %v572_v50 }
 0x1bf   : > { %v726_v14 = vadd.f32 %v724_v17, %v722_v61  ;;  %v733_v52 = vadd.f32 %v725_v2, %v723_v41 }
 0x1c1   : > { %v727_v56 = vrot.slane %v726_v14, 4  ;;  %v734_v47 = vrot.slane %v733_v52, 4 }
 0x1c3   : > { %v728_v37 = vadd.f32 %v727_v56, %v726_v14  ;;  %v735_v7 = vadd.f32 %v734_v47, %v733_v52 }
 0x1c4   : > { %v687_v30 = vpop.f32.mrf.mxu2  ;;  %v716_v45 = vpop.f32.mrf.mxu3 }
 0x1c5   : > { %v740_v15 = vmul.f32 %v687_v30, %v5999_v51  ;;  %v741_v27 = vmul.f32 %v716_v45, %v570_v6  ;;  %v729_v54 = vrot.slane %v728_v37, 2  ;;  %v736_v40 = vrot.slane %v735_v7, 2 }
 0x1c7   : > { %v730_v61 = vadd.f32 %v729_v54, %v728_v37  ;;  %v737_v17 = vadd.f32 %v736_v40, %v735_v7 }
 0x1c9   : > { %v731_v52 = vrot.slane %v730_v61, 1  ;;  %v738_v56 = vrot.slane %v737_v17, 1 }
 0x1cc   : > { %v690_v62 = vpop.f32.mrf.mxu2  ;;  %v719_v29 = vpop.f32.mrf.mxu3 }
 0x1cd   : > { %v742_v11 = vmul.f32 %v690_v62, %v571_v3  ;;  %v743_v24 = vmul.f32 %v719_v29, %v572_v50  ;;  %v732_v62 = vadd.f32 %v731_v52, %v730_v61  ;;  %v739_v3 = vadd.f32 %v738_v56, %v737_v17  ;;  %v8855_v52 = vld [vmem:[#allocation23_spill] sm:$0xff] }
 0x1cf   : > { %v744_v21 = vadd.f32 %v742_v11, %v740_v15  ;;  %v751_v43 = vadd.f32 %v743_v24, %v741_v27 }
 0x1d1   : > { %v745_v33 = vrot.slane %v744_v21, 4  ;;  %v752_v5 = vrot.slane %v751_v43, 4 }
 0x1d3   : > { %v746_v2 = vadd.f32 %v745_v33, %v744_v21  ;;  %v753_v41 = vadd.f32 %v752_v5, %v751_v43  ;;  %v8853_v5 = vld [vmem:[#allocation26_spill] sm:$0xff] }
 0x1d5   : > { %v747_v9 = vrot.slane %v746_v2, 2  ;;  %v754_v14 = vrot.slane %v753_v41, 2 }
 0x1d7   : > { %v748_v47 = vadd.f32 %v747_v9, %v746_v2  ;;  %v755_v4 = vadd.f32 %v754_v14, %v753_v41 }
 0x1d9   : > { %v749_v51 = vrot.slane %v748_v47, 1  ;;  %v756_v6 = vrot.slane %v755_v4, 1 }
 0x1db   : > { %v750_v50 = vadd.f32 %v749_v51, %v748_v47  ;;  %v757_v30 = vadd.f32 %v756_v6, %v755_v4  ;;  %v8856_v47 = vld [vmem:[#allocation24_spill] sm:$0xff] }
 0x1dd   : > { %v758_v24 = vsel %vm8850_vm11, %v732_v62, %v750_v50  ;;  %v759_v45 = vsel %vm8851_vm2, %v739_v3, %v757_v30  ;;  %vm8857_vm11 = vnez %v8733_v42  ;;  %vm8858_vm2 = vnez %v8735_v46 }
 0x1de   : > { %v762_v37 = vrot.slane %v759_v45, 6 }
 0x1e0   : > { %v764_v7 = vsel %vm8654_vm14, %v758_v24, %v762_v37  ;;  %vm8859_vm14 = vnez %v8737_v49 }
 0x1e1   : > { %v6141_v29 = vadd.f32 %v764_v7, %v5796_v59  ;;  %v8852_v59 = vld [vmem:[#allocation25_spill] sm:$0xff] }
 0x1e3   : > { %768 = vst [vmem:[#allocation1] ss:$4 sm:$0xff] %v6141_v29  ;;  %v849_v9 = vperm.slane %v6141_v29, 0  ;;  %v850_v15 = vperm.slane %v6141_v29, 2  ;;  %v855_v40 = vperm.slane %v6141_v29, 1  ;;  %v856_v17 = vperm.slane %v6141_v29, 3 }
 0x1e5   : > { %v853_v27 = vperm.slane %v849_v9, 0  ;;  %v854_v11 = vperm.slane %v850_v15, 0  ;;  %v859_v14 = vperm.slane %v855_v40, 1  ;;  %v860_v3 = vperm.slane %v856_v17, 1 }
 0x1e7   : > { %v861_v4 = vmul.f32 %v853_v27, %v5830_v22  ;;  %v862_v54 = vmul.f32 %v854_v11, %v5845_v31  ;;  %v863_v56 = vmul.f32 %v853_v27, %v8855_v52  ;;  %v864_v51 = vmul.f32 %v854_v11, %v8856_v47 }
 0x1e8   : > { %v865_v24 = vmul.f32 %v859_v14, %v5830_v22  ;;  %v866_v15 = vmul.f32 %v860_v3, %v5845_v31  ;;  %v6195_v27 = vmul.f32 %v859_v14, %v8855_v52  ;;  %v6198_v11 = vmul.f32 %v860_v3, %v8856_v47 }
 0x1e9   : > { %885 = vmatmul.f32.vlgmr.msrb.gmra.mxu2 %v861_v4  ;;  %914 = vmatmul.f32.vlgmr.msrb.gmra.mxu3 %v862_v54 }
 0x1ea   : > { %v769_v21 = vld.sshfl [vmem:[#allocation1] sm:$0xff pattern:$0x73625140]  ;;  %v770_v43 = vld.sshfl [vmem:[#allocation1 + $0x8] sm:$0xff pattern:$0x73625140]  ;;  %4555 = vmatpush.msk.msrb.mxu2 %vm5508_vm5, %v8803_v60  ;;  %4571 = vmatpush.msk.msrb.mxu3 %vm5516_vm7, %v8803_v60 }
 0x1eb   : > { %v773_v33 = vadd.f32 %v769_v21, %v8852_v59  ;;  %v774_v61 = vadd.f32 %v770_v43, %v8853_v5 }
 0x1ec   : > { %4556 = vmatpush.msk.msrb.mxu2 %vm5524_vm8, %v8803_v60  ;;  %4572 = vmatpush.msk.msrb.mxu3 %vm5532_vm10, %v8803_v60  ;;  %vm8872_vm8 = vnez %v8753_v48 }
 0x1ed   : > { %v775_v2 = vmax.f32 %v773_v33, 0.0  ;;  %v776_v41 = vmax.f32 %v774_v61, 0.0 }
 0x1ee   : > { %4557 = vmatpush.msk.msrb.mxu2 %vm5540_vm12, %v8803_v60  ;;  %4573 = vmatpush.msk.msrb.mxu3 %vm8854_vm6, %v8803_v60  ;;  %vm8860_vm6 = vnez %v8739_v53 }
 0x1ef   : > { %v777_v6 = vmin.f32 %v775_v2, 15.0  ;;  %v778_v62 = vmin.f32 %v776_v41, 15.0 }
 0x1f0   : > { %4558 = vmatpush.msk.msrb.mxu2 %vm8857_vm11, %v8803_v60  ;;  %4574 = vmatpush.msk.msrb.mxu3 %vm8858_vm2, %v8803_v60 }
 0x1f1   : > { %888 = vmatmul.f32.gmra.mxu2 %v863_v56  ;;  %917 = vmatmul.f32.gmra.mxu3 %v864_v51  ;;  %v779_v50 = vfloor.f32 %v777_v6  ;;  %v780_v30 = vfloor.f32 %v778_v62 }
 0x1f2   : > { %4559 = vmatpush.msk.msrb.mxu2 %vm8859_vm14, %v8803_v60  ;;  %4575 = vmatpush.msk.msrb.mxu3 %vm8860_vm6, %v8803_v60  ;;  %vm8861_vm14 = vnez %v8741_v58  ;;  %vm8862_vm6 = vnez %v8743_v63 }
 0x1f3   : > { %v6185_v45 = vsub.f32 %v777_v6, %v779_v50  ;;  %v6187_v37 = vcvt.f32.s32 %v779_v50  ;;  %v6189_v7 = vsub.f32 %v778_v62, %v780_v30  ;;  %v6191_v9 = vcvt.f32.s32 %v780_v30 }
 0x1f4   : > { %4560 = vmatpush.msk.msrb.mxu2 %vm8861_vm14, %v8803_v60  ;;  %4576 = vmatpush.msk.msrb.mxu3 %vm8862_vm6, %v8803_v60  ;;  %vm8863_vm14 = vnez %v8745_v10  ;;  %vm8864_vm6 = vnez %v8747_v28 }
 0x1f5   : > { %v785_v4 = vadd.s32 1, %v6187_v37  ;;  %v791_v54 = vperm.slane %v6187_v37, 0  ;;  %v797_v40 = vsub.f32 1.0, %v6185_v45  ;;  %v811_v21 = vperm.slane %v6185_v45, 0 }
 0x1f6   : > { %v786_v43 = vadd.s32 1, %v6191_v9  ;;  %v792_v33 = vperm.slane %v6191_v9, 0  ;;  %v798_v61 = vsub.f32 1.0, %v6189_v7  ;;  %v812_v17 = vperm.slane %v6189_v7, 0  ;;  %4561 = vmatpush.msk.msrb.mxu2 %vm8863_vm14, %v8803_v60  ;;  %4577 = vmatpush.msk.msrb.mxu3 %vm8864_vm6, %v8803_v60 }
 0x1f7   : > { %vm787_vm2 = vcmp.lt.s32.totalorder %v785_v4, 15  ;;  %vm6221_vm11 = vcmp.eq.s32.totalorder %v5724_v36, %v791_v54  ;;  %v799_v41 = vperm.slane %v797_v40, 0  ;;  %vm6226_vm12 = vcmp.eq.s32.totalorder %v5495_v1, %v791_v54 }
 0x1f8   : > { %v788_v56 = vsel %vm787_vm2, %v785_v4, 15  ;;  %vm789_vm10 = vcmp.lt.s32.totalorder %v786_v43, 15  ;;  %vm6231_vm14 = vcmp.eq.s32.totalorder %v5724_v36, %v792_v33  ;;  %v800_v6 = vperm.slane %v798_v61, 0  ;;  %4578 = vmatpush.msk.msrb.mxu3 %vm8872_vm8, %v8803_v60 }
 0x1f9   : > { %vm8871_vm6 = vnez %v8750_v57  ;;  %891 = vmatmul.f32.gmra.mxu2 %v865_v24  ;;  %920 = vmatmul.f32.gmra.mxu3 %v866_v15  ;;  %v803_v62 = vsel %vm6221_vm11, %v799_v41, 0.0  ;;  %v805_v3 = vperm.slane %v788_v56, 0  ;;  %v833_v50 = vperm.slane %v788_v56, 1 }
 0x1fa   : > { %4562 = vmatpush.msk.msrb.mxu2 %vm8871_vm6, %v8803_v60  ;;  %v790_v30 = vsel %vm789_vm10, %v786_v43, 15  ;;  %v804_v4 = vsel %vm6231_vm14, %v800_v6, 0.0  ;;  %v801_v57 = vsel %vm6226_vm12, %v799_v41, 0.0  ;;  %vm8873_vm2 = vnez %v8755_v35 }
 0x1fb   : > { %v806_v54 = vperm.slane %v790_v30, 0  ;;  %v834_v28 = vperm.slane %v790_v30, 1  ;;  %vm8874_vm8 = vnez %v8757_v32  ;;  %vm809_vm11 = vcmp.eq.s32.totalorder %v5724_v36, %v805_v3 }
 0x1fc   : > { %4563 = vmatpush.msk.msrb.mxu2 %vm8873_vm2, %v8803_v60  ;;  %4579 = vmatpush.msk.msrb.mxu3 %vm8874_vm8, %v8803_v60  ;;  %vm807_vm10 = vcmp.eq.s32.totalorder %v5495_v1, %v805_v3  ;;  %vm6256_vm6 = vcmp.eq.s32.totalorder %v5495_v1, %v792_v33  ;;  %v821_v15 = vperm.slane %v6187_v37, 1  ;;  %v815_v43 = vsel %vm809_vm11, %v811_v21, 0.0 }
 0x1fd   : > { %vm810_vm12 = vcmp.eq.s32.totalorder %v5724_v36, %v806_v54  ;;  %v813_v2 = vsel %vm807_vm10, %v811_v21, 0.0  ;;  %v802_v41 = vsel %vm6256_vm6, %v800_v6, 0.0  ;;  %vm8877_vm14 = vnez %v8759_v0 }
 0x1fe   : > { %4564 = vmatpush.msk.msrb.mxu2 %vm8877_vm14, %v8803_v60  ;;  %vm8878_vm8 = vnez %v8761_v44  ;;  %v819_v33 = vadd.f32 %v815_v43, %v803_v62  ;;  %v816_v14 = vsel %vm810_vm12, %v812_v17, 0.0  ;;  %v817_v56 = vadd.f32 %v813_v2, %v801_v57  ;;  %v8886_v2 = vld [vmem:[#allocation21_spill] sm:$0xff] }
 0x1ff   : > { %4580 = vmatpush.msk.msrb.mxu3 %vm8878_vm8, %v8803_v60  ;;  %vm808_vm2 = vcmp.eq.s32.totalorder %v5495_v1, %v806_v54  ;;  %v820_v37 = vadd.f32 %v816_v14, %v804_v4  ;;  %vm6272_vm11 = vcmp.eq.s32.totalorder %v5495_v1, %v821_v15  ;;  %v827_v6 = vperm.slane %v797_v40, 1 }
 0x200   : > { %v814_v51 = vsel %vm808_vm2, %v812_v17, 0.0  ;;  %vm8881_vm6 = vnez %v8764_v19  ;;  %vm8882_vm10 = vnez %v8767_v13  ;;  %953 = vmatpush.msrb.mxu0 %v819_v33  ;;  %vm835_vm12 = vcmp.eq.s32.totalorder %v5495_v1, %v833_v50 }
 0x201   : > { %4565 = vmatpush.msk.msrb.mxu2 %vm8881_vm6, %v8803_v60  ;;  %4581 = vmatpush.msk.msrb.mxu3 %vm8882_vm10, %v8803_v60  ;;  %v818_v57 = vadd.f32 %v814_v51, %v802_v41  ;;  %v839_v17 = vperm.slane %v6185_v45, 1  ;;  %v822_v62 = vperm.slane %v6191_v9, 1  ;;  %v829_v40 = vsel %vm6272_vm11, %v827_v6, 0.0  ;;  %v8888_v41 = vld [vmem:[#allocation22_spill] sm:$0xff] }
 0x202   : > { %982 = vmatpush.msrb.mxu1 %v820_v37  ;;  %v828_v3 = vperm.slane %v798_v61, 1  ;;  %vm836_vm2 = vcmp.eq.s32.totalorder %v5495_v1, %v834_v28  ;;  %v840_v30 = vperm.slane %v6189_v7, 1  ;;  %vm8883_vm10 = vnez %v8770_v34  ;;  %894 = vmatmul.f32.gmra.mxu2 %v6195_v27 }
 0x203   : > { %4566 = vmatpush.msk.msrb.mxu2 %vm8883_vm10, %v8803_v60  ;;  %923 = vmatmul.f32.gmra.mxu3 %v6198_v11  ;;  %v841_v45 = vsel %vm835_vm12, %v839_v17, 0.0  ;;  %vm824_vm6 = vcmp.eq.s32.totalorder %v5495_v1, %v822_v62  ;;  %vm825_vm8 = vcmp.eq.s32.totalorder %v5724_v36, %v821_v15  ;;  %vm837_vm11 = vcmp.eq.s32.totalorder %v5724_v36, %v833_v50 }
 0x204   : > { %954 = vmatpush.msrb.mxu0 %v817_v56  ;;  %983 = vmatpush.msrb.mxu1 %v818_v57  ;;  %v845_v9 = vadd.f32 %v841_v45, %v829_v40  ;;  %v830_v61 = vsel %vm824_vm6, %v828_v3, 0.0  ;;  %v842_v7 = vsel %vm836_vm2, %v840_v30, 0.0  ;;  %v831_v4 = vsel %vm825_vm8, %v827_v6, 0.0 }
 0x205   : > { %v846_v54 = vadd.f32 %v842_v7, %v830_v61  ;;  %v843_v24 = vsel %vm837_vm11, %v839_v17, 0.0  ;;  %vm826_vm10 = vcmp.eq.s32.totalorder %v5724_v36, %v822_v62  ;;  %vm838_vm14 = vcmp.eq.s32.totalorder %v5724_v36, %v834_v28  ;;  %4582 = vmatpush.msk.msrb.mxu3 %vm8843_vm9, %v8803_v60  ;;  %4567 = vmatpush.msk.msrb.mxu2 %vm8846_vm13, %v8803_v60 }
 0x206   : > { %v847_v27 = vadd.f32 %v843_v24, %v831_v4  ;;  %v832_v11 = vsel %vm826_vm10, %v828_v3, 0.0  ;;  %v844_v50 = vsel %vm838_vm14, %v840_v30, 0.0  ;;  %vm8887_vm8 = vnez %v8886_v2 }
 0x207   : > { %v848_v15 = vadd.f32 %v844_v50, %v832_v11  ;;  %4583 = vmatpush.msk.msrb.mxu3 %vm8847_vm15, %v8803_v60  ;;  %4568 = vmatpush.msk.msrb.mxu2 %vm8822_vm3, %v8803_v60  ;;  %vm8889_vm14 = vnez %v8888_v41  ;;  %vm8890_vm6 = vcmask 130048  }
 0x208   : > { %vm8891_vm10 = vmmov %vm8890_vm6 }
 0x209   : > { %4584 = vmatpush.msk.msrb.mxu3 %vm8848_vm4, %v8803_v60  ;;  %4569 = vmatpush.msk.msrb.mxu2 %vm8824_vm1, %v8803_v60  ;;  %vm8892_vm12 = vmmov %vm8890_vm6 }
 0x20a   : > { %vm8893_vm2 = vmmov %vm8890_vm6 }
 0x20b   : > { %4585 = vmatpush.msk.msrb.mxu3 %vm8825_vm0, %v8803_v60  ;;  %4570 = vmatpush.msk.msrb.mxu2 %vm8887_vm8, %v8803_v60  ;;  %vm8894_vm11 = vmmov %vm8893_vm2 }
 0x20d   : > { %4586 = vmatpush.msk.msrb.mxu3 %vm8889_vm14, %v8803_v60  ;;  %vm8895_vm14 = vmmov %vm8893_vm2 }
 0x26c   : > { %v886_v33 = vpop.f32.mrf.mxu2  ;;  %v915_v14 = vpop.f32.mrf.mxu3 }
 0x26d   : > { %v916_v56 = vadd.f32 %v915_v14, %v886_v33 }
 0x26f   : > { %4507 = vmatmul.msk.f32.vlgmr.msrb.gmra.mxu0 %vm8890_vm6, %v916_v56  ;;  %4511 = vmatmul.msk.f32.vlgmr.msrb.gmra.mxu1 %vm8891_vm10, %v916_v56  ;;  %vm8896_vm6 = vmmov %vm8893_vm2 }
 0x270   : > { %vm8897_vm10 = vmmov %vm8893_vm2 }
 0x274   : > { %v889_v37 = vpop.f32.mrf.mxu2  ;;  %v918_v51 = vpop.f32.mrf.mxu3 }
 0x275   : > { %v919_v21 = vadd.f32 %v918_v51, %v889_v37 }
 0x277   : > { %4508 = vmatmul.msk.f32.gmra.mxu0 %vm8892_vm12, %v919_v21  ;;  %4512 = vmatmul.msk.f32.gmra.mxu1 %vm8893_vm2, %v919_v21  ;;  %vm8900_vm2 = vcmask 1041408  }
 0x27c   : > { %v892_v6 = vpop.f32.mrf.mxu2  ;;  %v921_v57 = vpop.f32.mrf.mxu3 }
 0x27d   : > { %v922_v17 = vadd.f32 %v921_v57, %v892_v6 }
 0x27f   : > { %4509 = vmatmul.msk.f32.gmra.mxu0 %vm8894_vm11, %v922_v17  ;;  %4513 = vmatmul.msk.f32.gmra.mxu1 %vm8895_vm14, %v922_v17  ;;  %vm8898_vm14 = vcmask 1040384   ;;  %vm8901_vm11 = vnez %v8725_v20 }
 0x280   : > { %vm8899_vm12 = vmmov %vm8898_vm14 }
 0x285   : > { %v895_v62 = vpop.f32.mrf.mxu2 }
 0x286   : > { %v924_v40 = vpop.f32.mrf.mxu3 }
 0x287   : > { %v925_v3 = vadd.f32 %v924_v40, %v895_v62 }
 0x289   : > { %4510 = vmatmul.msk.f32.gmra.mxu0 %vm8896_vm6, %v925_v3  ;;  %4514 = vmatmul.msk.f32.gmra.mxu1 %vm8897_vm10, %v925_v3  ;;  %vm8902_vm6 = vnez %v8727_v23  ;;  %vm8903_vm10 = vnez %v8729_v26 }
 0x2ec   : > { %v956_v30 = vpop.f32.mrf.mxu0  ;;  %v985_v45 = vpop.f32.mrf.mxu1 }
 0x2ed   : > { %v997_v4 = vmul.f32 %v956_v30, %v845_v9  ;;  %v998_v24 = vmul.f32 %v985_v45, %v846_v54 }
 0x2f4   : > { %v959_v61 = vpop.f32.mrf.mxu0  ;;  %v988_v7 = vpop.f32.mrf.mxu1 }
 0x2f5   : > { %v999_v11 = vmul.f32 %v959_v61, %v847_v27  ;;  %v1000_v50 = vmul.f32 %v988_v7, %v848_v15 }
 0x2f7   : > { %v1001_v33 = vadd.f32 %v999_v11, %v997_v4  ;;  %v1008_v14 = vadd.f32 %v1000_v50, %v998_v24 }
 0x2f9   : > { %v1002_v51 = vrot.slane %v1001_v33, 4  ;;  %v1009_v21 = vrot.slane %v1008_v14, 4 }
 0x2fb   : > { %v1003_v6 = vadd.f32 %v1002_v51, %v1001_v33  ;;  %v1010_v57 = vadd.f32 %v1009_v21, %v1008_v14 }
 0x2fc   : > { %v962_v56 = vpop.f32.mrf.mxu0  ;;  %v991_v37 = vpop.f32.mrf.mxu1 }
 0x2fd   : > { %v1015_v40 = vmul.f32 %v962_v56, %v845_v9  ;;  %v1016_v3 = vmul.f32 %v991_v37, %v846_v54  ;;  %v1004_v43 = vrot.slane %v1003_v6, 2  ;;  %v1011_v28 = vrot.slane %v1010_v57, 2 }
 0x2ff   : > { %v1005_v4 = vadd.f32 %v1004_v43, %v1003_v6  ;;  %v1012_v24 = vadd.f32 %v1011_v28, %v1010_v57 }
 0x301   : > { %v1006_v33 = vrot.slane %v1005_v4, 1  ;;  %v1013_v14 = vrot.slane %v1012_v24, 1 }
 0x306   : > { %v965_v17 = vpop.f32.mrf.mxu0  ;;  %v994_v62 = vpop.f32.mrf.mxu1 }
 0x307   : > { %v1017_v41 = vmul.f32 %v965_v17, %v847_v27  ;;  %v1018_v2 = vmul.f32 %v994_v62, %v848_v15  ;;  %v1007_v27 = vadd.f32 %v1006_v33, %v1005_v4  ;;  %v1014_v15 = vadd.f32 %v1013_v14, %v1012_v24 }
 0x309   : > { %v1019_v30 = vadd.f32 %v1017_v41, %v1015_v40  ;;  %v1026_v45 = vadd.f32 %v1018_v2, %v1016_v3 }
 0x30b   : > { %v1020_v61 = vrot.slane %v1019_v30, 4  ;;  %v1027_v7 = vrot.slane %v1026_v45, 4 }
 0x30d   : > { %v1021_v11 = vadd.f32 %v1020_v61, %v1019_v30  ;;  %v1028_v50 = vadd.f32 %v1027_v7, %v1026_v45 }
 0x30f   : > { %v1022_v39 = vrot.slane %v1021_v11, 2  ;;  %v1029_v25 = vrot.slane %v1028_v50, 2 }
 0x311   : > { %v1023_v51 = vadd.f32 %v1022_v39, %v1021_v11  ;;  %v1030_v21 = vadd.f32 %v1029_v25, %v1028_v50 }
 0x313   : > { %v1024_v9 = vrot.slane %v1023_v51, 1  ;;  %v1031_v54 = vrot.slane %v1030_v21, 1 }
 0x315   : > { %v1025_v56 = vadd.f32 %v1024_v9, %v1023_v51  ;;  %v1032_v37 = vadd.f32 %v1031_v54, %v1030_v21 }
 0x317   : > { %v1033_v2 = vsel %vm8898_vm14, %v1007_v27, %v1025_v56  ;;  %v1034_v41 = vsel %vm8899_vm12, %v1014_v15, %v1032_v37  ;;  %vm8904_vm14 = vnez %v8731_v38  ;;  %vm8905_vm12 = vnez %v8733_v42 }
 0x318   : > { %v1037_v43 = vrot.slane %v1034_v41, 6 }
 0x31a   : > { %v1038_v28 = vsel %vm8900_vm2, %v1033_v2, %v1037_v43  ;;  %vm8906_vm2 = vnez %v8735_v46 }
 0x31b   : > { %v6338_v6 = vadd.f32 %v1038_v28, %v6141_v29 }
 0x31d   : > { %1042 = vst [vmem:[#allocation1] ss:$4 sm:$0xff] %v6338_v6  ;;  %v1123_v25 = vperm.slane %v6338_v6, 0  ;;  %v1124_v39 = vperm.slane %v6338_v6, 2  ;;  %v1129_v3 = vperm.slane %v6338_v6, 1  ;;  %v1130_v7 = vperm.slane %v6338_v6, 3 }
 0x31f   : > { %v1127_v57 = vperm.slane %v1123_v25, 0  ;;  %v1128_v17 = vperm.slane %v1124_v39, 0  ;;  %v1133_v11 = vperm.slane %v1129_v3, 1  ;;  %v1134_v21 = vperm.slane %v1130_v7, 1 }
 0x321   : > { %v1135_v62 = vmul.f32 %v1127_v57, %v5830_v22  ;;  %v1136_v40 = vmul.f32 %v1128_v17, %v5845_v31  ;;  %v1137_v50 = vmul.f32 %v1127_v57, %v8855_v52  ;;  %v1138_v33 = vmul.f32 %v1128_v17, %v8856_v47 }
 0x322   : > { %v1139_v27 = vmul.f32 %v1133_v11, %v5830_v22  ;;  %v1140_v41 = vmul.f32 %v1134_v21, %v5845_v31  ;;  %v6392_v43 = vmul.f32 %v1133_v11, %v8855_v52  ;;  %v6395_v28 = vmul.f32 %v1134_v21, %v8856_v47 }
 0x323   : > { %1159 = vmatmul.f32.vlgmr.msra.gmra.mxu2 %v1135_v62  ;;  %1188 = vmatmul.f32.vlgmr.msra.gmra.mxu3 %v1136_v40 }
 0x324   : > { %v1043_v30 = vld.sshfl [vmem:[#allocation1] sm:$0xff pattern:$0x73625140]  ;;  %v1044_v45 = vld.sshfl [vmem:[#allocation1 + $0x8] sm:$0xff pattern:$0x73625140]  ;;  %4595 = vmatpush.msk.msra.mxu2 %vm5508_vm5, %v8803_v60  ;;  %4611 = vmatpush.msk.msra.mxu3 %vm5516_vm7, %v8803_v60  ;;  %vm8922_vm7 = vnez %v8753_v48 }
 0x325   : > { %v1047_v29 = vadd.f32 %v1043_v30, %v8852_v59  ;;  %v1048_v61 = vadd.f32 %v1044_v45, %v8853_v5  ;;  %v8912_v45 = vld [vmem:[#allocation8_spill] sm:$0xff] }
 0x326   : > { %4596 = vmatpush.msk.msra.mxu2 %vm8901_vm11, %v8803_v60  ;;  %4612 = vmatpush.msk.msra.mxu3 %vm8902_vm6, %v8803_v60 }
 0x327   : > { %v1049_v4 = vmax.f32 %v1047_v29, 0.0  ;;  %v1050_v24 = vmax.f32 %v1048_v61, 0.0 }
 0x328   : > { %4597 = vmatpush.msk.msra.mxu2 %vm8903_vm10, %v8803_v60  ;;  %4613 = vmatpush.msk.msra.mxu3 %vm8904_vm14, %v8803_v60  ;;  %vm8907_vm14 = vnez %v8737_v49  ;;  %vm8908_vm10 = vnez %v8739_v53 }
 0x329   : > { %v1051_v14 = vmin.f32 %v1049_v4, 15.0  ;;  %v1052_v51 = vmin.f32 %v1050_v24, 15.0 }
 0x32a   : > { %4598 = vmatpush.msk.msra.mxu2 %vm8905_vm12, %v8803_v60  ;;  %4614 = vmatpush.msk.msra.mxu3 %vm8906_vm2, %v8803_v60 }
 0x32b   : > { %1162 = vmatmul.f32.gmra.mxu2 %v1137_v50  ;;  %1191 = vmatmul.f32.gmra.mxu3 %v1138_v33  ;;  %v1053_v9 = vfloor.f32 %v1051_v14  ;;  %v1054_v54 = vfloor.f32 %v1052_v51  ;;  %v8920_v50 = vld [vmem:[#allocation9_spill] sm:$0xff] }
 0x32c   : > { %4599 = vmatpush.msk.msra.mxu2 %vm8907_vm14, %v8803_v60  ;;  %4615 = vmatpush.msk.msra.mxu3 %vm8908_vm10, %v8803_v60  ;;  %vm8909_vm14 = vnez %v8741_v58  ;;  %vm8910_vm10 = vnez %v8743_v63 }
 0x32d   : > { %v6382_v15 = vsub.f32 %v1051_v14, %v1053_v9  ;;  %v6384_v56 = vcvt.f32.s32 %v1053_v9  ;;  %v6386_v37 = vsub.f32 %v1052_v51, %v1054_v54  ;;  %v6388_v2 = vcvt.f32.s32 %v1054_v54 }
 0x32e   : > { %4600 = vmatpush.msk.msra.mxu2 %vm8909_vm14, %v8803_v60  ;;  %4616 = vmatpush.msk.msra.mxu3 %vm8910_vm10, %v8803_v60  ;;  %vm8911_vm14 = vnez %v8745_v10  ;;  %vm8913_vm10 = vnez %v8912_v45 }
 0x32f   : > { %v1059_v25 = vadd.s32 1, %v6384_v56  ;;  %v1065_v39 = vperm.slane %v6384_v56, 0  ;;  %v1071_v57 = vsub.f32 1.0, %v6382_v15  ;;  %v1085_v17 = vperm.slane %v6382_v15, 0 }
 0x330   : > { %v1060_v62 = vadd.s32 1, %v6388_v2  ;;  %v1066_v40 = vperm.slane %v6388_v2, 0  ;;  %v1072_v3 = vsub.f32 1.0, %v6386_v37  ;;  %v1086_v30 = vperm.slane %v6386_v37, 0  ;;  %4601 = vmatpush.msk.msra.mxu2 %vm8911_vm14, %v8803_v60  ;;  %4617 = vmatpush.msk.msra.mxu3 %vm8913_vm10, %v8803_v60 }
 0x331   : > { %vm1061_vm2 = vcmp.lt.s32.totalorder %v1059_v25, 15  ;;  %vm6418_vm12 = vcmp.eq.s32.totalorder %v5724_v36, %v1065_v39  ;;  %v1073_v61 = vperm.slane %v1071_v57, 0  ;;  %vm6423_vm6 = vcmp.eq.s32.totalorder %v5495_v1, %v1065_v39 }
 0x332   : > { %v1062_v4 = vsel %vm1061_vm2, %v1059_v25, 15  ;;  %vm1063_vm11 = vcmp.lt.s32.totalorder %v1060_v62, 15  ;;  %vm6428_vm14 = vcmp.eq.s32.totalorder %v5724_v36, %v1066_v40  ;;  %v1074_v11 = vperm.slane %v1072_v3, 0  ;;  %4618 = vmatpush.msk.msra.mxu3 %vm8922_vm7, %v8803_v60 }
 0x333   : > { %vm8921_vm10 = vnez %v8920_v50  ;;  %1165 = vmatmul.f32.gmra.mxu2 %v1139_v27  ;;  %1194 = vmatmul.f32.gmra.mxu3 %v1140_v41  ;;  %v1077_v33 = vsel %vm6418_vm12, %v1073_v61, 0.0  ;;  %v1079_v14 = vperm.slane %v1062_v4, 0  ;;  %v1064_v51 = vsel %vm1063_vm11, %v1060_v62, 15 }
 0x334   : > { %4602 = vmatpush.msk.msra.mxu2 %vm8921_vm10, %v8803_v60  ;;  %v1075_v21 = vsel %vm6423_vm6, %v1073_v61, 0.0  ;;  %v1078_v9 = vsel %vm6428_vm14, %v1074_v11, 0.0  ;;  %v1080_v54 = vperm.slane %v1064_v51, 0  ;;  %vm6445_vm2 = vcmp.eq.s32.totalorder %v5495_v1, %v1066_v40 }
 0x335   : > { %v1095_v27 = vperm.slane %v6384_v56, 1  ;;  %vm8925_vm7 = vnez %v8755_v35  ;;  %vm8926_vm11 = vnez %v8757_v32  ;;  %vm1083_vm6 = vcmp.eq.s32.totalorder %v5724_v36, %v1079_v14 }
 0x336   : > { %4603 = vmatpush.msk.msra.mxu2 %vm8925_vm7, %v8803_v60  ;;  %4619 = vmatpush.msk.msra.mxu3 %vm8926_vm11, %v8803_v60  ;;  %vm1081_vm14 = vcmp.eq.s32.totalorder %v5495_v1, %v1079_v14  ;;  %v1076_v41 = vsel %vm6445_vm2, %v1074_v11, 0.0  ;;  %v1101_v39 = vperm.slane %v1071_v57, 1  ;;  %v1089_v62 = vsel %vm1083_vm6, %v1085_v17, 0.0 }
 0x337   : > { %vm1084_vm12 = vcmp.eq.s32.totalorder %v5724_v36, %v1080_v54  ;;  %v1087_v56 = vsel %vm1081_vm14, %v1085_v17, 0.0  ;;  %vm1082_vm10 = vcmp.eq.s32.totalorder %v5495_v1, %v1080_v54  ;;  %vm8927_vm7 = vnez %v8759_v0 }
 0x338   : > { %4604 = vmatpush.msk.msra.mxu2 %vm8927_vm7, %v8803_v60  ;;  %vm8928_vm11 = vnez %v8761_v44  ;;  %v1093_v40 = vadd.f32 %v1089_v62, %v1077_v33  ;;  %v1090_v29 = vsel %vm1084_vm12, %v1086_v30, 0.0  ;;  %v1091_v61 = vadd.f32 %v1087_v56, %v1075_v21 }
 0x339   : > { %4620 = vmatpush.msk.msra.mxu3 %vm8928_vm11, %v8803_v60  ;;  %v1088_v7 = vsel %vm1082_vm10, %v1086_v30, 0.0  ;;  %v1094_v24 = vadd.f32 %v1090_v29, %v1078_v9  ;;  %vm6469_vm2 = vcmp.eq.s32.totalorder %v5495_v1, %v1095_v27  ;;  %v1107_v17 = vperm.slane %v1062_v4, 1 }
 0x33a   : > { %v1092_v57 = vadd.f32 %v1088_v7, %v1076_v41  ;;  %vm8931_vm6 = vnez %v8764_v19  ;;  %vm8932_vm14 = vnez %v8767_v13  ;;  %1227 = vmatpush.msra.mxu0 %v1093_v40  ;;  %v1103_v30 = vsel %vm6469_vm2, %v1101_v39, 0.0 }
 0x33b   : > { %4605 = vmatpush.msk.msra.mxu2 %vm8931_vm6, %v8803_v60  ;;  %4621 = vmatpush.msk.msra.mxu3 %vm8932_vm14, %v8803_v60  ;;  %v1113_v33 = vperm.slane %v6382_v15, 1  ;;  %v1096_v14 = vperm.slane %v6388_v2, 1  ;;  %v1102_v21 = vperm.slane %v1072_v3, 1  ;;  %vm1109_vm10 = vcmp.eq.s32.totalorder %v5495_v1, %v1107_v17 }
 0x33c   : > { %1256 = vmatpush.msra.mxu1 %v1094_v24  ;;  %v1108_v4 = vperm.slane %v1064_v51, 1  ;;  %v1114_v9 = vperm.slane %v6386_v37, 1  ;;  %vm1099_vm12 = vcmp.eq.s32.totalorder %v5724_v36, %v1095_v27  ;;  %vm8933_vm14 = vnez %v8770_v34  ;;  %1168 = vmatmul.f32.gmra.mxu2 %v6392_v43 }
 0x33d   : > { %4606 = vmatpush.msk.msra.mxu2 %vm8933_vm14, %v8803_v60  ;;  %1197 = vmatmul.f32.gmra.mxu3 %v6395_v28  ;;  %v1115_v15 = vsel %vm1109_vm10, %v1113_v33, 0.0  ;;  %vm1098_vm2 = vcmp.eq.s32.totalorder %v5495_v1, %v1096_v14  ;;  %v1105_v2 = vsel %vm1099_vm12, %v1101_v39, 0.0  ;;  %vm1111_vm6 = vcmp.eq.s32.totalorder %v5724_v36, %v1107_v17 }
 0x33e   : > { %1228 = vmatpush.msra.mxu0 %v1091_v61  ;;  %1257 = vmatpush.msra.mxu1 %v1092_v57  ;;  %v1119_v3 = vadd.f32 %v1115_v15, %v1103_v30  ;;  %v1104_v37 = vsel %vm1098_vm2, %v1102_v21, 0.0  ;;  %vm1110_vm11 = vcmp.eq.s32.totalorder %v5495_v1, %v1108_v4  ;;  %v1117_v51 = vsel %vm1111_vm6, %v1113_v33, 0.0  ;;  %v8939_v61 = vld [vmem:[#allocation22_spill] sm:$0xff] }
 0x33f   : > { %v1116_v54 = vsel %vm1110_vm11, %v1114_v9, 0.0  ;;  %v1121_v25 = vadd.f32 %v1117_v51, %v1105_v2  ;;  %vm1100_vm14 = vcmp.eq.s32.totalorder %v5724_v36, %v1096_v14  ;;  %vm1112_vm7 = vcmp.eq.s32.totalorder %v5724_v36, %v1108_v4  ;;  %4622 = vmatpush.msk.msra.mxu3 %vm8843_vm9, %v8803_v60  ;;  %4607 = vmatpush.msk.msra.mxu2 %vm8846_vm13, %v8803_v60 }
 0x340   : > { %v1120_v43 = vadd.f32 %v1116_v54, %v1104_v37  ;;  %v1106_v28 = vsel %vm1100_vm14, %v1102_v21, 0.0  ;;  %v1118_v27 = vsel %vm1112_vm7, %v1114_v9, 0.0  ;;  %vm8940_vm7 = vnez %v8939_v61 }
 0x341   : > { %v1122_v41 = vadd.f32 %v1118_v27, %v1106_v28  ;;  %4623 = vmatpush.msk.msra.mxu3 %vm8847_vm15, %v8803_v60  ;;  %4608 = vmatpush.msk.msra.mxu2 %vm8822_vm3, %v8803_v60  ;;  %vm8941_vm11 = vcmask 130048  }
 0x342   : > { %vm8942_vm6 = vmmov %vm8941_vm11 }
 0x343   : > { %4624 = vmatpush.msk.msra.mxu3 %vm8848_vm4, %v8803_v60  ;;  %4609 = vmatpush.msk.msra.mxu2 %vm8824_vm1, %v8803_v60  ;;  %vm8943_vm14 = vmmov %vm8942_vm6 }
 0x344   : > { %vm8944_vm10 = vmmov %vm8942_vm6 }
 0x345   : > { %4625 = vmatpush.msk.msra.mxu3 %vm8825_vm0, %v8803_v60  ;;  %4610 = vmatpush.msk.msra.mxu2 %vm8887_vm8, %v8803_v60  ;;  %vm8945_vm12 = vmmov %vm8942_vm6 }
 0x346   : > { %vm8946_vm2 = vmmov %vm8942_vm6 }
 0x347   : > { %4626 = vmatpush.msk.msra.mxu3 %vm8940_vm7, %v8803_v60 }
 0x3a6   : > { %v1160_v7 = vpop.f32.mrf.mxu2  ;;  %v1189_v24 = vpop.f32.mrf.mxu3 }
 0x3a7   : > { %v1190_v57 = vadd.f32 %v1189_v24, %v1160_v7 }
 0x3a9   : > { %4547 = vmatmul.msk.f32.vlgmr.msra.gmra.mxu0 %vm8941_vm11, %v1190_v57  ;;  %4551 = vmatmul.msk.f32.vlgmr.msra.gmra.mxu1 %vm8942_vm6, %v1190_v57  ;;  %vm8947_vm11 = vmmov %vm8946_vm2 }
 0x3aa   : > { %vm8948_vm6 = vmmov %vm8946_vm2 }
 0x3ae   : > { %v1163_v11 = vpop.f32.mrf.mxu2  ;;  %v1192_v17 = vpop.f32.mrf.mxu3 }
 0x3af   : > { %v1193_v30 = vadd.f32 %v1192_v17, %v1163_v11 }
 0x3b1   : > { %4548 = vmatmul.msk.f32.gmra.mxu0 %vm8943_vm14, %v1193_v30  ;;  %4552 = vmatmul.msk.f32.gmra.mxu1 %vm8944_vm10, %v1193_v30  ;;  %vm8949_vm14 = vcmask 1040384  }
 0x3b2   : > { %vm8950_vm10 = vmmov %vm8949_vm14 }
 0x3b6   : > { %v1166_v33 = vpop.f32.mrf.mxu2  ;;  %v1195_v14 = vpop.f32.mrf.mxu3 }
 0x3b7   : > { %v1196_v21 = vadd.f32 %v1195_v14, %v1166_v33 }
 0x3b9   : > { %4549 = vmatmul.msk.f32.gmra.mxu0 %vm8945_vm12, %v1196_v21  ;;  %4553 = vmatmul.msk.f32.gmra.mxu1 %vm8946_vm2, %v1196_v21  ;;  %vm8951_vm12 = vcmask 1041408   ;;  %vm8952_vm2 = vnez %v8723_v16 }
 0x3bf   : > { %v1169_v4 = vpop.f32.mrf.mxu2 }
 0x3c0   : > { %v1198_v9 = vpop.f32.mrf.mxu3 }
 0x3c1   : > { %v1199_v15 = vadd.f32 %v1198_v9, %v1169_v4 }
 0x3c3   : > { %4550 = vmatmul.msk.f32.gmra.mxu0 %vm8947_vm11, %v1199_v15  ;;  %4554 = vmatmul.msk.f32.gmra.mxu1 %vm8948_vm6, %v1199_v15  ;;  %vm8953_vm11 = vnez %v8725_v20  ;;  %vm8954_vm6 = vnez %v8727_v23 }
 0x426   : > { %v1230_v2 = vpop.f32.mrf.mxu0  ;;  %v1259_v37 = vpop.f32.mrf.mxu1 }
 0x427   : > { %v1271_v28 = vmul.f32 %v1230_v2, %v1119_v3  ;;  %v1272_v27 = vmul.f32 %v1259_v37, %v1120_v43 }
 0x42e   : > { %v1233_v51 = vpop.f32.mrf.mxu0  ;;  %v1262_v54 = vpop.f32.mrf.mxu1 }
 0x42f   : > { %v1273_v7 = vmul.f32 %v1233_v51, %v1121_v25  ;;  %v1274_v24 = vmul.f32 %v1262_v54, %v1122_v41 }
 0x431   : > { %v1275_v57 = vadd.f32 %v1273_v7, %v1271_v28  ;;  %v1282_v11 = vadd.f32 %v1274_v24, %v1272_v27 }
 0x433   : > { %v1276_v33 = vrot.slane %v1275_v57, 4  ;;  %v1283_v14 = vrot.slane %v1282_v11, 4 }
 0x435   : > { %v1277_v21 = vadd.f32 %v1276_v33, %v1275_v57  ;;  %v1284_v4 = vadd.f32 %v1283_v14, %v1282_v11 }
 0x436   : > { %v1236_v17 = vpop.f32.mrf.mxu0  ;;  %v1265_v30 = vpop.f32.mrf.mxu1 }
 0x437   : > { %v1289_v29 = vmul.f32 %v1236_v17, %v1119_v3  ;;  %v1290_v15 = vmul.f32 %v1265_v30, %v1120_v43  ;;  %v1278_v62 = vrot.slane %v1277_v21, 2  ;;  %v1285_v39 = vrot.slane %v1284_v4, 2 }
 0x439   : > { %v1279_v28 = vadd.f32 %v1278_v62, %v1277_v21  ;;  %v1286_v27 = vadd.f32 %v1285_v39, %v1284_v4 }
 0x43b   : > { %v1280_v57 = vrot.slane %v1279_v28, 1  ;;  %v1287_v11 = vrot.slane %v1286_v27, 1 }
 0x440   : > { %v1239_v9 = vpop.f32.mrf.mxu0  ;;  %v1268_v61 = vpop.f32.mrf.mxu1 }
 0x441   : > { %v1291_v40 = vmul.f32 %v1239_v9, %v1121_v25  ;;  %v1292_v56 = vmul.f32 %v1268_v61, %v1122_v41  ;;  %v1281_v25 = vadd.f32 %v1280_v57, %v1279_v28  ;;  %v1288_v41 = vadd.f32 %v1287_v11, %v1286_v27 }
 0x443   : > { %v1293_v2 = vadd.f32 %v1291_v40, %v1289_v29  ;;  %v1300_v37 = vadd.f32 %v1292_v56, %v1290_v15 }
 0x445   : > { %v1294_v51 = vrot.slane %v1293_v2, 4  ;;  %v1301_v54 = vrot.slane %v1300_v37, 4 }
 0x447   : > { %v1295_v7 = vadd.f32 %v1294_v51, %v1293_v2  ;;  %v1302_v24 = vadd.f32 %v1301_v54, %v1300_v37 }
 0x449   : > { %v1296_v18 = vrot.slane %v1295_v7, 2  ;;  %v1303_v55 = vrot.slane %v1302_v24, 2 }
 0x44b   : > { %v1297_v33 = vadd.f32 %v1296_v18, %v1295_v7  ;;  %v1304_v14 = vadd.f32 %v1303_v55, %v1302_v24 }
 0x44d   : > { %v1298_v3 = vrot.slane %v1297_v33, 1  ;;  %v1305_v43 = vrot.slane %v1304_v14, 1 }
 0x44f   : > { %v1299_v61 = vadd.f32 %v1298_v3, %v1297_v33  ;;  %v1306_v17 = vadd.f32 %v1305_v43, %v1304_v14 }
 0x451   : > { %v1307_v56 = vsel %vm8949_vm14, %v1281_v25, %v1299_v61  ;;  %v1308_v40 = vsel %vm8950_vm10, %v1288_v41, %v1306_v17  ;;  %vm8955_vm14 = vnez %v8729_v26  ;;  %vm8956_vm10 = vnez %v8731_v38 }
 0x452   : > { %v1311_v62 = vrot.slane %v1308_v40, 6 }
 0x454   : > { %v1312_v39 = vsel %vm8951_vm12, %v1307_v56, %v1311_v62  ;;  %vm8957_vm12 = vnez %v8733_v42 }
 0x455   : > { %v6535_v29 = vadd.f32 %v1312_v39, %v6338_v6 }
 0x457   : > { %1316 = vst [vmem:[#allocation1] ss:$4 sm:$0xff] %v6535_v29  ;;  %v1397_v55 = vperm.slane %v6535_v29, 0  ;;  %v1398_v18 = vperm.slane %v6535_v29, 2  ;;  %v1403_v15 = vperm.slane %v6535_v29, 1  ;;  %v1404_v54 = vperm.slane %v6535_v29, 3 }
 0x459   : > { %v1401_v30 = vperm.slane %v1397_v55, 0  ;;  %v1402_v21 = vperm.slane %v1398_v18, 0  ;;  %v1407_v7 = vperm.slane %v1403_v15, 1  ;;  %v1408_v14 = vperm.slane %v1404_v54, 1 }
 0x45b   : > { %v1409_v4 = vmul.f32 %v1401_v30, %v5830_v22  ;;  %v1410_v9 = vmul.f32 %v1402_v21, %v5845_v31  ;;  %v1411_v24 = vmul.f32 %v1401_v30, %v8855_v52  ;;  %v1412_v57 = vmul.f32 %v1402_v21, %v8856_v47 }
 0x45c   : > { %v1413_v25 = vmul.f32 %v1407_v7, %v5830_v22  ;;  %v1414_v40 = vmul.f32 %v1408_v14, %v5845_v31  ;;  %v6589_v62 = vmul.f32 %v1407_v7, %v8855_v52  ;;  %v6592_v39 = vmul.f32 %v1408_v14, %v8856_v47 }
 0x45d   : > { %1433 = vmatmul.f32.vlgmr.msrb.gmra.mxu2 %v1409_v4  ;;  %1462 = vmatmul.f32.vlgmr.msrb.gmra.mxu3 %v1410_v9 }
 0x45e   : > { %v1317_v2 = vld.sshfl [vmem:[#allocation1] sm:$0xff pattern:$0x73625140]  ;;  %v1318_v37 = vld.sshfl [vmem:[#allocation1 + $0x8] sm:$0xff pattern:$0x73625140]  ;;  %4635 = vmatpush.msk.msrb.mxu2 %vm5508_vm5, %v8803_v60  ;;  %4651 = vmatpush.msk.msrb.mxu3 %vm8952_vm2, %v8803_v60  ;;  %vm8972_vm5 = vnez %v8753_v48 }
 0x45f   : > { %v1321_v6 = vadd.f32 %v1317_v2, %v8852_v59  ;;  %v1322_v51 = vadd.f32 %v1318_v37, %v8853_v5 }
 0x460   : > { %4636 = vmatpush.msk.msrb.mxu2 %vm8953_vm11, %v8803_v60  ;;  %4652 = vmatpush.msk.msrb.mxu3 %vm8954_vm6, %v8803_v60  ;;  %vm8958_vm6 = vnez %v8735_v46 }
 0x461   : > { %v1323_v28 = vmax.f32 %v1321_v6, 0.0  ;;  %v1324_v27 = vmax.f32 %v1322_v51, 0.0 }
 0x462   : > { %4637 = vmatpush.msk.msrb.mxu2 %vm8955_vm14, %v8803_v60  ;;  %4653 = vmatpush.msk.msrb.mxu3 %vm8956_vm10, %v8803_v60  ;;  %vm8959_vm10 = vnez %v8737_v49  ;;  %vm8960_vm14 = vnez %v8739_v53 }
 0x463   : > { %v1325_v11 = vmin.f32 %v1323_v28, 15.0  ;;  %v1326_v33 = vmin.f32 %v1324_v27, 15.0 }
 0x464   : > { %4638 = vmatpush.msk.msrb.mxu2 %vm8957_vm12, %v8803_v60  ;;  %4654 = vmatpush.msk.msrb.mxu3 %vm8958_vm6, %v8803_v60 }
 0x465   : > { %1436 = vmatmul.f32.gmra.mxu2 %v1411_v24  ;;  %1465 = vmatmul.f32.gmra.mxu3 %v1412_v57  ;;  %v1327_v3 = vfloor.f32 %v1325_v11  ;;  %v1328_v43 = vfloor.f32 %v1326_v33 }
 0x466   : > { %4639 = vmatpush.msk.msrb.mxu2 %vm8959_vm10, %v8803_v60  ;;  %4655 = vmatpush.msk.msrb.mxu3 %vm8960_vm14, %v8803_v60  ;;  %vm8961_vm10 = vnez %v8741_v58  ;;  %vm8962_vm14 = vnez %v8743_v63 }
 0x467   : > { %v6579_v41 = vsub.f32 %v1325_v11, %v1327_v3  ;;  %v6581_v61 = vcvt.f32.s32 %v1327_v3  ;;  %v6583_v17 = vsub.f32 %v1326_v33, %v1328_v43  ;;  %v6585_v56 = vcvt.f32.s32 %v1328_v43 }
 0x468   : > { %4640 = vmatpush.msk.msrb.mxu2 %vm8961_vm10, %v8803_v60  ;;  %4656 = vmatpush.msk.msrb.mxu3 %vm8962_vm14, %v8803_v60  ;;  %vm8963_vm10 = vnez %v8745_v10  ;;  %vm8964_vm14 = vnez %v8912_v45 }
 0x469   : > { %v1333_v55 = vadd.s32 1, %v6581_v61  ;;  %v1339_v18 = vperm.slane %v6581_v61, 0  ;;  %v1345_v30 = vsub.f32 1.0, %v6579_v41  ;;  %v1359_v21 = vperm.slane %v6579_v41, 0 }
 0x46a   : > { %v1334_v4 = vadd.s32 1, %v6585_v56  ;;  %v1340_v9 = vperm.slane %v6585_v56, 0  ;;  %v1346_v15 = vsub.f32 1.0, %v6583_v17  ;;  %v1360_v2 = vperm.slane %v6583_v17, 0  ;;  %4641 = vmatpush.msk.msrb.mxu2 %vm8963_vm10, %v8803_v60  ;;  %4657 = vmatpush.msk.msrb.mxu3 %vm8964_vm14, %v8803_v60 }
 0x46b   : > { %vm1335_vm6 = vcmp.lt.s32.totalorder %v1333_v55, 15  ;;  %vm6615_vm12 = vcmp.eq.s32.totalorder %v5724_v36, %v1339_v18  ;;  %v1347_v6 = vperm.slane %v1345_v30, 0  ;;  %vm6620_vm11 = vcmp.eq.s32.totalorder %v5495_v1, %v1339_v18 }
 0x46c   : > { %v1336_v54 = vsel %vm1335_vm6, %v1333_v55, 15  ;;  %vm1337_vm2 = vcmp.lt.s32.totalorder %v1334_v4, 15  ;;  %vm6625_vm10 = vcmp.eq.s32.totalorder %v5724_v36, %v1340_v9  ;;  %v1348_v27 = vperm.slane %v1346_v15, 0  ;;  %4658 = vmatpush.msk.msrb.mxu3 %vm8972_vm5, %v8803_v60 }
 0x46d   : > { %vm8971_vm14 = vnez %v8920_v50  ;;  %1439 = vmatmul.f32.gmra.mxu2 %v1413_v25  ;;  %1468 = vmatmul.f32.gmra.mxu3 %v1414_v40  ;;  %v1351_v7 = vsel %vm6615_vm12, %v1347_v6, 0.0  ;;  %v1353_v24 = vperm.slane %v1336_v54, 0  ;;  %v1338_v57 = vsel %vm1337_vm2, %v1334_v4, 15 }
 0x46e   : > { %4642 = vmatpush.msk.msrb.mxu2 %vm8971_vm14, %v8803_v60  ;;  %v1349_v11 = vsel %vm6620_vm11, %v1347_v6, 0.0  ;;  %v1352_v33 = vsel %vm6625_vm10, %v1348_v27, 0.0  ;;  %v1354_v14 = vperm.slane %v1338_v57, 0  ;;  %vm6642_vm6 = vcmp.eq.s32.totalorder %v5495_v1, %v1340_v9 }
 0x46f   : > { %v1369_v43 = vperm.slane %v6581_v61, 1  ;;  %vm8975_vm5 = vnez %v8755_v35  ;;  %vm8976_vm2 = vnez %v8757_v32  ;;  %vm1357_vm11 = vcmp.eq.s32.totalorder %v5724_v36, %v1353_v24 }
 0x470   : > { %4643 = vmatpush.msk.msrb.mxu2 %vm8975_vm5, %v8803_v60  ;;  %4659 = vmatpush.msk.msrb.mxu3 %vm8976_vm2, %v8803_v60  ;;  %vm1355_vm10 = vcmp.eq.s32.totalorder %v5495_v1, %v1353_v24  ;;  %v1350_v25 = vsel %vm6642_vm6, %v1348_v27, 0.0  ;;  %v1375_v40 = vperm.slane %v1345_v30, 1  ;;  %v1363_v55 = vsel %vm1357_vm11, %v1359_v21, 0.0 }
 0x471   : > { %vm1358_vm12 = vcmp.eq.s32.totalorder %v5724_v36, %v1354_v14  ;;  %v1361_v61 = vsel %vm1355_vm10, %v1359_v21, 0.0  ;;  %vm1356_vm14 = vcmp.eq.s32.totalorder %v5495_v1, %v1354_v14  ;;  %vm8977_vm5 = vnez %v8759_v0 }
 0x472   : > { %4644 = vmatpush.msk.msrb.mxu2 %vm8977_vm5, %v8803_v60  ;;  %vm8978_vm2 = vnez %v8761_v44  ;;  %v1367_v18 = vadd.f32 %v1363_v55, %v1351_v7  ;;  %v1364_v4 = vsel %vm1358_vm12, %v1360_v2, 0.0  ;;  %v1365_v9 = vadd.f32 %v1361_v61, %v1349_v11 }
 0x473   : > { %4660 = vmatpush.msk.msrb.mxu3 %vm8978_vm2, %v8803_v60  ;;  %v1362_v37 = vsel %vm1356_vm14, %v1360_v2, 0.0  ;;  %v1368_v6 = vadd.f32 %v1364_v4, %v1352_v33  ;;  %vm6666_vm6 = vcmp.eq.s32.totalorder %v5495_v1, %v1369_v43  ;;  %v1381_v21 = vperm.slane %v1336_v54, 1 }
 0x474   : > { %v1366_v30 = vadd.f32 %v1362_v37, %v1350_v25  ;;  %vm8981_vm11 = vnez %v8764_v19  ;;  %vm8982_vm10 = vnez %v8767_v13  ;;  %1501 = vmatpush.msrb.mxu0 %v1367_v18  ;;  %v1377_v2 = vsel %vm6666_vm6, %v1375_v40, 0.0 }
 0x475   : > { %4645 = vmatpush.msk.msrb.mxu2 %vm8981_vm11, %v8803_v60  ;;  %4661 = vmatpush.msk.msrb.mxu3 %vm8982_vm10, %v8803_v60  ;;  %v1387_v28 = vperm.slane %v6579_v41, 1  ;;  %v1370_v27 = vperm.slane %v6585_v56, 1  ;;  %v1376_v7 = vperm.slane %v1346_v15, 1  ;;  %vm1383_vm14 = vcmp.eq.s32.totalorder %v5495_v1, %v1381_v21 }
 0x476   : > { %1530 = vmatpush.msrb.mxu1 %v1368_v6  ;;  %v1382_v54 = vperm.slane %v1338_v57, 1  ;;  %v1388_v24 = vperm.slane %v6583_v17, 1  ;;  %vm1373_vm12 = vcmp.eq.s32.totalorder %v5724_v36, %v1369_v43  ;;  %vm8983_vm10 = vnez %v8770_v34  ;;  %1442 = vmatmul.f32.gmra.mxu2 %v6589_v62 }
 0x477   : > { %4646 = vmatpush.msk.msrb.mxu2 %vm8983_vm10, %v8803_v60  ;;  %1471 = vmatmul.f32.gmra.mxu3 %v6592_v39  ;;  %v1389_v41 = vsel %vm1383_vm14, %v1387_v28, 0.0  ;;  %vm1372_vm6 = vcmp.eq.s32.totalorder %v5495_v1, %v1370_v27  ;;  %v1379_v56 = vsel %vm1373_vm12, %v1375_v40, 0.0  ;;  %vm1385_vm11 = vcmp.eq.s32.totalorder %v5724_v36, %v1381_v21 }
 0x478   : > { %1502 = vmatpush.msrb.mxu0 %v1365_v9  ;;  %1531 = vmatpush.msrb.mxu1 %v1366_v30  ;;  %v1393_v15 = vadd.f32 %v1389_v41, %v1377_v2  ;;  %v1378_v17 = vsel %vm1372_vm6, %v1376_v7, 0.0  ;;  %vm1384_vm2 = vcmp.eq.s32.totalorder %v5495_v1, %v1382_v54  ;;  %v1391_v57 = vsel %vm1385_vm11, %v1387_v28, 0.0 }
 0x479   : > { %v1390_v11 = vsel %vm1384_vm2, %v1388_v24, 0.0  ;;  %v1395_v33 = vadd.f32 %v1391_v57, %v1379_v56  ;;  %vm1374_vm10 = vcmp.eq.s32.totalorder %v5724_v36, %v1370_v27  ;;  %vm1386_vm5 = vcmp.eq.s32.totalorder %v5724_v36, %v1382_v54  ;;  %4662 = vmatpush.msk.msrb.mxu3 %vm8843_vm9, %v8803_v60  ;;  %4647 = vmatpush.msk.msrb.mxu2 %vm8846_vm13, %v8803_v60 }
 0x47a   : > { %v1394_v39 = vadd.f32 %v1390_v11, %v1378_v17  ;;  %v1380_v14 = vsel %vm1374_vm10, %v1376_v7, 0.0  ;;  %v1392_v3 = vsel %vm1386_vm5, %v1388_v24, 0.0  ;;  %vm8992_vm5 = vcmask 130048  }
 0x47b   : > { %v1396_v43 = vadd.f32 %v1392_v3, %v1380_v14  ;;  %4663 = vmatpush.msk.msrb.mxu3 %vm8847_vm15, %v8803_v60  ;;  %4648 = vmatpush.msk.msrb.mxu2 %vm8822_vm3, %v8803_v60  ;;  %vm8993_vm2 = vmmov %vm8992_vm5 }
 0x47c   : > { %vm8994_vm11 = vmmov %vm8993_vm2 }
 0x47d   : > { %4664 = vmatpush.msk.msrb.mxu3 %vm8848_vm4, %v8803_v60  ;;  %4649 = vmatpush.msk.msrb.mxu2 %vm8824_vm1, %v8803_v60  ;;  %vm8995_vm10 = vmmov %vm8993_vm2 }
 0x47e   : > { %vm8996_vm14 = vmmov %vm8993_vm2 }
 0x47f   : > { %4665 = vmatpush.msk.msrb.mxu3 %vm8825_vm0, %v8803_v60  ;;  %4650 = vmatpush.msk.msrb.mxu2 %vm8887_vm8, %v8803_v60  ;;  %vm8997_vm12 = vmmov %vm8993_vm2 }
 0x480   : > { %vm8998_vm6 = vmmov %vm8993_vm2 }
 0x481   : > { %4666 = vmatpush.msk.msrb.mxu3 %vm8940_vm7, %v8803_v60 }
 0x4e0   : > { %v1434_v37 = vpop.f32.mrf.mxu2  ;;  %v1463_v6 = vpop.f32.mrf.mxu3 }
 0x4e1   : > { %v1464_v30 = vadd.f32 %v1463_v6, %v1434_v37 }
 0x4e3   : > { %4587 = vmatmul.msk.f32.vlgmr.msrb.gmra.mxu0 %vm8992_vm5, %v1464_v30  ;;  %4591 = vmatmul.msk.f32.vlgmr.msrb.gmra.mxu1 %vm8993_vm2, %v1464_v30  ;;  %vm8999_vm5 = vmmov %vm8993_vm2  ;;  %vm9000_vm2 = vcmask 1040384  }
 0x4e8   : > { %v1437_v51 = vpop.f32.mrf.mxu2  ;;  %v1466_v21 = vpop.f32.mrf.mxu3 }
 0x4e9   : > { %v1467_v2 = vadd.f32 %v1466_v21, %v1437_v51 }
 0x4eb   : > { %4588 = vmatmul.msk.f32.gmra.mxu0 %vm8994_vm11, %v1467_v2  ;;  %4592 = vmatmul.msk.f32.gmra.mxu1 %vm8995_vm10, %v1467_v2  ;;  %vm9001_vm11 = vmmov %vm9000_vm2  ;;  %vm9002_vm10 = vcmask 1041408  }
 0x4f0   : > { %v1440_v28 = vpop.f32.mrf.mxu2  ;;  %v1469_v27 = vpop.f32.mrf.mxu3 }
 0x4f1   : > { %v1470_v7 = vadd.f32 %v1469_v27, %v1440_v28 }
 0x4f3   : > { %4589 = vmatmul.msk.f32.gmra.mxu0 %vm8996_vm14, %v1470_v7  ;;  %4593 = vmatmul.msk.f32.gmra.mxu1 %vm8997_vm12, %v1470_v7  ;;  %vm9003_vm14 = vnez %v8721_v12  ;;  %vm9004_vm12 = vnez %v8723_v16 }
 0x4f9   : > { %v1443_v54 = vpop.f32.mrf.mxu2 }
 0x4fa   : > { %v1472_v24 = vpop.f32.mrf.mxu3 }
 0x4fb   : > { %v1473_v41 = vadd.f32 %v1472_v24, %v1443_v54 }
 0x4fd   : > { %4590 = vmatmul.msk.f32.gmra.mxu0 %vm8998_vm6, %v1473_v41  ;;  %4594 = vmatmul.msk.f32.gmra.mxu1 %vm8999_vm5, %v1473_v41  ;;  %vm9005_vm6 = vnez %v8725_v20  ;;  %vm9006_vm5 = vnez %v8727_v23 }
 0x560   : > { %v1504_v56 = vpop.f32.mrf.mxu0  ;;  %v1533_v17 = vpop.f32.mrf.mxu1 }
 0x561   : > { %v1545_v14 = vmul.f32 %v1504_v56, %v1393_v15  ;;  %v1546_v3 = vmul.f32 %v1533_v17, %v1394_v39 }
 0x568   : > { %v1507_v57 = vpop.f32.mrf.mxu0  ;;  %v1536_v11 = vpop.f32.mrf.mxu1 }
 0x569   : > { %v1547_v37 = vmul.f32 %v1507_v57, %v1395_v33  ;;  %v1548_v6 = vmul.f32 %v1536_v11, %v1396_v43 }
 0x56b   : > { %v1549_v30 = vadd.f32 %v1547_v37, %v1545_v14  ;;  %v1556_v51 = vadd.f32 %v1548_v6, %v1546_v3 }
 0x56d   : > { %v1550_v28 = vrot.slane %v1549_v30, 4  ;;  %v1557_v27 = vrot.slane %v1556_v51, 4 }
 0x56f   : > { %v1551_v7 = vadd.f32 %v1550_v28, %v1549_v30  ;;  %v1558_v54 = vadd.f32 %v1557_v27, %v1556_v51 }
 0x570   : > { %v1510_v21 = vpop.f32.mrf.mxu0  ;;  %v1539_v2 = vpop.f32.mrf.mxu1 }
 0x571   : > { %v1563_v4 = vmul.f32 %v1510_v21, %v1393_v15  ;;  %v1564_v41 = vmul.f32 %v1539_v2, %v1394_v39  ;;  %v1552_v55 = vrot.slane %v1551_v7, 2  ;;  %v1559_v40 = vrot.slane %v1558_v54, 2 }
 0x573   : > { %v1553_v14 = vadd.f32 %v1552_v55, %v1551_v7  ;;  %v1560_v3 = vadd.f32 %v1559_v40, %v1558_v54 }
 0x575   : > { %v1554_v30 = vrot.slane %v1553_v14, 1  ;;  %v1561_v51 = vrot.slane %v1560_v3, 1 }
 0x57a   : > { %v1513_v24 = vpop.f32.mrf.mxu0  ;;  %v1542_v9 = vpop.f32.mrf.mxu1 }
 0x57b   : > { %v1565_v18 = vmul.f32 %v1513_v24, %v1395_v33  ;;  %v1566_v61 = vmul.f32 %v1542_v9, %v1396_v43  ;;  %v1555_v33 = vadd.f32 %v1554_v30, %v1553_v14  ;;  %v1562_v43 = vadd.f32 %v1561_v51, %v1560_v3 }
 0x57d   : > { %v1567_v56 = vadd.f32 %v1565_v18, %v1563_v4  ;;  %v1574_v17 = vadd.f32 %v1566_v61, %v1564_v41 }
 0x57f   : > { %v1568_v57 = vrot.slane %v1567_v56, 4  ;;  %v1575_v11 = vrot.slane %v1574_v17, 4 }
 0x581   : > { %v1569_v37 = vadd.f32 %v1568_v57, %v1567_v56  ;;  %v1576_v6 = vadd.f32 %v1575_v11, %v1574_v17 }
 0x583   : > { %v1570_v25 = vrot.slane %v1569_v37, 2  ;;  %v1577_v62 = vrot.slane %v1576_v6, 2 }
 0x585   : > { %v1571_v28 = vadd.f32 %v1570_v25, %v1569_v37  ;;  %v1578_v27 = vadd.f32 %v1577_v62, %v1576_v6 }
 0x587   : > { %v1572_v15 = vrot.slane %v1571_v28, 1  ;;  %v1579_v39 = vrot.slane %v1578_v27, 1 }
 0x589   : > { %v1573_v9 = vadd.f32 %v1572_v15, %v1571_v28  ;;  %v1580_v21 = vadd.f32 %v1579_v39, %v1578_v27 }
 0x58b   : > { %v1581_v61 = vsel %vm9000_vm2, %v1555_v33, %v1573_v9  ;;  %v1582_v18 = vsel %vm9001_vm11, %v1562_v43, %v1580_v21  ;;  %vm9007_vm2 = vnez %v8729_v26  ;;  %vm9008_vm11 = vnez %v8731_v38 }
 0x58c   : > { %v1585_v55 = vrot.slane %v1582_v18, 6 }
 0x58e   : > { %v1586_v40 = vsel %vm9002_vm10, %v1581_v61, %v1585_v55  ;;  %vm9009_vm10 = vnez %v8733_v42 }
 0x58f   : > { %v6732_v4 = vadd.f32 %v1586_v40, %v6535_v29 }
 0x591   : > { %1590 = vst [vmem:[#allocation1] ss:$4 sm:$0xff] %v6732_v4  ;;  %v1671_v62 = vperm.slane %v6732_v4, 0  ;;  %v1672_v25 = vperm.slane %v6732_v4, 2  ;;  %v1677_v41 = vperm.slane %v6732_v4, 1  ;;  %v1678_v11 = vperm.slane %v6732_v4, 3 }
 0x593   : > { %v1675_v2 = vperm.slane %v1671_v62, 0  ;;  %v1676_v7 = vperm.slane %v1672_v25, 0  ;;  %v1681_v37 = vperm.slane %v1677_v41, 1  ;;  %v1682_v27 = vperm.slane %v1678_v11, 1 }
 0x595   : > { %v1683_v54 = vmul.f32 %v1675_v2, %v5830_v22  ;;  %v1684_v24 = vmul.f32 %v1676_v7, %v5845_v31  ;;  %v1685_v6 = vmul.f32 %v1675_v2, %v8855_v52  ;;  %v1686_v30 = vmul.f32 %v1676_v7, %v8856_v47 }
 0x596   : > { %v1687_v33 = vmul.f32 %v1681_v37, %v5830_v22  ;;  %v1688_v18 = vmul.f32 %v1682_v27, %v5845_v31  ;;  %v6786_v55 = vmul.f32 %v1681_v37, %v8855_v52  ;;  %v6789_v40 = vmul.f32 %v1682_v27, %v8856_v47 }
 0x597   : > { %1707 = vmatmul.f32.vlgmr.msra.gmra.mxu2 %v1683_v54  ;;  %1736 = vmatmul.f32.vlgmr.msra.gmra.mxu3 %v1684_v24 }
 0x598   : > { %v1591_v56 = vld.sshfl [vmem:[#allocation1] sm:$0xff pattern:$0x73625140]  ;;  %v1592_v17 = vld.sshfl [vmem:[#allocation1 + $0x8] sm:$0xff pattern:$0x73625140]  ;;  %4675 = vmatpush.msk.msra.mxu2 %vm9003_vm14, %v8803_v60  ;;  %4691 = vmatpush.msk.msra.mxu3 %vm9004_vm12, %v8803_v60  ;;  %vm9024_vm14 = vnez %v8753_v48 }
 0x599   : > { %v1595_v29 = vadd.f32 %v1591_v56, %v8852_v59  ;;  %v1596_v57 = vadd.f32 %v1592_v17, %v8853_v5 }
 0x59a   : > { %4676 = vmatpush.msk.msra.mxu2 %vm9005_vm6, %v8803_v60  ;;  %4692 = vmatpush.msk.msra.mxu3 %vm9006_vm5, %v8803_v60  ;;  %vm9010_vm5 = vnez %v8735_v46 }
 0x59b   : > { %v1597_v14 = vmax.f32 %v1595_v29, 0.0  ;;  %v1598_v3 = vmax.f32 %v1596_v57, 0.0 }
 0x59c   : > { %4677 = vmatpush.msk.msra.mxu2 %vm9007_vm2, %v8803_v60  ;;  %4693 = vmatpush.msk.msra.mxu3 %vm9008_vm11, %v8803_v60  ;;  %vm9011_vm11 = vnez %v8737_v49  ;;  %vm9012_vm2 = vnez %v8739_v53 }
 0x59d   : > { %v1599_v51 = vmin.f32 %v1597_v14, 15.0  ;;  %v1600_v28 = vmin.f32 %v1598_v3, 15.0 }
 0x59e   : > { %4678 = vmatpush.msk.msra.mxu2 %vm9009_vm10, %v8803_v60  ;;  %4694 = vmatpush.msk.msra.mxu3 %vm9010_vm5, %v8803_v60 }
 0x59f   : > { %1710 = vmatmul.f32.gmra.mxu2 %v1685_v6  ;;  %1739 = vmatmul.f32.gmra.mxu3 %v1686_v30  ;;  %v1601_v15 = vfloor.f32 %v1599_v51  ;;  %v1602_v39 = vfloor.f32 %v1600_v28 }
 0x5a0   : > { %4679 = vmatpush.msk.msra.mxu2 %vm9011_vm11, %v8803_v60  ;;  %4695 = vmatpush.msk.msra.mxu3 %vm9012_vm2, %v8803_v60  ;;  %vm9013_vm11 = vnez %v8741_v58  ;;  %vm9014_vm2 = vnez %v8743_v63 }
 0x5a1   : > { %v6776_v43 = vsub.f32 %v1599_v51, %v1601_v15  ;;  %v6778_v9 = vcvt.f32.s32 %v1601_v15  ;;  %v6780_v21 = vsub.f32 %v1600_v28, %v1602_v39  ;;  %v6782_v61 = vcvt.f32.s32 %v1602_v39 }
 0x5a2   : > { %4680 = vmatpush.msk.msra.mxu2 %vm9013_vm11, %v8803_v60  ;;  %4696 = vmatpush.msk.msra.mxu3 %vm9014_vm2, %v8803_v60  ;;  %vm9015_vm11 = vnez %v8745_v10  ;;  %vm9016_vm2 = vnez %v8912_v45 }
 0x5a3   : > { %v1607_v62 = vadd.s32 1, %v6778_v9  ;;  %v1613_v25 = vperm.slane %v6778_v9, 0  ;;  %v1619_v2 = vsub.f32 1.0, %v6776_v43  ;;  %v1633_v7 = vperm.slane %v6776_v43, 0 }
 0x5a4   : > { %v1608_v54 = vadd.s32 1, %v6782_v61  ;;  %v1614_v24 = vperm.slane %v6782_v61, 0  ;;  %v1620_v41 = vsub.f32 1.0, %v6780_v21  ;;  %v1634_v56 = vperm.slane %v6780_v21, 0  ;;  %4681 = vmatpush.msk.msra.mxu2 %vm9015_vm11, %v8803_v60  ;;  %4697 = vmatpush.msk.msra.mxu3 %vm9016_vm2, %v8803_v60 }
 0x5a5   : > { %vm1609_vm5 = vcmp.lt.s32.totalorder %v1607_v62, 15  ;;  %vm6812_vm10 = vcmp.eq.s32.totalorder %v5724_v36, %v1613_v25  ;;  %v1621_v29 = vperm.slane %v1619_v2, 0  ;;  %vm6817_vm6 = vcmp.eq.s32.totalorder %v5495_v1, %v1613_v25 }
 0x5a6   : > { %v1610_v11 = vsel %vm1609_vm5, %v1607_v62, 15  ;;  %vm1611_vm12 = vcmp.lt.s32.totalorder %v1608_v54, 15  ;;  %vm6822_vm11 = vcmp.eq.s32.totalorder %v5724_v36, %v1614_v24  ;;  %v1622_v3 = vperm.slane %v1620_v41, 0  ;;  %4698 = vmatpush.msk.msra.mxu3 %vm9024_vm14, %v8803_v60 }
 0x5a7   : > { %vm9023_vm2 = vnez %v8920_v50  ;;  %1713 = vmatmul.f32.gmra.mxu2 %v1687_v33  ;;  %1742 = vmatmul.f32.gmra.mxu3 %v1688_v18  ;;  %v1625_v37 = vsel %vm6812_vm10, %v1621_v29, 0.0  ;;  %v1627_v6 = vperm.slane %v1610_v11, 0  ;;  %v1612_v30 = vsel %vm1611_vm12, %v1608_v54, 15 }
 0x5a8   : > { %4682 = vmatpush.msk.msra.mxu2 %vm9023_vm2, %v8803_v60  ;;  %v1623_v51 = vsel %vm6817_vm6, %v1621_v29, 0.0  ;;  %v1626_v28 = vsel %vm6822_vm11, %v1622_v3, 0.0  ;;  %v1628_v27 = vperm.slane %v1612_v30, 0  ;;  %vm6839_vm5 = vcmp.eq.s32.totalorder %v5495_v1, %v1614_v24 }
 0x5a9   : > { %v1643_v39 = vperm.slane %v6778_v9, 1  ;;  %vm9027_vm14 = vnez %v8755_v35  ;;  %vm9028_vm12 = vnez %v8757_v32  ;;  %vm1631_vm6 = vcmp.eq.s32.totalorder %v5724_v36, %v1627_v6 }
 0x5aa   : > { %4683 = vmatpush.msk.msra.mxu2 %vm9027_vm14, %v8803_v60  ;;  %4699 = vmatpush.msk.msra.mxu3 %vm9028_vm12, %v8803_v60  ;;  %vm1629_vm11 = vcmp.eq.s32.totalorder %v5495_v1, %v1627_v6  ;;  %v1624_v33 = vsel %vm6839_vm5, %v1622_v3, 0.0  ;;  %v1649_v18 = vperm.slane %v1619_v2, 1  ;;  %v1637_v62 = vsel %vm1631_vm6, %v1633_v7, 0.0 }
 0x5ab   : > { %vm1632_vm10 = vcmp.eq.s32.totalorder %v5724_v36, %v1628_v27  ;;  %v1635_v9 = vsel %vm1629_vm11, %v1633_v7, 0.0  ;;  %vm1630_vm2 = vcmp.eq.s32.totalorder %v5495_v1, %v1628_v27  ;;  %vm9029_vm14 = vnez %v8759_v0 }
 0x5ac   : > { %4684 = vmatpush.msk.msra.mxu2 %vm9029_vm14, %v8803_v60  ;;  %vm9030_vm12 = vnez %v8761_v44  ;;  %v1641_v25 = vadd.f32 %v1637_v62, %v1625_v37  ;;  %v1638_v54 = vsel %vm1632_vm10, %v1634_v56, 0.0  ;;  %v1639_v24 = vadd.f32 %v1635_v9, %v1623_v51 }
 0x5ad   : > { %4700 = vmatpush.msk.msra.mxu3 %vm9030_vm12, %v8803_v60  ;;  %v1636_v17 = vsel %vm1630_vm2, %v1634_v56, 0.0  ;;  %v1642_v29 = vadd.f32 %v1638_v54, %v1626_v28  ;;  %vm6863_vm5 = vcmp.eq.s32.totalorder %v5495_v1, %v1643_v39  ;;  %v1655_v7 = vperm.slane %v1610_v11, 1 }
 0x5ae   : > { %v1640_v2 = vadd.f32 %v1636_v17, %v1624_v33  ;;  %vm9033_vm6 = vnez %v8764_v19  ;;  %vm9034_vm11 = vnez %v8767_v13  ;;  %1775 = vmatpush.msra.mxu0 %v1641_v25  ;;  %v1651_v56 = vsel %vm6863_vm5, %v1649_v18, 0.0 }
 0x5af   : > { %4685 = vmatpush.msk.msra.mxu2 %vm9033_vm6, %v8803_v60  ;;  %4701 = vmatpush.msk.msra.mxu3 %vm9034_vm11, %v8803_v60  ;;  %v1661_v14 = vperm.slane %v6776_v43, 1  ;;  %v1644_v3 = vperm.slane %v6782_v61, 1  ;;  %v1650_v37 = vperm.slane %v1620_v41, 1  ;;  %vm1657_vm2 = vcmp.eq.s32.totalorder %v5495_v1, %v1655_v7 }
 0x5b0   : > { %1804 = vmatpush.msra.mxu1 %v1642_v29  ;;  %v1656_v11 = vperm.slane %v1612_v30, 1  ;;  %v1662_v6 = vperm.slane %v6780_v21, 1  ;;  %vm1647_vm10 = vcmp.eq.s32.totalorder %v5724_v36, %v1643_v39  ;;  %vm9035_vm11 = vnez %v8770_v34  ;;  %1716 = vmatmul.f32.gmra.mxu2 %v6786_v55 }
 0x5b1   : > { %4686 = vmatpush.msk.msra.mxu2 %vm9035_vm11, %v8803_v60  ;;  %1745 = vmatmul.f32.gmra.mxu3 %v6789_v40  ;;  %v1663_v43 = vsel %vm1657_vm2, %v1661_v14, 0.0  ;;  %vm1646_vm5 = vcmp.eq.s32.totalorder %v5495_v1, %v1644_v3  ;;  %v1653_v61 = vsel %vm1647_vm10, %v1649_v18, 0.0  ;;  %vm1659_vm6 = vcmp.eq.s32.totalorder %v5724_v36, %v1655_v7 }
 0x5b2   : > { %1776 = vmatpush.msra.mxu0 %v1639_v24  ;;  %1805 = vmatpush.msra.mxu1 %v1640_v2  ;;  %v1667_v41 = vadd.f32 %v1663_v43, %v1651_v56  ;;  %v1652_v21 = vsel %vm1646_vm5, %v1650_v37, 0.0  ;;  %vm1658_vm12 = vcmp.eq.s32.totalorder %v5495_v1, %v1656_v11  ;;  %v1665_v30 = vsel %vm1659_vm6, %v1661_v14, 0.0 }
 0x5b3   : > { %v1664_v51 = vsel %vm1658_vm12, %v1662_v6, 0.0  ;;  %v1669_v28 = vadd.f32 %v1665_v30, %v1653_v61  ;;  %vm1648_vm11 = vcmp.eq.s32.totalorder %v5724_v36, %v1644_v3  ;;  %vm1660_vm14 = vcmp.eq.s32.totalorder %v5724_v36, %v1656_v11  ;;  %4702 = vmatpush.msk.msra.mxu3 %vm8843_vm9, %v8803_v60  ;;  %4687 = vmatpush.msk.msra.mxu2 %vm8846_vm13, %v8803_v60 }
 0x5b4   : > { %v1668_v40 = vadd.f32 %v1664_v51, %v1652_v21  ;;  %v1654_v27 = vsel %vm1648_vm11, %v1650_v37, 0.0  ;;  %v1666_v15 = vsel %vm1660_vm14, %v1662_v6, 0.0  ;;  %vm9044_vm14 = vcmask 130048  }
 0x5b5   : > { %v1670_v39 = vadd.f32 %v1666_v15, %v1654_v27  ;;  %4703 = vmatpush.msk.msra.mxu3 %vm8847_vm15, %v8803_v60  ;;  %4688 = vmatpush.msk.msra.mxu2 %vm8822_vm3, %v8803_v60  ;;  %vm9045_vm12 = vmmov %vm9044_vm14 }
 0x5b6   : > { %vm9046_vm6 = vmmov %vm9045_vm12 }
 0x5b7   : > { %4704 = vmatpush.msk.msra.mxu3 %vm8848_vm4, %v8803_v60  ;;  %4689 = vmatpush.msk.msra.mxu2 %vm8824_vm1, %v8803_v60  ;;  %vm9047_vm11 = vmmov %vm9046_vm6 }
 0x5b8   : > { %vm9048_vm2 = vmmov %vm9046_vm6 }
 0x5b9   : > { %4705 = vmatpush.msk.msra.mxu3 %vm8825_vm0, %v8803_v60  ;;  %4690 = vmatpush.msk.msra.mxu2 %vm8887_vm8, %v8803_v60  ;;  %vm9049_vm10 = vmmov %vm9048_vm2 }
 0x5ba   : > { %vm9050_vm5 = vmmov %vm9048_vm2 }
 0x5bb   : > { %4706 = vmatpush.msk.msra.mxu3 %vm8940_vm7, %v8803_v60 }
 0x61a   : > { %v1708_v17 = vpop.f32.mrf.mxu2  ;;  %v1737_v29 = vpop.f32.mrf.mxu3 }
 0x61b   : > { %v1738_v2 = vadd.f32 %v1737_v29, %v1708_v17 }
 0x61d   : > { %4627 = vmatmul.msk.f32.vlgmr.msra.gmra.mxu0 %vm9044_vm14, %v1738_v2  ;;  %4631 = vmatmul.msk.f32.vlgmr.msra.gmra.mxu1 %vm9045_vm12, %v1738_v2  ;;  %vm9051_vm14 = vmmov %vm9048_vm2  ;;  %vm9052_vm12 = vcmask 1040384  }
 0x622   : > { %v1711_v57 = vpop.f32.mrf.mxu2  ;;  %v1740_v7 = vpop.f32.mrf.mxu3 }
 0x623   : > { %v1741_v56 = vadd.f32 %v1740_v7, %v1711_v57 }
 0x625   : > { %4628 = vmatmul.msk.f32.gmra.mxu0 %vm9046_vm6, %v1741_v56  ;;  %4632 = vmatmul.msk.f32.gmra.mxu1 %vm9047_vm11, %v1741_v56  ;;  %vm9053_vm6 = vmmov %vm9052_vm12  ;;  %vm9054_vm11 = vcmask 1041408  }
 0x62a   : > { %v1714_v14 = vpop.f32.mrf.mxu2  ;;  %v1743_v3 = vpop.f32.mrf.mxu3 }
 0x62b   : > { %v1744_v37 = vadd.f32 %v1743_v3, %v1714_v14 }
 0x62d   : > { %4629 = vmatmul.msk.f32.gmra.mxu0 %vm9048_vm2, %v1744_v37  ;;  %4633 = vmatmul.msk.f32.gmra.mxu1 %vm9049_vm10, %v1744_v37  ;;  %vm9055_vm2 = vnez %v8721_v12  ;;  %vm9056_vm10 = vnez %v8723_v16 }
 0x633   : > { %v1717_v11 = vpop.f32.mrf.mxu2 }
 0x634   : > { %v1746_v6 = vpop.f32.mrf.mxu3 }
 0x635   : > { %v1747_v43 = vadd.f32 %v1746_v6, %v1717_v11 }
 0x637   : > { %4630 = vmatmul.msk.f32.gmra.mxu0 %vm9050_vm5, %v1747_v43  ;;  %4634 = vmatmul.msk.f32.gmra.mxu1 %vm9051_vm14, %v1747_v43  ;;  %vm9057_vm5 = vnez %v8725_v20  ;;  %vm9058_vm14 = vnez %v8727_v23 }
 0x69a   : > { %v1778_v61 = vpop.f32.mrf.mxu0  ;;  %v1807_v21 = vpop.f32.mrf.mxu1 }
 0x69b   : > { %v1819_v27 = vmul.f32 %v1778_v61, %v1667_v41  ;;  %v1820_v15 = vmul.f32 %v1807_v21, %v1668_v40 }
 0x6a2   : > { %v1781_v30 = vpop.f32.mrf.mxu0  ;;  %v1810_v51 = vpop.f32.mrf.mxu1 }
 0x6a3   : > { %v1821_v17 = vmul.f32 %v1781_v30, %v1669_v28  ;;  %v1822_v29 = vmul.f32 %v1810_v51, %v1670_v39 }
 0x6a5   : > { %v1823_v2 = vadd.f32 %v1821_v17, %v1819_v27  ;;  %v1830_v57 = vadd.f32 %v1822_v29, %v1820_v15 }
 0x6a7   : > { %v1824_v14 = vrot.slane %v1823_v2, 4  ;;  %v1831_v3 = vrot.slane %v1830_v57, 4 }
 0x6a9   : > { %v1825_v37 = vadd.f32 %v1824_v14, %v1823_v2  ;;  %v1832_v11 = vadd.f32 %v1831_v3, %v1830_v57 }
 0x6aa   : > { %v1784_v7 = vpop.f32.mrf.mxu0  ;;  %v1813_v56 = vpop.f32.mrf.mxu1 }
 0x6ab   : > { %v1837_v54 = vmul.f32 %v1784_v7, %v1667_v41  ;;  %v1838_v43 = vmul.f32 %v1813_v56, %v1668_v40  ;;  %v1826_v62 = vrot.slane %v1825_v37, 2  ;;  %v1833_v18 = vrot.slane %v1832_v11, 2 }
 0x6ad   : > { %v1827_v27 = vadd.f32 %v1826_v62, %v1825_v37  ;;  %v1834_v15 = vadd.f32 %v1833_v18, %v1832_v11 }
 0x6af   : > { %v1828_v2 = vrot.slane %v1827_v27, 1  ;;  %v1835_v57 = vrot.slane %v1834_v15, 1 }
 0x6b4   : > { %v1787_v6 = vpop.f32.mrf.mxu0  ;;  %v1816_v24 = vpop.f32.mrf.mxu1 }
 0x6b5   : > { %v1839_v25 = vmul.f32 %v1787_v6, %v1669_v28  ;;  %v1840_v9 = vmul.f32 %v1816_v24, %v1670_v39  ;;  %v1829_v28 = vadd.f32 %v1828_v2, %v1827_v27  ;;  %v1836_v39 = vadd.f32 %v1835_v57, %v1834_v15 }
 0x6b7   : > { %v1841_v61 = vadd.f32 %v1839_v25, %v1837_v54  ;;  %v1848_v21 = vadd.f32 %v1840_v9, %v1838_v43 }
 0x6b9   : > { %v1842_v30 = vrot.slane %v1841_v61, 4  ;;  %v1849_v51 = vrot.slane %v1848_v21, 4 }
 0x6bb   : > { %v1843_v17 = vadd.f32 %v1842_v30, %v1841_v61  ;;  %v1850_v29 = vadd.f32 %v1849_v51, %v1848_v21 }
 0x6bd   : > { %v1844_v33 = vrot.slane %v1843_v17, 2  ;;  %v1851_v55 = vrot.slane %v1850_v29, 2 }
 0x6bf   : > { %v1845_v14 = vadd.f32 %v1844_v33, %v1843_v17  ;;  %v1852_v3 = vadd.f32 %v1851_v55, %v1850_v29 }
 0x6c1   : > { %v1846_v41 = vrot.slane %v1845_v14, 1  ;;  %v1853_v40 = vrot.slane %v1852_v3, 1 }
 0x6c3   : > { %v1847_v24 = vadd.f32 %v1846_v41, %v1845_v14  ;;  %v1854_v7 = vadd.f32 %v1853_v40, %v1852_v3 }
 0x6c5   : > { %v1855_v9 = vsel %vm9052_vm12, %v1829_v28, %v1847_v24  ;;  %v1856_v25 = vsel %vm9053_vm6, %v1836_v39, %v1854_v7  ;;  %vm9059_vm12 = vnez %v8729_v26  ;;  %vm9060_vm6 = vnez %v8731_v38 }
 0x6c6   : > { %v1859_v62 = vrot.slane %v1856_v25, 6 }
 0x6c8   : > { %v1860_v18 = vsel %vm9054_vm11, %v1855_v9, %v1859_v62  ;;  %vm9061_vm11 = vnez %v8733_v42 }
 0x6c9   : > { %v6929_v54 = vadd.f32 %v1860_v18, %v6732_v4 }
 0x6cb   : > { %1864 = vst [vmem:[#allocation1] ss:$4 sm:$0xff] %v6929_v54  ;;  %v1945_v55 = vperm.slane %v6929_v54, 0  ;;  %v1946_v33 = vperm.slane %v6929_v54, 2  ;;  %v1951_v43 = vperm.slane %v6929_v54, 1  ;;  %v1952_v51 = vperm.slane %v6929_v54, 3 }
 0x6cd   : > { %v1949_v56 = vperm.slane %v1945_v55, 0  ;;  %v1950_v37 = vperm.slane %v1946_v33, 0  ;;  %v1955_v17 = vperm.slane %v1951_v43, 1  ;;  %v1956_v3 = vperm.slane %v1952_v51, 1 }
 0x6cf   : > { %v1957_v11 = vmul.f32 %v1949_v56, %v5830_v22  ;;  %v1958_v6 = vmul.f32 %v1950_v37, %v5845_v31  ;;  %v1959_v29 = vmul.f32 %v1949_v56, %v8855_v52  ;;  %v1960_v2 = vmul.f32 %v1950_v37, %v8856_v47 }
 0x6d0   : > { %v1961_v28 = vmul.f32 %v1955_v17, %v5830_v22  ;;  %v1962_v25 = vmul.f32 %v1956_v3, %v5845_v31  ;;  %v6983_v62 = vmul.f32 %v1955_v17, %v8855_v52  ;;  %v6986_v18 = vmul.f32 %v1956_v3, %v8856_v47 }
 0x6d1   : > { %1981 = vmatmul.f32.vlgmr.msrb.gmra.mxu2 %v1957_v11  ;;  %2010 = vmatmul.f32.vlgmr.msrb.gmra.mxu3 %v1958_v6 }
 0x6d2   : > { %v1865_v61 = vld.sshfl [vmem:[#allocation1] sm:$0xff pattern:$0x73625140]  ;;  %v1866_v21 = vld.sshfl [vmem:[#allocation1 + $0x8] sm:$0xff pattern:$0x73625140]  ;;  %4716 = vmatpush.msk.msrb.mxu2 %vm9055_vm2, %v8803_v60  ;;  %4732 = vmatpush.msk.msrb.mxu3 %vm9056_vm10, %v8803_v60  ;;  %vm9076_vm2 = vnez %v8753_v48 }
 0x6d3   : > { %v1869_v4 = vadd.f32 %v1865_v61, %v8852_v59  ;;  %v1870_v30 = vadd.f32 %v1866_v21, %v8853_v5 }
 0x6d4   : > { %4717 = vmatpush.msk.msrb.mxu2 %vm9057_vm5, %v8803_v60  ;;  %4733 = vmatpush.msk.msrb.mxu3 %vm9058_vm14, %v8803_v60  ;;  %vm9062_vm14 = vnez %v8735_v46 }
 0x6d5   : > { %v1871_v27 = vmax.f32 %v1869_v4, 0.0  ;;  %v1872_v15 = vmax.f32 %v1870_v30, 0.0 }
 0x6d6   : > { %4718 = vmatpush.msk.msrb.mxu2 %vm9059_vm12, %v8803_v60  ;;  %4734 = vmatpush.msk.msrb.mxu3 %vm9060_vm6, %v8803_v60  ;;  %vm9063_vm6 = vnez %v8737_v49  ;;  %vm9064_vm12 = vnez %v8739_v53 }
 0x6d7   : > { %v1873_v57 = vmin.f32 %v1871_v27, 15.0  ;;  %v1874_v14 = vmin.f32 %v1872_v15, 15.0 }
 0x6d8   : > { %4719 = vmatpush.msk.msrb.mxu2 %vm9061_vm11, %v8803_v60  ;;  %4735 = vmatpush.msk.msrb.mxu3 %vm9062_vm14, %v8803_v60 }
 0x6d9   : > { %1984 = vmatmul.f32.gmra.mxu2 %v1959_v29  ;;  %2013 = vmatmul.f32.gmra.mxu3 %v1960_v2  ;;  %v1875_v41 = vfloor.f32 %v1873_v57  ;;  %v1876_v40 = vfloor.f32 %v1874_v14 }
 0x6da   : > { %4720 = vmatpush.msk.msrb.mxu2 %vm9063_vm6, %v8803_v60  ;;  %4736 = vmatpush.msk.msrb.mxu3 %vm9064_vm12, %v8803_v60  ;;  %vm9065_vm6 = vnez %v8741_v58  ;;  %vm9066_vm12 = vnez %v8743_v63 }
 0x6db   : > { %v6973_v39 = vsub.f32 %v1873_v57, %v1875_v41  ;;  %v6975_v24 = vcvt.f32.s32 %v1875_v41  ;;  %v6977_v7 = vsub.f32 %v1874_v14, %v1876_v40  ;;  %v6979_v9 = vcvt.f32.s32 %v1876_v40 }
 0x6dc   : > { %4721 = vmatpush.msk.msrb.mxu2 %vm9065_vm6, %v8803_v60  ;;  %4737 = vmatpush.msk.msrb.mxu3 %vm9066_vm12, %v8803_v60  ;;  %vm9067_vm6 = vnez %v8745_v10  ;;  %vm9068_vm12 = vnez %v8912_v45 }
 0x6dd   : > { %v1881_v55 = vadd.s32 1, %v6975_v24  ;;  %v1887_v33 = vperm.slane %v6975_v24, 0  ;;  %v1893_v56 = vsub.f32 1.0, %v6973_v39  ;;  %v1907_v37 = vperm.slane %v6973_v39, 0 }
 0x6de   : > { %v1882_v11 = vadd.s32 1, %v6979_v9  ;;  %v1888_v6 = vperm.slane %v6979_v9, 0  ;;  %v1894_v43 = vsub.f32 1.0, %v6977_v7  ;;  %v1908_v61 = vperm.slane %v6977_v7, 0  ;;  %4722 = vmatpush.msk.msrb.mxu2 %vm9067_vm6, %v8803_v60  ;;  %4738 = vmatpush.msk.msrb.mxu3 %vm9068_vm12, %v8803_v60 }
 0x6df   : > { %vm1883_vm14 = vcmp.lt.s32.totalorder %v1881_v55, 15  ;;  %vm7009_vm11 = vcmp.eq.s32.totalorder %v5724_v36, %v1887_v33  ;;  %v1895_v4 = vperm.slane %v1893_v56, 0  ;;  %vm7014_vm5 = vcmp.eq.s32.totalorder %v5495_v1, %v1887_v33 }
 0x6e0   : > { %v1884_v51 = vsel %vm1883_vm14, %v1881_v55, 15  ;;  %vm1885_vm10 = vcmp.lt.s32.totalorder %v1882_v11, 15  ;;  %vm7019_vm6 = vcmp.eq.s32.totalorder %v5724_v36, %v1888_v6  ;;  %v1896_v15 = vperm.slane %v1894_v43, 0  ;;  %4739 = vmatpush.msk.msrb.mxu3 %vm9076_vm2, %v8803_v60 }
 0x6e1   : > { %vm9075_vm12 = vnez %v8920_v50  ;;  %1987 = vmatmul.f32.gmra.mxu2 %v1961_v28  ;;  %2016 = vmatmul.f32.gmra.mxu3 %v1962_v25  ;;  %v1899_v17 = vsel %vm7009_vm11, %v1895_v4, 0.0  ;;  %v1901_v29 = vperm.slane %v1884_v51, 0  ;;  %v1886_v2 = vsel %vm1885_vm10, %v1882_v11, 15 }
 0x6e2   : > { %4723 = vmatpush.msk.msrb.mxu2 %vm9075_vm12, %v8803_v60  ;;  %v1897_v57 = vsel %vm7014_vm5, %v1895_v4, 0.0  ;;  %v1900_v14 = vsel %vm7019_vm6, %v1896_v15, 0.0  ;;  %v1902_v3 = vperm.slane %v1886_v2, 0  ;;  %vm7036_vm14 = vcmp.eq.s32.totalorder %v5495_v1, %v1888_v6 }
 0x6e3   : > { %v1917_v40 = vperm.slane %v6975_v24, 1  ;;  %vm9079_vm2 = vnez %v8755_v35  ;;  %vm9080_vm10 = vnez %v8757_v32  ;;  %vm1905_vm5 = vcmp.eq.s32.totalorder %v5724_v36, %v1901_v29 }
 0x6e4   : > { %4724 = vmatpush.msk.msrb.mxu2 %vm9079_vm2, %v8803_v60  ;;  %4740 = vmatpush.msk.msrb.mxu3 %vm9080_vm10, %v8803_v60  ;;  %vm1903_vm6 = vcmp.eq.s32.totalorder %v5495_v1, %v1901_v29  ;;  %v1898_v28 = vsel %vm7036_vm14, %v1896_v15, 0.0  ;;  %v1923_v25 = vperm.slane %v1893_v56, 1  ;;  %v1911_v55 = vsel %vm1905_vm5, %v1907_v37, 0.0 }
 0x6e5   : > { %vm1906_vm11 = vcmp.eq.s32.totalorder %v5724_v36, %v1902_v3  ;;  %v1909_v24 = vsel %vm1903_vm6, %v1907_v37, 0.0  ;;  %vm1904_vm12 = vcmp.eq.s32.totalorder %v5495_v1, %v1902_v3  ;;  %vm9081_vm2 = vnez %v8759_v0 }
 0x6e6   : > { %4725 = vmatpush.msk.msrb.mxu2 %vm9081_vm2, %v8803_v60  ;;  %vm9082_vm10 = vnez %v8761_v44  ;;  %v1915_v33 = vadd.f32 %v1911_v55, %v1899_v17  ;;  %v1912_v11 = vsel %vm1906_vm11, %v1908_v61, 0.0  ;;  %v1913_v6 = vadd.f32 %v1909_v24, %v1897_v57 }
 0x6e7   : > { %4741 = vmatpush.msk.msrb.mxu3 %vm9082_vm10, %v8803_v60  ;;  %v1910_v21 = vsel %vm1904_vm12, %v1908_v61, 0.0  ;;  %v1916_v4 = vadd.f32 %v1912_v11, %v1900_v14  ;;  %vm7060_vm14 = vcmp.eq.s32.totalorder %v5495_v1, %v1917_v40  ;;  %v1929_v37 = vperm.slane %v1884_v51, 1 }
 0x6e8   : > { %v1914_v56 = vadd.f32 %v1910_v21, %v1898_v28  ;;  %vm9085_vm5 = vnez %v8764_v19  ;;  %vm9086_vm6 = vnez %v8767_v13  ;;  %2049 = vmatpush.msrb.mxu0 %v1915_v33  ;;  %v1925_v61 = vsel %vm7060_vm14, %v1923_v25, 0.0 }
 0x6e9   : > { %4726 = vmatpush.msk.msrb.mxu2 %vm9085_vm5, %v8803_v60  ;;  %4742 = vmatpush.msk.msrb.mxu3 %vm9086_vm6, %v8803_v60  ;;  %v1935_v27 = vperm.slane %v6973_v39, 1  ;;  %v1918_v15 = vperm.slane %v6979_v9, 1  ;;  %v1924_v17 = vperm.slane %v1894_v43, 1  ;;  %vm1931_vm12 = vcmp.eq.s32.totalorder %v5495_v1, %v1929_v37 }
 0x6ea   : > { %2078 = vmatpush.msrb.mxu1 %v1916_v4  ;;  %v1930_v51 = vperm.slane %v1886_v2, 1  ;;  %v1936_v29 = vperm.slane %v6977_v7, 1  ;;  %vm1921_vm11 = vcmp.eq.s32.totalorder %v5724_v36, %v1917_v40  ;;  %vm9087_vm6 = vnez %v8770_v34  ;;  %1990 = vmatmul.f32.gmra.mxu2 %v6983_v62 }
 0x6eb   : > { %4727 = vmatpush.msk.msrb.mxu2 %vm9087_vm6, %v8803_v60  ;;  %2019 = vmatmul.f32.gmra.mxu3 %v6986_v18  ;;  %v1937_v39 = vsel %vm1931_vm12, %v1935_v27, 0.0  ;;  %vm1920_vm14 = vcmp.eq.s32.totalorder %v5495_v1, %v1918_v15  ;;  %v1927_v9 = vsel %vm1921_vm11, %v1923_v25, 0.0  ;;  %vm1933_vm5 = vcmp.eq.s32.totalorder %v5724_v36, %v1929_v37 }
 0x6ec   : > { %2050 = vmatpush.msrb.mxu0 %v1913_v6  ;;  %2079 = vmatpush.msrb.mxu1 %v1914_v56  ;;  %v1941_v43 = vadd.f32 %v1937_v39, %v1925_v61  ;;  %v1926_v7 = vsel %vm1920_vm14, %v1924_v17, 0.0  ;;  %vm1932_vm10 = vcmp.eq.s32.totalorder %v5495_v1, %v1930_v51  ;;  %v1939_v2 = vsel %vm1933_vm5, %v1935_v27, 0.0 }
 0x6ed   : > { %v1938_v57 = vsel %vm1932_vm10, %v1936_v29, 0.0  ;;  %v1943_v14 = vadd.f32 %v1939_v2, %v1927_v9  ;;  %vm1922_vm6 = vcmp.eq.s32.totalorder %v5724_v36, %v1918_v15  ;;  %vm1934_vm2 = vcmp.eq.s32.totalorder %v5724_v36, %v1930_v51  ;;  %4743 = vmatpush.msk.msrb.mxu3 %vm8843_vm9, %v8803_v60  ;;  %4728 = vmatpush.msk.msrb.mxu2 %vm8846_vm13, %v8803_v60 }
 0x6ee   : > { %v1942_v18 = vadd.f32 %v1938_v57, %v1926_v7  ;;  %v1928_v3 = vsel %vm1922_vm6, %v1924_v17, 0.0  ;;  %v1940_v41 = vsel %vm1934_vm2, %v1936_v29, 0.0  ;;  %vm9096_vm2 = vcmask 130048  }
 0x6ef   : > { %v1944_v40 = vadd.f32 %v1940_v41, %v1928_v3  ;;  %4744 = vmatpush.msk.msrb.mxu3 %vm8847_vm15, %v8803_v60  ;;  %4729 = vmatpush.msk.msrb.mxu2 %vm8822_vm3, %v8803_v60  ;;  %vm9097_vm10 = vmmov %vm9096_vm2 }
 0x6f0   : > { %vm9098_vm5 = vmmov %vm9096_vm2 }
 0x6f1   : > { %4745 = vmatpush.msk.msrb.mxu3 %vm8848_vm4, %v8803_v60  ;;  %4730 = vmatpush.msk.msrb.mxu2 %vm8824_vm1, %v8803_v60  ;;  %vm9099_vm6 = vmmov %vm9096_vm2 }
 0x6f2   : > { %vm9100_vm12 = vmmov %vm9096_vm2 }
 0x6f3   : > { %4746 = vmatpush.msk.msrb.mxu3 %vm8825_vm0, %v8803_v60  ;;  %4731 = vmatpush.msk.msrb.mxu2 %vm8887_vm8, %v8803_v60  ;;  %vm9101_vm11 = vmmov %vm9096_vm2 }
 0x6f4   : > { %vm9102_vm14 = vmmov %vm9096_vm2 }
 0x6f5   : > { %4747 = vmatpush.msk.msrb.mxu3 %vm8940_vm7, %v8803_v60 }
 0x754   : > { %v1982_v21 = vpop.f32.mrf.mxu2  ;;  %v2011_v4 = vpop.f32.mrf.mxu3 }
 0x755   : > { %v2012_v56 = vadd.f32 %v2011_v4, %v1982_v21 }
 0x757   : > { %4667 = vmatmul.msk.f32.vlgmr.msrb.gmra.mxu0 %vm9096_vm2, %v2012_v56  ;;  %4671 = vmatmul.msk.f32.vlgmr.msrb.gmra.mxu1 %vm9097_vm10, %v2012_v56  ;;  %vm9103_vm10 = vcmask 1040384  }
 0x75c   : > { %v1985_v30 = vpop.f32.mrf.mxu2  ;;  %v2014_v37 = vpop.f32.mrf.mxu3 }
 0x75d   : > { %v2015_v61 = vadd.f32 %v2014_v37, %v1985_v30 }
 0x75f   : > { %4668 = vmatmul.msk.f32.gmra.mxu0 %vm9098_vm5, %v2015_v61  ;;  %4672 = vmatmul.msk.f32.gmra.mxu1 %vm9099_vm6, %v2015_v61  ;;  %vm9104_vm5 = vmmov %vm9103_vm10  ;;  %vm9105_vm6 = vcmask 1041408  }
 0x764   : > { %v1988_v27 = vpop.f32.mrf.mxu2  ;;  %v2017_v15 = vpop.f32.mrf.mxu3 }
 0x765   : > { %v2018_v17 = vadd.f32 %v2017_v15, %v1988_v27 }
 0x767   : > { %4669 = vmatmul.msk.f32.gmra.mxu0 %vm9100_vm12, %v2018_v17  ;;  %4673 = vmatmul.msk.f32.gmra.mxu1 %vm9101_vm11, %v2018_v17  ;;  %vm9106_vm12 = vnez %v8721_v12  ;;  %vm9107_vm11 = vnez %v8723_v16 }
 0x76d   : > { %v1991_v51 = vpop.f32.mrf.mxu2 }
 0x76e   : > { %v2020_v29 = vpop.f32.mrf.mxu3 }
 0x76f   : > { %v2021_v39 = vadd.f32 %v2020_v29, %v1991_v51 }
 0x771   : > { %4670 = vmatmul.msk.f32.gmra.mxu0 %vm9102_vm14, %v2021_v39  ;;  %4674 = vmatmul.msk.f32.gmra.mxu1 %vm9096_vm2, %v2021_v39  ;;  %vm9108_vm14 = vnez %v8725_v20  ;;  %vm9109_vm2 = vnez %v8727_v23 }
 0x7d4   : > { %v2052_v9 = vpop.f32.mrf.mxu0  ;;  %v2081_v7 = vpop.f32.mrf.mxu1 }
 0x7d5   : > { %v2093_v3 = vmul.f32 %v2052_v9, %v1941_v43  ;;  %v2094_v41 = vmul.f32 %v2081_v7, %v1942_v18 }
 0x7dc   : > { %v2055_v2 = vpop.f32.mrf.mxu0  ;;  %v2084_v57 = vpop.f32.mrf.mxu1 }
 0x7dd   : > { %v2095_v21 = vmul.f32 %v2055_v2, %v1943_v14  ;;  %v2096_v4 = vmul.f32 %v2084_v57, %v1944_v40 }
 0x7df   : > { %v2097_v56 = vadd.f32 %v2095_v21, %v2093_v3  ;;  %v2104_v30 = vadd.f32 %v2096_v4, %v2094_v41 }
 0x7e1   : > { %v2098_v27 = vrot.slane %v2097_v56, 4  ;;  %v2105_v15 = vrot.slane %v2104_v30, 4 }
 0x7e3   : > { %v2099_v17 = vadd.f32 %v2098_v27, %v2097_v56  ;;  %v2106_v51 = vadd.f32 %v2105_v15, %v2104_v30 }
 0x7e4   : > { %v2058_v37 = vpop.f32.mrf.mxu0  ;;  %v2087_v61 = vpop.f32.mrf.mxu1 }
 0x7e5   : > { %v2111_v11 = vmul.f32 %v2058_v37, %v1941_v43  ;;  %v2112_v39 = vmul.f32 %v2087_v61, %v1942_v18  ;;  %v2100_v55 = vrot.slane %v2099_v17, 2  ;;  %v2107_v25 = vrot.slane %v2106_v51, 2 }
 0x7e7   : > { %v2101_v3 = vadd.f32 %v2100_v55, %v2099_v17  ;;  %v2108_v41 = vadd.f32 %v2107_v25, %v2106_v51  ;;  %v4715_v51 = vld [vmem:[%s5489_s24 + $0x4] sm:$0xf] }
 0x7e9   : > { %v2102_v56 = vrot.slane %v2101_v3, 1  ;;  %v2109_v30 = vrot.slane %v2108_v41, 1 }
 0x7eb   : > { %v2103_v18 = vadd.f32 %v2102_v56, %v2101_v3 }
 0x7ee   : > { %v2061_v29 = vpop.f32.mrf.mxu0  ;;  %v2090_v6 = vpop.f32.mrf.mxu1 }
 0x7ef   : > { %v2113_v33 = vmul.f32 %v2061_v29, %v1943_v14  ;;  %v2114_v24 = vmul.f32 %v2090_v6, %v1944_v40  ;;  %v2110_v40 = vadd.f32 %v2109_v30, %v2108_v41 }
 0x7f1   : > { %v2115_v9 = vadd.f32 %v2113_v33, %v2111_v11  ;;  %v2122_v7 = vadd.f32 %v2114_v24, %v2112_v39 }
 0x7f3   : > { %v2116_v2 = vrot.slane %v2115_v9, 4  ;;  %v2123_v57 = vrot.slane %v2122_v7, 4 }
 0x7f5   : > { %v2117_v21 = vadd.f32 %v2116_v2, %v2115_v9  ;;  %v2124_v4 = vadd.f32 %v2123_v57, %v2122_v7  ;;  %v7134_v9 = vmul.f32 0.0078125, %v4715_v51 }
 0x7f7   : > { %v2118_v28 = vrot.slane %v2117_v21, 2  ;;  %v2125_v62 = vrot.slane %v2124_v4, 2 }
 0x7f9   : > { %v2119_v27 = vadd.f32 %v2118_v28, %v2117_v21  ;;  %v2126_v15 = vadd.f32 %v2125_v62, %v2124_v4 }
 0x7fb   : > { %v2120_v43 = vrot.slane %v2119_v27, 1  ;;  %v2127_v14 = vrot.slane %v2126_v15, 1 }
 0x7fd   : > { %v2121_v6 = vadd.f32 %v2120_v43, %v2119_v27  ;;  %v2128_v33 = vadd.f32 %v2127_v14, %v2126_v15 }
 0x7ff   : > { %v2129_v24 = vsel %vm9103_vm10, %v2103_v18, %v2121_v6  ;;  %v2130_v55 = vsel %vm9104_vm5, %v2110_v40, %v2128_v33  ;;  %vm9110_vm10 = vnez %v8729_v26  ;;  %vm9111_vm5 = vnez %v8731_v38 }
 0x800   : > { %v2133_v25 = vrot.slane %v2130_v55, 6  ;;  %v2497_v6 = vperm.slane %v7134_v9, 0 }
 0x802   : > { %v2134_v11 = vsel %vm9105_vm6, %v2129_v24, %v2133_v25  ;;  %vm9112_vm6 = vnez %v8733_v42 }
 0x803   : > { %v7126_v37 = vadd.f32 %v2134_v11, %v6929_v54 }
 0x805   : > { %2138 = vst [vmem:[#allocation1] ss:$4 sm:$0xff] %v7126_v37  ;;  %v2219_v62 = vperm.slane %v7126_v37, 0  ;;  %v2220_v28 = vperm.slane %v7126_v37, 2  ;;  %v2225_v3 = vperm.slane %v7126_v37, 1  ;;  %v2226_v41 = vperm.slane %v7126_v37, 3 }
 0x807   : > { %v2223_v61 = vperm.slane %v2219_v62, 0  ;;  %v2224_v17 = vperm.slane %v2220_v28, 0  ;;  %v2229_v43 = vperm.slane %v2225_v3, 1  ;;  %v2230_v14 = vperm.slane %v2226_v41, 1 }
 0x808   : > { %v7209_v3 = vperm.slane %v2497_v6, 0 }
 0x809   : > { %v2231_v29 = vmul.f32 %v2223_v61, %v5830_v22  ;;  %v2232_v39 = vmul.f32 %v2224_v17, %v5845_v31  ;;  %v2233_v56 = vmul.f32 %v2223_v61, %v8855_v52  ;;  %v2234_v30 = vmul.f32 %v2224_v17, %v8856_v47 }
 0x80a   : > { %v2235_v11 = vmul.f32 %v2229_v43, %v5830_v22  ;;  %v2236_v62 = vmul.f32 %v2230_v14, %v5845_v31  ;;  %v2237_v51 = vmul.f32 %v2229_v43, %v8855_v52 }
 0x80b   : > { %2255 = vmatmul.f32.vlgmr.msra.gmra.mxu2 %v2231_v29  ;;  %2284 = vmatmul.f32.vlgmr.msra.gmra.mxu3 %v2232_v39 }
 0x80c   : > { %v2139_v7 = vld.sshfl [vmem:[#allocation1] sm:$0xff pattern:$0x73625140]  ;;  %v2140_v54 = vld.sshfl [vmem:[#allocation1 + $0x8] sm:$0xff pattern:$0x73625140]  ;;  %4756 = vmatpush.msk.msra.mxu2 %vm9106_vm12, %v8803_v60  ;;  %4772 = vmatpush.msk.msra.mxu3 %vm9107_vm11, %v8803_v60 }
 0x80d   : > { %v2143_v2 = vadd.f32 %v2139_v7, %v8852_v59  ;;  %v2144_v57 = vadd.f32 %v2140_v54, %v8853_v5  ;;  %2416 = vst [vmem:[#allocation1] ss:$4 sm:$0xff] %v7134_v9  ;;  %v2238_v54 = vmul.f32 %v2230_v14, %v8856_v47 }
 0x80e   : > { %4757 = vmatpush.msk.msra.mxu2 %vm9108_vm14, %v8803_v60  ;;  %4773 = vmatpush.msk.msra.mxu3 %vm9109_vm2, %v8803_v60  ;;  %vm9113_vm2 = vnez %v8735_v46 }
 0x80f   : > { %v2145_v21 = vmax.f32 %v2143_v2, 0.0  ;;  %v2146_v4 = vmax.f32 %v2144_v57, 0.0 }
 0x810   : > { %4758 = vmatpush.msk.msra.mxu2 %vm9110_vm10, %v8803_v60  ;;  %4774 = vmatpush.msk.msra.mxu3 %vm9111_vm5, %v8803_v60  ;;  %vm9114_vm5 = vnez %v8737_v49  ;;  %vm9115_vm10 = vnez %v8739_v53 }
 0x811   : > { %v2147_v27 = vmin.f32 %v2145_v21, 15.0  ;;  %v2148_v15 = vmin.f32 %v2146_v4, 15.0  ;;  %v2498_v4 = vperm.slane %v7134_v9, 2 }
 0x812   : > { %4759 = vmatpush.msk.msra.mxu2 %vm9112_vm6, %v8803_v60  ;;  %4775 = vmatpush.msk.msra.mxu3 %vm9113_vm2, %v8803_v60  ;;  %vm9116_vm2 = vnez %v8741_v58 }
 0x813   : > { %2258 = vmatmul.f32.gmra.mxu2 %v2233_v56  ;;  %2287 = vmatmul.f32.gmra.mxu3 %v2234_v30  ;;  %v2149_v18 = vfloor.f32 %v2147_v27  ;;  %v2150_v40 = vfloor.f32 %v2148_v15 }
 0x814   : > { %4760 = vmatpush.msk.msra.mxu2 %vm9114_vm5, %v8803_v60  ;;  %4776 = vmatpush.msk.msra.mxu3 %vm9115_vm10, %v8803_v60  ;;  %vm9117_vm5 = vnez %v8743_v63 }
 0x815   : > { %v7174_v33 = vsub.f32 %v2147_v27, %v2149_v18  ;;  %v7176_v24 = vcvt.f32.s32 %v2149_v18  ;;  %v7178_v55 = vsub.f32 %v2148_v15, %v2150_v40  ;;  %v7180_v25 = vcvt.f32.s32 %v2150_v40 }
 0x816   : > { %4761 = vmatpush.msk.msra.mxu2 %vm9116_vm2, %v8803_v60  ;;  %4777 = vmatpush.msk.msra.mxu3 %vm9117_vm5, %v8803_v60  ;;  %vm9118_vm2 = vnez %v8745_v10  ;;  %vm9119_vm5 = vnez %v8912_v45 }
 0x817   : > { %v2155_v28 = vadd.s32 1, %v7176_v24  ;;  %v2161_v61 = vperm.slane %v7176_v24, 0  ;;  %v2167_v17 = vsub.f32 1.0, %v7174_v33  ;;  %v2156_v29 = vadd.s32 1, %v7180_v25 }
 0x818   : > { %v2162_v39 = vperm.slane %v7180_v25, 0  ;;  %v2168_v7 = vsub.f32 1.0, %v7178_v55  ;;  %4762 = vmatpush.msk.msra.mxu2 %vm9118_vm2, %v8803_v60  ;;  %4778 = vmatpush.msk.msra.mxu3 %vm9119_vm5, %v8803_v60  ;;  %vm9124_vm5 = vnez %v8920_v50  ;;  %vm9125_vm2 = vnez %v8753_v48 }
 0x819   : > { %vm2157_vm10 = vcmp.lt.s32.totalorder %v2155_v28, 15  ;;  %vm7205_vm6 = vcmp.eq.s32.totalorder %v5724_v36, %v2161_v61  ;;  %v2169_v57 = vperm.slane %v2167_v17, 0  ;;  %vm2159_vm14 = vcmp.lt.s32.totalorder %v2156_v29, 15 }
 0x81a   : > { %v7211_v41 = vsel %vm2157_vm10, %v2155_v28, 15  ;;  %vm7214_vm11 = vcmp.eq.s32.totalorder %v5495_v1, %v2161_v61  ;;  %4763 = vmatpush.msk.msra.mxu2 %vm9124_vm5, %v8803_v60  ;;  %4779 = vmatpush.msk.msra.mxu3 %vm9125_vm2, %v8803_v60  ;;  %v2181_v30 = vperm.slane %v7174_v33, 0  ;;  %v7227_v27 = vsel %vm2159_vm14, %v2156_v29, 15 }
 0x81b   : > { %2261 = vmatmul.f32.gmra.mxu2 %v2235_v11  ;;  %2290 = vmatmul.f32.gmra.mxu3 %v2236_v62  ;;  %v2175_v56 = vperm.slane %v7211_v41, 0  ;;  %v2170_v15 = vperm.slane %v2168_v7, 0  ;;  %v2173_v43 = vsel %vm7205_vm6, %v2169_v57, 0.0  ;;  %vm7232_vm10 = vcmp.eq.s32.totalorder %v5724_v36, %v2162_v39 }
 0x81c   : > { %v2176_v18 = vperm.slane %v7227_v27, 0  ;;  %v2182_v40 = vperm.slane %v7178_v55, 0  ;;  %vm9128_vm2 = vnez %v8755_v35  ;;  %vm9129_vm14 = vnez %v8757_v32 }
 0x81d   : > { %4764 = vmatpush.msk.msra.mxu2 %vm9128_vm2, %v8803_v60  ;;  %4780 = vmatpush.msk.msra.mxu3 %vm9129_vm14, %v8803_v60  ;;  %vm2179_vm5 = vcmp.eq.s32.totalorder %v5724_v36, %v2175_v56  ;;  %v2171_v6 = vsel %vm7214_vm11, %v2169_v57, 0.0  ;;  %vm2177_vm6 = vcmp.eq.s32.totalorder %v5495_v1, %v2175_v56  ;;  %vm7249_vm7 = vcmp.eq.s32.totalorder %v5495_v1, %v2162_v39 }
 0x81e   : > { %v2185_v62 = vsel %vm2179_vm5, %v2181_v30, 0.0  ;;  %vm2180_vm12 = vcmp.eq.s32.totalorder %v5724_v36, %v2176_v18  ;;  %v2183_v28 = vsel %vm2177_vm6, %v2181_v30, 0.0  ;;  %vm2178_vm2 = vcmp.eq.s32.totalorder %v5495_v1, %v2176_v18 }
 0x81f   : > { %vm9132_vm14 = vnez %v8759_v0  ;;  %vm9133_vm11 = vnez %v8761_v44  ;;  %v2189_v61 = vadd.f32 %v2185_v62, %v2173_v43  ;;  %v2174_v29 = vsel %vm7232_vm10, %v2170_v15, 0.0 }
 0x820   : > { %4765 = vmatpush.msk.msra.mxu2 %vm9132_vm14, %v8803_v60  ;;  %4781 = vmatpush.msk.msra.mxu3 %vm9133_vm11, %v8803_v60  ;;  %v2186_v39 = vsel %vm2180_vm12, %v2182_v40, 0.0  ;;  %v2184_v2 = vsel %vm2178_vm2, %v2182_v40, 0.0  ;;  %v2187_v21 = vadd.f32 %v2183_v28, %v2171_v6  ;;  %v2172_v56 = vsel %vm7249_vm7, %v2170_v15, 0.0 }
 0x821   : > { %v2190_v57 = vadd.f32 %v2186_v39, %v2174_v29  ;;  %v2509_v30 = vmul.f32 %v7209_v3, %v5830_v22  ;;  %vm9134_vm5 = vnez %v8764_v19  ;;  %vm9135_vm6 = vnez %v8767_v13  ;;  %2323 = vmatpush.msra.mxu0 %v2189_v61 }
 0x822   : > { %4766 = vmatpush.msk.msra.mxu2 %vm9134_vm5, %v8803_v60  ;;  %4782 = vmatpush.msk.msra.mxu3 %vm9135_vm6, %v8803_v60  ;;  %v2188_v43 = vadd.f32 %v2184_v2, %v2172_v56  ;;  %v2191_v14 = vperm.slane %v7176_v24, 1  ;;  %v2197_v18 = vperm.slane %v2167_v17, 1  ;;  %v2203_v40 = vperm.slane %v7211_v41, 1 }
 0x823   : > { %2352 = vmatpush.msra.mxu1 %v2190_v57  ;;  %v2209_v15 = vperm.slane %v7174_v33, 1  ;;  %v2192_v6 = vperm.slane %v7180_v25, 1  ;;  %v2198_v11 = vperm.slane %v2168_v7, 1  ;;  %v2204_v62 = vperm.slane %v7227_v27, 1  ;;  %2264 = vmatmul.f32.gmra.mxu2 %v2237_v51 }
 0x824   : > { %vm9136_vm7 = vnez %v8770_v34  ;;  %2293 = vmatmul.f32.gmra.mxu3 %v2238_v54  ;;  %v2502_v28 = vperm.slane %v2498_v4, 0  ;;  %vm2193_vm12 = vcmp.eq.s32.totalorder %v5495_v1, %v2191_v14  ;;  %vm2205_vm2 = vcmp.eq.s32.totalorder %v5495_v1, %v2203_v40  ;;  %2324 = vmatpush.msra.mxu0 %v2187_v21 }
 0x825   : > { %4767 = vmatpush.msk.msra.mxu2 %vm9136_vm7, %v8803_v60  ;;  %v2210_v24 = vperm.slane %v7178_v55, 1  ;;  %2353 = vmatpush.msra.mxu1 %v2188_v43  ;;  %v2199_v33 = vsel %vm2193_vm12, %v2197_v18, 0.0  ;;  %v2211_v25 = vsel %vm2205_vm2, %v2209_v15, 0.0  ;;  %vm2194_vm10 = vcmp.eq.s32.totalorder %v5495_v1, %v2192_v6 }
 0x826   : > { %vm2206_vm6 = vcmp.eq.s32.totalorder %v5495_v1, %v2204_v62  ;;  %v7286_v17 = vadd.f32 %v2211_v25, %v2199_v33  ;;  %v2200_v7 = vsel %vm2194_vm10, %v2198_v11, 0.0  ;;  %vm2195_vm7 = vcmp.eq.s32.totalorder %v5724_v36, %v2191_v14  ;;  %4783 = vmatpush.msk.msra.mxu3 %vm8843_vm9, %v8803_v60 }
 0x827   : > { %v2212_v51 = vsel %vm2206_vm6, %v2210_v24, 0.0  ;;  %4768 = vmatpush.msk.msra.mxu2 %vm8846_vm13, %v8803_v60  ;;  %v2201_v41 = vsel %vm2195_vm7, %v2197_v18, 0.0  ;;  %vm2207_vm12 = vcmp.eq.s32.totalorder %v5724_v36, %v2203_v40  ;;  %vm2196_vm2 = vcmp.eq.s32.totalorder %v5724_v36, %v2192_v6  ;;  %v9145_v40 = vld [vmem:[#allocation22_spill] sm:$0xff] }
 0x828   : > { %v7295_v54 = vadd.f32 %v2212_v51, %v2200_v7  ;;  %v2510_v4 = vmul.f32 %v2502_v28, %v5845_v31  ;;  %v2213_v27 = vsel %vm2207_vm12, %v2209_v15, 0.0  ;;  %v2202_v61 = vsel %vm2196_vm2, %v2198_v11, 0.0  ;;  %4784 = vmatpush.msk.msra.mxu3 %vm8847_vm15, %v8803_v60  ;;  %v2418_v7 = vld.sshfl [vmem:[#allocation1 + $0x8] sm:$0xff pattern:$0x73625140] }
 0x829   : > { %vm2208_vm6 = vcmp.eq.s32.totalorder %v5724_v36, %v2204_v62  ;;  %4769 = vmatpush.msk.msra.mxu2 %vm8822_vm3, %v8803_v60  ;;  %v7307_v2 = vadd.f32 %v2213_v27, %v2201_v41  ;;  %vm9144_vm7 = vnez %v8721_v12  ;;  %vm9146_vm10 = vnez %v9145_v40  ;;  %v2417_v51 = vld.sshfl [vmem:[#allocation1] sm:$0xff pattern:$0x73625140] }
 0x82a   : > { %v2214_v57 = vsel %vm2208_vm6, %v2210_v24, 0.0  ;;  %4785 = vmatpush.msk.msra.mxu3 %vm8848_vm4, %v8803_v60  ;;  %v2512_v15 = vmul.f32 %v2502_v28, %v8856_v47  ;;  %v2503_v6 = vperm.slane %v7134_v9, 1  ;;  %v2504_v11 = vperm.slane %v7134_v9, 3 }
 0x82b   : > { %v7309_v21 = vadd.f32 %v2214_v57, %v2202_v61  ;;  %4770 = vmatpush.msk.msra.mxu2 %vm8824_vm1, %v8803_v60  ;;  %vm9147_vm12 = vnez %v8723_v16  ;;  %vm9148_vm2 = vnez %v8725_v20  ;;  %vm9149_vm6 = vnez %v8727_v23 }
 0x82c   : > { %2533 = vmatmul.f32.vlgmr.msrb.gmra.mxu2 %v2509_v30  ;;  %2562 = vmatmul.f32.vlgmr.msrb.gmra.mxu3 %v2510_v4  ;;  %v2511_v30 = vmul.f32 %v7209_v3, %v8855_v52  ;;  %v2507_v3 = vperm.slane %v2503_v6, 1  ;;  %v2508_v62 = vperm.slane %v2504_v11, 1  ;;  %v2422_v41 = vadd.f32 %v2418_v7, %v8853_v5 }
 0x82d   : > { %4786 = vmatpush.msk.msra.mxu3 %vm8825_vm0, %v8803_v60  ;;  %4771 = vmatpush.msk.msra.mxu2 %vm8887_vm8, %v8803_v60  ;;  %v2421_v4 = vadd.f32 %v2417_v51, %v8852_v59 }
 0x82e   : > { %v2513_v28 = vmul.f32 %v2507_v3, %v5830_v22  ;;  %v2514_v24 = vmul.f32 %v2508_v62, %v5845_v31  ;;  %v2515_v33 = vmul.f32 %v2507_v3, %v8855_v52  ;;  %v2516_v25 = vmul.f32 %v2508_v62, %v8856_v47 }
 0x82f   : > { %4796 = vmatpush.msk.msrb.mxu2 %vm9144_vm7, %v8803_v60  ;;  %4787 = vmatpush.msk.msra.mxu3 %vm9146_vm10, %v8803_v60  ;;  %vm9150_vm7 = vnez %v8729_v26  ;;  %vm9151_vm10 = vnez %v8731_v38  ;;  %v2424_v27 = vmax.f32 %v2422_v41, 0.0  ;;  %v2423_v61 = vmax.f32 %v2421_v4, 0.0 }
 0x831   : > { %4812 = vmatpush.msk.msrb.mxu3 %vm9147_vm12, %v8803_v60  ;;  %4797 = vmatpush.msk.msrb.mxu2 %vm9148_vm2, %v8803_v60  ;;  %vm9152_vm12 = vnez %v8733_v42  ;;  %vm9153_vm2 = vnez %v8735_v46  ;;  %v2426_v57 = vmin.f32 %v2424_v27, 15.0 }
 0x833   : > { %4813 = vmatpush.msk.msrb.mxu3 %vm9149_vm6, %v8803_v60  ;;  %4798 = vmatpush.msk.msrb.mxu2 %vm9150_vm7, %v8803_v60  ;;  %vm9154_vm6 = vnez %v8737_v49  ;;  %vm9155_vm7 = vnez %v8739_v53 }
 0x834   : > { %2536 = vmatmul.f32.gmra.mxu2 %v2511_v30  ;;  %2565 = vmatmul.f32.gmra.mxu3 %v2512_v15  ;;  %v2425_v30 = vmin.f32 %v2423_v61, 15.0  ;;  %v2428_v15 = vfloor.f32 %v2426_v57 }
 0x835   : > { %4814 = vmatpush.msk.msrb.mxu3 %vm9151_vm10, %v8803_v60  ;;  %4799 = vmatpush.msk.msrb.mxu2 %vm9152_vm12, %v8803_v60  ;;  %vm9156_vm10 = vnez %v8741_v58  ;;  %vm9157_vm12 = vnez %v8743_v63 }
 0x836   : > { %v2427_v6 = vfloor.f32 %v2425_v30  ;;  %v7433_v11 = vsub.f32 %v2426_v57, %v2428_v15  ;;  %v7435_v3 = vcvt.f32.s32 %v2428_v15 }
 0x837   : > { %4815 = vmatpush.msk.msrb.mxu3 %vm9153_vm2, %v8803_v60  ;;  %4800 = vmatpush.msk.msrb.mxu2 %vm9154_vm6, %v8803_v60  ;;  %vm9158_vm2 = vnez %v8745_v10  ;;  %vm9159_vm6 = vnez %v8912_v45 }
 0x838   : > { %v7437_v62 = vsub.f32 %v2425_v30, %v2427_v6  ;;  %v2460_v61 = vperm.slane %v7433_v11, 0 }
 0x839   : > { %4816 = vmatpush.msk.msrb.mxu3 %vm9155_vm7, %v8803_v60  ;;  %4801 = vmatpush.msk.msrb.mxu2 %vm9156_vm10, %v8803_v60  ;;  %vm9160_vm7 = vnez %v8920_v50  ;;  %vm9161_vm10 = vnez %v8753_v48 }
 0x83a   : > { %v8688_v41 = vsub.f32 1.0, %v7437_v62 }
 0x83b   : > { %4817 = vmatpush.msk.msrb.mxu3 %vm9157_vm12, %v8803_v60  ;;  %4802 = vmatpush.msk.msrb.mxu2 %vm9158_vm2, %v8803_v60  ;;  %vm9162_vm12 = vnez %v8755_v35  ;;  %vm9163_vm2 = vnez %v8757_v32 }
 0x83c   : > { %2539 = vmatmul.f32.gmra.mxu2 %v2513_v28  ;;  %2568 = vmatmul.f32.gmra.mxu3 %v2514_v24  ;;  %v7439_v28 = vcvt.f32.s32 %v2427_v6  ;;  %v2434_v24 = vadd.s32 1, %v7435_v3  ;;  %v2447_v15 = vperm.slane %v8688_v41, 0 }
 0x83d   : > { %4818 = vmatpush.msk.msrb.mxu3 %vm9159_vm6, %v8803_v60  ;;  %4803 = vmatpush.msk.msrb.mxu2 %vm9160_vm7, %v8803_v60 }
 0x83e   : > { %v2433_v7 = vadd.s32 1, %v7439_v28  ;;  %v2439_v51 = vperm.slane %v7439_v28, 0 }
 0x83f   : > { %4819 = vmatpush.msk.msrb.mxu3 %vm9161_vm10, %v8803_v60  ;;  %4804 = vmatpush.msk.msrb.mxu2 %vm9162_vm12, %v8803_v60  ;;  %vm9164_vm12 = vnez %v8767_v13 }
 0x841   : > { %4820 = vmatpush.msk.msrb.mxu3 %vm9163_vm2, %v8803_v60  ;;  %4805 = vmatpush.msk.msrb.mxu2 %vm9132_vm14, %v8803_v60  ;;  %vm9165_vm2 = vnez %v8770_v34 }
 0x843   : > { %4821 = vmatpush.msk.msrb.mxu3 %vm9133_vm11, %v8803_v60  ;;  %4806 = vmatpush.msk.msrb.mxu2 %vm9134_vm5, %v8803_v60 }
 0x844   : > { %2542 = vmatmul.f32.gmra.mxu2 %v2515_v33  ;;  %2571 = vmatmul.f32.gmra.mxu3 %v2516_v25  ;;  %v2440_v33 = vperm.slane %v7435_v3, 0  ;;  %v8684_v25 = vsub.f32 1.0, %v7433_v11 }
 0x845   : > { %4822 = vmatpush.msk.msrb.mxu3 %vm9164_vm12, %v8803_v60  ;;  %4807 = vmatpush.msk.msrb.mxu2 %vm9165_vm2, %v8803_v60 }
 0x846   : > { %v2448_v27 = vperm.slane %v8684_v25, 0  ;;  %v2459_v25 = vperm.slane %v7437_v62, 0 }
 0x847   : > { %4823 = vmatpush.msk.msrb.mxu3 %vm8843_vm9, %v8803_v60  ;;  %4808 = vmatpush.msk.msrb.mxu2 %vm8846_vm13, %v8803_v60 }
 0x849   : > { %4824 = vmatpush.msk.msrb.mxu3 %vm8847_vm15, %v8803_v60  ;;  %4809 = vmatpush.msk.msrb.mxu2 %vm8822_vm3, %v8803_v60  ;;  %vm9166_vm15 = vnez %v9145_v40 }
 0x84b   : > { %4825 = vmatpush.msk.msrb.mxu3 %vm8848_vm4, %v8803_v60  ;;  %4810 = vmatpush.msk.msrb.mxu2 %vm8824_vm1, %v8803_v60  ;;  %vm7458_vm1 = vcmp.eq.s32.totalorder %v5724_v36, %v2439_v51  ;;  %vm2441_vm4 = vcmp.eq.s32.totalorder %v5495_v1, %v2439_v51 }
 0x84c   : > { %v2449_v4 = vsel %vm2441_vm4, %v2447_v15, 0.0  ;;  %vm9171_vm4 = vcmask 130048  }
 0x84d   : > { %4826 = vmatpush.msk.msrb.mxu3 %vm8825_vm0, %v8803_v60  ;;  %4811 = vmatpush.msk.msrb.mxu2 %vm8887_vm8, %v8803_v60  ;;  %vm7448_vm8 = vcmp.eq.s32.totalorder %v5724_v36, %v2440_v33  ;;  %vm2435_vm0 = vcmp.lt.s32.totalorder %v2433_v7, 15 }
 0x84e   : > { %v2452_v6 = vsel %vm7448_vm8, %v2448_v27, 0.0  ;;  %v7467_v18 = vsel %vm2435_vm0, %v2433_v7, 15 }
 0x84f   : > { %4827 = vmatpush.msk.msrb.mxu3 %vm9166_vm15, %v8803_v60  ;;  %vm2437_vm15 = vcmp.lt.s32.totalorder %v2434_v24, 15  ;;  %v2453_v14 = vperm.slane %v7467_v18, 0 }
 0x850   : > { %v7455_v57 = vsel %vm2437_vm15, %v2434_v24, 15  ;;  %v2451_v24 = vsel %vm7458_vm1, %v2447_v15, 0.0  ;;  %vm2442_vm15 = vcmp.eq.s32.totalorder %v5495_v1, %v2440_v33  ;;  %vm9172_vm1 = vmmov %vm9171_vm4 }
 0x851   : > { %v2454_v40 = vperm.slane %v7455_v57, 0  ;;  %v2450_v41 = vsel %vm2442_vm15, %v2448_v27, 0.0  ;;  %vm2457_vm0 = vcmp.eq.s32.totalorder %v5724_v36, %v2453_v14  ;;  %vm2455_vm13 = vcmp.eq.s32.totalorder %v5495_v1, %v2453_v14  ;;  %vm9174_vm15 = vmmov %vm9172_vm1 }
 0x852   : > { %v2463_v56 = vsel %vm2457_vm0, %v2459_v25, 0.0  ;;  %v2461_v29 = vsel %vm2455_vm13, %v2459_v25, 0.0  ;;  %vm9175_vm13 = vmmov %vm9172_vm1 }
 0x853   : > { %vm2458_vm3 = vcmp.eq.s32.totalorder %v5724_v36, %v2454_v40  ;;  %vm2456_vm8 = vcmp.eq.s32.totalorder %v5495_v1, %v2454_v40  ;;  %v2467_v55 = vadd.f32 %v2463_v56, %v2451_v24  ;;  %v2465_v33 = vadd.f32 %v2461_v29, %v2449_v4  ;;  %vm9177_vm0 = vmmov %vm9172_vm1 }
 0x854   : > { %v2464_v43 = vsel %vm2458_vm3, %v2460_v61, 0.0  ;;  %v2462_v7 = vsel %vm2456_vm8, %v2460_v61, 0.0  ;;  %vm9173_vm3 = vmmov %vm9172_vm1 }
 0x855   : > { %v2468_v30 = vadd.f32 %v2464_v43, %v2452_v6  ;;  %v2466_v39 = vadd.f32 %v2462_v7, %v2450_v41  ;;  %2601 = vmatpush.msrb.mxu0 %v2467_v55  ;;  %vm9176_vm8 = vmmov %vm9172_vm1 }
 0x857   : > { %2630 = vmatpush.msrb.mxu1 %v2468_v30  ;;  %2602 = vmatpush.msrb.mxu0 %v2465_v33 }
 0x859   : > { %2631 = vmatpush.msrb.mxu1 %v2466_v39 }
 0x88e   : > { %v2256_v51 = vpop.f32.mrf.mxu2  ;;  %v2285_v27 = vpop.f32.mrf.mxu3 }
 0x88f   : > { %v2286_v40 = vadd.f32 %v2285_v27, %v2256_v51 }
 0x891   : > { %4707 = vmatmul.msk.f32.vlgmr.msra.gmra.mxu0 %vm9171_vm4, %v2286_v40  ;;  %4711 = vmatmul.msk.f32.vlgmr.msra.gmra.mxu1 %vm9172_vm1, %v2286_v40  ;;  %vm9178_vm4 = vmmov %vm9177_vm0 }
 0x892   : > { %vm9179_vm1 = vmmov %vm9177_vm0 }
 0x896   : > { %v2259_v61 = vpop.f32.mrf.mxu2  ;;  %v2288_v15 = vpop.f32.mrf.mxu3 }
 0x897   : > { %v2289_v14 = vadd.f32 %v2288_v15, %v2259_v61 }
 0x899   : > { %4708 = vmatmul.msk.f32.gmra.mxu0 %vm9173_vm3, %v2289_v14  ;;  %4712 = vmatmul.msk.f32.gmra.mxu1 %vm9174_vm15, %v2289_v14  ;;  %vm9180_vm3 = vmmov %vm9177_vm0 }
 0x89a   : > { %vm9181_vm15 = vmmov %vm9177_vm0 }
 0x89e   : > { %v2262_v56 = vpop.f32.mrf.mxu2  ;;  %v2291_v29 = vpop.f32.mrf.mxu3 }
 0x89f   : > { %v2292_v43 = vadd.f32 %v2291_v29, %v2262_v56 }
 0x8a1   : > { %4709 = vmatmul.msk.f32.gmra.mxu0 %vm9175_vm13, %v2292_v43  ;;  %4713 = vmatmul.msk.f32.gmra.mxu1 %vm9176_vm8, %v2292_v43  ;;  %vm9182_vm13 = vmmov %vm9177_vm0 }
 0x8a2   : > { %vm9183_vm8 = vmmov %vm9177_vm0 }
 0x8a6   : > { %v2265_v55 = vpop.f32.mrf.mxu2 }
 0x8a7   : > { %v2294_v39 = vpop.f32.mrf.mxu3 }
 0x8a8   : > { %v2295_v25 = vadd.f32 %v2294_v39, %v2265_v55 }
 0x8aa   : > { %4710 = vmatmul.msk.f32.gmra.mxu0 %vm9177_vm0, %v2295_v25  ;;  %4714 = vmatmul.msk.f32.gmra.mxu1 %vm9178_vm4, %v2295_v25  ;;  %vm9184_vm4 = vmmov %vm9177_vm0 }
 0x8af   : > { %v2534_v41 = vpop.f32.mrf.mxu2  ;;  %v2563_v6 = vpop.f32.mrf.mxu3 }
 0x8b0   : > { %v2564_v24 = vadd.f32 %v2563_v6, %v2534_v41 }
 0x8b2   : > { %4748 = vmatmul.msk.f32.vlgmr.msrb.gmra.mxu0 %vm9179_vm1, %v2564_v24  ;;  %4752 = vmatmul.msk.f32.vlgmr.msrb.gmra.mxu1 %vm9180_vm3, %v2564_v24  ;;  %vm9185_vm1 = vmmov %vm9177_vm0 }
 0x8b7   : > { %v2537_v4 = vpop.f32.mrf.mxu2  ;;  %v2566_v7 = vpop.f32.mrf.mxu3 }
 0x8b8   : > { %v2567_v30 = vadd.f32 %v2566_v7, %v2537_v4 }
 0x8ba   : > { %4749 = vmatmul.msk.f32.gmra.mxu0 %vm9181_vm15, %v2567_v30  ;;  %4753 = vmatmul.msk.f32.gmra.mxu1 %vm9182_vm13, %v2567_v30 }
 0x8bf   : > { %v2540_v33 = vpop.f32.mrf.mxu2  ;;  %v2569_v51 = vpop.f32.mrf.mxu3 }
 0x8c0   : > { %v2570_v27 = vadd.f32 %v2569_v51, %v2540_v33 }
 0x8c2   : > { %4750 = vmatmul.msk.f32.gmra.mxu0 %vm9183_vm8, %v2570_v27  ;;  %4754 = vmatmul.msk.f32.gmra.mxu1 %vm9177_vm0, %v2570_v27 }
 0x8c7   : > { %v2543_v40 = vpop.f32.mrf.mxu2  ;;  %v2572_v61 = vpop.f32.mrf.mxu3 }
 0x8c8   : > { %v2573_v15 = vadd.f32 %v2572_v61, %v2543_v40 }
 0x8ca   : > { %4751 = vmatmul.msk.f32.gmra.mxu0 %vm9184_vm4, %v2573_v15  ;;  %4755 = vmatmul.msk.f32.gmra.mxu1 %vm9185_vm1, %v2573_v15 }
 0x90e   : > { %v2326_v14 = vpop.f32.mrf.mxu0  ;;  %v2355_v56 = vpop.f32.mrf.mxu1 }
 0x90f   : > { %v2367_v55 = vmul.f32 %v2326_v14, %v7286_v17  ;;  %v2368_v39 = vmul.f32 %v2355_v56, %v7295_v54 }
 0x916   : > { %v2329_v29 = vpop.f32.mrf.mxu0  ;;  %v2358_v43 = vpop.f32.mrf.mxu1 }
 0x917   : > { %v2369_v25 = vmul.f32 %v2329_v29, %v7307_v2  ;;  %v2370_v41 = vmul.f32 %v2358_v43, %v7309_v21 }
 0x919   : > { %v2371_v6 = vadd.f32 %v2369_v25, %v2367_v55  ;;  %v2378_v24 = vadd.f32 %v2370_v41, %v2368_v39  ;;  %v2469_v25 = vperm.slane %v7439_v28, 1  ;;  %v2481_v41 = vperm.slane %v7467_v18, 1 }
 0x91b   : > { %v2372_v30 = vrot.slane %v2371_v6, 4  ;;  %v2379_v33 = vrot.slane %v2378_v24, 4  ;;  %vm7521_vm13 = vcmp.eq.s32.totalorder %v5495_v1, %v2469_v25  ;;  %vm7526_vm8 = vcmp.eq.s32.totalorder %v5495_v1, %v2481_v41 }
 0x91c   : > { %vm7544_vm1 = vcmp.eq.s32.totalorder %v5724_v36, %v2469_v25  ;;  %vm2485_vm9 = vcmp.eq.s32.totalorder %v5724_v36, %v2481_v41 }
 0x91d   : > { %v2373_v51 = vadd.f32 %v2372_v30, %v2371_v6  ;;  %v2380_v27 = vadd.f32 %v2379_v33, %v2378_v24  ;;  %v2470_v6 = vperm.slane %v7435_v3, 1  ;;  %v2482_v24 = vperm.slane %v7455_v57, 1 }
 0x91e   : > { %v2332_v4 = vpop.f32.mrf.mxu0  ;;  %v2361_v7 = vpop.f32.mrf.mxu1 }
 0x91f   : > { %v2385_v15 = vmul.f32 %v2332_v4, %v7286_v17  ;;  %v2386_v14 = vmul.f32 %v2361_v7, %v7295_v54  ;;  %v2374_v8 = vrot.slane %v2373_v51, 2  ;;  %v2381_v43 = vrot.slane %v2380_v27, 2 }
 0x920   : > { %v9186_v54 = vsub.f32 1.0, %v7437_v62  ;;  %vm7511_vm3 = vcmp.eq.s32.totalorder %v5724_v36, %v2470_v6  ;;  %vm7516_vm15 = vcmp.eq.s32.totalorder %v5724_v36, %v2482_v24  ;;  %vm7534_vm0 = vcmp.eq.s32.totalorder %v5495_v1, %v2470_v6 }
 0x921   : > { %v2375_v18 = vadd.f32 %v2374_v8, %v2373_v51  ;;  %v2382_v3 = vadd.f32 %v2381_v43, %v2380_v27  ;;  %vm7539_vm4 = vcmp.eq.s32.totalorder %v5495_v1, %v2482_v24 }
 0x922   : > { %v2475_v4 = vperm.slane %v9186_v54, 1 }
 0x923   : > { %v2383_v6 = vrot.slane %v2382_v3, 1 }
 0x927   : > { %v2335_v40 = vpop.f32.mrf.mxu0  ;;  %v2364_v61 = vpop.f32.mrf.mxu1 }
 0x928   : > { %v2387_v56 = vmul.f32 %v2335_v40, %v7307_v2  ;;  %v2388_v29 = vmul.f32 %v2364_v61, %v7309_v21  ;;  %v2487_v2 = vperm.slane %v7437_v62, 1  ;;  %v9195_v61 = vsub.f32 1.0, %v7433_v11 }
 0x92a   : > { %v2389_v55 = vadd.f32 %v2387_v56, %v2385_v15  ;;  %v2396_v39 = vadd.f32 %v2388_v29, %v2386_v14  ;;  %v2476_v15 = vperm.slane %v9195_v61, 1  ;;  %v2488_v14 = vperm.slane %v7433_v11, 1 }
 0x92b   : > { %v2479_v61 = vsel %vm7544_vm1, %v2475_v4, 0.0  ;;  %v2491_v34 = vsel %vm2485_vm9, %v2487_v2, 0.0  ;;  %v2489_v41 = vsel %vm7526_vm8, %v2487_v2, 0.0  ;;  %vm9209_vm1 = vnez %v8723_v16 }
 0x92c   : > { %v2390_v30 = vrot.slane %v2389_v55, 4  ;;  %v2397_v17 = vrot.slane %v2396_v39, 4  ;;  %v2480_v11 = vsel %vm7511_vm3, %v2476_v15, 0.0  ;;  %v2478_v21 = vsel %vm7534_vm0, %v2476_v15, 0.0 }
 0x92d   : > { %v2490_v28 = vsel %vm7539_vm4, %v2488_v14, 0.0  ;;  %v2495_v13 = vadd.f32 %v2491_v34, %v2479_v61  ;;  %vm9202_vm3 = vcmask 1040384   ;;  %vm9208_vm4 = vnez %v8721_v12 }
 0x92e   : > { %v2391_v57 = vadd.f32 %v2390_v30, %v2389_v55  ;;  %v2398_v7 = vadd.f32 %v2397_v17, %v2396_v39  ;;  %v2492_v55 = vsel %vm7516_vm15, %v2488_v14, 0.0  ;;  %v2376_v39 = vrot.slane %v2375_v18, 1  ;;  %vm9203_vm9 = vmmov %vm9202_vm3 }
 0x92f   : > { %v2604_v40 = vpop.f32.mrf.mxu0  ;;  %v2633_v8 = vpop.f32.mrf.mxu1  ;;  %v2477_v17 = vsel %vm7521_vm13, %v2475_v4, 0.0  ;;  %v2494_v2 = vadd.f32 %v2490_v28, %v2478_v21  ;;  %vm9204_vm15 = vcmask 1041408   ;;  %vm9205_vm13 = vmmov %vm9202_vm3 }
 0x930   : > { %v2392_v51 = vrot.slane %v2391_v57, 2  ;;  %v2399_v27 = vrot.slane %v2398_v7, 2  ;;  %v2493_v56 = vadd.f32 %v2489_v41, %v2477_v17  ;;  %vm9206_vm8 = vmmov %vm9202_vm3 }
 0x931   : > { %vm9207_vm0 = vmmov %vm9204_vm15 }
 0x932   : > { %v2393_v30 = vadd.f32 %v2392_v51, %v2391_v57  ;;  %v2400_v24 = vadd.f32 %v2399_v27, %v2398_v7  ;;  %v2496_v57 = vadd.f32 %v2492_v55, %v2480_v11  ;;  %v2377_v7 = vadd.f32 %v2376_v39, %v2375_v18 }
 0x933   : > { %v2384_v51 = vadd.f32 %v2383_v6, %v2382_v3  ;;  %v2646_v11 = vmul.f32 %v2633_v8, %v2494_v2  ;;  %v2645_v3 = vmul.f32 %v2604_v40, %v2493_v56 }
 0x934   : > { %v2394_v54 = vrot.slane %v2393_v30, 1  ;;  %v2401_v25 = vrot.slane %v2400_v24, 1 }
 0x936   : > { %v2395_v33 = vadd.f32 %v2394_v54, %v2393_v30  ;;  %v2402_v27 = vadd.f32 %v2401_v25, %v2400_v24 }
 0x937   : > { %v2607_v19 = vpop.f32.mrf.mxu0  ;;  %v2636_v43 = vpop.f32.mrf.mxu1 }
 0x938   : > { %v2403_v4 = vsel %vm9202_vm3, %v2377_v7, %v2395_v33  ;;  %v2404_v62 = vsel %vm9203_vm9, %v2384_v51, %v2402_v27  ;;  %v2648_v15 = vmul.f32 %v2636_v43, %v2496_v57  ;;  %v2647_v14 = vmul.f32 %v2607_v19, %v2495_v13 }
 0x939   : > { %v2407_v44 = vrot.slane %v2404_v62, 6  ;;  %vm9210_vm3 = vnez %v8725_v20  ;;  %vm9211_vm9 = vnez %v8727_v23 }
 0x93a   : > { %v2656_v55 = vadd.f32 %v2648_v15, %v2646_v11  ;;  %v2649_v34 = vadd.f32 %v2647_v14, %v2645_v3 }
 0x93b   : > { %v2408_v29 = vsel %vm9204_vm15, %v2403_v4, %v2407_v44  ;;  %vm9212_vm15 = vnez %v8729_v26 }
 0x93c   : > { %v2410_v18 = vadd.f32 %v2408_v29, %v7126_v37  ;;  %v2657_v30 = vrot.slane %v2656_v55, 4  ;;  %v2650_v24 = vrot.slane %v2649_v34, 4 }
 0x93e   : > { %2411 = vst [vmem:[%s7569_s17] sm:$0xf] %v2410_v18  ;;  %v2658_v17 = vadd.f32 %v2657_v30, %v2656_v55  ;;  %v2651_v54 = vadd.f32 %v2650_v24, %v2649_v34 }
 0x93f   : > { %v2610_v39 = vpop.f32.mrf.mxu0  ;;  %v2639_v6 = vpop.f32.mrf.mxu1 }
 0x940   : > { %v2663_v19 = vmul.f32 %v2610_v39, %v2493_v56  ;;  %v2664_v8 = vmul.f32 %v2639_v6, %v2494_v2  ;;  %v2659_v40 = vrot.slane %v2658_v17, 2  ;;  %v2652_v28 = vrot.slane %v2651_v54, 2 }
 0x942   : > { %v2660_v33 = vadd.f32 %v2659_v40, %v2658_v17  ;;  %v2653_v4 = vadd.f32 %v2652_v28, %v2651_v54 }
 0x944   : > { %v2661_v29 = vrot.slane %v2660_v33, 1  ;;  %v2654_v18 = vrot.slane %v2653_v4, 1 }
 0x946   : > { %v2655_v55 = vadd.f32 %v2654_v18, %v2653_v4 }
 0x947   : > { %v2613_v25 = vpop.f32.mrf.mxu0  ;;  %v2642_v44 = vpop.f32.mrf.mxu1 }
 0x948   : > { %v2665_v61 = vmul.f32 %v2613_v25, %v2495_v13  ;;  %v2666_v37 = vmul.f32 %v2642_v44, %v2496_v57  ;;  %v2662_v13 = vadd.f32 %v2661_v29, %v2660_v33 }
 0x94a   : > { %v2667_v41 = vadd.f32 %v2665_v61, %v2663_v19  ;;  %v2674_v21 = vadd.f32 %v2666_v37, %v2664_v8 }
 0x94c   : > { %v2668_v7 = vrot.slane %v2667_v41, 4  ;;  %v2675_v51 = vrot.slane %v2674_v21, 4 }
 0x94e   : > { %v2669_v27 = vadd.f32 %v2668_v7, %v2667_v41  ;;  %v2676_v43 = vadd.f32 %v2675_v51, %v2674_v21 }
 0x950   : > { %v2670_v62 = vrot.slane %v2669_v27, 2  ;;  %v2677_v15 = vrot.slane %v2676_v43, 2 }
 0x952   : > { %v2671_v14 = vadd.f32 %v2670_v62, %v2669_v27  ;;  %v2678_v11 = vadd.f32 %v2677_v15, %v2676_v43 }
 0x954   : > { %v2672_v56 = vrot.slane %v2671_v14, 1  ;;  %v2679_v2 = vrot.slane %v2678_v11, 1 }
 0x956   : > { %v2673_v57 = vadd.f32 %v2672_v56, %v2671_v14  ;;  %v2680_v3 = vadd.f32 %v2679_v2, %v2678_v11 }
 0x958   : > { %v2682_v34 = vsel %vm9205_vm13, %v2662_v13, %v2680_v3  ;;  %v2681_v6 = vsel %vm9206_vm8, %v2655_v55, %v2673_v57  ;;  %vm9213_vm13 = vnez %v8731_v38  ;;  %vm9214_vm8 = vnez %v8733_v42 }
 0x959   : > { %v2685_v39 = vrot.slane %v2682_v34, 6 }
 0x95b   : > { %v2686_v30 = vsel %vm9207_vm0, %v2681_v6, %v2685_v39  ;;  %vm9215_vm0 = vnez %v8735_v46 }
 0x95c   : > { %v7576_v24 = vadd.f32 %v2686_v30, %v7134_v9 }
 0x95e   : > { %2690 = vst [vmem:[#allocation1] ss:$4 sm:$0xff] %v7576_v24  ;;  %v2771_v17 = vperm.slane %v7576_v24, 0  ;;  %v2772_v54 = vperm.slane %v7576_v24, 2  ;;  %v2777_v61 = vperm.slane %v7576_v24, 1  ;;  %v2778_v21 = vperm.slane %v7576_v24, 3 }
 0x960   : > { %v2775_v25 = vperm.slane %v2771_v17, 0  ;;  %v2776_v44 = vperm.slane %v2772_v54, 0  ;;  %v2781_v51 = vperm.slane %v2777_v61, 1  ;;  %v2782_v62 = vperm.slane %v2778_v21, 1 }
 0x962   : > { %v2783_v19 = vmul.f32 %v2775_v25, %v5830_v22  ;;  %v2784_v8 = vmul.f32 %v2776_v44, %v5845_v31  ;;  %v2785_v33 = vmul.f32 %v2775_v25, %v8855_v52  ;;  %v2786_v27 = vmul.f32 %v2776_v44, %v8856_v47  ;;  %v9235_v44 = vld [vmem:[#allocation12_spill] sm:$0xff] }
 0x963   : > { %v2787_v14 = vmul.f32 %v2781_v51, %v5830_v22  ;;  %v2788_v13 = vmul.f32 %v2782_v62, %v5845_v31  ;;  %v7630_v57 = vmul.f32 %v2781_v51, %v8855_v52  ;;  %v7633_v3 = vmul.f32 %v2782_v62, %v8856_v47 }
 0x964   : > { %2807 = vmatmul.f32.vlgmr.msra.gmra.mxu2 %v2783_v19  ;;  %2836 = vmatmul.f32.vlgmr.msra.gmra.mxu3 %v2784_v8 }
 0x965   : > { %v2691_v37 = vld.sshfl [vmem:[#allocation1] sm:$0xff pattern:$0x73625140]  ;;  %v2692_v40 = vld.sshfl [vmem:[#allocation1 + $0x8] sm:$0xff pattern:$0x73625140]  ;;  %4836 = vmatpush.msk.msra.mxu2 %vm9208_vm4, %v8803_v60  ;;  %4852 = vmatpush.msk.msra.mxu3 %vm9209_vm1, %v8803_v60 }
 0x966   : > { %v2695_v9 = vadd.f32 %v2691_v37, %v8852_v59  ;;  %v2696_v41 = vadd.f32 %v2692_v40, %v8853_v5 }
 0x967   : > { %4837 = vmatpush.msk.msra.mxu2 %vm9210_vm3, %v8803_v60  ;;  %4853 = vmatpush.msk.msra.mxu3 %vm9211_vm9, %v8803_v60 }
 0x968   : > { %v2697_v28 = vmax.f32 %v2695_v9, 0.0  ;;  %v2698_v7 = vmax.f32 %v2696_v41, 0.0 }
 0x969   : > { %4838 = vmatpush.msk.msra.mxu2 %vm9212_vm15, %v8803_v60  ;;  %4854 = vmatpush.msk.msra.mxu3 %vm9213_vm13, %v8803_v60  ;;  %vm9216_vm13 = vnez %v8737_v49  ;;  %vm9217_vm15 = vnez %v8739_v53 }
 0x96a   : > { %v2699_v43 = vmin.f32 %v2697_v28, 15.0  ;;  %v2700_v4 = vmin.f32 %v2698_v7, 15.0 }
 0x96b   : > { %4839 = vmatpush.msk.msra.mxu2 %vm9214_vm8, %v8803_v60  ;;  %4855 = vmatpush.msk.msra.mxu3 %vm9215_vm0, %v8803_v60 }
 0x96c   : > { %2810 = vmatmul.f32.gmra.mxu2 %v2785_v33  ;;  %2839 = vmatmul.f32.gmra.mxu3 %v2786_v27  ;;  %v2701_v15 = vfloor.f32 %v2699_v43  ;;  %v2702_v29 = vfloor.f32 %v2700_v4 }
 0x96d   : > { %4840 = vmatpush.msk.msra.mxu2 %vm9216_vm13, %v8803_v60  ;;  %4856 = vmatpush.msk.msra.mxu3 %vm9217_vm15, %v8803_v60  ;;  %vm9218_vm13 = vnez %v8741_v58  ;;  %vm9219_vm15 = vnez %v8743_v63 }
 0x96e   : > { %v7620_v11 = vsub.f32 %v2699_v43, %v2701_v15  ;;  %v7622_v18 = vcvt.f32.s32 %v2701_v15  ;;  %v7624_v56 = vsub.f32 %v2700_v4, %v2702_v29  ;;  %v7626_v2 = vcvt.f32.s32 %v2702_v29  ;;  %v9231_v29 = vld [vmem:[#allocation10_spill] sm:$0xff] }
 0x96f   : > { %4841 = vmatpush.msk.msra.mxu2 %vm9218_vm13, %v8803_v60  ;;  %4857 = vmatpush.msk.msra.mxu3 %vm9219_vm15, %v8803_v60  ;;  %vm9220_vm13 = vnez %v8745_v10 }
 0x970   : > { %v2707_v55 = vadd.s32 1, %v7622_v18  ;;  %v2713_v34 = vperm.slane %v7622_v18, 0  ;;  %v2719_v39 = vsub.f32 1.0, %v7620_v11  ;;  %v2733_v6 = vperm.slane %v7620_v11, 0 }
 0x971   : > { %v2708_v30 = vadd.s32 1, %v7626_v2  ;;  %v2714_v17 = vperm.slane %v7626_v2, 0  ;;  %v2720_v54 = vsub.f32 1.0, %v7624_v56  ;;  %v2734_v25 = vperm.slane %v7624_v56, 0  ;;  %4842 = vmatpush.msk.msra.mxu2 %vm9220_vm13, %v8803_v60  ;;  %4858 = vmatpush.msk.msra.mxu3 %vm9159_vm6, %v8803_v60 }
 0x972   : > { %vm2709_vm15 = vcmp.lt.s32.totalorder %v2707_v55, 15  ;;  %vm7656_vm0 = vcmp.eq.s32.totalorder %v5724_v36, %v2713_v34  ;;  %v2721_v19 = vperm.slane %v2719_v39, 0  ;;  %vm7661_vm8 = vcmp.eq.s32.totalorder %v5495_v1, %v2713_v34 }
 0x973   : > { %v2710_v61 = vsel %vm2709_vm15, %v2707_v55, 15  ;;  %vm2711_vm9 = vcmp.lt.s32.totalorder %v2708_v30, 15  ;;  %vm7666_vm13 = vcmp.eq.s32.totalorder %v5724_v36, %v2714_v17  ;;  %v2722_v40 = vperm.slane %v2720_v54, 0  ;;  %4843 = vmatpush.msk.msra.mxu2 %vm9160_vm7, %v8803_v60  ;;  %4859 = vmatpush.msk.msra.mxu3 %vm9161_vm10, %v8803_v60 }
 0x974   : > { %2813 = vmatmul.f32.gmra.mxu2 %v2787_v14  ;;  %2842 = vmatmul.f32.gmra.mxu3 %v2788_v13  ;;  %v2725_v9 = vsel %vm7656_vm0, %v2721_v19, 0.0  ;;  %v2727_v41 = vperm.slane %v2710_v61, 0  ;;  %v2712_v21 = vsel %vm2711_vm9, %v2708_v30, 15  ;;  %v2723_v28 = vsel %vm7661_vm8, %v2721_v19, 0.0 }
 0x975   : > { %v2726_v7 = vsel %vm7666_vm13, %v2722_v40, 0.0  ;;  %v2728_v51 = vperm.slane %v2712_v21, 0  ;;  %vm7683_vm15 = vcmp.eq.s32.totalorder %v5495_v1, %v2714_v17  ;;  %v2743_v27 = vperm.slane %v7622_v18, 1  ;;  %v9234_v17 = vld [vmem:[#allocation11_spill] sm:$0xff] }
 0x976   : > { %vm9229_vm10 = vnez %v8755_v35  ;;  %vm9230_vm9 = vnez %v8757_v32  ;;  %vm2731_vm8 = vcmp.eq.s32.totalorder %v5724_v36, %v2727_v41  ;;  %vm2729_vm13 = vcmp.eq.s32.totalorder %v5495_v1, %v2727_v41 }
 0x977   : > { %4844 = vmatpush.msk.msra.mxu2 %vm9229_vm10, %v8803_v60  ;;  %4860 = vmatpush.msk.msra.mxu3 %vm9230_vm9, %v8803_v60  ;;  %v2724_v43 = vsel %vm7683_vm15, %v2722_v40, 0.0  ;;  %v2749_v4 = vperm.slane %v2719_v39, 1  ;;  %v2737_v62 = vsel %vm2731_vm8, %v2733_v6, 0.0  ;;  %vm2732_vm0 = vcmp.eq.s32.totalorder %v5724_v36, %v2728_v51 }
 0x978   : > { %v2735_v15 = vsel %vm2729_vm13, %v2733_v6, 0.0  ;;  %vm2730_vm7 = vcmp.eq.s32.totalorder %v5495_v1, %v2728_v51  ;;  %v2741_v14 = vadd.f32 %v2737_v62, %v2725_v9  ;;  %v2738_v18 = vsel %vm2732_vm0, %v2734_v25, 0.0  ;;  %v9236_v9 = vld [vmem:[#allocation13_spill] sm:$0xff]  ;;  %v9245_v62 = vld [vmem:[#allocation18_spill] sm:$0xff] }
 0x979   : > { %4845 = vmatpush.msk.msra.mxu2 %vm9132_vm14, %v8803_v60  ;;  %4861 = vmatpush.msk.msra.mxu3 %vm9133_vm11, %v8803_v60  ;;  %v2739_v13 = vadd.f32 %v2735_v15, %v2723_v28  ;;  %v2736_v55 = vsel %vm2730_vm7, %v2734_v25, 0.0  ;;  %v2742_v34 = vadd.f32 %v2738_v18, %v2726_v7  ;;  %vm7707_vm15 = vcmp.eq.s32.totalorder %v5495_v1, %v2743_v27  ;;  %v9247_v15 = vld [vmem:[#allocation19_spill] sm:$0xff]  ;;  %v9251_v18 = vld [vmem:[#allocation21_spill] sm:$0xff] }
 0x97a   : > { %v2740_v39 = vadd.f32 %v2736_v55, %v2724_v43  ;;  %v2755_v6 = vperm.slane %v2710_v61, 1  ;;  %2875 = vmatpush.msra.mxu0 %v2741_v14  ;;  %v2751_v25 = vsel %vm7707_vm15, %v2749_v4, 0.0  ;;  %v2761_v19 = vperm.slane %v7620_v11, 1  ;;  %v9241_v43 = vld [vmem:[#allocation16_spill] sm:$0xff] }
 0x97b   : > { %4846 = vmatpush.msk.msra.mxu2 %vm9134_vm5, %v8803_v60  ;;  %4862 = vmatpush.msk.msra.mxu3 %vm9164_vm12, %v8803_v60  ;;  %v2744_v8 = vperm.slane %v7626_v2, 1  ;;  %v2750_v37 = vperm.slane %v2720_v54, 1  ;;  %v2756_v61 = vperm.slane %v2712_v21, 1  ;;  %v2762_v40 = vperm.slane %v7624_v56, 1  ;;  %v9249_v14 = vld [vmem:[#allocation20_spill] sm:$0xff] }
 0x97c   : > { %2904 = vmatpush.msra.mxu1 %v2742_v34  ;;  %vm2757_vm7 = vcmp.eq.s32.totalorder %v5495_v1, %v2755_v6  ;;  %vm2747_vm8 = vcmp.eq.s32.totalorder %v5724_v36, %v2743_v27  ;;  %2816 = vmatmul.f32.gmra.mxu2 %v7630_v57  ;;  %vm2759_vm0 = vcmp.eq.s32.totalorder %v5724_v36, %v2755_v6  ;;  %v9237_v57 = vld [vmem:[#allocation14_spill] sm:$0xff] }
 0x97d   : > { %4847 = vmatpush.msk.msra.mxu2 %vm9165_vm2, %v8803_v60  ;;  %2845 = vmatmul.f32.gmra.mxu3 %v7633_v3  ;;  %v2763_v11 = vsel %vm2757_vm7, %v2761_v19, 0.0  ;;  %vm2746_vm13 = vcmp.eq.s32.totalorder %v5495_v1, %v2744_v8  ;;  %v2753_v2 = vsel %vm2747_vm8, %v2749_v4, 0.0  ;;  %vm2758_vm15 = vcmp.eq.s32.totalorder %v5495_v1, %v2756_v61  ;;  %v9239_v3 = vld [vmem:[#allocation15_spill] sm:$0xff]  ;;  %v9243_v4 = vld [vmem:[#allocation17_spill] sm:$0xff] }
 0x97e   : > { %2876 = vmatpush.msra.mxu0 %v2739_v13  ;;  %2905 = vmatpush.msra.mxu1 %v2740_v39  ;;  %v2767_v54 = vadd.f32 %v2763_v11, %v2751_v25  ;;  %v2752_v56 = vsel %vm2746_vm13, %v2750_v37, 0.0  ;;  %v2765_v41 = vsel %vm2759_vm0, %v2761_v19, 0.0  ;;  %v2764_v21 = vsel %vm2758_vm15, %v2762_v40, 0.0  ;;  %v9253_v13 = vld [vmem:[#allocation22_spill] sm:$0xff] }
 0x97f   : > { %v2769_v28 = vadd.f32 %v2765_v41, %v2753_v2  ;;  %vm2748_vm2 = vcmp.eq.s32.totalorder %v5724_v36, %v2744_v8  ;;  %vm2760_vm12 = vcmp.eq.s32.totalorder %v5724_v36, %v2756_v61  ;;  %vm9238_vm7 = vnez %v9237_v57 }
 0x980   : > { %4863 = vmatpush.msk.msra.mxu3 %vm9238_vm7, %v8803_v60  ;;  %vm9240_vm8 = vnez %v9239_v3  ;;  %v2768_v7 = vadd.f32 %v2764_v21, %v2752_v56  ;;  %v2754_v51 = vsel %vm2748_vm2, %v2750_v37, 0.0  ;;  %v2766_v33 = vsel %vm2760_vm12, %v2762_v40, 0.0 }
 0x981   : > { %4848 = vmatpush.msk.msra.mxu2 %vm9240_vm8, %v8803_v60  ;;  %v2770_v27 = vadd.f32 %v2766_v33, %v2754_v51  ;;  %vm9242_vm13 = vnez %v9241_v43  ;;  %vm9244_vm0 = vnez %v9243_v4  ;;  %vm9246_vm15 = vnez %v9245_v62 }
 0x982   : > { %4864 = vmatpush.msk.msra.mxu3 %vm9242_vm13, %v8803_v60  ;;  %vm9248_vm7 = vnez %v9247_v15  ;;  %vm9250_vm12 = vnez %v9249_v14  ;;  %vm9252_vm2 = vnez %v9251_v18  ;;  %vm9254_vm13 = vnez %v9253_v13 }
 0x983   : > { %4849 = vmatpush.msk.msra.mxu2 %vm9244_vm0, %v8803_v60 }
 0x984   : > { %4865 = vmatpush.msk.msra.mxu3 %vm9246_vm15, %v8803_v60  ;;  %vm9255_vm15 = vcmask 130048  }
 0x985   : > { %4850 = vmatpush.msk.msra.mxu2 %vm9248_vm7, %v8803_v60  ;;  %vm9256_vm0 = vmmov %vm9255_vm15 }
 0x986   : > { %4866 = vmatpush.msk.msra.mxu3 %vm9250_vm12, %v8803_v60  ;;  %vm9257_vm7 = vmmov %vm9256_vm0 }
 0x987   : > { %4851 = vmatpush.msk.msra.mxu2 %vm9252_vm2, %v8803_v60  ;;  %vm9258_vm12 = vmmov %vm9256_vm0 }
 0x988   : > { %4867 = vmatpush.msk.msra.mxu3 %vm9254_vm13, %v8803_v60  ;;  %vm9259_vm2 = vmmov %vm9256_vm0 }
 0x989   : > { %vm9260_vm13 = vmmov %vm9256_vm0 }
 0x9e7   : > { %v2808_v55 = vpop.f32.mrf.mxu2  ;;  %v2837_v34 = vpop.f32.mrf.mxu3 }
 0x9e8   : > { %v2838_v39 = vadd.f32 %v2837_v34, %v2808_v55 }
 0x9ea   : > { %4788 = vmatmul.msk.f32.vlgmr.msra.gmra.mxu0 %vm9255_vm15, %v2838_v39  ;;  %4792 = vmatmul.msk.f32.vlgmr.msra.gmra.mxu1 %vm9256_vm0, %v2838_v39  ;;  %vm9261_vm15 = vmmov %vm9256_vm0 }
 0x9ef   : > { %v2811_v30 = vpop.f32.mrf.mxu2  ;;  %v2840_v6 = vpop.f32.mrf.mxu3 }
 0x9f0   : > { %v2841_v25 = vadd.f32 %v2840_v6, %v2811_v30 }
 0x9f2   : > { %4789 = vmatmul.msk.f32.gmra.mxu0 %vm9257_vm7, %v2841_v25  ;;  %4793 = vmatmul.msk.f32.gmra.mxu1 %vm9258_vm12, %v2841_v25  ;;  %vm9262_vm7 = vcmask 1040384   ;;  %vm9264_vm12 = vcmask 1041408  }
 0x9f7   : > { %v2814_v19 = vpop.f32.mrf.mxu2  ;;  %v2843_v8 = vpop.f32.mrf.mxu3 }
 0x9f8   : > { %v2844_v37 = vadd.f32 %v2843_v8, %v2814_v19 }
 0x9fa   : > { %4790 = vmatmul.msk.f32.gmra.mxu0 %vm9259_vm2, %v2844_v37  ;;  %4794 = vmatmul.msk.f32.gmra.mxu1 %vm9260_vm13, %v2844_v37  ;;  %vm9263_vm13 = vmmov %vm9262_vm7  ;;  %vm9265_vm2 = vnez %v8727_v23 }
 0x9ff   : > { %v2817_v61 = vpop.f32.mrf.mxu2 }
 0xa00   : > { %v2846_v40 = vpop.f32.mrf.mxu3 }
 0xa01   : > { %v2847_v11 = vadd.f32 %v2846_v40, %v2817_v61 }
 0xa03   : > { %4791 = vmatmul.msk.f32.gmra.mxu0 %vm9261_vm15, %v2847_v11  ;;  %4795 = vmatmul.msk.f32.gmra.mxu1 %vm9256_vm0, %v2847_v11  ;;  %vm9266_vm15 = vnez %v8729_v26  ;;  %vm9267_vm0 = vnez %v8731_v38 }
 0xa67   : > { %v2878_v2 = vpop.f32.mrf.mxu0  ;;  %v2907_v56 = vpop.f32.mrf.mxu1 }
 0xa68   : > { %v2919_v51 = vmul.f32 %v2878_v2, %v2767_v54  ;;  %v2920_v33 = vmul.f32 %v2907_v56, %v2768_v7 }
 0xa6f   : > { %v2881_v41 = vpop.f32.mrf.mxu0  ;;  %v2910_v21 = vpop.f32.mrf.mxu1 }
 0xa70   : > { %v2921_v55 = vmul.f32 %v2881_v41, %v2769_v28  ;;  %v2922_v34 = vmul.f32 %v2910_v21, %v2770_v27 }
 0xa72   : > { %v2923_v39 = vadd.f32 %v2921_v55, %v2919_v51  ;;  %v2930_v30 = vadd.f32 %v2922_v34, %v2920_v33 }
 0xa74   : > { %v2924_v19 = vrot.slane %v2923_v39, 4  ;;  %v2931_v8 = vrot.slane %v2930_v30, 4 }
 0xa76   : > { %v2925_v37 = vadd.f32 %v2924_v19, %v2923_v39  ;;  %v2932_v61 = vadd.f32 %v2931_v8, %v2930_v30 }
 0xa77   : > { %v2884_v6 = vpop.f32.mrf.mxu0  ;;  %v2913_v25 = vpop.f32.mrf.mxu1 }
 0xa78   : > { %v2937_v18 = vmul.f32 %v2884_v6, %v2767_v54  ;;  %v2938_v11 = vmul.f32 %v2913_v25, %v2768_v7  ;;  %v2926_v62 = vrot.slane %v2925_v37, 2  ;;  %v2933_v4 = vrot.slane %v2932_v61, 2 }
 0xa7a   : > { %v2927_v51 = vadd.f32 %v2926_v62, %v2925_v37  ;;  %v2934_v33 = vadd.f32 %v2933_v4, %v2932_v61 }
 0xa7c   : > { %v2928_v39 = vrot.slane %v2927_v51, 1  ;;  %v2935_v30 = vrot.slane %v2934_v33, 1 }
 0xa80   : > { %v2887_v40 = vpop.f32.mrf.mxu0  ;;  %v2916_v13 = vpop.f32.mrf.mxu1 }
 0xa81   : > { %v2939_v14 = vmul.f32 %v2887_v40, %v2769_v28  ;;  %v2940_v15 = vmul.f32 %v2916_v13, %v2770_v27  ;;  %v2929_v28 = vadd.f32 %v2928_v39, %v2927_v51  ;;  %v2936_v27 = vadd.f32 %v2935_v30, %v2934_v33 }
 0xa83   : > { %v2941_v2 = vadd.f32 %v2939_v14, %v2937_v18  ;;  %v2948_v56 = vadd.f32 %v2940_v15, %v2938_v11 }
 0xa85   : > { %v2942_v41 = vrot.slane %v2941_v2, 4  ;;  %v2949_v21 = vrot.slane %v2948_v56, 4 }
 0xa87   : > { %v2943_v55 = vadd.f32 %v2942_v41, %v2941_v2  ;;  %v2950_v34 = vadd.f32 %v2949_v21, %v2948_v56 }
 0xa89   : > { %v2944_v43 = vrot.slane %v2943_v55, 2  ;;  %v2951_v3 = vrot.slane %v2950_v34, 2 }
 0xa8b   : > { %v2945_v19 = vadd.f32 %v2944_v43, %v2943_v55  ;;  %v2952_v8 = vadd.f32 %v2951_v3, %v2950_v34 }
 0xa8d   : > { %v2946_v54 = vrot.slane %v2945_v19, 1  ;;  %v2953_v7 = vrot.slane %v2952_v8, 1 }
 0xa8f   : > { %v2947_v13 = vadd.f32 %v2946_v54, %v2945_v19  ;;  %v2954_v6 = vadd.f32 %v2953_v7, %v2952_v8 }
 0xa91   : > { %v2955_v15 = vsel %vm9262_vm7, %v2929_v28, %v2947_v13  ;;  %v2956_v14 = vsel %vm9263_vm13, %v2936_v27, %v2954_v6  ;;  %vm9268_vm7 = vnez %v8733_v42  ;;  %vm9269_vm13 = vnez %v8735_v46 }
 0xa92   : > { %v2959_v62 = vrot.slane %v2956_v14, 6 }
 0xa94   : > { %v2960_v4 = vsel %vm9264_vm12, %v2955_v15, %v2959_v62  ;;  %vm9270_vm12 = vnez %v8737_v49 }
 0xa95   : > { %v7773_v18 = vadd.f32 %v2960_v4, %v7576_v24 }
 0xa97   : > { %2964 = vst [vmem:[#allocation1] ss:$4 sm:$0xff] %v7773_v18  ;;  %v3045_v3 = vperm.slane %v7773_v18, 0  ;;  %v3046_v43 = vperm.slane %v7773_v18, 2  ;;  %v3051_v11 = vperm.slane %v7773_v18, 1  ;;  %v3052_v21 = vperm.slane %v7773_v18, 3 }
 0xa99   : > { %v3049_v25 = vperm.slane %v3045_v3, 0  ;;  %v3050_v37 = vperm.slane %v3046_v43, 0  ;;  %v3055_v55 = vperm.slane %v3051_v11, 1  ;;  %v3056_v8 = vperm.slane %v3052_v21, 1 }
 0xa9b   : > { %v3057_v61 = vmul.f32 %v3049_v25, %v5830_v22  ;;  %v3058_v40 = vmul.f32 %v3050_v37, %v5845_v31  ;;  %v3059_v34 = vmul.f32 %v3049_v25, %v8855_v52  ;;  %v3060_v39 = vmul.f32 %v3050_v37, %v8856_v47 }
 0xa9c   : > { %v3061_v28 = vmul.f32 %v3055_v55, %v5830_v22  ;;  %v3062_v14 = vmul.f32 %v3056_v8, %v5845_v31  ;;  %v7827_v62 = vmul.f32 %v3055_v55, %v8855_v52  ;;  %v7830_v4 = vmul.f32 %v3056_v8, %v8856_v47 }
 0xa9d   : > { %3081 = vmatmul.f32.vlgmr.msrb.gmra.mxu2 %v3057_v61  ;;  %3110 = vmatmul.f32.vlgmr.msrb.gmra.mxu3 %v3058_v40 }
 0xa9e   : > { %v2965_v2 = vld.sshfl [vmem:[#allocation1] sm:$0xff pattern:$0x73625140]  ;;  %v2966_v56 = vld.sshfl [vmem:[#allocation1 + $0x8] sm:$0xff pattern:$0x73625140]  ;;  %4876 = vmatpush.msk.msrb.mxu2 %vm9208_vm4, %v8803_v60  ;;  %4892 = vmatpush.msk.msrb.mxu3 %vm9209_vm1, %v8803_v60 }
 0xa9f   : > { %v2969_v24 = vadd.f32 %v2965_v2, %v8852_v59  ;;  %v2970_v41 = vadd.f32 %v2966_v56, %v8853_v5 }
 0xaa0   : > { %4877 = vmatpush.msk.msrb.mxu2 %vm9210_vm3, %v8803_v60  ;;  %4893 = vmatpush.msk.msrb.mxu3 %vm9265_vm2, %v8803_v60  ;;  %vm9282_vm2 = vnez %v8753_v48 }
 0xaa1   : > { %v2971_v51 = vmax.f32 %v2969_v24, 0.0  ;;  %v2972_v33 = vmax.f32 %v2970_v41, 0.0 }
 0xaa2   : > { %4878 = vmatpush.msk.msrb.mxu2 %vm9266_vm15, %v8803_v60  ;;  %4894 = vmatpush.msk.msrb.mxu3 %vm9267_vm0, %v8803_v60  ;;  %vm9271_vm0 = vnez %v8739_v53 }
 0xaa3   : > { %v2973_v30 = vmin.f32 %v2971_v51, 15.0  ;;  %v2974_v19 = vmin.f32 %v2972_v33, 15.0 }
 0xaa4   : > { %4879 = vmatpush.msk.msrb.mxu2 %vm9268_vm7, %v8803_v60  ;;  %4895 = vmatpush.msk.msrb.mxu3 %vm9269_vm13, %v8803_v60 }
 0xaa5   : > { %3084 = vmatmul.f32.gmra.mxu2 %v3059_v34  ;;  %3113 = vmatmul.f32.gmra.mxu3 %v3060_v39  ;;  %v2975_v54 = vfloor.f32 %v2973_v30  ;;  %v2976_v7 = vfloor.f32 %v2974_v19 }
 0xaa6   : > { %4880 = vmatpush.msk.msrb.mxu2 %vm9270_vm12, %v8803_v60  ;;  %4896 = vmatpush.msk.msrb.mxu3 %vm9271_vm0, %v8803_v60  ;;  %vm9272_vm12 = vnez %v8741_v58  ;;  %vm9273_vm0 = vnez %v8743_v63 }
 0xaa7   : > { %v7817_v27 = vsub.f32 %v2973_v30, %v2975_v54  ;;  %v7819_v13 = vcvt.f32.s32 %v2975_v54  ;;  %v7821_v6 = vsub.f32 %v2974_v19, %v2976_v7  ;;  %v7823_v15 = vcvt.f32.s32 %v2976_v7 }
 0xaa8   : > { %4881 = vmatpush.msk.msrb.mxu2 %vm9272_vm12, %v8803_v60  ;;  %4897 = vmatpush.msk.msrb.mxu3 %vm9273_vm0, %v8803_v60  ;;  %vm9274_vm12 = vnez %v8745_v10 }
 0xaa9   : > { %v2981_v3 = vadd.s32 1, %v7819_v13  ;;  %v2987_v43 = vperm.slane %v7819_v13, 0  ;;  %v2993_v25 = vsub.f32 1.0, %v7817_v27  ;;  %v3007_v37 = vperm.slane %v7817_v27, 0 }
 0xaaa   : > { %v2982_v61 = vadd.s32 1, %v7823_v15  ;;  %v2988_v40 = vperm.slane %v7823_v15, 0  ;;  %v2994_v11 = vsub.f32 1.0, %v7821_v6  ;;  %v3008_v2 = vperm.slane %v7821_v6, 0  ;;  %4882 = vmatpush.msk.msrb.mxu2 %vm9274_vm12, %v8803_v60  ;;  %4898 = vmatpush.msk.msrb.mxu3 %vm9159_vm6, %v8803_v60 }
 0xaab   : > { %vm2983_vm0 = vcmp.lt.s32.totalorder %v2981_v3, 15  ;;  %vm7853_vm13 = vcmp.eq.s32.totalorder %v5724_v36, %v2987_v43  ;;  %v2995_v24 = vperm.slane %v2993_v25, 0  ;;  %vm7858_vm7 = vcmp.eq.s32.totalorder %v5495_v1, %v2987_v43 }
 0xaac   : > { %v2984_v21 = vsel %vm2983_vm0, %v2981_v3, 15  ;;  %vm2985_vm15 = vcmp.lt.s32.totalorder %v2982_v61, 15  ;;  %vm7863_vm12 = vcmp.eq.s32.totalorder %v5724_v36, %v2988_v40  ;;  %v2996_v33 = vperm.slane %v2994_v11, 0  ;;  %4899 = vmatpush.msk.msrb.mxu3 %vm9282_vm2, %v8803_v60 }
 0xaad   : > { %vm9281_vm6 = vnez %v8920_v50  ;;  %3087 = vmatmul.f32.gmra.mxu2 %v3061_v28  ;;  %3116 = vmatmul.f32.gmra.mxu3 %v3062_v14  ;;  %v2999_v55 = vsel %vm7853_vm13, %v2995_v24, 0.0  ;;  %v3001_v34 = vperm.slane %v2984_v21, 0  ;;  %v2986_v39 = vsel %vm2985_vm15, %v2982_v61, 15 }
 0xaae   : > { %4883 = vmatpush.msk.msrb.mxu2 %vm9281_vm6, %v8803_v60  ;;  %v2997_v30 = vsel %vm7858_vm7, %v2995_v24, 0.0  ;;  %v3000_v19 = vsel %vm7863_vm12, %v2996_v33, 0.0  ;;  %v3002_v8 = vperm.slane %v2986_v39, 0  ;;  %vm7880_vm0 = vcmp.eq.s32.totalorder %v5495_v1, %v2988_v40  ;;  %4900 = vmatpush.msk.msrb.mxu3 %vm9230_vm9, %v8803_v60 }
 0xaaf   : > { %v3017_v7 = vperm.slane %v7819_v13, 1  ;;  %vm3005_vm15 = vcmp.eq.s32.totalorder %v5724_v36, %v3001_v34  ;;  %vm3003_vm7 = vcmp.eq.s32.totalorder %v5495_v1, %v3001_v34  ;;  %v2998_v28 = vsel %vm7880_vm0, %v2996_v33, 0.0 }
 0xab0   : > { %4884 = vmatpush.msk.msrb.mxu2 %vm9229_vm10, %v8803_v60  ;;  %v3023_v14 = vperm.slane %v2993_v25, 1  ;;  %v3011_v3 = vsel %vm3005_vm15, %v3007_v37, 0.0  ;;  %vm3006_vm13 = vcmp.eq.s32.totalorder %v5724_v36, %v3002_v8  ;;  %v3009_v13 = vsel %vm3003_vm7, %v3007_v37, 0.0  ;;  %4901 = vmatpush.msk.msrb.mxu3 %vm9133_vm11, %v8803_v60 }
 0xab1   : > { %vm3004_vm12 = vcmp.eq.s32.totalorder %v5495_v1, %v3002_v8  ;;  %v3015_v43 = vadd.f32 %v3011_v3, %v2999_v55  ;;  %v3012_v61 = vsel %vm3006_vm13, %v3008_v2, 0.0  ;;  %v3013_v40 = vadd.f32 %v3009_v13, %v2997_v30  ;;  %v9295_v3 = vld [vmem:[#allocation18_spill] sm:$0xff]  ;;  %v9297_v13 = vld [vmem:[#allocation19_spill] sm:$0xff] }
 0xab2   : > { %4885 = vmatpush.msk.msrb.mxu2 %vm9132_vm14, %v8803_v60  ;;  %v3010_v56 = vsel %vm3004_vm12, %v3008_v2, 0.0  ;;  %v3016_v24 = vadd.f32 %v3012_v61, %v3000_v19  ;;  %vm7904_vm0 = vcmp.eq.s32.totalorder %v5495_v1, %v3017_v7  ;;  %v3029_v37 = vperm.slane %v2984_v21, 1  ;;  %v9301_v61 = vld [vmem:[#allocation21_spill] sm:$0xff] }
 0xab3   : > { %v3014_v25 = vadd.f32 %v3010_v56, %v2998_v28  ;;  %vm9287_vm15 = vnez %v9235_v44  ;;  %3149 = vmatpush.msrb.mxu0 %v3015_v43  ;;  %v3025_v2 = vsel %vm7904_vm0, %v3023_v14, 0.0  ;;  %v3035_v51 = vperm.slane %v7817_v27, 1  ;;  %v9291_v28 = vld [vmem:[#allocation16_spill] sm:$0xff] }
 0xab4   : > { %4886 = vmatpush.msk.msrb.mxu2 %vm9134_vm5, %v8803_v60  ;;  %4902 = vmatpush.msk.msrb.mxu3 %vm9287_vm15, %v8803_v60  ;;  %v3018_v33 = vperm.slane %v7823_v15, 1  ;;  %v3024_v55 = vperm.slane %v2994_v11, 1  ;;  %vm3031_vm7 = vcmp.eq.s32.totalorder %v5495_v1, %v3029_v37  ;;  %v3030_v21 = vperm.slane %v2986_v39, 1  ;;  %v9299_v43 = vld [vmem:[#allocation20_spill] sm:$0xff] }
 0xab5   : > { %3178 = vmatpush.msrb.mxu1 %v3016_v24  ;;  %v3036_v34 = vperm.slane %v7821_v6, 1  ;;  %vm3021_vm13 = vcmp.eq.s32.totalorder %v5724_v36, %v3017_v7  ;;  %vm9288_vm12 = vnez %v9236_v9  ;;  %3090 = vmatmul.f32.gmra.mxu2 %v7827_v62  ;;  %v3037_v27 = vsel %vm3031_vm7, %v3035_v51, 0.0 }
 0xab6   : > { %4887 = vmatpush.msk.msrb.mxu2 %vm9288_vm12, %v8803_v60  ;;  %3119 = vmatmul.f32.gmra.mxu3 %v7830_v4  ;;  %vm3020_vm0 = vcmp.eq.s32.totalorder %v5495_v1, %v3018_v33  ;;  %v3027_v15 = vsel %vm3021_vm13, %v3023_v14, 0.0  ;;  %vm3033_vm15 = vcmp.eq.s32.totalorder %v5724_v36, %v3029_v37  ;;  %v3041_v11 = vadd.f32 %v3037_v27, %v3025_v2  ;;  %v9293_v14 = vld [vmem:[#allocation17_spill] sm:$0xff] }
 0xab7   : > { %3150 = vmatpush.msrb.mxu0 %v3013_v40  ;;  %3179 = vmatpush.msrb.mxu1 %v3014_v25  ;;  %v3026_v6 = vsel %vm3020_vm0, %v3024_v55, 0.0  ;;  %vm3032_vm5 = vcmp.eq.s32.totalorder %v5495_v1, %v3030_v21  ;;  %v3039_v39 = vsel %vm3033_vm15, %v3035_v51, 0.0  ;;  %vm3022_vm12 = vcmp.eq.s32.totalorder %v5724_v36, %v3018_v33  ;;  %v9303_v40 = vld [vmem:[#allocation22_spill] sm:$0xff] }
 0xab8   : > { %v3038_v30 = vsel %vm3032_vm5, %v3036_v34, 0.0  ;;  %v3043_v19 = vadd.f32 %v3039_v39, %v3027_v15  ;;  %vm3034_vm11 = vcmp.eq.s32.totalorder %v5724_v36, %v3030_v21  ;;  %vm9289_vm7 = vnez %v9237_v57  ;;  %4888 = vmatpush.msk.msrb.mxu2 %vm9240_vm8, %v8803_v60  ;;  %v9399_v57 = vld [vmem:[#allocation19_spill] sm:$0xff] }
 0xab9   : > { %4903 = vmatpush.msk.msrb.mxu3 %vm9289_vm7, %v8803_v60  ;;  %v3042_v4 = vadd.f32 %v3038_v30, %v3026_v6  ;;  %v3028_v8 = vsel %vm3022_vm12, %v3024_v55, 0.0  ;;  %v3040_v54 = vsel %vm3034_vm11, %v3036_v34, 0.0  ;;  %vm9292_vm5 = vnez %v9291_v28 }
 0xaba   : > { %v3044_v7 = vadd.f32 %v3040_v54, %v3028_v8  ;;  %vm9294_vm15 = vnez %v9293_v14  ;;  %vm9296_vm13 = vnez %v9295_v3  ;;  %vm9298_vm0 = vnez %v9297_v13 }
 0xabb   : > { %4904 = vmatpush.msk.msrb.mxu3 %vm9292_vm5, %v8803_v60  ;;  %4889 = vmatpush.msk.msrb.mxu2 %vm9294_vm15, %v8803_v60  ;;  %vm9300_vm11 = vnez %v9299_v43  ;;  %vm9302_vm12 = vnez %v9301_v61  ;;  %vm9304_vm5 = vnez %v9303_v40 }
 0xabd   : > { %4905 = vmatpush.msk.msrb.mxu3 %vm9296_vm13, %v8803_v60  ;;  %4890 = vmatpush.msk.msrb.mxu2 %vm9298_vm0, %v8803_v60  ;;  %vm9305_vm13 = vcmask 130048  }
 0xabe   : > { %vm9306_vm15 = vmmov %vm9305_vm13 }
 0xabf   : > { %4906 = vmatpush.msk.msrb.mxu3 %vm9300_vm11, %v8803_v60  ;;  %4891 = vmatpush.msk.msrb.mxu2 %vm9302_vm12, %v8803_v60  ;;  %vm9307_vm0 = vmmov %vm9305_vm13 }
 0xac0   : > { %vm9308_vm11 = vmmov %vm9307_vm0 }
 0xac1   : > { %4907 = vmatpush.msk.msrb.mxu3 %vm9304_vm5, %v8803_v60  ;;  %vm9309_vm12 = vmmov %vm9307_vm0 }
 0xac2   : > { %vm9310_vm5 = vmmov %vm9307_vm0 }
 0xb20   : > { %v3082_v56 = vpop.f32.mrf.mxu2  ;;  %v3111_v24 = vpop.f32.mrf.mxu3 }
 0xb21   : > { %v3112_v25 = vadd.f32 %v3111_v24, %v3082_v56 }
 0xb23   : > { %4828 = vmatmul.msk.f32.vlgmr.msrb.gmra.mxu0 %vm9305_vm13, %v3112_v25  ;;  %4832 = vmatmul.msk.f32.vlgmr.msrb.gmra.mxu1 %vm9306_vm15, %v3112_v25  ;;  %vm9311_vm13 = vmmov %vm9307_vm0 }
 0xb24   : > { %vm9312_vm15 = vmmov %vm9307_vm0 }
 0xb28   : > { %v3085_v41 = vpop.f32.mrf.mxu2  ;;  %v3114_v37 = vpop.f32.mrf.mxu3 }
 0xb29   : > { %v3115_v2 = vadd.f32 %v3114_v37, %v3085_v41 }
 0xb2b   : > { %4829 = vmatmul.msk.f32.gmra.mxu0 %vm9307_vm0, %v3115_v2  ;;  %4833 = vmatmul.msk.f32.gmra.mxu1 %vm9308_vm11, %v3115_v2  ;;  %vm9315_vm11 = vcmask 1041408  }
 0xb30   : > { %v3088_v51 = vpop.f32.mrf.mxu2  ;;  %v3117_v33 = vpop.f32.mrf.mxu3 }
 0xb31   : > { %v3118_v55 = vadd.f32 %v3117_v33, %v3088_v51 }
 0xb33   : > { %4830 = vmatmul.msk.f32.gmra.mxu0 %vm9309_vm12, %v3118_v55  ;;  %4834 = vmatmul.msk.f32.gmra.mxu1 %vm9310_vm5, %v3118_v55  ;;  %vm9313_vm5 = vcmask 1040384   ;;  %vm9316_vm12 = vnez %v8727_v23 }
 0xb34   : > { %vm9314_vm0 = vmmov %vm9313_vm5 }
 0xb38   : > { %v3091_v21 = vpop.f32.mrf.mxu2 }
 0xb39   : > { %v3120_v34 = vpop.f32.mrf.mxu3 }
 0xb3a   : > { %v3121_v27 = vadd.f32 %v3120_v34, %v3091_v21 }
 0xb3c   : > { %4831 = vmatmul.msk.f32.gmra.mxu0 %vm9311_vm13, %v3121_v27  ;;  %4835 = vmatmul.msk.f32.gmra.mxu1 %vm9312_vm15, %v3121_v27  ;;  %vm9317_vm13 = vnez %v8729_v26  ;;  %vm9318_vm15 = vnez %v8731_v38 }
 0xba0   : > { %v3152_v15 = vpop.f32.mrf.mxu0  ;;  %v3181_v6 = vpop.f32.mrf.mxu1 }
 0xba1   : > { %v3193_v8 = vmul.f32 %v3152_v15, %v3041_v11  ;;  %v3194_v54 = vmul.f32 %v3181_v6, %v3042_v4 }
 0xba8   : > { %v3155_v39 = vpop.f32.mrf.mxu0  ;;  %v3184_v30 = vpop.f32.mrf.mxu1 }
 0xba9   : > { %v3195_v56 = vmul.f32 %v3155_v39, %v3043_v19  ;;  %v3196_v24 = vmul.f32 %v3184_v30, %v3044_v7 }
 0xbab   : > { %v3197_v25 = vadd.f32 %v3195_v56, %v3193_v8  ;;  %v3204_v41 = vadd.f32 %v3196_v24, %v3194_v54 }
 0xbad   : > { %v3198_v51 = vrot.slane %v3197_v25, 4  ;;  %v3205_v33 = vrot.slane %v3204_v41, 4 }
 0xbaf   : > { %v3199_v55 = vadd.f32 %v3198_v51, %v3197_v25  ;;  %v3206_v21 = vadd.f32 %v3205_v33, %v3204_v41 }
 0xbb0   : > { %v3158_v37 = vpop.f32.mrf.mxu0  ;;  %v3187_v2 = vpop.f32.mrf.mxu1 }
 0xbb1   : > { %v3211_v61 = vmul.f32 %v3158_v37, %v3041_v11  ;;  %v3212_v27 = vmul.f32 %v3187_v2, %v3042_v4  ;;  %v3200_v3 = vrot.slane %v3199_v55, 2  ;;  %v3207_v14 = vrot.slane %v3206_v21, 2 }
 0xbb3   : > { %v3201_v8 = vadd.f32 %v3200_v3, %v3199_v55  ;;  %v3208_v54 = vadd.f32 %v3207_v14, %v3206_v21 }
 0xbb5   : > { %v3202_v25 = vrot.slane %v3201_v8, 1  ;;  %v3209_v41 = vrot.slane %v3208_v54, 1 }
 0xbb9   : > { %v3161_v34 = vpop.f32.mrf.mxu0  ;;  %v3190_v40 = vpop.f32.mrf.mxu1 }
 0xbba   : > { %v3213_v43 = vmul.f32 %v3161_v34, %v3043_v19  ;;  %v3214_v13 = vmul.f32 %v3190_v40, %v3044_v7  ;;  %v3203_v19 = vadd.f32 %v3202_v25, %v3201_v8  ;;  %v3210_v7 = vadd.f32 %v3209_v41, %v3208_v54 }
 0xbbc   : > { %v3215_v15 = vadd.f32 %v3213_v43, %v3211_v61  ;;  %v3222_v6 = vadd.f32 %v3214_v13, %v3212_v27 }
 0xbbe   : > { %v3216_v39 = vrot.slane %v3215_v15, 4  ;;  %v3223_v30 = vrot.slane %v3222_v6, 4 }
 0xbc0   : > { %v3217_v56 = vadd.f32 %v3216_v39, %v3215_v15  ;;  %v3224_v24 = vadd.f32 %v3223_v30, %v3222_v6 }
 0xbc2   : > { %v3218_v28 = vrot.slane %v3217_v56, 2  ;;  %v3225_v62 = vrot.slane %v3224_v24, 2 }
 0xbc4   : > { %v3219_v51 = vadd.f32 %v3218_v28, %v3217_v56  ;;  %v3226_v33 = vadd.f32 %v3225_v62, %v3224_v24 }
 0xbc6   : > { %v3220_v11 = vrot.slane %v3219_v51, 1  ;;  %v3227_v4 = vrot.slane %v3226_v33, 1 }
 0xbc8   : > { %v3221_v40 = vadd.f32 %v3220_v11, %v3219_v51  ;;  %v3228_v37 = vadd.f32 %v3227_v4, %v3226_v33 }
 0xbca   : > { %v3229_v13 = vsel %vm9313_vm5, %v3203_v19, %v3221_v40  ;;  %v3230_v43 = vsel %vm9314_vm0, %v3210_v7, %v3228_v37  ;;  %vm9319_vm5 = vnez %v8733_v42  ;;  %vm9320_vm0 = vnez %v8735_v46 }
 0xbcb   : > { %v3233_v3 = vrot.slane %v3230_v43, 6 }
 0xbcd   : > { %v3234_v14 = vsel %vm9315_vm11, %v3229_v13, %v3233_v3  ;;  %vm9321_vm11 = vnez %v8737_v49 }
 0xbce   : > { %v7970_v61 = vadd.f32 %v3234_v14, %v7773_v18 }
 0xbd0   : > { %3238 = vst [vmem:[#allocation1] ss:$4 sm:$0xff] %v7970_v61  ;;  %v3319_v62 = vperm.slane %v7970_v61, 0  ;;  %v3320_v28 = vperm.slane %v7970_v61, 2  ;;  %v3325_v27 = vperm.slane %v7970_v61, 1  ;;  %v3326_v30 = vperm.slane %v7970_v61, 3 }
 0xbd2   : > { %v3323_v2 = vperm.slane %v3319_v62, 0  ;;  %v3324_v55 = vperm.slane %v3320_v28, 0  ;;  %v3329_v56 = vperm.slane %v3325_v27, 1  ;;  %v3330_v33 = vperm.slane %v3326_v30, 1 }
 0xbd4   : > { %v3331_v21 = vmul.f32 %v3323_v2, %v5830_v22  ;;  %v3332_v34 = vmul.f32 %v3324_v55, %v5845_v31  ;;  %v3333_v24 = vmul.f32 %v3323_v2, %v8855_v52  ;;  %v3334_v25 = vmul.f32 %v3324_v55, %v8856_v47 }
 0xbd5   : > { %v3335_v19 = vmul.f32 %v3329_v56, %v5830_v22  ;;  %v3336_v43 = vmul.f32 %v3330_v33, %v5845_v31  ;;  %v8024_v3 = vmul.f32 %v3329_v56, %v8855_v52  ;;  %v8027_v14 = vmul.f32 %v3330_v33, %v8856_v47 }
 0xbd6   : > { %3355 = vmatmul.f32.vlgmr.msra.gmra.mxu2 %v3331_v21  ;;  %3384 = vmatmul.f32.vlgmr.msra.gmra.mxu3 %v3332_v34 }
 0xbd7   : > { %v3239_v15 = vld.sshfl [vmem:[#allocation1] sm:$0xff pattern:$0x73625140]  ;;  %v3240_v6 = vld.sshfl [vmem:[#allocation1 + $0x8] sm:$0xff pattern:$0x73625140]  ;;  %4916 = vmatpush.msk.msra.mxu2 %vm9208_vm4, %v8803_v60  ;;  %4932 = vmatpush.msk.msra.mxu3 %vm9209_vm1, %v8803_v60 }
 0xbd8   : > { %v3243_v18 = vadd.f32 %v3239_v15, %v8852_v59  ;;  %v3244_v39 = vadd.f32 %v3240_v6, %v8853_v5 }
 0xbd9   : > { %4917 = vmatpush.msk.msra.mxu2 %vm9210_vm3, %v8803_v60  ;;  %4933 = vmatpush.msk.msra.mxu3 %vm9316_vm12, %v8803_v60 }
 0xbda   : > { %v3245_v8 = vmax.f32 %v3243_v18, 0.0  ;;  %v3246_v54 = vmax.f32 %v3244_v39, 0.0 }
 0xbdb   : > { %4918 = vmatpush.msk.msra.mxu2 %vm9317_vm13, %v8803_v60  ;;  %4934 = vmatpush.msk.msra.mxu3 %vm9318_vm15, %v8803_v60  ;;  %vm9322_vm15 = vnez %v8739_v53 }
 0xbdc   : > { %v3247_v41 = vmin.f32 %v3245_v8, 15.0  ;;  %v3248_v51 = vmin.f32 %v3246_v54, 15.0 }
 0xbdd   : > { %4919 = vmatpush.msk.msra.mxu2 %vm9319_vm5, %v8803_v60  ;;  %4935 = vmatpush.msk.msra.mxu3 %vm9320_vm0, %v8803_v60 }
 0xbde   : > { %3358 = vmatmul.f32.gmra.mxu2 %v3333_v24  ;;  %3387 = vmatmul.f32.gmra.mxu3 %v3334_v25  ;;  %v3249_v11 = vfloor.f32 %v3247_v41  ;;  %v3250_v4 = vfloor.f32 %v3248_v51 }
 0xbdf   : > { %4920 = vmatpush.msk.msra.mxu2 %vm9321_vm11, %v8803_v60  ;;  %4936 = vmatpush.msk.msra.mxu3 %vm9322_vm15, %v8803_v60  ;;  %vm9323_vm11 = vnez %v8741_v58  ;;  %vm9324_vm15 = vnez %v8743_v63 }
 0xbe0   : > { %v8014_v7 = vsub.f32 %v3247_v41, %v3249_v11  ;;  %v8016_v40 = vcvt.f32.s32 %v3249_v11  ;;  %v8018_v37 = vsub.f32 %v3248_v51, %v3250_v4  ;;  %v8020_v13 = vcvt.f32.s32 %v3250_v4 }
 0xbe1   : > { %4921 = vmatpush.msk.msra.mxu2 %vm9323_vm11, %v8803_v60  ;;  %4937 = vmatpush.msk.msra.mxu3 %vm9324_vm15, %v8803_v60  ;;  %vm9325_vm11 = vnez %v8745_v10  ;;  %vm9326_vm15 = vnez %v8912_v45 }
 0xbe2   : > { %v3255_v62 = vadd.s32 1, %v8016_v40  ;;  %v3261_v28 = vperm.slane %v8016_v40, 0  ;;  %v3267_v2 = vsub.f32 1.0, %v8014_v7  ;;  %v3281_v55 = vperm.slane %v8014_v7, 0 }
 0xbe3   : > { %v3256_v21 = vadd.s32 1, %v8020_v13  ;;  %v3262_v34 = vperm.slane %v8020_v13, 0  ;;  %v3268_v27 = vsub.f32 1.0, %v8018_v37  ;;  %v3282_v15 = vperm.slane %v8018_v37, 0  ;;  %4922 = vmatpush.msk.msra.mxu2 %vm9325_vm11, %v8803_v60  ;;  %4938 = vmatpush.msk.msra.mxu3 %vm9326_vm15, %v8803_v60 }
 0xbe4   : > { %vm3257_vm0 = vcmp.lt.s32.totalorder %v3255_v62, 15  ;;  %vm8050_vm5 = vcmp.eq.s32.totalorder %v5724_v36, %v3261_v28  ;;  %v3269_v18 = vperm.slane %v3267_v2, 0  ;;  %vm8055_vm13 = vcmp.eq.s32.totalorder %v5495_v1, %v3261_v28 }
 0xbe5   : > { %v3258_v30 = vsel %vm3257_vm0, %v3255_v62, 15  ;;  %vm3259_vm12 = vcmp.lt.s32.totalorder %v3256_v21, 15  ;;  %vm8060_vm11 = vcmp.eq.s32.totalorder %v5724_v36, %v3262_v34  ;;  %v3270_v54 = vperm.slane %v3268_v27, 0  ;;  %4923 = vmatpush.msk.msra.mxu2 %vm9281_vm6, %v8803_v60  ;;  %4939 = vmatpush.msk.msra.mxu3 %vm9282_vm2, %v8803_v60 }
 0xbe6   : > { %3361 = vmatmul.f32.gmra.mxu2 %v3335_v19  ;;  %3390 = vmatmul.f32.gmra.mxu3 %v3336_v43  ;;  %v3273_v56 = vsel %vm8050_vm5, %v3269_v18, 0.0  ;;  %v3275_v24 = vperm.slane %v3258_v30, 0  ;;  %v3260_v25 = vsel %vm3259_vm12, %v3256_v21, 15  ;;  %v3271_v41 = vsel %vm8055_vm13, %v3269_v18, 0.0 }
 0xbe7   : > { %v3274_v51 = vsel %vm8060_vm11, %v3270_v54, 0.0  ;;  %v3276_v33 = vperm.slane %v3260_v25, 0  ;;  %vm8077_vm0 = vcmp.eq.s32.totalorder %v5495_v1, %v3262_v34  ;;  %v3291_v4 = vperm.slane %v8016_v40, 1  ;;  %4924 = vmatpush.msk.msra.mxu2 %vm9229_vm10, %v8803_v60  ;;  %4940 = vmatpush.msk.msra.mxu3 %vm9230_vm9, %v8803_v60 }
 0xbe8   : > { %vm3279_vm12 = vcmp.eq.s32.totalorder %v5724_v36, %v3275_v24  ;;  %vm3277_vm13 = vcmp.eq.s32.totalorder %v5495_v1, %v3275_v24  ;;  %v3272_v19 = vsel %vm8077_vm0, %v3270_v54, 0.0  ;;  %v3297_v43 = vperm.slane %v3267_v2, 1 }
 0xbe9   : > { %v3285_v62 = vsel %vm3279_vm12, %v3281_v55, 0.0  ;;  %vm3280_vm5 = vcmp.eq.s32.totalorder %v5724_v36, %v3276_v33  ;;  %v3283_v40 = vsel %vm3277_vm13, %v3281_v55, 0.0  ;;  %vm3278_vm11 = vcmp.eq.s32.totalorder %v5495_v1, %v3276_v33  ;;  %4925 = vmatpush.msk.msra.mxu2 %vm9132_vm14, %v8803_v60 }
 0xbea   : > { %vm9335_vm9 = vnez %v9231_v29  ;;  %v3289_v28 = vadd.f32 %v3285_v62, %v3273_v56  ;;  %v3286_v21 = vsel %vm3280_vm5, %v3282_v15, 0.0  ;;  %v3287_v34 = vadd.f32 %v3283_v40, %v3271_v41  ;;  %v9346_v62 = vld [vmem:[#allocation18_spill] sm:$0xff]  ;;  %v9348_v40 = vld [vmem:[#allocation19_spill] sm:$0xff] }
 0xbeb   : > { %4941 = vmatpush.msk.msra.mxu3 %vm9335_vm9, %v8803_v60  ;;  %v3284_v6 = vsel %vm3278_vm11, %v3282_v15, 0.0  ;;  %v3290_v18 = vadd.f32 %v3286_v21, %v3274_v51  ;;  %vm8101_vm0 = vcmp.eq.s32.totalorder %v5495_v1, %v3291_v4  ;;  %v3303_v55 = vperm.slane %v3258_v30, 1  ;;  %v9352_v21 = vld [vmem:[#allocation21_spill] sm:$0xff] }
 0xbec   : > { %v3288_v2 = vadd.f32 %v3284_v6, %v3272_v19  ;;  %vm9338_vm12 = vnez %v9234_v17  ;;  %vm9339_vm13 = vnez %v9235_v44  ;;  %3423 = vmatpush.msra.mxu0 %v3289_v28  ;;  %v3299_v15 = vsel %vm8101_vm0, %v3297_v43, 0.0  ;;  %v9342_v19 = vld [vmem:[#allocation16_spill] sm:$0xff] }
 0xbed   : > { %4926 = vmatpush.msk.msra.mxu2 %vm9338_vm12, %v8803_v60  ;;  %4942 = vmatpush.msk.msra.mxu3 %vm9339_vm13, %v8803_v60  ;;  %v3309_v8 = vperm.slane %v8014_v7, 1  ;;  %v3292_v54 = vperm.slane %v8020_v13, 1  ;;  %v3298_v56 = vperm.slane %v3268_v27, 1  ;;  %vm3305_vm5 = vcmp.eq.s32.totalorder %v5495_v1, %v3303_v55  ;;  %v9350_v28 = vld [vmem:[#allocation20_spill] sm:$0xff] }
 0xbee   : > { %3452 = vmatpush.msra.mxu1 %v3290_v18  ;;  %v3304_v30 = vperm.slane %v3260_v25, 1  ;;  %v3310_v24 = vperm.slane %v8018_v37, 1  ;;  %vm3295_vm11 = vcmp.eq.s32.totalorder %v5724_v36, %v3291_v4  ;;  %vm9340_vm13 = vnez %v9236_v9  ;;  %3364 = vmatmul.f32.gmra.mxu2 %v8024_v3 }
 0xbef   : > { %4927 = vmatpush.msk.msra.mxu2 %vm9340_vm13, %v8803_v60  ;;  %3393 = vmatmul.f32.gmra.mxu3 %v8027_v14  ;;  %v3311_v7 = vsel %vm3305_vm5, %v3309_v8, 0.0  ;;  %vm3294_vm0 = vcmp.eq.s32.totalorder %v5495_v1, %v3292_v54  ;;  %v3301_v13 = vsel %vm3295_vm11, %v3297_v43, 0.0  ;;  %vm3307_vm12 = vcmp.eq.s32.totalorder %v5724_v36, %v3303_v55  ;;  %v9344_v43 = vld [vmem:[#allocation17_spill] sm:$0xff] }
 0xbf0   : > { %3424 = vmatpush.msra.mxu0 %v3287_v34  ;;  %3453 = vmatpush.msra.mxu1 %v3288_v2  ;;  %v3315_v27 = vadd.f32 %v3311_v7, %v3299_v15  ;;  %v3300_v37 = vsel %vm3294_vm0, %v3298_v56, 0.0  ;;  %vm3306_vm9 = vcmp.eq.s32.totalorder %v5495_v1, %v3304_v30  ;;  %v3313_v25 = vsel %vm3307_vm12, %v3309_v8, 0.0  ;;  %v9354_v34 = vld [vmem:[#allocation22_spill] sm:$0xff] }
 0xbf1   : > { %v3312_v41 = vsel %vm3306_vm9, %v3310_v24, 0.0  ;;  %v3317_v51 = vadd.f32 %v3313_v25, %v3301_v13  ;;  %vm3296_vm13 = vcmp.eq.s32.totalorder %v5724_v36, %v3292_v54  ;;  %vm3308_vm14 = vcmp.eq.s32.totalorder %v5724_v36, %v3304_v30  ;;  %4943 = vmatpush.msk.msra.mxu3 %vm9289_vm7, %v8803_v60  ;;  %4928 = vmatpush.msk.msra.mxu2 %vm9240_vm8, %v8803_v60 }
 0xbf2   : > { %v3316_v14 = vadd.f32 %v3312_v41, %v3300_v37  ;;  %v3302_v33 = vsel %vm3296_vm13, %v3298_v56, 0.0  ;;  %v3314_v11 = vsel %vm3308_vm14, %v3310_v24, 0.0  ;;  %vm9343_vm9 = vnez %v9342_v19 }
 0xbf3   : > { %v3318_v4 = vadd.f32 %v3314_v11, %v3302_v33  ;;  %4944 = vmatpush.msk.msra.mxu3 %vm9343_vm9, %v8803_v60  ;;  %vm9345_vm12 = vnez %v9344_v43  ;;  %vm9347_vm5 = vnez %v9346_v62  ;;  %vm9349_vm11 = vnez %v9348_v40 }
 0xbf4   : > { %4929 = vmatpush.msk.msra.mxu2 %vm9345_vm12, %v8803_v60  ;;  %vm9351_vm14 = vnez %v9350_v28  ;;  %vm9353_vm13 = vnez %v9352_v21  ;;  %vm9355_vm0 = vnez %v9354_v34 }
 0xbf5   : > { %4945 = vmatpush.msk.msra.mxu3 %vm9347_vm5, %v8803_v60  ;;  %vm9356_vm5 = vcmask 130048  }
 0xbf6   : > { %4930 = vmatpush.msk.msra.mxu2 %vm9349_vm11, %v8803_v60  ;;  %vm9357_vm12 = vmmov %vm9356_vm5 }
 0xbf7   : > { %4946 = vmatpush.msk.msra.mxu3 %vm9351_vm14, %v8803_v60  ;;  %vm9358_vm11 = vmmov %vm9356_vm5 }
 0xbf8   : > { %4931 = vmatpush.msk.msra.mxu2 %vm9353_vm13, %v8803_v60  ;;  %vm9359_vm14 = vmmov %vm9356_vm5 }
 0xbf9   : > { %4947 = vmatpush.msk.msra.mxu3 %vm9355_vm0, %v8803_v60  ;;  %vm9360_vm13 = vmmov %vm9356_vm5 }
 0xbfa   : > { %vm9361_vm0 = vmmov %vm9356_vm5 }
 0xc59   : > { %v3356_v6 = vpop.f32.mrf.mxu2  ;;  %v3385_v18 = vpop.f32.mrf.mxu3 }
 0xc5a   : > { %v3386_v2 = vadd.f32 %v3385_v18, %v3356_v6 }
 0xc5c   : > { %4868 = vmatmul.msk.f32.vlgmr.msra.gmra.mxu0 %vm9356_vm5, %v3386_v2  ;;  %4872 = vmatmul.msk.f32.vlgmr.msra.gmra.mxu1 %vm9357_vm12, %v3386_v2  ;;  %vm9362_vm5 = vmmov %vm9361_vm0 }
 0xc5d   : > { %vm9363_vm12 = vmmov %vm9361_vm0 }
 0xc61   : > { %v3359_v39 = vpop.f32.mrf.mxu2  ;;  %v3388_v55 = vpop.f32.mrf.mxu3 }
 0xc62   : > { %v3389_v15 = vadd.f32 %v3388_v55, %v3359_v39 }
 0xc64   : > { %4869 = vmatmul.msk.f32.gmra.mxu0 %vm9358_vm11, %v3389_v15  ;;  %4873 = vmatmul.msk.f32.gmra.mxu1 %vm9359_vm14, %v3389_v15  ;;  %vm9364_vm11 = vcmask 1040384  }
 0xc65   : > { %vm9365_vm14 = vmmov %vm9364_vm11 }
 0xc69   : > { %v3362_v8 = vpop.f32.mrf.mxu2  ;;  %v3391_v54 = vpop.f32.mrf.mxu3 }
 0xc6a   : > { %v3392_v56 = vadd.f32 %v3391_v54, %v3362_v8 }
 0xc6c   : > { %4870 = vmatmul.msk.f32.gmra.mxu0 %vm9360_vm13, %v3392_v56  ;;  %4874 = vmatmul.msk.f32.gmra.mxu1 %vm9361_vm0, %v3392_v56  ;;  %vm9366_vm13 = vcmask 1041408   ;;  %vm9367_vm0 = vnez %v8727_v23 }
 0xc71   : > { %v3365_v30 = vpop.f32.mrf.mxu2 }
 0xc72   : > { %v3394_v24 = vpop.f32.mrf.mxu3 }
 0xc73   : > { %v3395_v7 = vadd.f32 %v3394_v24, %v3365_v30 }
 0xc75   : > { %4871 = vmatmul.msk.f32.gmra.mxu0 %vm9362_vm5, %v3395_v7  ;;  %4875 = vmatmul.msk.f32.gmra.mxu1 %vm9363_vm12, %v3395_v7  ;;  %vm9371_vm5 = vnez %v8735_v46  ;;  %vm9372_vm12 = vnez %v8737_v49 }
 0xcd9   : > { %v3426_v13 = vpop.f32.mrf.mxu0  ;;  %v3455_v37 = vpop.f32.mrf.mxu1 }
 0xcda   : > { %v3467_v33 = vmul.f32 %v3426_v13, %v3315_v27  ;;  %v3468_v11 = vmul.f32 %v3455_v37, %v3316_v14 }
 0xce1   : > { %v3429_v25 = vpop.f32.mrf.mxu0  ;;  %v3458_v41 = vpop.f32.mrf.mxu1 }
 0xce2   : > { %v3469_v6 = vmul.f32 %v3429_v25, %v3317_v51  ;;  %v3470_v18 = vmul.f32 %v3458_v41, %v3318_v4 }
 0xce4   : > { %v3471_v2 = vadd.f32 %v3469_v6, %v3467_v33  ;;  %v3478_v39 = vadd.f32 %v3470_v18, %v3468_v11 }
 0xce6   : > { %v3472_v8 = vrot.slane %v3471_v2, 4  ;;  %v3479_v54 = vrot.slane %v3478_v39, 4 }
 0xce8   : > { %v3473_v56 = vadd.f32 %v3472_v8, %v3471_v2  ;;  %v3480_v30 = vadd.f32 %v3479_v54, %v3478_v39 }
 0xce9   : > { %v3432_v55 = vpop.f32.mrf.mxu0  ;;  %v3461_v15 = vpop.f32.mrf.mxu1 }
 0xcea   : > { %v3485_v21 = vmul.f32 %v3432_v55, %v3315_v27  ;;  %v3486_v7 = vmul.f32 %v3461_v15, %v3316_v14  ;;  %v3474_v62 = vrot.slane %v3473_v56, 2  ;;  %v3481_v43 = vrot.slane %v3480_v30, 2 }
 0xcec   : > { %v3475_v33 = vadd.f32 %v3474_v62, %v3473_v56  ;;  %v3482_v11 = vadd.f32 %v3481_v43, %v3480_v30 }
 0xcee   : > { %v3476_v2 = vrot.slane %v3475_v33, 1  ;;  %v3483_v39 = vrot.slane %v3482_v11, 1 }
 0xcf2   : > { %v3435_v24 = vpop.f32.mrf.mxu0  ;;  %v3464_v34 = vpop.f32.mrf.mxu1 }
 0xcf3   : > { %v3487_v28 = vmul.f32 %v3435_v24, %v3317_v51  ;;  %v3488_v40 = vmul.f32 %v3464_v34, %v3318_v4  ;;  %v3477_v51 = vadd.f32 %v3476_v2, %v3475_v33  ;;  %v3484_v4 = vadd.f32 %v3483_v39, %v3482_v11 }
 0xcf5   : > { %v3489_v13 = vadd.f32 %v3487_v28, %v3485_v21  ;;  %v3496_v37 = vadd.f32 %v3488_v40, %v3486_v7 }
 0xcf7   : > { %v3490_v25 = vrot.slane %v3489_v13, 4  ;;  %v3497_v41 = vrot.slane %v3496_v37, 4 }
 0xcf9   : > { %v3491_v6 = vadd.f32 %v3490_v25, %v3489_v13  ;;  %v3498_v18 = vadd.f32 %v3497_v41, %v3496_v37 }
 0xcfb   : > { %v3492_v19 = vrot.slane %v3491_v6, 2  ;;  %v3499_v3 = vrot.slane %v3498_v18, 2 }
 0xcfd   : > { %v3493_v8 = vadd.f32 %v3492_v19, %v3491_v6  ;;  %v3500_v54 = vadd.f32 %v3499_v3, %v3498_v18 }
 0xcff   : > { %v3494_v27 = vrot.slane %v3493_v8, 1  ;;  %v3501_v14 = vrot.slane %v3500_v54, 1 }
 0xd01   : > { %v3495_v34 = vadd.f32 %v3494_v27, %v3493_v8  ;;  %v3502_v55 = vadd.f32 %v3501_v14, %v3500_v54 }
 0xd03   : > { %v3503_v40 = vsel %vm9364_vm11, %v3477_v51, %v3495_v34  ;;  %v3504_v28 = vsel %vm9365_vm14, %v3484_v4, %v3502_v55  ;;  %vm9373_vm11 = vnez %v8739_v53  ;;  %vm9374_vm14 = vnez %v8741_v58 }
 0xd04   : > { %v3507_v62 = vrot.slane %v3504_v28, 6 }
 0xd06   : > { %v3508_v43 = vsel %vm9366_vm13, %v3503_v40, %v3507_v62  ;;  %vm9375_vm13 = vnez %v8743_v63 }
 0xd07   : > { %v8167_v21 = vadd.f32 %v3508_v43, %v7970_v61 }
 0xd09   : > { %3512 = vst [vmem:[#allocation1] ss:$4 sm:$0xff] %v8167_v21  ;;  %v3593_v3 = vperm.slane %v8167_v21, 0  ;;  %v3594_v19 = vperm.slane %v8167_v21, 2  ;;  %v3599_v7 = vperm.slane %v8167_v21, 1  ;;  %v3600_v41 = vperm.slane %v8167_v21, 3 }
 0xd0b   : > { %v3597_v15 = vperm.slane %v3593_v3, 0  ;;  %v3598_v56 = vperm.slane %v3594_v19, 0  ;;  %v3603_v11 = vperm.slane %v3599_v7, 1  ;;  %v3604_v2 = vperm.slane %v3600_v41, 1 }
 0xd0d   : > { %v3605_v30 = vmul.f32 %v3597_v15, %v5830_v22  ;;  %v3606_v24 = vmul.f32 %v3598_v56, %v5845_v31  ;;  %v3607_v16 = vmul.f32 %v3597_v15, %v8855_v52  ;;  %v3608_v20 = vmul.f32 %v3598_v56, %v8856_v47 }
 0xd0e   : > { %v3610_v54 = vmul.f32 %v3604_v2, %v5845_v31  ;;  %v8221_v27 = vmul.f32 %v3603_v11, %v8855_v52  ;;  %v8224_v49 = vmul.f32 %v3604_v2, %v8856_v47 }
 0xd0f   : > { %3629 = vmatmul.f32.vlgmr.msrb.gmra.mxu2 %v3605_v30  ;;  %3658 = vmatmul.f32.vlgmr.msrb.gmra.mxu3 %v3606_v24 }
 0xd10   : > { %v3513_v13 = vld.sshfl [vmem:[#allocation1] sm:$0xff pattern:$0x73625140]  ;;  %v3514_v37 = vld.sshfl [vmem:[#allocation1 + $0x8] sm:$0xff pattern:$0x73625140]  ;;  %4956 = vmatpush.msk.msrb.mxu2 %vm9208_vm4, %v8803_v60  ;;  %4972 = vmatpush.msk.msrb.mxu3 %vm9209_vm1, %v8803_v60  ;;  %vm9368_vm4 = vnez %v8729_v26  ;;  %vm9369_vm1 = vnez %v8731_v38  ;;  %v3609_v38 = vmul.f32 %v3603_v11, %v5830_v22 }
 0xd11   : > { %v3517_v61 = vadd.f32 %v3513_v13, %v8852_v59  ;;  %v3518_v25 = vadd.f32 %v3514_v37, %v8853_v5 }
 0xd12   : > { %4957 = vmatpush.msk.msrb.mxu2 %vm9210_vm3, %v8803_v60  ;;  %4973 = vmatpush.msk.msrb.mxu3 %vm9367_vm0, %v8803_v60  ;;  %vm9370_vm3 = vnez %v8733_v42  ;;  %vm9376_vm0 = vnez %v8745_v10 }
 0xd13   : > { %v3519_v12 = vmax.f32 %v3517_v61, 0.0  ;;  %v3520_v33 = vmax.f32 %v3518_v25, 0.0 }
 0xd14   : > { %4958 = vmatpush.msk.msrb.mxu2 %vm9368_vm4, %v8803_v60  ;;  %4974 = vmatpush.msk.msrb.mxu3 %vm9369_vm1, %v8803_v60 }
 0xd15   : > { %v3521_v6 = vmin.f32 %v3519_v12, 15.0  ;;  %v3522_v18 = vmin.f32 %v3520_v33, 15.0 }
 0xd16   : > { %4959 = vmatpush.msk.msrb.mxu2 %vm9370_vm3, %v8803_v60  ;;  %4975 = vmatpush.msk.msrb.mxu3 %vm9371_vm5, %v8803_v60 }
 0xd17   : > { %3632 = vmatmul.f32.gmra.mxu2 %v3607_v16  ;;  %3661 = vmatmul.f32.gmra.mxu3 %v3608_v20  ;;  %v3523_v23 = vfloor.f32 %v3521_v6  ;;  %v3524_v26 = vfloor.f32 %v3522_v18 }
 0xd18   : > { %4960 = vmatpush.msk.msrb.mxu2 %vm9372_vm12, %v8803_v60  ;;  %4976 = vmatpush.msk.msrb.mxu3 %vm9373_vm11, %v8803_v60 }
 0xd19   : > { %v8211_v42 = vsub.f32 %v3521_v6, %v3523_v23  ;;  %v8213_v39 = vcvt.f32.s32 %v3523_v23  ;;  %v8215_v46 = vsub.f32 %v3522_v18, %v3524_v26  ;;  %v8217_v8 = vcvt.f32.s32 %v3524_v26 }
 0xd1a   : > { %4961 = vmatpush.msk.msrb.mxu2 %vm9374_vm14, %v8803_v60  ;;  %4977 = vmatpush.msk.msrb.mxu3 %vm9375_vm13, %v8803_v60 }
 0xd1b   : > { %v3529_v53 = vadd.s32 1, %v8213_v39  ;;  %v3535_v14 = vperm.slane %v8213_v39, 0  ;;  %v3541_v51 = vsub.f32 1.0, %v8211_v42  ;;  %v3555_v4 = vperm.slane %v8211_v42, 0 }
 0xd1c   : > { %v3530_v34 = vadd.s32 1, %v8217_v8  ;;  %v3536_v55 = vperm.slane %v8217_v8, 0  ;;  %v3542_v40 = vsub.f32 1.0, %v8215_v46  ;;  %v3556_v58 = vperm.slane %v8215_v46, 0  ;;  %4962 = vmatpush.msk.msrb.mxu2 %vm9376_vm0, %v8803_v60  ;;  %4978 = vmatpush.msk.msrb.mxu3 %vm9326_vm15, %v8803_v60 }
 0xd1d   : > { %vm3531_vm4 = vcmp.lt.s32.totalorder %v3529_v53, 15  ;;  %vm8247_vm1 = vcmp.eq.s32.totalorder %v5724_v36, %v3535_v14  ;;  %v3543_v28 = vperm.slane %v3541_v51, 0  ;;  %vm8252_vm3 = vcmp.eq.s32.totalorder %v5495_v1, %v3535_v14  ;;  %v9397_v14 = vld [vmem:[#allocation18_spill] sm:$0xff] }
 0xd1e   : > { %v3532_v43 = vsel %vm3531_vm4, %v3529_v53, 15  ;;  %vm3533_vm5 = vcmp.lt.s32.totalorder %v3530_v34, 15  ;;  %vm8257_vm12 = vcmp.eq.s32.totalorder %v5724_v36, %v3536_v55  ;;  %v3544_v45 = vperm.slane %v3542_v40, 0  ;;  %4963 = vmatpush.msk.msrb.mxu2 %vm9281_vm6, %v8803_v60  ;;  %4979 = vmatpush.msk.msrb.mxu3 %vm9282_vm2, %v8803_v60  ;;  %v9395_v53 = vld [vmem:[#allocation17_spill] sm:$0xff] }
 0xd1f   : > { %3635 = vmatmul.f32.gmra.mxu2 %v3609_v38  ;;  %3664 = vmatmul.f32.gmra.mxu3 %v3610_v54  ;;  %v3547_v3 = vsel %vm8247_vm1, %v3543_v28, 0.0  ;;  %v3549_v19 = vperm.slane %v3532_v43, 0  ;;  %v3534_v15 = vsel %vm3533_vm5, %v3530_v34, 15  ;;  %v3545_v56 = vsel %vm8252_vm3, %v3543_v28, 0.0  ;;  %v9405_v34 = vld [vmem:[#allocation22_spill] sm:$0xff] }
 0xd20   : > { %v3548_v30 = vsel %vm8257_vm12, %v3544_v45, 0.0  ;;  %v3550_v24 = vperm.slane %v3534_v15, 0  ;;  %vm8274_vm6 = vcmp.eq.s32.totalorder %v5495_v1, %v3536_v55  ;;  %v3565_v48 = vperm.slane %v8213_v39, 1  ;;  %4964 = vmatpush.msk.msrb.mxu2 %vm9229_vm10, %v8803_v60 }
 0xd21   : > { %vm9385_vm2 = vnez %v8757_v32  ;;  %vm3553_vm15 = vcmp.eq.s32.totalorder %v5724_v36, %v3549_v19  ;;  %vm3551_vm11 = vcmp.eq.s32.totalorder %v5495_v1, %v3549_v19  ;;  %v3546_v7 = vsel %vm8274_vm6, %v3544_v45, 0.0 }
 0xd22   : > { %4980 = vmatpush.msk.msrb.mxu3 %vm9385_vm2, %v8803_v60  ;;  %v3571_v13 = vperm.slane %v3541_v51, 1  ;;  %v3559_v37 = vsel %vm3553_vm15, %v3555_v4, 0.0  ;;  %vm3554_vm14 = vcmp.eq.s32.totalorder %v5724_v36, %v3550_v24  ;;  %v3557_v61 = vsel %vm3551_vm11, %v3555_v4, 0.0  ;;  %v9401_v51 = vld [vmem:[#allocation20_spill] sm:$0xff]  ;;  %v9403_v4 = vld [vmem:[#allocation21_spill] sm:$0xff] }
 0xd23   : > { %vm3552_vm13 = vcmp.eq.s32.totalorder %v5495_v1, %v3550_v24  ;;  %vm9386_vm10 = vnez %v8759_v0  ;;  %vm9387_vm0 = vnez %v9231_v29  ;;  %v3563_v35 = vadd.f32 %v3559_v37, %v3547_v3 }
 0xd24   : > { %4965 = vmatpush.msk.msrb.mxu2 %vm9386_vm10, %v8803_v60  ;;  %4981 = vmatpush.msk.msrb.mxu3 %vm9387_vm0, %v8803_v60  ;;  %v3560_v32 = vsel %vm3554_vm14, %v3556_v58, 0.0  ;;  %v3561_v25 = vadd.f32 %v3557_v61, %v3545_v56  ;;  %v3558_v41 = vsel %vm3552_vm13, %v3556_v58, 0.0  ;;  %vm8298_vm4 = vcmp.eq.s32.totalorder %v5495_v1, %v3565_v48 }
 0xd25   : > { %v3564_v12 = vadd.f32 %v3560_v32, %v3548_v30  ;;  %v3562_v33 = vadd.f32 %v3558_v41, %v3546_v7  ;;  %v3577_v16 = vperm.slane %v3532_v43, 1  ;;  %vm9390_vm1 = vnez %v9234_v17  ;;  %3697 = vmatpush.msrb.mxu0 %v3563_v35 }
 0xd26   : > { %4966 = vmatpush.msk.msrb.mxu2 %vm9390_vm1, %v8803_v60  ;;  %vm9391_vm3 = vnez %v9235_v44  ;;  %v3573_v0 = vsel %vm8298_vm4, %v3571_v13, 0.0  ;;  %v3583_v29 = vperm.slane %v8211_v42, 1  ;;  %v3566_v20 = vperm.slane %v8217_v8, 1 }
 0xd27   : > { %4982 = vmatpush.msk.msrb.mxu3 %vm9391_vm3, %v8803_v60  ;;  %v3572_v6 = vperm.slane %v3542_v40, 1  ;;  %3726 = vmatpush.msrb.mxu1 %v3564_v12  ;;  %vm3579_vm5 = vcmp.eq.s32.totalorder %v5495_v1, %v3577_v16  ;;  %v3578_v18 = vperm.slane %v3534_v15, 1  ;;  %v3584_v17 = vperm.slane %v8215_v46, 1 }
 0xd28   : > { %vm3569_vm12 = vcmp.eq.s32.totalorder %v5724_v36, %v3565_v48  ;;  %vm9392_vm6 = vnez %v9236_v9  ;;  %3638 = vmatmul.f32.gmra.mxu2 %v8221_v27  ;;  %3667 = vmatmul.f32.gmra.mxu3 %v8224_v49  ;;  %v3585_v44 = vsel %vm3579_vm5, %v3583_v29, 0.0  ;;  %vm3568_vm2 = vcmp.eq.s32.totalorder %v5495_v1, %v3566_v20 }
 0xd29   : > { %4967 = vmatpush.msk.msrb.mxu2 %vm9392_vm6, %v8803_v60  ;;  %v3575_v2 = vsel %vm3569_vm12, %v3571_v13, 0.0  ;;  %vm3581_vm15 = vcmp.eq.s32.totalorder %v5724_v36, %v3577_v16  ;;  %3698 = vmatpush.msrb.mxu0 %v3561_v25  ;;  %v3589_v23 = vadd.f32 %v3585_v44, %v3573_v0  ;;  %v3574_v26 = vsel %vm3568_vm2, %v3572_v6, 0.0 }
 0xd2a   : > { %3727 = vmatpush.msrb.mxu1 %v3562_v33  ;;  %vm3580_vm11 = vcmp.eq.s32.totalorder %v5495_v1, %v3578_v18  ;;  %v3587_v38 = vsel %vm3581_vm15, %v3583_v29, 0.0  ;;  %vm3570_vm14 = vcmp.eq.s32.totalorder %v5724_v36, %v3566_v20  ;;  %vm3582_vm13 = vcmp.eq.s32.totalorder %v5724_v36, %v3578_v18  ;;  %4983 = vmatpush.msk.msrb.mxu3 %vm9289_vm7, %v8803_v60 }
 0xd2b   : > { %v3586_v42 = vsel %vm3580_vm11, %v3584_v17, 0.0  ;;  %v3591_v9 = vadd.f32 %v3587_v38, %v3575_v2  ;;  %4968 = vmatpush.msk.msrb.mxu2 %vm9240_vm8, %v8803_v60  ;;  %v3576_v8 = vsel %vm3570_vm14, %v3572_v6, 0.0  ;;  %v3588_v54 = vsel %vm3582_vm13, %v3584_v17, 0.0 }
 0xd2c   : > { %v3590_v46 = vadd.f32 %v3586_v42, %v3574_v26  ;;  %v3592_v27 = vadd.f32 %v3588_v54, %v3576_v8  ;;  %4984 = vmatpush.msk.msrb.mxu3 %vm9343_vm9, %v8803_v60  ;;  %vm9396_vm10 = vnez %v9395_v53  ;;  %vm9398_vm0 = vnez %v9397_v14 }
 0xd2d   : > { %4969 = vmatpush.msk.msrb.mxu2 %vm9396_vm10, %v8803_v60  ;;  %vm9400_vm7 = vnez %v9399_v57  ;;  %vm9402_vm8 = vnez %v9401_v51  ;;  %vm9404_vm4 = vnez %v9403_v4  ;;  %vm9406_vm9 = vnez %v9405_v34 }
 0xd2e   : > { %4985 = vmatpush.msk.msrb.mxu3 %vm9398_vm0, %v8803_v60  ;;  %vm9407_vm1 = vcmask 130048   ;;  %vm9415_vm14 = vcmask 1040384   ;;  %vm9417_vm10 = vcmask 1041408  }
 0xd2f   : > { %4970 = vmatpush.msk.msrb.mxu2 %vm9400_vm7, %v8803_v60  ;;  %vm9408_vm3 = vmmov %vm9407_vm1 }
 0xd30   : > { %4986 = vmatpush.msk.msrb.mxu3 %vm9402_vm8, %v8803_v60  ;;  %vm9409_vm5 = vmmov %vm9407_vm1 }
 0xd31   : > { %4971 = vmatpush.msk.msrb.mxu2 %vm9404_vm4, %v8803_v60  ;;  %vm9410_vm12 = vmmov %vm9407_vm1 }
 0xd32   : > { %4987 = vmatpush.msk.msrb.mxu3 %vm9406_vm9, %v8803_v60  ;;  %vm9411_vm6 = vmmov %vm9407_vm1 }
 0xd33   : > { %vm9412_vm2 = vmmov %vm9407_vm1 }
 0xd34   : > { %vm9413_vm15 = vmmov %vm9407_vm1 }
 0xd35   : > { %vm9414_vm11 = vmmov %vm9407_vm1 }
 0xd36   : > { %vm9416_vm13 = vmmov %vm9415_vm14 }
 0xd92   : > { %v3630_v55 = vpop.f32.mrf.mxu2  ;;  %v3659_v40 = vpop.f32.mrf.mxu3 }
 0xd93   : > { %v3660_v58 = vadd.f32 %v3659_v40, %v3630_v55 }
 0xd95   : > { %4908 = vmatmul.msk.f32.vlgmr.msrb.gmra.mxu0 %vm9407_vm1, %v3660_v58  ;;  %4912 = vmatmul.msk.f32.vlgmr.msrb.gmra.mxu1 %vm9408_vm3, %v3660_v58 }
 0xd9a   : > { %v3633_v63 = vpop.f32.mrf.mxu2  ;;  %v3662_v28 = vpop.f32.mrf.mxu3 }
 0xd9b   : > { %v3663_v62 = vadd.f32 %v3662_v28, %v3633_v63 }
 0xd9d   : > { %4909 = vmatmul.msk.f32.gmra.mxu0 %vm9409_vm5, %v3663_v62  ;;  %4913 = vmatmul.msk.f32.gmra.mxu1 %vm9410_vm12, %v3663_v62 }
 0xda2   : > { %v3636_v43 = vpop.f32.mrf.mxu2  ;;  %v3665_v10 = vpop.f32.mrf.mxu3 }
 0xda3   : > { %v3666_v45 = vadd.f32 %v3665_v10, %v3636_v43 }
 0xda5   : > { %4910 = vmatmul.msk.f32.gmra.mxu0 %vm9411_vm6, %v3666_v45  ;;  %4914 = vmatmul.msk.f32.gmra.mxu1 %vm9412_vm2, %v3666_v45 }
 0xdab   : > { %v3639_v60 = vpop.f32.mrf.mxu2  ;;  %v3668_v3 = vpop.f32.mrf.mxu3 }
 0xdac   : > { %v3669_v19 = vadd.f32 %v3668_v3, %v3639_v60 }
 0xdae   : > { %4911 = vmatmul.msk.f32.gmra.mxu0 %vm9413_vm15, %v3669_v19  ;;  %4915 = vmatmul.msk.f32.gmra.mxu1 %vm9414_vm11, %v3669_v19 }
 0xe12   : > { %v3700_v15 = vpop.f32.mrf.mxu0  ;;  %v3729_v56 = vpop.f32.mrf.mxu1 }
 0xe13   : > { %v3741_v50 = vmul.f32 %v3700_v15, %v3589_v23  ;;  %v3742_v48 = vmul.f32 %v3729_v56, %v3590_v46 }
 0xe1a   : > { %v3703_v30 = vpop.f32.mrf.mxu0  ;;  %v3732_v24 = vpop.f32.mrf.mxu1 }
 0xe1b   : > { %v3743_v7 = vmul.f32 %v3703_v30, %v3591_v9  ;;  %v3744_v13 = vmul.f32 %v3732_v24, %v3592_v27 }
 0xe1d   : > { %v3745_v37 = vadd.f32 %v3743_v7, %v3741_v50  ;;  %v3752_v61 = vadd.f32 %v3744_v13, %v3742_v48 }
 0xe1f   : > { %v3746_v25 = vrot.slane %v3745_v37, 4  ;;  %v3753_v41 = vrot.slane %v3752_v61, 4 }
 0xe21   : > { %v3747_v12 = vadd.f32 %v3746_v25, %v3745_v37  ;;  %v3754_v33 = vadd.f32 %v3753_v41, %v3752_v61 }
 0xe22   : > { %v3706_v35 = vpop.f32.mrf.mxu0  ;;  %v3735_v32 = vpop.f32.mrf.mxu1 }
 0xe23   : > { %v3759_v0 = vmul.f32 %v3706_v35, %v3589_v23  ;;  %v3760_v29 = vmul.f32 %v3735_v32, %v3590_v46  ;;  %v3748_v18 = vrot.slane %v3747_v12, 2  ;;  %v3755_v17 = vrot.slane %v3754_v33, 2 }
 0xe25   : > { %v3749_v42 = vadd.f32 %v3748_v18, %v3747_v12  ;;  %v3756_v39 = vadd.f32 %v3755_v17, %v3754_v33 }
 0xe27   : > { %v3750_v14 = vrot.slane %v3749_v42, 1  ;;  %v3757_v57 = vrot.slane %v3756_v39, 1 }
 0xe2b   : > { %v3709_v11 = vpop.f32.mrf.mxu0  ;;  %v3738_v16 = vpop.f32.mrf.mxu1 }
 0xe2c   : > { %v3761_v20 = vmul.f32 %v3709_v11, %v3591_v9  ;;  %v3762_v6 = vmul.f32 %v3738_v16, %v3592_v27  ;;  %v3751_v9 = vadd.f32 %v3750_v14, %v3749_v42  ;;  %v3758_v27 = vadd.f32 %v3757_v57, %v3756_v39 }
 0xe2e   : > { %v3763_v44 = vadd.f32 %v3761_v20, %v3759_v0  ;;  %v3770_v2 = vadd.f32 %v3762_v6, %v3760_v29 }
 0xe30   : > { %v3764_v26 = vrot.slane %v3763_v44, 4  ;;  %v3771_v38 = vrot.slane %v3770_v2, 4 }
 0xe32   : > { %v3765_v8 = vadd.f32 %v3764_v26, %v3763_v44  ;;  %v3772_v54 = vadd.f32 %v3771_v38, %v3770_v2 }
 0xe34   : > { %v3766_v49 = vrot.slane %v3765_v8, 2  ;;  %v3773_v53 = vrot.slane %v3772_v54, 2 }
 0xe36   : > { %v3767_v51 = vadd.f32 %v3766_v49, %v3765_v8  ;;  %v3774_v4 = vadd.f32 %v3773_v53, %v3772_v54 }
 0xe38   : > { %v3768_v23 = vrot.slane %v3767_v51, 1  ;;  %v3775_v46 = vrot.slane %v3774_v4, 1 }
 0xe3a   : > { %v3769_v34 = vadd.f32 %v3768_v23, %v3767_v51  ;;  %v3776_v55 = vadd.f32 %v3775_v46, %v3774_v4 }
 0xe3c   : > { %v3777_v40 = vsel %vm9415_vm14, %v3751_v9, %v3769_v34  ;;  %v3778_v58 = vsel %vm9416_vm13, %v3758_v27, %v3776_v55 }
 0xe3d   : > { %v3781_v63 = vrot.slane %v3778_v58, 6 }
 0xe3f   : > { %v3782_v28 = vsel %vm9417_vm10, %v3777_v40, %v3781_v63 }
 0xe40   : > { %v8364_v62 = vadd.f32 %v3782_v28, %v8167_v21 }
 0xe42   : > { %3786 = vst [vmem:[#allocation1] ss:$4 sm:$0xff] %v8364_v62  ;;  %v3867_v43 = vperm.slane %v8364_v62, 0  ;;  %v3868_v10 = vperm.slane %v8364_v62, 2  ;;  %v3873_v24 = vperm.slane %v8364_v62, 1  ;;  %v3874_v50 = vperm.slane %v8364_v62, 3 }
 0xe44   : > { %v3871_v45 = vperm.slane %v3867_v43, 0  ;;  %v3872_v60 = vperm.slane %v3868_v10, 0  ;;  %v3877_v32 = vperm.slane %v3873_v24, 1  ;;  %v3878_v25 = vperm.slane %v3874_v50, 1 }
 0xe46   : > { %v3879_v3 = vmul.f32 %v3871_v45, %v5830_v22  ;;  %v3880_v19 = vmul.f32 %v3872_v60, %v5845_v31  ;;  %v3881_v13 = vmul.f32 %v3871_v45, %v8855_v52  ;;  %v3882_v37 = vmul.f32 %v3872_v60, %v8856_v47 }
 0xe47   : > { %v3883_v29 = vmul.f32 %v3877_v32, %v5830_v22  ;;  %v3884_v20 = vmul.f32 %v3878_v25, %v5845_v31  ;;  %v3885_v6 = vmul.f32 %v3877_v32, %v8855_v52  ;;  %v3886_v18 = vmul.f32 %v3878_v25, %v8856_v47 }
 0xe48   : > { %3903 = vmatmul.f32.vlgmr.msra.gmra.mxu2 %v3879_v3  ;;  %3932 = vmatmul.f32.vlgmr.msra.gmra.mxu3 %v3880_v19 }
 0xe49   : > { %v3787_v15 = vld.sshfl [vmem:[#allocation1] sm:$0xff pattern:$0x73625140]  ;;  %v3788_v56 = vld.sshfl [vmem:[#allocation1 + $0x8] sm:$0xff pattern:$0x73625140] }
 0xe4a   : > { %v3791_v30 = vadd.f32 %v3787_v15, %v8852_v59  ;;  %v3792_v21 = vadd.f32 %v3788_v56, %v8853_v5 }
 0xe4c   : > { %v3793_v48 = vmax.f32 %v3791_v30, 0.0  ;;  %v3794_v7 = vmax.f32 %v3792_v21, 0.0 }
 0xe4e   : > { %v3795_v61 = vmin.f32 %v3793_v48, 15.0  ;;  %v3796_v35 = vmin.f32 %v3794_v7, 15.0 }
 0xe50   : > { %3906 = vmatmul.f32.gmra.mxu2 %v3881_v13  ;;  %3935 = vmatmul.f32.gmra.mxu3 %v3882_v37  ;;  %v3797_v41 = vfloor.f32 %v3795_v61  ;;  %v3798_v12 = vfloor.f32 %v3796_v35 }
 0xe52   : > { %v8377_v33 = vsub.f32 %v3795_v61, %v3797_v41  ;;  %v5224_v11 = vcvt.f32.s32 %v3797_v41  ;;  %v8379_v16 = vsub.f32 %v3796_v35, %v3798_v12  ;;  %v8381_v0 = vcvt.f32.s32 %v3798_v12 }
 0xe54   : > { %v3803_v17 = vadd.s32 1, %v5224_v11  ;;  %v3809_v44 = vperm.slane %v5224_v11, 0  ;;  %v3815_v2 = vsub.f32 1.0, %v8377_v33  ;;  %v3829_v26 = vperm.slane %v8377_v33, 0 }
 0xe55   : > { %v3804_v38 = vadd.s32 1, %v8381_v0  ;;  %v3810_v42 = vperm.slane %v8381_v0, 0  ;;  %v3816_v39 = vsub.f32 1.0, %v8379_v16  ;;  %v3830_v8 = vperm.slane %v8379_v16, 0 }
 0xe56   : > { %vm3805_vm0 = vcmp.lt.s32.totalorder %v3803_v17, 15  ;;  %vm8394_vm7 = vcmp.eq.s32.totalorder %v5724_v36, %v3809_v44  ;;  %v3817_v49 = vperm.slane %v3815_v2, 0  ;;  %vm8399_vm8 = vcmp.eq.s32.totalorder %v5495_v1, %v3809_v44 }
 0xe57   : > { %v3806_v14 = vsel %vm3805_vm0, %v3803_v17, 15  ;;  %vm3807_vm4 = vcmp.lt.s32.totalorder %v3804_v38, 15  ;;  %vm8404_vm9 = vcmp.eq.s32.totalorder %v5724_v36, %v3810_v42  ;;  %v3818_v51 = vperm.slane %v3816_v39, 0 }
 0xe58   : > { %3909 = vmatmul.f32.gmra.mxu2 %v3883_v29  ;;  %3938 = vmatmul.f32.gmra.mxu3 %v3884_v20  ;;  %v3821_v4 = vsel %vm8394_vm7, %v3817_v49, 0.0  ;;  %v3823_v23 = vperm.slane %v3806_v14, 0  ;;  %v3808_v46 = vsel %vm3807_vm4, %v3804_v38, 15  ;;  %v3819_v9 = vsel %vm8399_vm8, %v3817_v49, 0.0 }
 0xe59   : > { %v3822_v27 = vsel %vm8404_vm9, %v3818_v51, 0.0  ;;  %v3824_v34 = vperm.slane %v3808_v46, 0  ;;  %vm3812_vm1 = vcmp.eq.s32.totalorder %v5495_v1, %v3810_v42  ;;  %v3839_v55 = vperm.slane %v5224_v11, 1 }
 0xe5a   : > { %vm3827_vm3 = vcmp.eq.s32.totalorder %v5724_v36, %v3823_v23  ;;  %vm3825_vm5 = vcmp.eq.s32.totalorder %v5495_v1, %v3823_v23  ;;  %v3820_v40 = vsel %vm3812_vm1, %v3818_v51, 0.0  ;;  %v3845_v58 = vperm.slane %v3815_v2, 1 }
 0xe5b   : > { %v3833_v63 = vsel %vm3827_vm3, %v3829_v26, 0.0  ;;  %vm3828_vm12 = vcmp.eq.s32.totalorder %v5724_v36, %v3824_v34  ;;  %v3831_v28 = vsel %vm3825_vm5, %v3829_v26, 0.0  ;;  %vm3826_vm6 = vcmp.eq.s32.totalorder %v5495_v1, %v3824_v34 }
 0xe5c   : > { %v3837_v43 = vadd.f32 %v3833_v63, %v3821_v4  ;;  %v3834_v10 = vsel %vm3828_vm12, %v3830_v8, 0.0  ;;  %v3835_v45 = vadd.f32 %v3831_v28, %v3819_v9  ;;  %v3832_v60 = vsel %vm3826_vm6, %v3830_v8, 0.0 }
 0xe5d   : > { %v3838_v3 = vadd.f32 %v3834_v10, %v3822_v27  ;;  %v3836_v19 = vadd.f32 %v3832_v60, %v3820_v40  ;;  %vm8420_vm2 = vcmp.eq.s32.totalorder %v5495_v1, %v3839_v55  ;;  %v3851_v56 = vperm.slane %v3806_v14, 1 }
 0xe5e   : > { %3971 = vmatpush.msra.mxu0 %v3837_v43  ;;  %v3847_v30 = vsel %vm8420_vm2, %v3845_v58, 0.0  ;;  %v3857_v21 = vperm.slane %v8377_v33, 1  ;;  %v3840_v24 = vperm.slane %v8381_v0, 1  ;;  %v3846_v50 = vperm.slane %v3816_v39, 1 }
 0xe5f   : > { %4000 = vmatpush.msra.mxu1 %v3838_v3  ;;  %vm3853_vm15 = vcmp.eq.s32.totalorder %v5495_v1, %v3851_v56  ;;  %v3852_v48 = vperm.slane %v3808_v46, 1  ;;  %v3858_v7 = vperm.slane %v8379_v16, 1  ;;  %vm3843_vm11 = vcmp.eq.s32.totalorder %v5724_v36, %v3839_v55 }
 0xe60   : > { %3912 = vmatmul.f32.gmra.mxu2 %v3885_v6  ;;  %3941 = vmatmul.f32.gmra.mxu3 %v3886_v18  ;;  %v3859_v13 = vsel %vm3853_vm15, %v3857_v21, 0.0  ;;  %vm3842_vm14 = vcmp.eq.s32.totalorder %v5495_v1, %v3840_v24  ;;  %v3849_v37 = vsel %vm3843_vm11, %v3845_v58, 0.0  ;;  %vm3855_vm13 = vcmp.eq.s32.totalorder %v5724_v36, %v3851_v56 }
 0xe61   : > { %3972 = vmatpush.msra.mxu0 %v3835_v45  ;;  %4001 = vmatpush.msra.mxu1 %v3836_v19  ;;  %v3863_v61 = vadd.f32 %v3859_v13, %v3847_v30  ;;  %v3848_v35 = vsel %vm3842_vm14, %v3846_v50, 0.0  ;;  %vm3854_vm10 = vcmp.eq.s32.totalorder %v5495_v1, %v3852_v48  ;;  %v3861_v32 = vsel %vm3855_vm13, %v3857_v21, 0.0 }
 0xe62   : > { %v3860_v25 = vsel %vm3854_vm10, %v3858_v7, 0.0  ;;  %v3865_v41 = vadd.f32 %v3861_v32, %v3849_v37  ;;  %vm3844_vm0 = vcmp.eq.s32.totalorder %v5724_v36, %v3840_v24  ;;  %vm3856_vm7 = vcmp.eq.s32.totalorder %v5724_v36, %v3852_v48 }
 0xe63   : > { %v3864_v12 = vadd.f32 %v3860_v25, %v3848_v35  ;;  %v3850_v33 = vsel %vm3844_vm0, %v3846_v50, 0.0  ;;  %v3862_v11 = vsel %vm3856_vm7, %v3858_v7, 0.0  ;;  %vm9426_vm8 = vcmask 130048  }
 0xe64   : > { %v3866_v16 = vadd.f32 %v3862_v11, %v3850_v33  ;;  %vm9427_vm4 = vmmov %vm9426_vm8  ;;  %vm9434_vm2 = vcmask 1040384   ;;  %vm9436_vm11 = vcmask 1041408  }
 0xe65   : > { %vm9428_vm9 = vmmov %vm9427_vm4 }
 0xe66   : > { %vm9429_vm1 = vmmov %vm9427_vm4 }
 0xe67   : > { %vm9430_vm3 = vmmov %vm9429_vm1 }
 0xe68   : > { %vm9431_vm5 = vmmov %vm9429_vm1 }
 0xe69   : > { %vm9432_vm12 = vmmov %vm9429_vm1 }
 0xe6a   : > { %vm9433_vm6 = vmmov %vm9429_vm1 }
 0xe6b   : > { %vm9435_vm15 = vmmov %vm9434_vm2 }
 0xecb   : > { %v3904_v0 = vpop.f32.mrf.mxu2  ;;  %v3933_v29 = vpop.f32.mrf.mxu3 }
 0xecc   : > { %v3934_v20 = vadd.f32 %v3933_v29, %v3904_v0 }
 0xece   : > { %4948 = vmatmul.msk.f32.vlgmr.msra.gmra.mxu0 %vm9426_vm8, %v3934_v20  ;;  %4952 = vmatmul.msk.f32.vlgmr.msra.gmra.mxu1 %vm9427_vm4, %v3934_v20 }
 0xed3   : > { %v3907_v6 = vpop.f32.mrf.mxu2  ;;  %v3936_v18 = vpop.f32.mrf.mxu3 }
 0xed4   : > { %v3937_v17 = vadd.f32 %v3936_v18, %v3907_v6 }
 0xed6   : > { %4949 = vmatmul.msk.f32.gmra.mxu0 %vm9428_vm9, %v3937_v17  ;;  %4953 = vmatmul.msk.f32.gmra.mxu1 %vm9429_vm1, %v3937_v17 }
 0xedb   : > { %v3910_v44 = vpop.f32.mrf.mxu2  ;;  %v3939_v2 = vpop.f32.mrf.mxu3 }
 0xedc   : > { %v3940_v26 = vadd.f32 %v3939_v2, %v3910_v44 }
 0xede   : > { %4950 = vmatmul.msk.f32.gmra.mxu0 %vm9430_vm3, %v3940_v26  ;;  %4954 = vmatmul.msk.f32.gmra.mxu1 %vm9431_vm5, %v3940_v26 }
 0xee3   : > { %v3913_v38 = vpop.f32.mrf.mxu2  ;;  %v3942_v42 = vpop.f32.mrf.mxu3 }
 0xee4   : > { %v3943_v39 = vadd.f32 %v3942_v42, %v3913_v38 }
 0xee6   : > { %4951 = vmatmul.msk.f32.gmra.mxu0 %vm9432_vm12, %v3943_v39  ;;  %4955 = vmatmul.msk.f32.gmra.mxu1 %vm9433_vm6, %v3943_v39 }
 0xf4b   : > { %v3974_v8 = vpop.f32.mrf.mxu0  ;;  %v4003_v54 = vpop.f32.mrf.mxu1 }
 0xf4c   : > { %v4015_v14 = vmul.f32 %v3974_v8, %v3863_v61  ;;  %v4016_v57 = vmul.f32 %v4003_v54, %v3864_v12 }
 0xf53   : > { %v3977_v49 = vpop.f32.mrf.mxu0  ;;  %v4006_v53 = vpop.f32.mrf.mxu1 }
 0xf54   : > { %v4017_v51 = vmul.f32 %v3977_v49, %v3865_v41  ;;  %v4018_v4 = vmul.f32 %v4006_v53, %v3866_v16 }
 0xf56   : > { %v4019_v23 = vadd.f32 %v4017_v51, %v4015_v14  ;;  %v4026_v46 = vadd.f32 %v4018_v4, %v4016_v57 }
 0xf58   : > { %v4020_v34 = vrot.slane %v4019_v23, 4  ;;  %v4027_v55 = vrot.slane %v4026_v46, 4 }
 0xf5a   : > { %v4021_v40 = vadd.f32 %v4020_v34, %v4019_v23  ;;  %v4028_v58 = vadd.f32 %v4027_v55, %v4026_v46 }
 0xf5b   : > { %v3980_v9 = vpop.f32.mrf.mxu0  ;;  %v4009_v27 = vpop.f32.mrf.mxu1 }
 0xf5c   : > { %v4033_v43 = vmul.f32 %v3980_v9, %v3863_v61  ;;  %v4034_v10 = vmul.f32 %v4009_v27, %v3864_v12  ;;  %v4022_v3 = vrot.slane %v4021_v40, 2  ;;  %v4029_v19 = vrot.slane %v4028_v58, 2 }
 0xf5e   : > { %v4023_v24 = vadd.f32 %v4022_v3, %v4021_v40  ;;  %v4030_v50 = vadd.f32 %v4029_v19, %v4028_v58 }
 0xf60   : > { %v4024_v35 = vrot.slane %v4023_v24, 1  ;;  %v4031_v32 = vrot.slane %v4030_v50, 1 }
 0xf62   : > { %v4032_v11 = vadd.f32 %v4031_v32, %v4030_v50 }
 0xf63   : > { %v3983_v63 = vpop.f32.mrf.mxu0  ;;  %v4012_v28 = vpop.f32.mrf.mxu1 }
 0xf64   : > { %v4035_v45 = vmul.f32 %v3983_v63, %v3865_v41  ;;  %v4036_v60 = vmul.f32 %v4012_v28, %v3866_v16  ;;  %v4025_v41 = vadd.f32 %v4024_v35, %v4023_v24 }
 0xf66   : > { %v4037_v15 = vadd.f32 %v4035_v45, %v4033_v43  ;;  %v4044_v56 = vadd.f32 %v4036_v60, %v4034_v10 }
 0xf68   : > { %v4038_v30 = vrot.slane %v4037_v15, 4  ;;  %v4045_v21 = vrot.slane %v4044_v56, 4 }
 0xf6a   : > { %v4039_v48 = vadd.f32 %v4038_v30, %v4037_v15  ;;  %v4046_v7 = vadd.f32 %v4045_v21, %v4044_v56 }
 0xf6c   : > { %v4040_v13 = vrot.slane %v4039_v48, 2  ;;  %v4047_v37 = vrot.slane %v4046_v7, 2 }
 0xf6e   : > { %v4041_v25 = vadd.f32 %v4040_v13, %v4039_v48  ;;  %v4048_v33 = vadd.f32 %v4047_v37, %v4046_v7 }
 0xf70   : > { %v4042_v61 = vrot.slane %v4041_v25, 1  ;;  %v4049_v12 = vrot.slane %v4048_v33, 1 }
 0xf72   : > { %v4043_v16 = vadd.f32 %v4042_v61, %v4041_v25  ;;  %v4050_v0 = vadd.f32 %v4049_v12, %v4048_v33 }
 0xf74   : > { %v4051_v29 = vsel %vm9434_vm2, %v4025_v41, %v4043_v16  ;;  %v4052_v20 = vsel %vm9435_vm15, %v4032_v11, %v4050_v0 }
 0xf75   : > { %v4055_v6 = vrot.slane %v4052_v20, 6 }
 0xf77   : > { %v4056_v18 = vsel %vm9436_vm11, %v4051_v29, %v4055_v6 }
 0xf78   : > { %v8448_v17 = vadd.f32 %v4056_v18, %v8364_v62 }
 0xf7a   : > { %4060 = vst [vmem:[#allocation1] ss:$4 sm:$0xff] %v8448_v17  ;;  %v4141_v44 = vperm.slane %v8448_v17, 0  ;;  %v4142_v2 = vperm.slane %v8448_v17, 2  ;;  %v4147_v53 = vperm.slane %v8448_v17, 1  ;;  %v4148_v14 = vperm.slane %v8448_v17, 3 }
 0xf7c   : > { %v4145_v26 = vperm.slane %v4141_v44, 0  ;;  %v4146_v38 = vperm.slane %v4142_v2, 0  ;;  %v4151_v27 = vperm.slane %v4147_v53, 1  ;;  %v4152_v34 = vperm.slane %v4148_v14, 1 }
 0xf7e   : > { %v4153_v42 = vmul.f32 %v4145_v26, %v5830_v22  ;;  %v4154_v39 = vmul.f32 %v4146_v38, %v5845_v31  ;;  %v4155_v4 = vmul.f32 %v4145_v26, %v8855_v52  ;;  %v4156_v23 = vmul.f32 %v4146_v38, %v8856_v47 }
 0xf7f   : > { %v4157_v28 = vmul.f32 %v4151_v27, %v5830_v22  ;;  %v4158_v43 = vmul.f32 %v4152_v34, %v5845_v31  ;;  %v4159_v10 = vmul.f32 %v4151_v27, %v8855_v52  ;;  %v4160_v45 = vmul.f32 %v4152_v34, %v8856_v47 }
 0xf80   : > { %4177 = vmatmul.f32.vlgmr.msrb.gmra.mxu2 %v4153_v42  ;;  %4206 = vmatmul.f32.vlgmr.msrb.gmra.mxu3 %v4154_v39 }
 0xf81   : > { %v4061_v8 = vld.sshfl [vmem:[#allocation1] sm:$0xff pattern:$0x73625140]  ;;  %v4062_v54 = vld.sshfl [vmem:[#allocation1 + $0x8] sm:$0xff pattern:$0x73625140] }
 0xf82   : > { %v4065_v49 = vadd.f32 %v4061_v8, %v8852_v59  ;;  %v4066_v62 = vadd.f32 %v4062_v54, %v8853_v5 }
 0xf84   : > { %v4067_v57 = vmax.f32 %v4065_v49, 0.0  ;;  %v4068_v51 = vmax.f32 %v4066_v62, 0.0 }
 0xf86   : > { %v4069_v46 = vmin.f32 %v4067_v57, 15.0  ;;  %v4070_v9 = vmin.f32 %v4068_v51, 15.0 }
 0xf88   : > { %4180 = vmatmul.f32.gmra.mxu2 %v4155_v4  ;;  %4209 = vmatmul.f32.gmra.mxu3 %v4156_v23  ;;  %v4071_v55 = vfloor.f32 %v4069_v46  ;;  %v4072_v59 = vfloor.f32 %v4070_v9 }
 0xf8a   : > { %v8461_v40 = vsub.f32 %v4069_v46, %v4071_v55  ;;  %v5228_v5 = vcvt.f32.s32 %v4071_v55  ;;  %v8463_v58 = vsub.f32 %v4070_v9, %v4072_v59  ;;  %v8465_v63 = vcvt.f32.s32 %v4072_v59 }
 0xf8c   : > { %v4077_v60 = vadd.s32 1, %v5228_v5  ;;  %v4083_v3 = vperm.slane %v5228_v5, 0  ;;  %v4089_v19 = vsub.f32 1.0, %v8461_v40  ;;  %v4103_v15 = vperm.slane %v8461_v40, 0 }
 0xf8d   : > { %v4078_v56 = vadd.s32 1, %v8465_v63  ;;  %v4084_v30 = vperm.slane %v8465_v63, 0  ;;  %v4090_v21 = vsub.f32 1.0, %v8463_v58  ;;  %v4104_v22 = vperm.slane %v8463_v58, 0 }
 0xf8e   : > { %vm4079_vm14 = vcmp.lt.s32.totalorder %v4077_v60, 15  ;;  %vm8478_vm13 = vcmp.eq.s32.totalorder %v5724_v36, %v4083_v3  ;;  %v4091_v52 = vperm.slane %v4089_v19, 0  ;;  %vm8483_vm10 = vcmp.eq.s32.totalorder %v5495_v1, %v4083_v3 }
 0xf8f   : > { %v4080_v24 = vsel %vm4079_vm14, %v4077_v60, 15  ;;  %vm4081_vm0 = vcmp.lt.s32.totalorder %v4078_v56, 15  ;;  %vm8488_vm7 = vcmp.eq.s32.totalorder %v5724_v36, %v4084_v30  ;;  %v4092_v48 = vperm.slane %v4090_v21, 0 }
 0xf90   : > { %4183 = vmatmul.f32.gmra.mxu2 %v4157_v28  ;;  %4212 = vmatmul.f32.gmra.mxu3 %v4158_v43  ;;  %v4095_v7 = vsel %vm8478_vm13, %v4091_v52, 0.0  ;;  %v4097_v13 = vperm.slane %v4080_v24, 0  ;;  %v4082_v37 = vsel %vm4081_vm0, %v4078_v56, 15  ;;  %v4093_v35 = vsel %vm8483_vm10, %v4091_v52, 0.0 }
 0xf91   : > { %v4096_v32 = vsel %vm8488_vm7, %v4092_v48, 0.0  ;;  %v4098_v25 = vperm.slane %v4082_v37, 0  ;;  %vm4086_vm8 = vcmp.eq.s32.totalorder %v5495_v1, %v4084_v30  ;;  %v4113_v33 = vperm.slane %v5228_v5, 1 }
 0xf92   : > { %vm4101_vm4 = vcmp.eq.s32.totalorder %v5724_v36, %v4097_v13  ;;  %vm4099_vm9 = vcmp.eq.s32.totalorder %v5495_v1, %v4097_v13  ;;  %v4094_v61 = vsel %vm4086_vm8, %v4092_v48, 0.0  ;;  %v4119_v12 = vperm.slane %v4089_v19, 1 }
 0xf93   : > { %v4107_v41 = vsel %vm4101_vm4, %v4103_v15, 0.0  ;;  %vm4102_vm1 = vcmp.eq.s32.totalorder %v5724_v36, %v4098_v25  ;;  %v4105_v11 = vsel %vm4099_vm9, %v4103_v15, 0.0  ;;  %vm4100_vm3 = vcmp.eq.s32.totalorder %v5495_v1, %v4098_v25 }
 0xf94   : > { %v4111_v16 = vadd.f32 %v4107_v41, %v4095_v7  ;;  %v4108_v0 = vsel %vm4102_vm1, %v4104_v22, 0.0  ;;  %v4109_v29 = vadd.f32 %v4105_v11, %v4093_v35  ;;  %v4106_v20 = vsel %vm4100_vm3, %v4104_v22, 0.0 }
 0xf95   : > { %v4112_v6 = vadd.f32 %v4108_v0, %v4096_v32  ;;  %v4110_v18 = vadd.f32 %v4106_v20, %v4094_v61  ;;  %vm8504_vm5 = vcmp.eq.s32.totalorder %v5495_v1, %v4113_v33  ;;  %v4125_v2 = vperm.slane %v4080_v24, 1 }
 0xf96   : > { %4245 = vmatpush.msrb.mxu0 %v4111_v16  ;;  %5007 = vmatpush.msra.mxu2 %v4111_v16  ;;  %v4121_v26 = vsel %vm8504_vm5, %v4119_v12, 0.0  ;;  %v4131_v38 = vperm.slane %v8461_v40, 1  ;;  %v4114_v42 = vperm.slane %v8465_v63, 1  ;;  %v4120_v39 = vperm.slane %v4090_v21, 1 }
 0xf97   : > { %4274 = vmatpush.msrb.mxu1 %v4112_v6  ;;  %5009 = vmatpush.msra.mxu3 %v4112_v6  ;;  %vm4127_vm12 = vcmp.eq.s32.totalorder %v5495_v1, %v4125_v2  ;;  %v4126_v8 = vperm.slane %v4082_v37, 1  ;;  %v4132_v54 = vperm.slane %v8463_v58, 1  ;;  %vm8515_vm6 = vcmp.eq.s32.totalorder %v5724_v36, %v4113_v33 }
 0xf98   : > { %4186 = vmatmul.f32.gmra.mxu2 %v4159_v10  ;;  %4215 = vmatmul.f32.gmra.mxu3 %v4160_v45  ;;  %v4133_v62 = vsel %vm4127_vm12, %v4131_v38, 0.0  ;;  %vm4116_vm2 = vcmp.eq.s32.totalorder %v5495_v1, %v4114_v42  ;;  %v4123_v53 = vsel %vm8515_vm6, %v4119_v12, 0.0  ;;  %vm4129_vm15 = vcmp.eq.s32.totalorder %v5724_v36, %v4125_v2 }
 0xf99   : > { %4246 = vmatpush.msrb.mxu0 %v4109_v29  ;;  %5008 = vmatpush.msra.mxu2 %v4109_v29  ;;  %v4137_v14 = vadd.f32 %v4133_v62, %v4121_v26  ;;  %v4122_v57 = vsel %vm4116_vm2, %v4120_v39, 0.0  ;;  %vm4128_vm11 = vcmp.eq.s32.totalorder %v5495_v1, %v4126_v8  ;;  %v4135_v51 = vsel %vm4129_vm15, %v4131_v38, 0.0 }
 0xf9a   : > { %4275 = vmatpush.msrb.mxu1 %v4110_v18  ;;  %5010 = vmatpush.msra.mxu3 %v4110_v18  ;;  %v4134_v4 = vsel %vm4128_vm11, %v4132_v54, 0.0  ;;  %v4139_v23 = vadd.f32 %v4135_v51, %v4123_v53  ;;  %vm4118_vm14 = vcmp.eq.s32.totalorder %v5724_v36, %v4114_v42  ;;  %vm4130_vm13 = vcmp.eq.s32.totalorder %v5724_v36, %v4126_v8 }
 0xf9b   : > { %v4138_v46 = vadd.f32 %v4134_v4, %v4122_v57  ;;  %v4124_v9 = vsel %vm4118_vm14, %v4120_v39, 0.0  ;;  %v4136_v27 = vsel %vm4130_vm13, %v4132_v54, 0.0  ;;  %vm9447_vm10 = vcmask 130048  }
 0xf9c   : > { %v4140_v34 = vadd.f32 %v4136_v27, %v4124_v9  ;;  %vm9448_vm0 = vmmov %vm9447_vm10  ;;  %vm9455_vm5 = vcmask 1040384   ;;  %vm9457_vm6 = vcmask 1041408  }
 0xf9d   : > { %vm9449_vm7 = vmmov %vm9448_vm0 }
 0xf9e   : > { %vm9450_vm8 = vmmov %vm9448_vm0 }
 0xf9f   : > { %vm9451_vm4 = vmmov %vm9448_vm0 }
 0xfa0   : > { %vm9452_vm9 = vmmov %vm9448_vm0 }
 0xfa1   : > { %vm9453_vm1 = vmmov %vm9448_vm0 }
 0xfa2   : > { %vm9454_vm3 = vmmov %vm9448_vm0 }
 0xfa3   : > { %vm9456_vm12 = vmmov %vm9455_vm5 }
0x1003   : > { %v4178_v55 = vpop.f32.mrf.mxu2  ;;  %v4207_v59 = vpop.f32.mrf.mxu3 }
0x1004   : > { %v4208_v40 = vadd.f32 %v4207_v59, %v4178_v55 }
0x1006   : > { %4988 = vmatmul.msk.f32.vlgmr.msrb.gmra.mxu0 %vm9447_vm10, %v4208_v40  ;;  %4992 = vmatmul.msk.f32.vlgmr.msrb.gmra.mxu1 %vm9448_vm0, %v4208_v40 }
0x100b   : > { %v4181_v1 = vpop.f32.mrf.mxu2  ;;  %v4210_v5 = vpop.f32.mrf.mxu3 }
0x100c   : > { %v4211_v58 = vadd.f32 %v4210_v5, %v4181_v1 }
0x100e   : > { %4989 = vmatmul.msk.f32.gmra.mxu0 %vm9449_vm7, %v4211_v58  ;;  %4993 = vmatmul.msk.f32.gmra.mxu1 %vm9450_vm8, %v4211_v58 }
0x1013   : > { %v4184_v63 = vpop.f32.mrf.mxu2  ;;  %v4213_v36 = vpop.f32.mrf.mxu3 }
0x1014   : > { %v4214_v28 = vadd.f32 %v4213_v36, %v4184_v63 }
0x1016   : > { %4990 = vmatmul.msk.f32.gmra.mxu0 %vm9451_vm4, %v4214_v28  ;;  %4994 = vmatmul.msk.f32.gmra.mxu1 %vm9452_vm9, %v4214_v28 }
0x101b   : > { %v4187_v43 = vpop.f32.mrf.mxu2  ;;  %v4216_v10 = vpop.f32.mrf.mxu3 }
0x101c   : > { %v4217_v45 = vadd.f32 %v4216_v10, %v4187_v43 }
0x101e   : > { %4991 = vmatmul.msk.f32.vlgmr.msra.gmra.mxu2 %vm9453_vm1, %v4217_v45  ;;  %4995 = vmatmul.msk.f32.vlgmr.msra.gmra.mxu3 %vm9454_vm3, %v4217_v45 }
0x1083   : > { %v4248_v60 = vpop.f32.mrf.mxu0  ;;  %v4277_v3 = vpop.f32.mrf.mxu1 }
0x1084   : > { %v4289_v56 = vmul.f32 %v4248_v60, %v4137_v14  ;;  %v4290_v30 = vmul.f32 %v4277_v3, %v4138_v46 }
0x108b   : > { %v4251_v19 = vpop.f32.mrf.mxu0  ;;  %v4280_v15 = vpop.f32.mrf.mxu1 }
0x108c   : > { %v4291_v21 = vmul.f32 %v4251_v19, %v4139_v23  ;;  %v4292_v22 = vmul.f32 %v4280_v15, %v4140_v34 }
0x108e   : > { %v4293_v31 = vadd.f32 %v4291_v21, %v4289_v56  ;;  %v4300_v52 = vadd.f32 %v4292_v22, %v4290_v30 }
0x1090   : > { %v4294_v47 = vrot.slane %v4293_v31, 4  ;;  %v4301_v24 = vrot.slane %v4300_v52, 4 }
0x1092   : > { %v4295_v7 = vadd.f32 %v4294_v47, %v4293_v31  ;;  %v4302_v13 = vadd.f32 %v4301_v24, %v4300_v52 }
0x1093   : > { %v4254_v50 = vpop.f32.mrf.mxu0  ;;  %v4283_v48 = vpop.f32.mrf.mxu1 }
0x1094   : > { %v4307_v32 = vmul.f32 %v4254_v50, %v4137_v14  ;;  %v4308_v25 = vmul.f32 %v4283_v48, %v4138_v46  ;;  %v4296_v12 = vrot.slane %v4295_v7, 2  ;;  %v4303_v41 = vrot.slane %v4302_v13, 2 }
0x1096   : > { %v4297_v20 = vadd.f32 %v4296_v12, %v4295_v7  ;;  %v4304_v6 = vadd.f32 %v4303_v41, %v4302_v13 }
0x1098   : > { %v4298_v38 = vrot.slane %v4297_v20, 1  ;;  %v4305_v42 = vrot.slane %v4304_v6, 1 }
0x109a   : > { %v4299_v62 = vadd.f32 %v4298_v38, %v4297_v20  ;;  %v4306_v53 = vadd.f32 %v4305_v42, %v4304_v6 }
0x10a1   : > { %v4257_v37 = vpop.f32.mrf.mxu2  ;;  %v4286_v35 = vpop.f32.mrf.mxu3 }
0x10a2   : > { %v4309_v33 = vmul.f32 %v4257_v37, %v4139_v23  ;;  %v4310_v61 = vmul.f32 %v4286_v35, %v4140_v34 }
0x10a4   : > { %v4311_v11 = vadd.f32 %v4309_v33, %v4307_v32  ;;  %v4318_v16 = vadd.f32 %v4310_v61, %v4308_v25 }
0x10a6   : > { %v4312_v0 = vrot.slane %v4311_v11, 4  ;;  %v4319_v29 = vrot.slane %v4318_v16, 4 }
0x10a8   : > { %v4313_v18 = vadd.f32 %v4312_v0, %v4311_v11  ;;  %v4320_v44 = vadd.f32 %v4319_v29, %v4318_v16 }
0x10aa   : > { %v4314_v2 = vrot.slane %v4313_v18, 2  ;;  %v4321_v26 = vrot.slane %v4320_v44, 2 }
0x10ac   : > { %v4315_v39 = vadd.f32 %v4314_v2, %v4313_v18  ;;  %v4322_v8 = vadd.f32 %v4321_v26, %v4320_v44 }
0x10ae   : > { %v4316_v54 = vrot.slane %v4315_v39, 1  ;;  %v4323_v49 = vrot.slane %v4322_v8, 1 }
0x10b0   : > { %v4317_v14 = vadd.f32 %v4316_v54, %v4315_v39  ;;  %v4324_v57 = vadd.f32 %v4323_v49, %v4322_v8 }
0x10b2   : > { %v4325_v51 = vsel %vm9455_vm5, %v4299_v62, %v4317_v14  ;;  %v4326_v4 = vsel %vm9456_vm12, %v4306_v53, %v4324_v57 }
0x10b3   : > { %v4329_v23 = vrot.slane %v4326_v4, 6 }
0x10b5   : > { %v4330_v46 = vsel %vm9457_vm6, %v4325_v51, %v4329_v23 }
0x10b6   : > { %v4332_v9 = vadd.f32 %v4330_v46, %v8448_v17 }
0x10b8   : > { %4996 = vst [vmem:[%s7569_s17 + $0x4] sm:$0xf] %v4332_v9 }
0x10b9   : > { %5340 = shalt.err (!%p5337_p4)
}
0x10ba   : > { %s5385_s16 = smov 64   ;;  %s5386_s20 = smov 4  }
0x10bb   : > { %5233 = dma.vmem_to_hbm [thread:$0]  (%p5447_p11), %s4350_s29, 128, %s4352_s30, %s4336_s10, %s5385_s16, %s5385_s16, %s5386_s20  }
0x10bc PF: > { %s4366_s21 = sand.u32 1, %s5367_s6   ;;  %p9458_p7 = scmp.ge.s32.totalorder %s5379_s9, 2 }
0x10bd   : > { %s4367_s22 = scalar_lea.sflag [#allocation4], %s4366_s21 }
0x10be   : > { %p5240_p5 = pnand %p9458_p7, %p5451_p12 }
0x10c0   : > { %p5241_p8 = pneg %p5240_p5 }
0x10c2   : > { %5362 = dma.done.wait (%p5241_p8), %s4367_s22, 128  }
0x10c3   : > { %5364 = vsyncadd (%p5241_p8), %s4367_s22, 4294967168  ;;  %p14_p10 = scmp.ge.s32.totalorder %s5422_s12, 4   ;;  %s9459_s6 = smov %s5371_s7 }
0x10c4   : > { %s9460_s7 = smov %s5375_s8  ;;  %s9461_s8 = smov %s5434_s15 }
0x10c5   : > { %s9462_s9 = smov %s5422_s12  ;;  %16 = sbr.rel (!%p14_p10) target bundleno = 5 (0x5), region = 71 }
0x10ca   :  { %4373 = vsyncpa [#allocation3], 1 }
0x10cb   :  { %4375 = vsyncpa [#allocation3 + $0x1], 1 }
0x10cc   :  { %4376 = vsyncpa [#allocation4], 1 }
0x10cd   :  { %4378 = vsyncpa [#allocation4 + $0x1], 1 }

</bundles_post_ra>
